<compile_context>
chip_gen: v7x
topology: tpu7x:2x2x1
jax: 0.10.0
libtpu: 0.0.40
codegen_flags: <defaults>
</compile_context>

<pallas_src>
import jax
import jax.numpy as jnp
from jax.experimental import pallas as pl
from jax.experimental.pallas import tpu as pltpu

K = 4  # ConvTranspose kernel size


# ----------------------------- Pallas kernels ------------------------------

def _convt_bn_relu_kernel(xp_ref, w_ref, g_ref, b_ref, o_ref):
    # xp_ref: (N, H+2, W+2, Cin)   bf16 input, zero-padded by 1 per spatial side
    # w_ref : (2, 2, 4*Cin, Cout)  bf16 packed per-phase 2x2-tap weight matrices
    # g_ref : (1, Cout) f32 BN gamma    b_ref: (1, Cout) f32 BN beta
    # o_ref : (2, 2, N*H*W, Cout)  bf16; [ph, pw] = output pixels (2m+ph, 2n+pw)
    N, Hp, Wp, Cin = xp_ref.shape
    H, W = Hp - 2, Wp - 2
    Cout = o_ref.shape[-1]
    M = N * H * W

    xp = xp_ref[...]
    ys = []
    s1 = jnp.zeros((1, Cout), jnp.float32)   # sum
    s2 = jnp.zeros((1, Cout), jnp.float32)   # sum of squares
    for ph in range(2):
        for pw in range(2):
            # im2col: 4 shifted taps concatenated on the lane dim -> one deep matmul
            patch = jnp.concatenate(
                [xp[:, ph + dh:ph + dh + H, pw + dw:pw + dw + W, :].reshape(M, Cin)
                 for dh in range(2) for dw in range(2)], axis=-1)
            y = jnp.dot(patch, w_ref[ph, pw, :, :],
                        preferred_element_type=jnp.float32)        # (M, Cout) f32
            ys.append(y)
            s1 = s1 + jnp.sum(y, axis=0, keepdims=True)
            s2 = s2 + jnp.sum(y * y, axis=0, keepdims=True)

    # training-mode BatchNorm2d (biased variance over N,H,W), single pass, f32.
    inv_cnt = 1.0 / (4 * M)
    mean = s1 * inv_cnt
    var = s2 * inv_cnt - mean * mean
    scale = jax.lax.rsqrt(var + 1e-5) * g_ref[...]
    shift = b_ref[...] - mean * scale
    i = 0
    for ph in range(2):
        for pw in range(2):
            o_ref[ph, pw, :, :] = jnp.maximum(
                ys[i] * scale + shift, 0.0).astype(o_ref.dtype)
            i += 1


def _convt_tanh_kernel(xp_ref, w_ref, o_ref):
    # Final block: transposed conv (as above) + Tanh, no BN.
    N, Hp, Wp, Cin = xp_ref.shape
    H, W = Hp - 2, Wp - 2
    M = N * H * W
    xp = xp_ref[...]
    for ph in range(2):
        for pw in range(2):
            patch = jnp.concatenate(
                [xp[:, ph + dh:ph + dh + H, pw + dw:pw + dw + W, :].reshape(M, Cin)
                 for dh in range(2) for dw in range(2)], axis=-1)
            y = jnp.dot(patch, w_ref[ph, pw, :, :],
                        preferred_element_type=jnp.float32)
            o_ref[ph, pw, :, :] = jnp.tanh(y).astype(o_ref.dtype)


# ------------------------------ JAX wrappers --------------------------------

def _vmem_spec():
    return pl.BlockSpec(memory_space=pltpu.MemorySpace.VMEM)


def _pack_convT_weight(w_pt, dtype=jnp.bfloat16):
    """PyTorch ConvTranspose2d weight (Cin, Cout, 4, 4) -> (2, 2, 4*Cin, Cout).

    Sub-pixel decomposition of the stride-2 transposed conv with the
    ReflectionPad2d(-1) crop folded in: output pixel (2m+ph, 2n+pw) =
    sum_{dh,dw in {0,1}} xp[m+ph+dh, n+pw+dw] @ W[:, :, 3-ph-2dh, 3-pw-2dw],
    where xp is the input zero-padded by 1 on each spatial side.
    Tap order along the 4*Cin axis is (dh, dw, cin), matching the kernel's
    patch construction.  Packed once at init (hoisted out of the forward)."""
    blocks_ph = []
    for ph in range(2):
        blocks_pw = []
        for pw in range(2):
            taps = []
            for dh in range(2):
                for dw in range(2):
                    kh = 3 - ph - 2 * dh
                    kw = 3 - pw - 2 * dw
                    taps.append(w_pt[:, :, kh, kw])            # (Cin, Cout)
            blocks_pw.append(jnp.concatenate(taps, axis=0))    # (4*Cin, Cout)
        blocks_ph.append(jnp.stack(blocks_pw, axis=0))         # (2, 4*Cin, Cout)
    return jnp.stack(blocks_ph, axis=0).astype(dtype)          # (2, 2, 4*Cin, Cout)


def _pad1(x):
    zero = jnp.zeros((), x.dtype)
    return jax.lax.pad(x, zero, [(0, 0, 0), (1, 1, 0), (1, 1, 0), (0, 0, 0)])


def _phases_to_nhwc(o, N, H, W, Cout):
    # (2, 2, N*H*W, Cout) -> (N, 2H, 2W, Cout); contiguous merge done by XLA.
    o = o.reshape(2, 2, N, H, W, Cout)
    o = jnp.transpose(o, (2, 3, 0, 4, 1, 5))      # (N, H, ph, W, pw, Cout)
    return o.reshape(N, 2 * H, 2 * W, Cout)


def convt_bn_relu(x_nhwc, w_packed, gamma_1c, beta_1c):
    """ConvTranspose2d(4,2,0,bias=False) + ReflectionPad2d(-1) + BN + ReLU."""
    N, H, W, _ = x_nhwc.shape
    Cout = w_packed.shape[-1]
    xp = _pad1(x_nhwc.astype(jnp.bfloat16))
    out = pl.pallas_call(
        _convt_bn_relu_kernel,
        out_shape=jax.ShapeDtypeStruct((2, 2, N * H * W, Cout), jnp.bfloat16),
        in_specs=[_vmem_spec()] * 4,
        out_specs=_vmem_spec(),
    )(xp, w_packed, gamma_1c, beta_1c)
    return _phases_to_nhwc(out, N, H, W, Cout)


def convt_tanh(x_nhwc, w_packed):
    """ConvTranspose2d(4,2,0,bias=False) + ReflectionPad2d(-1) + Tanh."""
    N, H, W, _ = x_nhwc.shape
    Cout = w_packed.shape[-1]
    xp = _pad1(x_nhwc.astype(jnp.bfloat16))
    out = pl.pallas_call(
        _convt_tanh_kernel,
        out_shape=jax.ShapeDtypeStruct((2, 2, N * H * W, Cout), jnp.float32),
        in_specs=[_vmem_spec()] * 2,
        out_specs=_vmem_spec(),
    )(xp, w_packed)
    return _phases_to_nhwc(out, N, H, W, Cout)


# ------------------------------- parameters ---------------------------------

def init_generator_params(key, ngf, nz, nc):
    """Deterministic DCGAN-style init: conv weights ~N(0,0.02), BN gamma=1, beta=0."""
    chans = [(nz, ngf * 8), (ngf * 8, ngf * 4), (ngf * 4, ngf * 2),
             (ngf * 2, ngf), (ngf, nc)]
    params = []
    for i, (cin, cout) in enumerate(chans):
        key, sub = jax.random.split(key)
        w = 0.02 * jax.random.normal(sub, (cin, cout, K, K), jnp.float32)
        layer = {'w': w}
        if i < 4:  # layers 1..4 have BatchNorm2d
            layer['gamma'] = jnp.ones((cout,), jnp.float32)
            layer['beta'] = jnp.zeros((cout,), jnp.float32)
        params.append(layer)
    return params


def prepare_generator_params(params):
    """One-time weight re-layout (flip + per-phase pack, bf16) + BN param shaping."""
    prepped = []
    for layer in params:
        p = {'w': _pack_convT_weight(layer['w'])}
        if 'gamma' in layer:
            c = layer['gamma'].shape[0]
            p['gamma'] = layer['gamma'].reshape(1, c).astype(jnp.float32)
            p['beta'] = layer['beta'].reshape(1, c).astype(jnp.float32)
        prepped.append(p)
    return prepped


@jax.jit
def generator_forward(prepped, noise_nchw):
    # mask_sizes = [] -> m2..m32 == 0, no concatenation anywhere.
    x = jnp.transpose(noise_nchw, (0, 2, 3, 1)).astype(jnp.bfloat16)  # -> NHWC
    for i in range(4):
        x = convt_bn_relu(x, prepped[i]['w'], prepped[i]['gamma'], prepped[i]['beta'])
    x = convt_tanh(x, prepped[4]['w'])
    return jnp.transpose(x, (0, 3, 1, 2))  # -> NCHW


# --------------------------- plain-JAX reference -----------------------------

def _ref_convT_crop(x_nchw, w_pt):
    w = jnp.transpose(jnp.flip(w_pt, axis=(2, 3)), (1, 0, 2, 3))  # OIHW, flipped
    return jax.lax.conv_general_dilated(
        x_nchw, w, window_strides=(1, 1), padding=[(2, 2), (2, 2)],
        lhs_dilation=(2, 2), dimension_numbers=('NCHW', 'OIHW', 'NCHW'),
        precision=jax.lax.Precision.HIGHEST)


def reference_forward(params, noise):
    x = noise.astype(jnp.float32)
    for i in range(4):
        x = _ref_convT_crop(x, params[i]['w'])
        mean = jnp.mean(x, axis=(0, 2, 3), keepdims=True)
        var = jnp.mean((x - mean) ** 2, axis=(0, 2, 3), keepdims=True)
        x = (x - mean) * jax.lax.rsqrt(var + 1e-5)
        x = x * params[i]['gamma'].reshape(1, -1, 1, 1) \
              + params[i]['beta'].reshape(1, -1, 1, 1)
        x = jnp.maximum(x, 0.0)
    x = _ref_convT_crop(x, params[4]['w'])
    return jnp.tanh(x)


# ----------------------------------- main ------------------------------------

if __name__ == "__main__":
    # Small shapes: Generator(ngpu=1, ngf=8, nz=16, nc=3, mask_sizes=[])
    ngpu, ngf, nz, nc = 1, 8, 16, 3
    N = 2

    key = jax.random.PRNGKey(0)
    kp, kn = jax.random.split(key)
    params = init_generator_params(kp, ngf, nz, nc)
    prepped = prepare_generator_params(params)   # weight packing hoisted out of forward
    noise = jax.random.normal(kn, (N, nz, 1, 1), jnp.float32)  # NCHW like PyTorch

    out = generator_forward(prepped, noise)
    out = jax.block_until_ready(out)
    assert out.shape == (N, nc, 32, 32), out.shape

    ref = reference_forward(params, noise)
    err = float(jnp.max(jnp.abs(out - ref)))
    assert err < 5e-2, f"max abs err vs reference: {err}"

    # TODO(synk): BatchNorm2d running-stat updates (module side effects) are not
    # modeled; only training-mode batch-statistics normalization is implemented.
    print("KERNEL_OK")
</pallas_src>

<mosaic_0001>
module attributes {stable_mosaic.version = 11 : i64} {
  func.func @_convt_bn_relu_kernel(%arg0: memref<2x3x3x16xbf16, #tpu.memory_space<vmem>>, %arg1: memref<2x2x64x64xbf16, #tpu.memory_space<vmem>>, %arg2: memref<1x64xf32, #tpu.memory_space<vmem>>, %arg3: memref<1x64xf32, #tpu.memory_space<vmem>>, %arg4: memref<2x2x2x64xbf16, #tpu.memory_space<vmem>>) attributes {dimension_semantics = [], scalar_prefetch = 0 : i64, scratch_operands = 0 : i64, tpu.core_type = #tpu.core_type<tc>} {
    %c0 = arith.constant 0 : index
    %c0_0 = arith.constant 0 : index
    %c0_1 = arith.constant 0 : index
    %c0_2 = arith.constant 0 : index
    %0 = vector.load %arg0[%c0, %c0_0, %c0_1, %c0_2] : memref<2x3x3x16xbf16, #tpu.memory_space<vmem>>, vector<2x3x3x16xbf16>
    %cst = arith.constant 0.000000e+00 : f32
    %1 = vector.broadcast %cst : f32 to vector<1x64xf32>
    %cst_3 = arith.constant 0.000000e+00 : f32
    %2 = vector.broadcast %cst_3 : f32 to vector<1x64xf32>
    %3 = vector.extract_strided_slice %0 {offsets = [0, 0, 0, 0], sizes = [2, 1, 1, 16], strides = [1, 1, 1, 1]} : vector<2x3x3x16xbf16> to vector<2x1x1x16xbf16>
    %4 = vector.shape_cast %3 : vector<2x1x1x16xbf16> to vector<2x16xbf16>
    %5 = vector.extract_strided_slice %0 {offsets = [0, 0, 1, 0], sizes = [2, 1, 1, 16], strides = [1, 1, 1, 1]} : vector<2x3x3x16xbf16> to vector<2x1x1x16xbf16>
    %6 = vector.shape_cast %5 : vector<2x1x1x16xbf16> to vector<2x16xbf16>
    %7 = vector.extract_strided_slice %0 {offsets = [0, 1, 0, 0], sizes = [2, 1, 1, 16], strides = [1, 1, 1, 1]} : vector<2x3x3x16xbf16> to vector<2x1x1x16xbf16>
    %8 = vector.shape_cast %7 : vector<2x1x1x16xbf16> to vector<2x16xbf16>
    %9 = vector.extract_strided_slice %0 {offsets = [0, 1, 1, 0], sizes = [2, 1, 1, 16], strides = [1, 1, 1, 1]} : vector<2x3x3x16xbf16> to vector<2x1x1x16xbf16>
    %10 = vector.shape_cast %9 : vector<2x1x1x16xbf16> to vector<2x16xbf16>
    %11 = tpu.concatenate %4, %6, %8, %10 in 1 : vector<2x16xbf16>, vector<2x16xbf16>, vector<2x16xbf16>, vector<2x16xbf16> -> vector<2x64xbf16>
    %c0_4 = arith.constant 0 : index
    %c0_5 = arith.constant 0 : index
    %c0_6 = arith.constant 0 : index
    %c0_7 = arith.constant 0 : index
    %12 = vector.load %arg1[%c0_4, %c0_5, %c0_6, %c0_7] : memref<2x2x64x64xbf16, #tpu.memory_space<vmem>>, vector<1x1x64x64xbf16>
    %13 = vector.shape_cast %12 : vector<1x1x64x64xbf16> to vector<64x64xbf16>
    %cst_8 = arith.constant dense<0.000000e+00> : vector<2x64xf32>
    %14 = tpu.matmul %11, %13, %cst_8 {dimension_numbers = #tpu.dot_dimension_numbers<[1], [0], [0], [1], [0, 0, 1, 1], [], []>} : vector<2x64xbf16>, vector<64x64xbf16>, vector<2x64xf32> -> vector<2x64xf32>
    %cst_9 = arith.constant dense<0.000000e+00> : vector<64xf32>
    %15 = vector.multi_reduction <add>, %14, %cst_9 [0] : vector<2x64xf32> to vector<64xf32>
    %16 = vector.shape_cast %15 : vector<64xf32> to vector<1x64xf32>
    %17 = arith.addf %1, %16 : vector<1x64xf32>
    %18 = arith.mulf %14, %14 : vector<2x64xf32>
    %cst_10 = arith.constant dense<0.000000e+00> : vector<64xf32>
    %19 = vector.multi_reduction <add>, %18, %cst_10 [0] : vector<2x64xf32> to vector<64xf32>
    %20 = vector.shape_cast %19 : vector<64xf32> to vector<1x64xf32>
    %21 = arith.addf %2, %20 : vector<1x64xf32>
    %22 = vector.extract_strided_slice %0 {offsets = [0, 0, 1, 0], sizes = [2, 1, 1, 16], strides = [1, 1, 1, 1]} : vector<2x3x3x16xbf16> to vector<2x1x1x16xbf16>
    %23 = vector.shape_cast %22 : vector<2x1x1x16xbf16> to vector<2x16xbf16>
    %24 = vector.extract_strided_slice %0 {offsets = [0, 0, 2, 0], sizes = [2, 1, 1, 16], strides = [1, 1, 1, 1]} : vector<2x3x3x16xbf16> to vector<2x1x1x16xbf16>
    %25 = vector.shape_cast %24 : vector<2x1x1x16xbf16> to vector<2x16xbf16>
    %26 = vector.extract_strided_slice %0 {offsets = [0, 1, 1, 0], sizes = [2, 1, 1, 16], strides = [1, 1, 1, 1]} : vector<2x3x3x16xbf16> to vector<2x1x1x16xbf16>
    %27 = vector.shape_cast %26 : vector<2x1x1x16xbf16> to vector<2x16xbf16>
    %28 = vector.extract_strided_slice %0 {offsets = [0, 1, 2, 0], sizes = [2, 1, 1, 16], strides = [1, 1, 1, 1]} : vector<2x3x3x16xbf16> to vector<2x1x1x16xbf16>
    %29 = vector.shape_cast %28 : vector<2x1x1x16xbf16> to vector<2x16xbf16>
    %30 = tpu.concatenate %23, %25, %27, %29 in 1 : vector<2x16xbf16>, vector<2x16xbf16>, vector<2x16xbf16>, vector<2x16xbf16> -> vector<2x64xbf16>
    %c0_11 = arith.constant 0 : index
    %c1 = arith.constant 1 : index
    %c0_12 = arith.constant 0 : index
    %c0_13 = arith.constant 0 : index
    %31 = vector.load %arg1[%c0_11, %c1, %c0_12, %c0_13] : memref<2x2x64x64xbf16, #tpu.memory_space<vmem>>, vector<1x1x64x64xbf16>
    %32 = vector.shape_cast %31 : vector<1x1x64x64xbf16> to vector<64x64xbf16>
    %cst_14 = arith.constant dense<0.000000e+00> : vector<2x64xf32>
    %33 = tpu.matmul %30, %32, %cst_14 {dimension_numbers = #tpu.dot_dimension_numbers<[1], [0], [0], [1], [0, 0, 1, 1], [], []>} : vector<2x64xbf16>, vector<64x64xbf16>, vector<2x64xf32> -> vector<2x64xf32>
    %cst_15 = arith.constant dense<0.000000e+00> : vector<64xf32>
    %34 = vector.multi_reduction <add>, %33, %cst_15 [0] : vector<2x64xf32> to vector<64xf32>
    %35 = vector.shape_cast %34 : vector<64xf32> to vector<1x64xf32>
    %36 = arith.addf %17, %35 : vector<1x64xf32>
    %37 = arith.mulf %33, %33 : vector<2x64xf32>
    %cst_16 = arith.constant dense<0.000000e+00> : vector<64xf32>
    %38 = vector.multi_reduction <add>, %37, %cst_16 [0] : vector<2x64xf32> to vector<64xf32>
    %39 = vector.shape_cast %38 : vector<64xf32> to vector<1x64xf32>
    %40 = arith.addf %21, %39 : vector<1x64xf32>
    %41 = vector.extract_strided_slice %0 {offsets = [0, 1, 0, 0], sizes = [2, 1, 1, 16], strides = [1, 1, 1, 1]} : vector<2x3x3x16xbf16> to vector<2x1x1x16xbf16>
    %42 = vector.shape_cast %41 : vector<2x1x1x16xbf16> to vector<2x16xbf16>
    %43 = vector.extract_strided_slice %0 {offsets = [0, 1, 1, 0], sizes = [2, 1, 1, 16], strides = [1, 1, 1, 1]} : vector<2x3x3x16xbf16> to vector<2x1x1x16xbf16>
    %44 = vector.shape_cast %43 : vector<2x1x1x16xbf16> to vector<2x16xbf16>
    %45 = vector.extract_strided_slice %0 {offsets = [0, 2, 0, 0], sizes = [2, 1, 1, 16], strides = [1, 1, 1, 1]} : vector<2x3x3x16xbf16> to vector<2x1x1x16xbf16>
    %46 = vector.shape_cast %45 : vector<2x1x1x16xbf16> to vector<2x16xbf16>
    %47 = vector.extract_strided_slice %0 {offsets = [0, 2, 1, 0], sizes = [2, 1, 1, 16], strides = [1, 1, 1, 1]} : vector<2x3x3x16xbf16> to vector<2x1x1x16xbf16>
    %48 = vector.shape_cast %47 : vector<2x1x1x16xbf16> to vector<2x16xbf16>
    %49 = tpu.concatenate %42, %44, %46, %48 in 1 : vector<2x16xbf16>, vector<2x16xbf16>, vector<2x16xbf16>, vector<2x16xbf16> -> vector<2x64xbf16>
    %c1_17 = arith.constant 1 : index
    %c0_18 = arith.constant 0 : index
    %c0_19 = arith.constant 0 : index
    %c0_20 = arith.constant 0 : index
    %50 = vector.load %arg1[%c1_17, %c0_18, %c0_19, %c0_20] : memref<2x2x64x64xbf16, #tpu.memory_space<vmem>>, vector<1x1x64x64xbf16>
    %51 = vector.shape_cast %50 : vector<1x1x64x64xbf16> to vector<64x64xbf16>
    %cst_21 = arith.constant dense<0.000000e+00> : vector<2x64xf32>
    %52 = tpu.matmul %49, %51, %cst_21 {dimension_numbers = #tpu.dot_dimension_numbers<[1], [0], [0], [1], [0, 0, 1, 1], [], []>} : vector<2x64xbf16>, vector<64x64xbf16>, vector<2x64xf32> -> vector<2x64xf32>
    %cst_22 = arith.constant dense<0.000000e+00> : vector<64xf32>
    %53 = vector.multi_reduction <add>, %52, %cst_22 [0] : vector<2x64xf32> to vector<64xf32>
    %54 = vector.shape_cast %53 : vector<64xf32> to vector<1x64xf32>
    %55 = arith.addf %36, %54 : vector<1x64xf32>
    %56 = arith.mulf %52, %52 : vector<2x64xf32>
    %cst_23 = arith.constant dense<0.000000e+00> : vector<64xf32>
    %57 = vector.multi_reduction <add>, %56, %cst_23 [0] : vector<2x64xf32> to vector<64xf32>
    %58 = vector.shape_cast %57 : vector<64xf32> to vector<1x64xf32>
    %59 = arith.addf %40, %58 : vector<1x64xf32>
    %60 = vector.extract_strided_slice %0 {offsets = [0, 1, 1, 0], sizes = [2, 1, 1, 16], strides = [1, 1, 1, 1]} : vector<2x3x3x16xbf16> to vector<2x1x1x16xbf16>
    %61 = vector.shape_cast %60 : vector<2x1x1x16xbf16> to vector<2x16xbf16>
    %62 = vector.extract_strided_slice %0 {offsets = [0, 1, 2, 0], sizes = [2, 1, 1, 16], strides = [1, 1, 1, 1]} : vector<2x3x3x16xbf16> to vector<2x1x1x16xbf16>
    %63 = vector.shape_cast %62 : vector<2x1x1x16xbf16> to vector<2x16xbf16>
    %64 = vector.extract_strided_slice %0 {offsets = [0, 2, 1, 0], sizes = [2, 1, 1, 16], strides = [1, 1, 1, 1]} : vector<2x3x3x16xbf16> to vector<2x1x1x16xbf16>
    %65 = vector.shape_cast %64 : vector<2x1x1x16xbf16> to vector<2x16xbf16>
    %66 = vector.extract_strided_slice %0 {offsets = [0, 2, 2, 0], sizes = [2, 1, 1, 16], strides = [1, 1, 1, 1]} : vector<2x3x3x16xbf16> to vector<2x1x1x16xbf16>
    %67 = vector.shape_cast %66 : vector<2x1x1x16xbf16> to vector<2x16xbf16>
    %68 = tpu.concatenate %61, %63, %65, %67 in 1 : vector<2x16xbf16>, vector<2x16xbf16>, vector<2x16xbf16>, vector<2x16xbf16> -> vector<2x64xbf16>
    %c1_24 = arith.constant 1 : index
    %c1_25 = arith.constant 1 : index
    %c0_26 = arith.constant 0 : index
    %c0_27 = arith.constant 0 : index
    %69 = vector.load %arg1[%c1_24, %c1_25, %c0_26, %c0_27] : memref<2x2x64x64xbf16, #tpu.memory_space<vmem>>, vector<1x1x64x64xbf16>
    %70 = vector.shape_cast %69 : vector<1x1x64x64xbf16> to vector<64x64xbf16>
    %cst_28 = arith.constant dense<0.000000e+00> : vector<2x64xf32>
    %71 = tpu.matmul %68, %70, %cst_28 {dimension_numbers = #tpu.dot_dimension_numbers<[1], [0], [0], [1], [0, 0, 1, 1], [], []>} : vector<2x64xbf16>, vector<64x64xbf16>, vector<2x64xf32> -> vector<2x64xf32>
    %cst_29 = arith.constant dense<0.000000e+00> : vector<64xf32>
    %72 = vector.multi_reduction <add>, %71, %cst_29 [0] : vector<2x64xf32> to vector<64xf32>
    %73 = vector.shape_cast %72 : vector<64xf32> to vector<1x64xf32>
    %74 = arith.addf %55, %73 : vector<1x64xf32>
    %75 = arith.mulf %71, %71 : vector<2x64xf32>
    %cst_30 = arith.constant dense<0.000000e+00> : vector<64xf32>
    %76 = vector.multi_reduction <add>, %75, %cst_30 [0] : vector<2x64xf32> to vector<64xf32>
    %77 = vector.shape_cast %76 : vector<64xf32> to vector<1x64xf32>
    %78 = arith.addf %59, %77 : vector<1x64xf32>
    %cst_31 = arith.constant 1.250000e-01 : f32
    %79 = vector.broadcast %cst_31 : f32 to vector<1x64xf32>
    %80 = arith.mulf %74, %79 : vector<1x64xf32>
    %cst_32 = arith.constant 1.250000e-01 : f32
    %81 = vector.broadcast %cst_32 : f32 to vector<1x64xf32>
    %82 = arith.mulf %78, %81 : vector<1x64xf32>
    %83 = arith.mulf %80, %80 : vector<1x64xf32>
    %84 = arith.subf %82, %83 : vector<1x64xf32>
    %cst_33 = arith.constant 9.99999974E-6 : f32
    %85 = vector.broadcast %cst_33 : f32 to vector<1x64xf32>
    %86 = arith.addf %84, %85 : vector<1x64xf32>
    %87 = math.rsqrt %86 : vector<1x64xf32>
    %c0_34 = arith.constant 0 : index
    %c0_35 = arith.constant 0 : index
    %88 = vector.load %arg2[%c0_34, %c0_35] : memref<1x64xf32, #tpu.memory_space<vmem>>, vector<1x64xf32>
    %89 = arith.mulf %87, %88 : vector<1x64xf32>
    %c0_36 = arith.constant 0 : index
    %c0_37 = arith.constant 0 : index
    %90 = vector.load %arg3[%c0_36, %c0_37] : memref<1x64xf32, #tpu.memory_space<vmem>>, vector<1x64xf32>
    %91 = arith.mulf %80, %89 : vector<1x64xf32>
    %92 = arith.subf %90, %91 : vector<1x64xf32>
    %93 = vector.broadcast %89 : vector<1x64xf32> to vector<2x64xf32>
    %94 = arith.mulf %14, %93 : vector<2x64xf32>
    %95 = vector.broadcast %92 : vector<1x64xf32> to vector<2x64xf32>
    %96 = arith.addf %94, %95 : vector<2x64xf32>
    %cst_38 = arith.constant 0.000000e+00 : f32
    %97 = vector.broadcast %cst_38 : f32 to vector<2x64xf32>
    %98 = arith.maximumf %96, %97 : vector<2x64xf32>
    %99 = arith.truncf %98 : vector<2x64xf32> to vector<2x64xbf16>
    %c0_39 = arith.constant 0 : index
    %c0_40 = arith.constant 0 : index
    %c0_41 = arith.constant 0 : index
    %c0_42 = arith.constant 0 : index
    %100 = vector.load %arg4[%c0_39, %c0_40, %c0_41, %c0_42] : memref<2x2x2x64xbf16, #tpu.memory_space<vmem>>, vector<1x1x2x64xbf16>
    %101 = vector.shape_cast %100 : vector<1x1x2x64xbf16> to vector<2x64xbf16>
    %102 = vector.shape_cast %99 : vector<2x64xbf16> to vector<1x1x2x64xbf16>
    tpu.vector_store %arg4[%c0_39, %c0_40, %c0_41, %c0_42], %102 {strides = array<i32>} : memref<2x2x2x64xbf16, #tpu.memory_space<vmem>>, vector<1x1x2x64xbf16>,
    %103 = vector.broadcast %89 : vector<1x64xf32> to vector<2x64xf32>
    %104 = arith.mulf %33, %103 : vector<2x64xf32>
    %105 = vector.broadcast %92 : vector<1x64xf32> to vector<2x64xf32>
    %106 = arith.addf %104, %105 : vector<2x64xf32>
    %cst_43 = arith.constant 0.000000e+00 : f32
    %107 = vector.broadcast %cst_43 : f32 to vector<2x64xf32>
    %108 = arith.maximumf %106, %107 : vector<2x64xf32>
    %109 = arith.truncf %108 : vector<2x64xf32> to vector<2x64xbf16>
    %c0_44 = arith.constant 0 : index
    %c1_45 = arith.constant 1 : index
    %c0_46 = arith.constant 0 : index
    %c0_47 = arith.constant 0 : index
    %110 = vector.load %arg4[%c0_44, %c1_45, %c0_46, %c0_47] : memref<2x2x2x64xbf16, #tpu.memory_space<vmem>>, vector<1x1x2x64xbf16>
    %111 = vector.shape_cast %110 : vector<1x1x2x64xbf16> to vector<2x64xbf16>
    %112 = vector.shape_cast %109 : vector<2x64xbf16> to vector<1x1x2x64xbf16>
    tpu.vector_store %arg4[%c0_44, %c1_45, %c0_46, %c0_47], %112 {strides = array<i32>} : memref<2x2x2x64xbf16, #tpu.memory_space<vmem>>, vector<1x1x2x64xbf16>,
    %113 = vector.broadcast %89 : vector<1x64xf32> to vector<2x64xf32>
    %114 = arith.mulf %52, %113 : vector<2x64xf32>
    %115 = vector.broadcast %92 : vector<1x64xf32> to vector<2x64xf32>
    %116 = arith.addf %114, %115 : vector<2x64xf32>
    %cst_48 = arith.constant 0.000000e+00 : f32
    %117 = vector.broadcast %cst_48 : f32 to vector<2x64xf32>
    %118 = arith.maximumf %116, %117 : vector<2x64xf32>
    %119 = arith.truncf %118 : vector<2x64xf32> to vector<2x64xbf16>
    %c1_49 = arith.constant 1 : index
    %c0_50 = arith.constant 0 : index
    %c0_51 = arith.constant 0 : index
    %c0_52 = arith.constant 0 : index
    %120 = vector.load %arg4[%c1_49, %c0_50, %c0_51, %c0_52] : memref<2x2x2x64xbf16, #tpu.memory_space<vmem>>, vector<1x1x2x64xbf16>
    %121 = vector.shape_cast %120 : vector<1x1x2x64xbf16> to vector<2x64xbf16>
    %122 = vector.shape_cast %119 : vector<2x64xbf16> to vector<1x1x2x64xbf16>
    tpu.vector_store %arg4[%c1_49, %c0_50, %c0_51, %c0_52], %122 {strides = array<i32>} : memref<2x2x2x64xbf16, #tpu.memory_space<vmem>>, vector<1x1x2x64xbf16>,
    %123 = vector.broadcast %89 : vector<1x64xf32> to vector<2x64xf32>
    %124 = arith.mulf %71, %123 : vector<2x64xf32>
    %125 = vector.broadcast %92 : vector<1x64xf32> to vector<2x64xf32>
    %126 = arith.addf %124, %125 : vector<2x64xf32>
    %cst_53 = arith.constant 0.000000e+00 : f32
    %127 = vector.broadcast %cst_53 : f32 to vector<2x64xf32>
    %128 = arith.maximumf %126, %127 : vector<2x64xf32>
    %129 = arith.truncf %128 : vector<2x64xf32> to vector<2x64xbf16>
    %c1_54 = arith.constant 1 : index
    %c1_55 = arith.constant 1 : index
    %c0_56 = arith.constant 0 : index
    %c0_57 = arith.constant 0 : index
    %130 = vector.load %arg4[%c1_54, %c1_55, %c0_56, %c0_57] : memref<2x2x2x64xbf16, #tpu.memory_space<vmem>>, vector<1x1x2x64xbf16>
    %131 = vector.shape_cast %130 : vector<1x1x2x64xbf16> to vector<2x64xbf16>
    %132 = vector.shape_cast %129 : vector<2x64xbf16> to vector<1x1x2x64xbf16>
    tpu.vector_store %arg4[%c1_54, %c1_55, %c0_56, %c0_57], %132 {strides = array<i32>} : memref<2x2x2x64xbf16, #tpu.memory_space<vmem>>, vector<1x1x2x64xbf16>,
    return
  }
}

module attributes {stable_mosaic.version = 11 : i64} {
  func.func @_convt_bn_relu_kernel(%arg0: memref<2x4x4x64xbf16, #tpu.memory_space<vmem>>, %arg1: memref<2x2x256x32xbf16, #tpu.memory_space<vmem>>, %arg2: memref<1x32xf32, #tpu.memory_space<vmem>>, %arg3: memref<1x32xf32, #tpu.memory_space<vmem>>, %arg4: memref<2x2x8x32xbf16, #tpu.memory_space<vmem>>) attributes {dimension_semantics = [], scalar_prefetch = 0 : i64, scratch_operands = 0 : i64, tpu.core_type = #tpu.core_type<tc>} {
    %c0 = arith.constant 0 : index
    %c0_0 = arith.constant 0 : index
    %c0_1 = arith.constant 0 : index
    %c0_2 = arith.constant 0 : index
    %0 = vector.load %arg0[%c0, %c0_0, %c0_1, %c0_2] : memref<2x4x4x64xbf16, #tpu.memory_space<vmem>>, vector<2x4x4x64xbf16>
    %cst = arith.constant 0.000000e+00 : f32
    %1 = vector.broadcast %cst : f32 to vector<1x32xf32>
    %cst_3 = arith.constant 0.000000e+00 : f32
    %2 = vector.broadcast %cst_3 : f32 to vector<1x32xf32>
    %3 = vector.extract_strided_slice %0 {offsets = [0, 0, 0, 0], sizes = [2, 2, 2, 64], strides = [1, 1, 1, 1]} : vector<2x4x4x64xbf16> to vector<2x2x2x64xbf16>
    %4 = vector.shape_cast %3 : vector<2x2x2x64xbf16> to vector<8x64xbf16>
    %5 = vector.extract_strided_slice %0 {offsets = [0, 0, 1, 0], sizes = [2, 2, 2, 64], strides = [1, 1, 1, 1]} : vector<2x4x4x64xbf16> to vector<2x2x2x64xbf16>
    %6 = vector.shape_cast %5 : vector<2x2x2x64xbf16> to vector<8x64xbf16>
    %7 = vector.extract_strided_slice %0 {offsets = [0, 1, 0, 0], sizes = [2, 2, 2, 64], strides = [1, 1, 1, 1]} : vector<2x4x4x64xbf16> to vector<2x2x2x64xbf16>
    %8 = vector.shape_cast %7 : vector<2x2x2x64xbf16> to vector<8x64xbf16>
    %9 = vector.extract_strided_slice %0 {offsets = [0, 1, 1, 0], sizes = [2, 2, 2, 64], strides = [1, 1, 1, 1]} : vector<2x4x4x64xbf16> to vector<2x2x2x64xbf16>
    %10 = vector.shape_cast %9 : vector<2x2x2x64xbf16> to vector<8x64xbf16>
    %11 = tpu.concatenate %4, %6, %8, %10 in 1 : vector<8x64xbf16>, vector<8x64xbf16>, vector<8x64xbf16>, vector<8x64xbf16> -> vector<8x256xbf16>
    %c0_4 = arith.constant 0 : index
    %c0_5 = arith.constant 0 : index
    %c0_6 = arith.constant 0 : index
    %c0_7 = arith.constant 0 : index
    %12 = vector.load %arg1[%c0_4, %c0_5, %c0_6, %c0_7] : memref<2x2x256x32xbf16, #tpu.memory_space<vmem>>, vector<1x1x256x32xbf16>
    %13 = vector.shape_cast %12 : vector<1x1x256x32xbf16> to vector<256x32xbf16>
    %cst_8 = arith.constant dense<0.000000e+00> : vector<8x32xf32>
    %14 = tpu.matmul %11, %13, %cst_8 {dimension_numbers = #tpu.dot_dimension_numbers<[1], [0], [0], [1], [0, 0, 1, 1], [], []>} : vector<8x256xbf16>, vector<256x32xbf16>, vector<8x32xf32> -> vector<8x32xf32>
    %cst_9 = arith.constant dense<0.000000e+00> : vector<32xf32>
    %15 = vector.multi_reduction <add>, %14, %cst_9 [0] : vector<8x32xf32> to vector<32xf32>
    %16 = vector.shape_cast %15 : vector<32xf32> to vector<1x32xf32>
    %17 = arith.addf %1, %16 : vector<1x32xf32>
    %18 = arith.mulf %14, %14 : vector<8x32xf32>
    %cst_10 = arith.constant dense<0.000000e+00> : vector<32xf32>
    %19 = vector.multi_reduction <add>, %18, %cst_10 [0] : vector<8x32xf32> to vector<32xf32>
    %20 = vector.shape_cast %19 : vector<32xf32> to vector<1x32xf32>
    %21 = arith.addf %2, %20 : vector<1x32xf32>
    %22 = vector.extract_strided_slice %0 {offsets = [0, 0, 1, 0], sizes = [2, 2, 2, 64], strides = [1, 1, 1, 1]} : vector<2x4x4x64xbf16> to vector<2x2x2x64xbf16>
    %23 = vector.shape_cast %22 : vector<2x2x2x64xbf16> to vector<8x64xbf16>
    %24 = vector.extract_strided_slice %0 {offsets = [0, 0, 2, 0], sizes = [2, 2, 2, 64], strides = [1, 1, 1, 1]} : vector<2x4x4x64xbf16> to vector<2x2x2x64xbf16>
    %25 = vector.shape_cast %24 : vector<2x2x2x64xbf16> to vector<8x64xbf16>
    %26 = vector.extract_strided_slice %0 {offsets = [0, 1, 1, 0], sizes = [2, 2, 2, 64], strides = [1, 1, 1, 1]} : vector<2x4x4x64xbf16> to vector<2x2x2x64xbf16>
    %27 = vector.shape_cast %26 : vector<2x2x2x64xbf16> to vector<8x64xbf16>
    %28 = vector.extract_strided_slice %0 {offsets = [0, 1, 2, 0], sizes = [2, 2, 2, 64], strides = [1, 1, 1, 1]} : vector<2x4x4x64xbf16> to vector<2x2x2x64xbf16>
    %29 = vector.shape_cast %28 : vector<2x2x2x64xbf16> to vector<8x64xbf16>
    %30 = tpu.concatenate %23, %25, %27, %29 in 1 : vector<8x64xbf16>, vector<8x64xbf16>, vector<8x64xbf16>, vector<8x64xbf16> -> vector<8x256xbf16>
    %c0_11 = arith.constant 0 : index
    %c1 = arith.constant 1 : index
    %c0_12 = arith.constant 0 : index
    %c0_13 = arith.constant 0 : index
    %31 = vector.load %arg1[%c0_11, %c1, %c0_12, %c0_13] : memref<2x2x256x32xbf16, #tpu.memory_space<vmem>>, vector<1x1x256x32xbf16>
    %32 = vector.shape_cast %31 : vector<1x1x256x32xbf16> to vector<256x32xbf16>
    %cst_14 = arith.constant dense<0.000000e+00> : vector<8x32xf32>
    %33 = tpu.matmul %30, %32, %cst_14 {dimension_numbers = #tpu.dot_dimension_numbers<[1], [0], [0], [1], [0, 0, 1, 1], [], []>} : vector<8x256xbf16>, vector<256x32xbf16>, vector<8x32xf32> -> vector<8x32xf32>
    %cst_15 = arith.constant dense<0.000000e+00> : vector<32xf32>
    %34 = vector.multi_reduction <add>, %33, %cst_15 [0] : vector<8x32xf32> to vector<32xf32>
    %35 = vector.shape_cast %34 : vector<32xf32> to vector<1x32xf32>
    %36 = arith.addf %17, %35 : vector<1x32xf32>
    %37 = arith.mulf %33, %33 : vector<8x32xf32>
    %cst_16 = arith.constant dense<0.000000e+00> : vector<32xf32>
    %38 = vector.multi_reduction <add>, %37, %cst_16 [0] : vector<8x32xf32> to vector<32xf32>
    %39 = vector.shape_cast %38 : vector<32xf32> to vector<1x32xf32>
    %40 = arith.addf %21, %39 : vector<1x32xf32>
    %41 = vector.extract_strided_slice %0 {offsets = [0, 1, 0, 0], sizes = [2, 2, 2, 64], strides = [1, 1, 1, 1]} : vector<2x4x4x64xbf16> to vector<2x2x2x64xbf16>
    %42 = vector.shape_cast %41 : vector<2x2x2x64xbf16> to vector<8x64xbf16>
    %43 = vector.extract_strided_slice %0 {offsets = [0, 1, 1, 0], sizes = [2, 2, 2, 64], strides = [1, 1, 1, 1]} : vector<2x4x4x64xbf16> to vector<2x2x2x64xbf16>
    %44 = vector.shape_cast %43 : vector<2x2x2x64xbf16> to vector<8x64xbf16>
    %45 = vector.extract_strided_slice %0 {offsets = [0, 2, 0, 0], sizes = [2, 2, 2, 64], strides = [1, 1, 1, 1]} : vector<2x4x4x64xbf16> to vector<2x2x2x64xbf16>
    %46 = vector.shape_cast %45 : vector<2x2x2x64xbf16> to vector<8x64xbf16>
    %47 = vector.extract_strided_slice %0 {offsets = [0, 2, 1, 0], sizes = [2, 2, 2, 64], strides = [1, 1, 1, 1]} : vector<2x4x4x64xbf16> to vector<2x2x2x64xbf16>
    %48 = vector.shape_cast %47 : vector<2x2x2x64xbf16> to vector<8x64xbf16>
    %49 = tpu.concatenate %42, %44, %46, %48 in 1 : vector<8x64xbf16>, vector<8x64xbf16>, vector<8x64xbf16>, vector<8x64xbf16> -> vector<8x256xbf16>
    %c1_17 = arith.constant 1 : index
    %c0_18 = arith.constant 0 : index
    %c0_19 = arith.constant 0 : index
    %c0_20 = arith.constant 0 : index
    %50 = vector.load %arg1[%c1_17, %c0_18, %c0_19, %c0_20] : memref<2x2x256x32xbf16, #tpu.memory_space<vmem>>, vector<1x1x256x32xbf16>
    %51 = vector.shape_cast %50 : vector<1x1x256x32xbf16> to vector<256x32xbf16>
    %cst_21 = arith.constant dense<0.000000e+00> : vector<8x32xf32>
    %52 = tpu.matmul %49, %51, %cst_21 {dimension_numbers = #tpu.dot_dimension_numbers<[1], [0], [0], [1], [0, 0, 1, 1], [], []>} : vector<8x256xbf16>, vector<256x32xbf16>, vector<8x32xf32> -> vector<8x32xf32>
    %cst_22 = arith.constant dense<0.000000e+00> : vector<32xf32>
    %53 = vector.multi_reduction <add>, %52, %cst_22 [0] : vector<8x32xf32> to vector<32xf32>
    %54 = vector.shape_cast %53 : vector<32xf32> to vector<1x32xf32>
    %55 = arith.addf %36, %54 : vector<1x32xf32>
    %56 = arith.mulf %52, %52 : vector<8x32xf32>
    %cst_23 = arith.constant dense<0.000000e+00> : vector<32xf32>
    %57 = vector.multi_reduction <add>, %56, %cst_23 [0] : vector<8x32xf32> to vector<32xf32>
    %58 = vector.shape_cast %57 : vector<32xf32> to vector<1x32xf32>
    %59 = arith.addf %40, %58 : vector<1x32xf32>
    %60 = vector.extract_strided_slice %0 {offsets = [0, 1, 1, 0], sizes = [2, 2, 2, 64], strides = [1, 1, 1, 1]} : vector<2x4x4x64xbf16> to vector<2x2x2x64xbf16>
    %61 = vector.shape_cast %60 : vector<2x2x2x64xbf16> to vector<8x64xbf16>
    %62 = vector.extract_strided_slice %0 {offsets = [0, 1, 2, 0], sizes = [2, 2, 2, 64], strides = [1, 1, 1, 1]} : vector<2x4x4x64xbf16> to vector<2x2x2x64xbf16>
    %63 = vector.shape_cast %62 : vector<2x2x2x64xbf16> to vector<8x64xbf16>
    %64 = vector.extract_strided_slice %0 {offsets = [0, 2, 1, 0], sizes = [2, 2, 2, 64], strides = [1, 1, 1, 1]} : vector<2x4x4x64xbf16> to vector<2x2x2x64xbf16>
    %65 = vector.shape_cast %64 : vector<2x2x2x64xbf16> to vector<8x64xbf16>
    %66 = vector.extract_strided_slice %0 {offsets = [0, 2, 2, 0], sizes = [2, 2, 2, 64], strides = [1, 1, 1, 1]} : vector<2x4x4x64xbf16> to vector<2x2x2x64xbf16>
    %67 = vector.shape_cast %66 : vector<2x2x2x64xbf16> to vector<8x64xbf16>
    %68 = tpu.concatenate %61, %63, %65, %67 in 1 : vector<8x64xbf16>, vector<8x64xbf16>, vector<8x64xbf16>, vector<8x64xbf16> -> vector<8x256xbf16>
    %c1_24 = arith.constant 1 : index
    %c1_25 = arith.constant 1 : index
    %c0_26 = arith.constant 0 : index
    %c0_27 = arith.constant 0 : index
    %69 = vector.load %arg1[%c1_24, %c1_25, %c0_26, %c0_27] : memref<2x2x256x32xbf16, #tpu.memory_space<vmem>>, vector<1x1x256x32xbf16>
    %70 = vector.shape_cast %69 : vector<1x1x256x32xbf16> to vector<256x32xbf16>
    %cst_28 = arith.constant dense<0.000000e+00> : vector<8x32xf32>
    %71 = tpu.matmul %68, %70, %cst_28 {dimension_numbers = #tpu.dot_dimension_numbers<[1], [0], [0], [1], [0, 0, 1, 1], [], []>} : vector<8x256xbf16>, vector<256x32xbf16>, vector<8x32xf32> -> vector<8x32xf32>
    %cst_29 = arith.constant dense<0.000000e+00> : vector<32xf32>
    %72 = vector.multi_reduction <add>, %71, %cst_29 [0] : vector<8x32xf32> to vector<32xf32>
    %73 = vector.shape_cast %72 : vector<32xf32> to vector<1x32xf32>
    %74 = arith.addf %55, %73 : vector<1x32xf32>
    %75 = arith.mulf %71, %71 : vector<8x32xf32>
    %cst_30 = arith.constant dense<0.000000e+00> : vector<32xf32>
    %76 = vector.multi_reduction <add>, %75, %cst_30 [0] : vector<8x32xf32> to vector<32xf32>
    %77 = vector.shape_cast %76 : vector<32xf32> to vector<1x32xf32>
    %78 = arith.addf %59, %77 : vector<1x32xf32>
    %cst_31 = arith.constant 3.125000e-02 : f32
    %79 = vector.broadcast %cst_31 : f32 to vector<1x32xf32>
    %80 = arith.mulf %74, %79 : vector<1x32xf32>
    %cst_32 = arith.constant 3.125000e-02 : f32
    %81 = vector.broadcast %cst_32 : f32 to vector<1x32xf32>
    %82 = arith.mulf %78, %81 : vector<1x32xf32>
    %83 = arith.mulf %80, %80 : vector<1x32xf32>
    %84 = arith.subf %82, %83 : vector<1x32xf32>
    %cst_33 = arith.constant 9.99999974E-6 : f32
    %85 = vector.broadcast %cst_33 : f32 to vector<1x32xf32>
    %86 = arith.addf %84, %85 : vector<1x32xf32>
    %87 = math.rsqrt %86 : vector<1x32xf32>
    %c0_34 = arith.constant 0 : index
    %c0_35 = arith.constant 0 : index
    %88 = vector.load %arg2[%c0_34, %c0_35] : memref<1x32xf32, #tpu.memory_space<vmem>>, vector<1x32xf32>
    %89 = arith.mulf %87, %88 : vector<1x32xf32>
    %c0_36 = arith.constant 0 : index
    %c0_37 = arith.constant 0 : index
    %90 = vector.load %arg3[%c0_36, %c0_37] : memref<1x32xf32, #tpu.memory_space<vmem>>, vector<1x32xf32>
    %91 = arith.mulf %80, %89 : vector<1x32xf32>
    %92 = arith.subf %90, %91 : vector<1x32xf32>
    %93 = vector.broadcast %89 : vector<1x32xf32> to vector<8x32xf32>
    %94 = arith.mulf %14, %93 : vector<8x32xf32>
    %95 = vector.broadcast %92 : vector<1x32xf32> to vector<8x32xf32>
    %96 = arith.addf %94, %95 : vector<8x32xf32>
    %cst_38 = arith.constant 0.000000e+00 : f32
    %97 = vector.broadcast %cst_38 : f32 to vector<8x32xf32>
    %98 = arith.maximumf %96, %97 : vector<8x32xf32>
    %99 = arith.truncf %98 : vector<8x32xf32> to vector<8x32xbf16>
    %c0_39 = arith.constant 0 : index
    %c0_40 = arith.constant 0 : index
    %c0_41 = arith.constant 0 : index
    %c0_42 = arith.constant 0 : index
    %100 = vector.load %arg4[%c0_39, %c0_40, %c0_41, %c0_42] : memref<2x2x8x32xbf16, #tpu.memory_space<vmem>>, vector<1x1x8x32xbf16>
    %101 = vector.shape_cast %100 : vector<1x1x8x32xbf16> to vector<8x32xbf16>
    %102 = vector.shape_cast %99 : vector<8x32xbf16> to vector<1x1x8x32xbf16>
    tpu.vector_store %arg4[%c0_39, %c0_40, %c0_41, %c0_42], %102 {strides = array<i32>} : memref<2x2x8x32xbf16, #tpu.memory_space<vmem>>, vector<1x1x8x32xbf16>,
    %103 = vector.broadcast %89 : vector<1x32xf32> to vector<8x32xf32>
    %104 = arith.mulf %33, %103 : vector<8x32xf32>
    %105 = vector.broadcast %92 : vector<1x32xf32> to vector<8x32xf32>
    %106 = arith.addf %104, %105 : vector<8x32xf32>
    %cst_43 = arith.constant 0.000000e+00 : f32
    %107 = vector.broadcast %cst_43 : f32 to vector<8x32xf32>
    %108 = arith.maximumf %106, %107 : vector<8x32xf32>
    %109 = arith.truncf %108 : vector<8x32xf32> to vector<8x32xbf16>
    %c0_44 = arith.constant 0 : index
    %c1_45 = arith.constant 1 : index
    %c0_46 = arith.constant 0 : index
    %c0_47 = arith.constant 0 : index
    %110 = vector.load %arg4[%c0_44, %c1_45, %c0_46, %c0_47] : memref<2x2x8x32xbf16, #tpu.memory_space<vmem>>, vector<1x1x8x32xbf16>
    %111 = vector.shape_cast %110 : vector<1x1x8x32xbf16> to vector<8x32xbf16>
    %112 = vector.shape_cast %109 : vector<8x32xbf16> to vector<1x1x8x32xbf16>
    tpu.vector_store %arg4[%c0_44, %c1_45, %c0_46, %c0_47], %112 {strides = array<i32>} : memref<2x2x8x32xbf16, #tpu.memory_space<vmem>>, vector<1x1x8x32xbf16>,
    %113 = vector.broadcast %89 : vector<1x32xf32> to vector<8x32xf32>
    %114 = arith.mulf %52, %113 : vector<8x32xf32>
    %115 = vector.broadcast %92 : vector<1x32xf32> to vector<8x32xf32>
    %116 = arith.addf %114, %115 : vector<8x32xf32>
    %cst_48 = arith.constant 0.000000e+00 : f32
    %117 = vector.broadcast %cst_48 : f32 to vector<8x32xf32>
    %118 = arith.maximumf %116, %117 : vector<8x32xf32>
    %119 = arith.truncf %118 : vector<8x32xf32> to vector<8x32xbf16>
    %c1_49 = arith.constant 1 : index
    %c0_50 = arith.constant 0 : index
    %c0_51 = arith.constant 0 : index
    %c0_52 = arith.constant 0 : index
    %120 = vector.load %arg4[%c1_49, %c0_50, %c0_51, %c0_52] : memref<2x2x8x32xbf16, #tpu.memory_space<vmem>>, vector<1x1x8x32xbf16>
    %121 = vector.shape_cast %120 : vector<1x1x8x32xbf16> to vector<8x32xbf16>
    %122 = vector.shape_cast %119 : vector<8x32xbf16> to vector<1x1x8x32xbf16>
    tpu.vector_store %arg4[%c1_49, %c0_50, %c0_51, %c0_52], %122 {strides = array<i32>} : memref<2x2x8x32xbf16, #tpu.memory_space<vmem>>, vector<1x1x8x32xbf16>,
    %123 = vector.broadcast %89 : vector<1x32xf32> to vector<8x32xf32>
    %124 = arith.mulf %71, %123 : vector<8x32xf32>
    %125 = vector.broadcast %92 : vector<1x32xf32> to vector<8x32xf32>
    %126 = arith.addf %124, %125 : vector<8x32xf32>
    %cst_53 = arith.constant 0.000000e+00 : f32
    %127 = vector.broadcast %cst_53 : f32 to vector<8x32xf32>
    %128 = arith.maximumf %126, %127 : vector<8x32xf32>
    %129 = arith.truncf %128 : vector<8x32xf32> to vector<8x32xbf16>
    %c1_54 = arith.constant 1 : index
    %c1_55 = arith.constant 1 : index
    %c0_56 = arith.constant 0 : index
    %c0_57 = arith.constant 0 : index
    %130 = vector.load %arg4[%c1_54, %c1_55, %c0_56, %c0_57] : memref<2x2x8x32xbf16, #tpu.memory_space<vmem>>, vector<1x1x8x32xbf16>
    %131 = vector.shape_cast %130 : vector<1x1x8x32xbf16> to vector<8x32xbf16>
    %132 = vector.shape_cast %129 : vector<8x32xbf16> to vector<1x1x8x32xbf16>
    tpu.vector_store %arg4[%c1_54, %c1_55, %c0_56, %c0_57], %132 {strides = array<i32>} : memref<2x2x8x32xbf16, #tpu.memory_space<vmem>>, vector<1x1x8x32xbf16>,
    return
  }
}

module attributes {stable_mosaic.version = 11 : i64} {
  func.func @_convt_bn_relu_kernel(%arg0: memref<2x6x6x32xbf16, #tpu.memory_space<vmem>>, %arg1: memref<2x2x128x16xbf16, #tpu.memory_space<vmem>>, %arg2: memref<1x16xf32, #tpu.memory_space<vmem>>, %arg3: memref<1x16xf32, #tpu.memory_space<vmem>>, %arg4: memref<2x2x32x16xbf16, #tpu.memory_space<vmem>>) attributes {dimension_semantics = [], scalar_prefetch = 0 : i64, scratch_operands = 0 : i64, tpu.core_type = #tpu.core_type<tc>} {
    %c0 = arith.constant 0 : index
    %c0_0 = arith.constant 0 : index
    %c0_1 = arith.constant 0 : index
    %c0_2 = arith.constant 0 : index
    %0 = vector.load %arg0[%c0, %c0_0, %c0_1, %c0_2] : memref<2x6x6x32xbf16, #tpu.memory_space<vmem>>, vector<2x6x6x32xbf16>
    %cst = arith.constant 0.000000e+00 : f32
    %1 = vector.broadcast %cst : f32 to vector<1x16xf32>
    %cst_3 = arith.constant 0.000000e+00 : f32
    %2 = vector.broadcast %cst_3 : f32 to vector<1x16xf32>
    %3 = vector.extract_strided_slice %0 {offsets = [0, 0, 0, 0], sizes = [2, 4, 4, 32], strides = [1, 1, 1, 1]} : vector<2x6x6x32xbf16> to vector<2x4x4x32xbf16>
    %4 = vector.shape_cast %3 : vector<2x4x4x32xbf16> to vector<32x32xbf16>
    %5 = vector.extract_strided_slice %0 {offsets = [0, 0, 1, 0], sizes = [2, 4, 4, 32], strides = [1, 1, 1, 1]} : vector<2x6x6x32xbf16> to vector<2x4x4x32xbf16>
    %6 = vector.shape_cast %5 : vector<2x4x4x32xbf16> to vector<32x32xbf16>
    %7 = vector.extract_strided_slice %0 {offsets = [0, 1, 0, 0], sizes = [2, 4, 4, 32], strides = [1, 1, 1, 1]} : vector<2x6x6x32xbf16> to vector<2x4x4x32xbf16>
    %8 = vector.shape_cast %7 : vector<2x4x4x32xbf16> to vector<32x32xbf16>
    %9 = vector.extract_strided_slice %0 {offsets = [0, 1, 1, 0], sizes = [2, 4, 4, 32], strides = [1, 1, 1, 1]} : vector<2x6x6x32xbf16> to vector<2x4x4x32xbf16>
    %10 = vector.shape_cast %9 : vector<2x4x4x32xbf16> to vector<32x32xbf16>
    %11 = tpu.concatenate %4, %6, %8, %10 in 1 : vector<32x32xbf16>, vector<32x32xbf16>, vector<32x32xbf16>, vector<32x32xbf16> -> vector<32x128xbf16>
    %c0_4 = arith.constant 0 : index
    %c0_5 = arith.constant 0 : index
    %c0_6 = arith.constant 0 : index
    %c0_7 = arith.constant 0 : index
    %12 = vector.load %arg1[%c0_4, %c0_5, %c0_6, %c0_7] : memref<2x2x128x16xbf16, #tpu.memory_space<vmem>>, vector<1x1x128x16xbf16>
    %13 = vector.shape_cast %12 : vector<1x1x128x16xbf16> to vector<128x16xbf16>
    %cst_8 = arith.constant dense<0.000000e+00> : vector<32x16xf32>
    %14 = tpu.matmul %11, %13, %cst_8 {dimension_numbers = #tpu.dot_dimension_numbers<[1], [0], [0], [1], [0, 0, 1, 1], [], []>} : vector<32x128xbf16>, vector<128x16xbf16>, vector<32x16xf32> -> vector<32x16xf32>
    %cst_9 = arith.constant dense<0.000000e+00> : vector<16xf32>
    %15 = vector.multi_reduction <add>, %14, %cst_9 [0] : vector<32x16xf32> to vector<16xf32>
    %16 = vector.shape_cast %15 : vector<16xf32> to vector<1x16xf32>
    %17 = arith.addf %1, %16 : vector<1x16xf32>
    %18 = arith.mulf %14, %14 : vector<32x16xf32>
    %cst_10 = arith.constant dense<0.000000e+00> : vector<16xf32>
    %19 = vector.multi_reduction <add>, %18, %cst_10 [0] : vector<32x16xf32> to vector<16xf32>
    %20 = vector.shape_cast %19 : vector<16xf32> to vector<1x16xf32>
    %21 = arith.addf %2, %20 : vector<1x16xf32>
    %22 = vector.extract_strided_slice %0 {offsets = [0, 0, 1, 0], sizes = [2, 4, 4, 32], strides = [1, 1, 1, 1]} : vector<2x6x6x32xbf16> to vector<2x4x4x32xbf16>
    %23 = vector.shape_cast %22 : vector<2x4x4x32xbf16> to vector<32x32xbf16>
    %24 = vector.extract_strided_slice %0 {offsets = [0, 0, 2, 0], sizes = [2, 4, 4, 32], strides = [1, 1, 1, 1]} : vector<2x6x6x32xbf16> to vector<2x4x4x32xbf16>
    %25 = vector.shape_cast %24 : vector<2x4x4x32xbf16> to vector<32x32xbf16>
    %26 = vector.extract_strided_slice %0 {offsets = [0, 1, 1, 0], sizes = [2, 4, 4, 32], strides = [1, 1, 1, 1]} : vector<2x6x6x32xbf16> to vector<2x4x4x32xbf16>
    %27 = vector.shape_cast %26 : vector<2x4x4x32xbf16> to vector<32x32xbf16>
    %28 = vector.extract_strided_slice %0 {offsets = [0, 1, 2, 0], sizes = [2, 4, 4, 32], strides = [1, 1, 1, 1]} : vector<2x6x6x32xbf16> to vector<2x4x4x32xbf16>
    %29 = vector.shape_cast %28 : vector<2x4x4x32xbf16> to vector<32x32xbf16>
    %30 = tpu.concatenate %23, %25, %27, %29 in 1 : vector<32x32xbf16>, vector<32x32xbf16>, vector<32x32xbf16>, vector<32x32xbf16> -> vector<32x128xbf16>
    %c0_11 = arith.constant 0 : index
    %c1 = arith.constant 1 : index
    %c0_12 = arith.constant 0 : index
    %c0_13 = arith.constant 0 : index
    %31 = vector.load %arg1[%c0_11, %c1, %c0_12, %c0_13] : memref<2x2x128x16xbf16, #tpu.memory_space<vmem>>, vector<1x1x128x16xbf16>
    %32 = vector.shape_cast %31 : vector<1x1x128x16xbf16> to vector<128x16xbf16>
    %cst_14 = arith.constant dense<0.000000e+00> : vector<32x16xf32>
    %33 = tpu.matmul %30, %32, %cst_14 {dimension_numbers = #tpu.dot_dimension_numbers<[1], [0], [0], [1], [0, 0, 1, 1], [], []>} : vector<32x128xbf16>, vector<128x16xbf16>, vector<32x16xf32> -> vector<32x16xf32>
    %cst_15 = arith.constant dense<0.000000e+00> : vector<16xf32>
    %34 = vector.multi_reduction <add>, %33, %cst_15 [0] : vector<32x16xf32> to vector<16xf32>
    %35 = vector.shape_cast %34 : vector<16xf32> to vector<1x16xf32>
    %36 = arith.addf %17, %35 : vector<1x16xf32>
    %37 = arith.mulf %33, %33 : vector<32x16xf32>
    %cst_16 = arith.constant dense<0.000000e+00> : vector<16xf32>
    %38 = vector.multi_reduction <add>, %37, %cst_16 [0] : vector<32x16xf32> to vector<16xf32>
    %39 = vector.shape_cast %38 : vector<16xf32> to vector<1x16xf32>
    %40 = arith.addf %21, %39 : vector<1x16xf32>
    %41 = vector.extract_strided_slice %0 {offsets = [0, 1, 0, 0], sizes = [2, 4, 4, 32], strides = [1, 1, 1, 1]} : vector<2x6x6x32xbf16> to vector<2x4x4x32xbf16>
    %42 = vector.shape_cast %41 : vector<2x4x4x32xbf16> to vector<32x32xbf16>
    %43 = vector.extract_strided_slice %0 {offsets = [0, 1, 1, 0], sizes = [2, 4, 4, 32], strides = [1, 1, 1, 1]} : vector<2x6x6x32xbf16> to vector<2x4x4x32xbf16>
    %44 = vector.shape_cast %43 : vector<2x4x4x32xbf16> to vector<32x32xbf16>
    %45 = vector.extract_strided_slice %0 {offsets = [0, 2, 0, 0], sizes = [2, 4, 4, 32], strides = [1, 1, 1, 1]} : vector<2x6x6x32xbf16> to vector<2x4x4x32xbf16>
    %46 = vector.shape_cast %45 : vector<2x4x4x32xbf16> to vector<32x32xbf16>
    %47 = vector.extract_strided_slice %0 {offsets = [0, 2, 1, 0], sizes = [2, 4, 4, 32], strides = [1, 1, 1, 1]} : vector<2x6x6x32xbf16> to vector<2x4x4x32xbf16>
    %48 = vector.shape_cast %47 : vector<2x4x4x32xbf16> to vector<32x32xbf16>
    %49 = tpu.concatenate %42, %44, %46, %48 in 1 : vector<32x32xbf16>, vector<32x32xbf16>, vector<32x32xbf16>, vector<32x32xbf16> -> vector<32x128xbf16>
    %c1_17 = arith.constant 1 : index
    %c0_18 = arith.constant 0 : index
    %c0_19 = arith.constant 0 : index
    %c0_20 = arith.constant 0 : index
    %50 = vector.load %arg1[%c1_17, %c0_18, %c0_19, %c0_20] : memref<2x2x128x16xbf16, #tpu.memory_space<vmem>>, vector<1x1x128x16xbf16>
    %51 = vector.shape_cast %50 : vector<1x1x128x16xbf16> to vector<128x16xbf16>
    %cst_21 = arith.constant dense<0.000000e+00> : vector<32x16xf32>
    %52 = tpu.matmul %49, %51, %cst_21 {dimension_numbers = #tpu.dot_dimension_numbers<[1], [0], [0], [1], [0, 0, 1, 1], [], []>} : vector<32x128xbf16>, vector<128x16xbf16>, vector<32x16xf32> -> vector<32x16xf32>
    %cst_22 = arith.constant dense<0.000000e+00> : vector<16xf32>
    %53 = vector.multi_reduction <add>, %52, %cst_22 [0] : vector<32x16xf32> to vector<16xf32>
    %54 = vector.shape_cast %53 : vector<16xf32> to vector<1x16xf32>
    %55 = arith.addf %36, %54 : vector<1x16xf32>
    %56 = arith.mulf %52, %52 : vector<32x16xf32>
    %cst_23 = arith.constant dense<0.000000e+00> : vector<16xf32>
    %57 = vector.multi_reduction <add>, %56, %cst_23 [0] : vector<32x16xf32> to vector<16xf32>
    %58 = vector.shape_cast %57 : vector<16xf32> to vector<1x16xf32>
    %59 = arith.addf %40, %58 : vector<1x16xf32>
    %60 = vector.extract_strided_slice %0 {offsets = [0, 1, 1, 0], sizes = [2, 4, 4, 32], strides = [1, 1, 1, 1]} : vector<2x6x6x32xbf16> to vector<2x4x4x32xbf16>
    %61 = vector.shape_cast %60 : vector<2x4x4x32xbf16> to vector<32x32xbf16>
    %62 = vector.extract_strided_slice %0 {offsets = [0, 1, 2, 0], sizes = [2, 4, 4, 32], strides = [1, 1, 1, 1]} : vector<2x6x6x32xbf16> to vector<2x4x4x32xbf16>
    %63 = vector.shape_cast %62 : vector<2x4x4x32xbf16> to vector<32x32xbf16>
    %64 = vector.extract_strided_slice %0 {offsets = [0, 2, 1, 0], sizes = [2, 4, 4, 32], strides = [1, 1, 1, 1]} : vector<2x6x6x32xbf16> to vector<2x4x4x32xbf16>
    %65 = vector.shape_cast %64 : vector<2x4x4x32xbf16> to vector<32x32xbf16>
    %66 = vector.extract_strided_slice %0 {offsets = [0, 2, 2, 0], sizes = [2, 4, 4, 32], strides = [1, 1, 1, 1]} : vector<2x6x6x32xbf16> to vector<2x4x4x32xbf16>
    %67 = vector.shape_cast %66 : vector<2x4x4x32xbf16> to vector<32x32xbf16>
    %68 = tpu.concatenate %61, %63, %65, %67 in 1 : vector<32x32xbf16>, vector<32x32xbf16>, vector<32x32xbf16>, vector<32x32xbf16> -> vector<32x128xbf16>
    %c1_24 = arith.constant 1 : index
    %c1_25 = arith.constant 1 : index
    %c0_26 = arith.constant 0 : index
    %c0_27 = arith.constant 0 : index
    %69 = vector.load %arg1[%c1_24, %c1_25, %c0_26, %c0_27] : memref<2x2x128x16xbf16, #tpu.memory_space<vmem>>, vector<1x1x128x16xbf16>
    %70 = vector.shape_cast %69 : vector<1x1x128x16xbf16> to vector<128x16xbf16>
    %cst_28 = arith.constant dense<0.000000e+00> : vector<32x16xf32>
    %71 = tpu.matmul %68, %70, %cst_28 {dimension_numbers = #tpu.dot_dimension_numbers<[1], [0], [0], [1], [0, 0, 1, 1], [], []>} : vector<32x128xbf16>, vector<128x16xbf16>, vector<32x16xf32> -> vector<32x16xf32>
    %cst_29 = arith.constant dense<0.000000e+00> : vector<16xf32>
    %72 = vector.multi_reduction <add>, %71, %cst_29 [0] : vector<32x16xf32> to vector<16xf32>
    %73 = vector.shape_cast %72 : vector<16xf32> to vector<1x16xf32>
    %74 = arith.addf %55, %73 : vector<1x16xf32>
    %75 = arith.mulf %71, %71 : vector<32x16xf32>
    %cst_30 = arith.constant dense<0.000000e+00> : vector<16xf32>
    %76 = vector.multi_reduction <add>, %75, %cst_30 [0] : vector<32x16xf32> to vector<16xf32>
    %77 = vector.shape_cast %76 : vector<16xf32> to vector<1x16xf32>
    %78 = arith.addf %59, %77 : vector<1x16xf32>
    %cst_31 = arith.constant 7.812500e-03 : f32
    %79 = vector.broadcast %cst_31 : f32 to vector<1x16xf32>
    %80 = arith.mulf %74, %79 : vector<1x16xf32>
    %cst_32 = arith.constant 7.812500e-03 : f32
    %81 = vector.broadcast %cst_32 : f32 to vector<1x16xf32>
    %82 = arith.mulf %78, %81 : vector<1x16xf32>
    %83 = arith.mulf %80, %80 : vector<1x16xf32>
    %84 = arith.subf %82, %83 : vector<1x16xf32>
    %cst_33 = arith.constant 9.99999974E-6 : f32
    %85 = vector.broadcast %cst_33 : f32 to vector<1x16xf32>
    %86 = arith.addf %84, %85 : vector<1x16xf32>
    %87 = math.rsqrt %86 : vector<1x16xf32>
    %c0_34 = arith.constant 0 : index
    %c0_35 = arith.constant 0 : index
    %88 = vector.load %arg2[%c0_34, %c0_35] : memref<1x16xf32, #tpu.memory_space<vmem>>, vector<1x16xf32>
    %89 = arith.mulf %87, %88 : vector<1x16xf32>
    %c0_36 = arith.constant 0 : index
    %c0_37 = arith.constant 0 : index
    %90 = vector.load %arg3[%c0_36, %c0_37] : memref<1x16xf32, #tpu.memory_space<vmem>>, vector<1x16xf32>
    %91 = arith.mulf %80, %89 : vector<1x16xf32>
    %92 = arith.subf %90, %91 : vector<1x16xf32>
    %93 = vector.broadcast %89 : vector<1x16xf32> to vector<32x16xf32>
    %94 = arith.mulf %14, %93 : vector<32x16xf32>
    %95 = vector.broadcast %92 : vector<1x16xf32> to vector<32x16xf32>
    %96 = arith.addf %94, %95 : vector<32x16xf32>
    %cst_38 = arith.constant 0.000000e+00 : f32
    %97 = vector.broadcast %cst_38 : f32 to vector<32x16xf32>
    %98 = arith.maximumf %96, %97 : vector<32x16xf32>
    %99 = arith.truncf %98 : vector<32x16xf32> to vector<32x16xbf16>
    %c0_39 = arith.constant 0 : index
    %c0_40 = arith.constant 0 : index
    %c0_41 = arith.constant 0 : index
    %c0_42 = arith.constant 0 : index
    %100 = vector.load %arg4[%c0_39, %c0_40, %c0_41, %c0_42] : memref<2x2x32x16xbf16, #tpu.memory_space<vmem>>, vector<1x1x32x16xbf16>
    %101 = vector.shape_cast %100 : vector<1x1x32x16xbf16> to vector<32x16xbf16>
    %102 = vector.shape_cast %99 : vector<32x16xbf16> to vector<1x1x32x16xbf16>
    tpu.vector_store %arg4[%c0_39, %c0_40, %c0_41, %c0_42], %102 {strides = array<i32>} : memref<2x2x32x16xbf16, #tpu.memory_space<vmem>>, vector<1x1x32x16xbf16>,
    %103 = vector.broadcast %89 : vector<1x16xf32> to vector<32x16xf32>
    %104 = arith.mulf %33, %103 : vector<32x16xf32>
    %105 = vector.broadcast %92 : vector<1x16xf32> to vector<32x16xf32>
    %106 = arith.addf %104, %105 : vector<32x16xf32>
    %cst_43 = arith.constant 0.000000e+00 : f32
    %107 = vector.broadcast %cst_43 : f32 to vector<32x16xf32>
    %108 = arith.maximumf %106, %107 : vector<32x16xf32>
    %109 = arith.truncf %108 : vector<32x16xf32> to vector<32x16xbf16>
    %c0_44 = arith.constant 0 : index
    %c1_45 = arith.constant 1 : index
    %c0_46 = arith.constant 0 : index
    %c0_47 = arith.constant 0 : index
    %110 = vector.load %arg4[%c0_44, %c1_45, %c0_46, %c0_47] : memref<2x2x32x16xbf16, #tpu.memory_space<vmem>>, vector<1x1x32x16xbf16>
    %111 = vector.shape_cast %110 : vector<1x1x32x16xbf16> to vector<32x16xbf16>
    %112 = vector.shape_cast %109 : vector<32x16xbf16> to vector<1x1x32x16xbf16>
    tpu.vector_store %arg4[%c0_44, %c1_45, %c0_46, %c0_47], %112 {strides = array<i32>} : memref<2x2x32x16xbf16, #tpu.memory_space<vmem>>, vector<1x1x32x16xbf16>,
    %113 = vector.broadcast %89 : vector<1x16xf32> to vector<32x16xf32>
    %114 = arith.mulf %52, %113 : vector<32x16xf32>
    %115 = vector.broadcast %92 : vector<1x16xf32> to vector<32x16xf32>
    %116 = arith.addf %114, %115 : vector<32x16xf32>
    %cst_48 = arith.constant 0.000000e+00 : f32
    %117 = vector.broadcast %cst_48 : f32 to vector<32x16xf32>
    %118 = arith.maximumf %116, %117 : vector<32x16xf32>
    %119 = arith.truncf %118 : vector<32x16xf32> to vector<32x16xbf16>
    %c1_49 = arith.constant 1 : index
    %c0_50 = arith.constant 0 : index
    %c0_51 = arith.constant 0 : index
    %c0_52 = arith.constant 0 : index
    %120 = vector.load %arg4[%c1_49, %c0_50, %c0_51, %c0_52] : memref<2x2x32x16xbf16, #tpu.memory_space<vmem>>, vector<1x1x32x16xbf16>
    %121 = vector.shape_cast %120 : vector<1x1x32x16xbf16> to vector<32x16xbf16>
    %122 = vector.shape_cast %119 : vector<32x16xbf16> to vector<1x1x32x16xbf16>
    tpu.vector_store %arg4[%c1_49, %c0_50, %c0_51, %c0_52], %122 {strides = array<i32>} : memref<2x2x32x16xbf16, #tpu.memory_space<vmem>>, vector<1x1x32x16xbf16>,
    %123 = vector.broadcast %89 : vector<1x16xf32> to vector<32x16xf32>
    %124 = arith.mulf %71, %123 : vector<32x16xf32>
    %125 = vector.broadcast %92 : vector<1x16xf32> to vector<32x16xf32>
    %126 = arith.addf %124, %125 : vector<32x16xf32>
    %cst_53 = arith.constant 0.000000e+00 : f32
    %127 = vector.broadcast %cst_53 : f32 to vector<32x16xf32>
    %128 = arith.maximumf %126, %127 : vector<32x16xf32>
    %129 = arith.truncf %128 : vector<32x16xf32> to vector<32x16xbf16>
    %c1_54 = arith.constant 1 : index
    %c1_55 = arith.constant 1 : index
    %c0_56 = arith.constant 0 : index
    %c0_57 = arith.constant 0 : index
    %130 = vector.load %arg4[%c1_54, %c1_55, %c0_56, %c0_57] : memref<2x2x32x16xbf16, #tpu.memory_space<vmem>>, vector<1x1x32x16xbf16>
    %131 = vector.shape_cast %130 : vector<1x1x32x16xbf16> to vector<32x16xbf16>
    %132 = vector.shape_cast %129 : vector<32x16xbf16> to vector<1x1x32x16xbf16>
    tpu.vector_store %arg4[%c1_54, %c1_55, %c0_56, %c0_57], %132 {strides = array<i32>} : memref<2x2x32x16xbf16, #tpu.memory_space<vmem>>, vector<1x1x32x16xbf16>,
    return
  }
}

module attributes {stable_mosaic.version = 11 : i64} {
  func.func @_convt_bn_relu_kernel(%arg0: memref<2x10x10x16xbf16, #tpu.memory_space<vmem>>, %arg1: memref<2x2x64x8xbf16, #tpu.memory_space<vmem>>, %arg2: memref<1x8xf32, #tpu.memory_space<vmem>>, %arg3: memref<1x8xf32, #tpu.memory_space<vmem>>, %arg4: memref<2x2x128x8xbf16, #tpu.memory_space<vmem>>) attributes {dimension_semantics = [], scalar_prefetch = 0 : i64, scratch_operands = 0 : i64, tpu.core_type = #tpu.core_type<tc>} {
    %c0 = arith.constant 0 : index
    %c0_0 = arith.constant 0 : index
    %c0_1 = arith.constant 0 : index
    %c0_2 = arith.constant 0 : index
    %0 = vector.load %arg0[%c0, %c0_0, %c0_1, %c0_2] : memref<2x10x10x16xbf16, #tpu.memory_space<vmem>>, vector<2x10x10x16xbf16>
    %cst = arith.constant 0.000000e+00 : f32
    %1 = vector.broadcast %cst : f32 to vector<1x8xf32>
    %cst_3 = arith.constant 0.000000e+00 : f32
    %2 = vector.broadcast %cst_3 : f32 to vector<1x8xf32>
    %3 = vector.extract_strided_slice %0 {offsets = [0, 0, 0, 0], sizes = [2, 8, 8, 16], strides = [1, 1, 1, 1]} : vector<2x10x10x16xbf16> to vector<2x8x8x16xbf16>
    %4 = vector.shape_cast %3 : vector<2x8x8x16xbf16> to vector<128x16xbf16>
    %5 = vector.extract_strided_slice %0 {offsets = [0, 0, 1, 0], sizes = [2, 8, 8, 16], strides = [1, 1, 1, 1]} : vector<2x10x10x16xbf16> to vector<2x8x8x16xbf16>
    %6 = vector.shape_cast %5 : vector<2x8x8x16xbf16> to vector<128x16xbf16>
    %7 = vector.extract_strided_slice %0 {offsets = [0, 1, 0, 0], sizes = [2, 8, 8, 16], strides = [1, 1, 1, 1]} : vector<2x10x10x16xbf16> to vector<2x8x8x16xbf16>
    %8 = vector.shape_cast %7 : vector<2x8x8x16xbf16> to vector<128x16xbf16>
    %9 = vector.extract_strided_slice %0 {offsets = [0, 1, 1, 0], sizes = [2, 8, 8, 16], strides = [1, 1, 1, 1]} : vector<2x10x10x16xbf16> to vector<2x8x8x16xbf16>
    %10 = vector.shape_cast %9 : vector<2x8x8x16xbf16> to vector<128x16xbf16>
    %11 = tpu.concatenate %4, %6, %8, %10 in 1 : vector<128x16xbf16>, vector<128x16xbf16>, vector<128x16xbf16>, vector<128x16xbf16> -> vector<128x64xbf16>
    %c0_4 = arith.constant 0 : index
    %c0_5 = arith.constant 0 : index
    %c0_6 = arith.constant 0 : index
    %c0_7 = arith.constant 0 : index
    %12 = vector.load %arg1[%c0_4, %c0_5, %c0_6, %c0_7] : memref<2x2x64x8xbf16, #tpu.memory_space<vmem>>, vector<1x1x64x8xbf16>
    %13 = vector.shape_cast %12 : vector<1x1x64x8xbf16> to vector<64x8xbf16>
    %cst_8 = arith.constant dense<0.000000e+00> : vector<128x8xf32>
    %14 = tpu.matmul %11, %13, %cst_8 {dimension_numbers = #tpu.dot_dimension_numbers<[1], [0], [0], [1], [0, 0, 1, 1], [], []>} : vector<128x64xbf16>, vector<64x8xbf16>, vector<128x8xf32> -> vector<128x8xf32>
    %cst_9 = arith.constant dense<0.000000e+00> : vector<8xf32>
    %15 = vector.multi_reduction <add>, %14, %cst_9 [0] : vector<128x8xf32> to vector<8xf32>
    %16 = vector.shape_cast %15 : vector<8xf32> to vector<1x8xf32>
    %17 = arith.addf %1, %16 : vector<1x8xf32>
    %18 = arith.mulf %14, %14 : vector<128x8xf32>
    %cst_10 = arith.constant dense<0.000000e+00> : vector<8xf32>
    %19 = vector.multi_reduction <add>, %18, %cst_10 [0] : vector<128x8xf32> to vector<8xf32>
    %20 = vector.shape_cast %19 : vector<8xf32> to vector<1x8xf32>
    %21 = arith.addf %2, %20 : vector<1x8xf32>
    %22 = vector.extract_strided_slice %0 {offsets = [0, 0, 1, 0], sizes = [2, 8, 8, 16], strides = [1, 1, 1, 1]} : vector<2x10x10x16xbf16> to vector<2x8x8x16xbf16>
    %23 = vector.shape_cast %22 : vector<2x8x8x16xbf16> to vector<128x16xbf16>
    %24 = vector.extract_strided_slice %0 {offsets = [0, 0, 2, 0], sizes = [2, 8, 8, 16], strides = [1, 1, 1, 1]} : vector<2x10x10x16xbf16> to vector<2x8x8x16xbf16>
    %25 = vector.shape_cast %24 : vector<2x8x8x16xbf16> to vector<128x16xbf16>
    %26 = vector.extract_strided_slice %0 {offsets = [0, 1, 1, 0], sizes = [2, 8, 8, 16], strides = [1, 1, 1, 1]} : vector<2x10x10x16xbf16> to vector<2x8x8x16xbf16>
    %27 = vector.shape_cast %26 : vector<2x8x8x16xbf16> to vector<128x16xbf16>
    %28 = vector.extract_strided_slice %0 {offsets = [0, 1, 2, 0], sizes = [2, 8, 8, 16], strides = [1, 1, 1, 1]} : vector<2x10x10x16xbf16> to vector<2x8x8x16xbf16>
    %29 = vector.shape_cast %28 : vector<2x8x8x16xbf16> to vector<128x16xbf16>
    %30 = tpu.concatenate %23, %25, %27, %29 in 1 : vector<128x16xbf16>, vector<128x16xbf16>, vector<128x16xbf16>, vector<128x16xbf16> -> vector<128x64xbf16>
    %c0_11 = arith.constant 0 : index
    %c1 = arith.constant 1 : index
    %c0_12 = arith.constant 0 : index
    %c0_13 = arith.constant 0 : index
    %31 = vector.load %arg1[%c0_11, %c1, %c0_12, %c0_13] : memref<2x2x64x8xbf16, #tpu.memory_space<vmem>>, vector<1x1x64x8xbf16>
    %32 = vector.shape_cast %31 : vector<1x1x64x8xbf16> to vector<64x8xbf16>
    %cst_14 = arith.constant dense<0.000000e+00> : vector<128x8xf32>
    %33 = tpu.matmul %30, %32, %cst_14 {dimension_numbers = #tpu.dot_dimension_numbers<[1], [0], [0], [1], [0, 0, 1, 1], [], []>} : vector<128x64xbf16>, vector<64x8xbf16>, vector<128x8xf32> -> vector<128x8xf32>
    %cst_15 = arith.constant dense<0.000000e+00> : vector<8xf32>
    %34 = vector.multi_reduction <add>, %33, %cst_15 [0] : vector<128x8xf32> to vector<8xf32>
    %35 = vector.shape_cast %34 : vector<8xf32> to vector<1x8xf32>
    %36 = arith.addf %17, %35 : vector<1x8xf32>
    %37 = arith.mulf %33, %33 : vector<128x8xf32>
    %cst_16 = arith.constant dense<0.000000e+00> : vector<8xf32>
    %38 = vector.multi_reduction <add>, %37, %cst_16 [0] : vector<128x8xf32> to vector<8xf32>
    %39 = vector.shape_cast %38 : vector<8xf32> to vector<1x8xf32>
    %40 = arith.addf %21, %39 : vector<1x8xf32>
    %41 = vector.extract_strided_slice %0 {offsets = [0, 1, 0, 0], sizes = [2, 8, 8, 16], strides = [1, 1, 1, 1]} : vector<2x10x10x16xbf16> to vector<2x8x8x16xbf16>
    %42 = vector.shape_cast %41 : vector<2x8x8x16xbf16> to vector<128x16xbf16>
    %43 = vector.extract_strided_slice %0 {offsets = [0, 1, 1, 0], sizes = [2, 8, 8, 16], strides = [1, 1, 1, 1]} : vector<2x10x10x16xbf16> to vector<2x8x8x16xbf16>
    %44 = vector.shape_cast %43 : vector<2x8x8x16xbf16> to vector<128x16xbf16>
    %45 = vector.extract_strided_slice %0 {offsets = [0, 2, 0, 0], sizes = [2, 8, 8, 16], strides = [1, 1, 1, 1]} : vector<2x10x10x16xbf16> to vector<2x8x8x16xbf16>
    %46 = vector.shape_cast %45 : vector<2x8x8x16xbf16> to vector<128x16xbf16>
    %47 = vector.extract_strided_slice %0 {offsets = [0, 2, 1, 0], sizes = [2, 8, 8, 16], strides = [1, 1, 1, 1]} : vector<2x10x10x16xbf16> to vector<2x8x8x16xbf16>
    %48 = vector.shape_cast %47 : vector<2x8x8x16xbf16> to vector<128x16xbf16>
    %49 = tpu.concatenate %42, %44, %46, %48 in 1 : vector<128x16xbf16>, vector<128x16xbf16>, vector<128x16xbf16>, vector<128x16xbf16> -> vector<128x64xbf16>
    %c1_17 = arith.constant 1 : index
    %c0_18 = arith.constant 0 : index
    %c0_19 = arith.constant 0 : index
    %c0_20 = arith.constant 0 : index
    %50 = vector.load %arg1[%c1_17, %c0_18, %c0_19, %c0_20] : memref<2x2x64x8xbf16, #tpu.memory_space<vmem>>, vector<1x1x64x8xbf16>
    %51 = vector.shape_cast %50 : vector<1x1x64x8xbf16> to vector<64x8xbf16>
    %cst_21 = arith.constant dense<0.000000e+00> : vector<128x8xf32>
    %52 = tpu.matmul %49, %51, %cst_21 {dimension_numbers = #tpu.dot_dimension_numbers<[1], [0], [0], [1], [0, 0, 1, 1], [], []>} : vector<128x64xbf16>, vector<64x8xbf16>, vector<128x8xf32> -> vector<128x8xf32>
    %cst_22 = arith.constant dense<0.000000e+00> : vector<8xf32>
    %53 = vector.multi_reduction <add>, %52, %cst_22 [0] : vector<128x8xf32> to vector<8xf32>
    %54 = vector.shape_cast %53 : vector<8xf32> to vector<1x8xf32>
    %55 = arith.addf %36, %54 : vector<1x8xf32>
    %56 = arith.mulf %52, %52 : vector<128x8xf32>
    %cst_23 = arith.constant dense<0.000000e+00> : vector<8xf32>
    %57 = vector.multi_reduction <add>, %56, %cst_23 [0] : vector<128x8xf32> to vector<8xf32>
    %58 = vector.shape_cast %57 : vector<8xf32> to vector<1x8xf32>
    %59 = arith.addf %40, %58 : vector<1x8xf32>
    %60 = vector.extract_strided_slice %0 {offsets = [0, 1, 1, 0], sizes = [2, 8, 8, 16], strides = [1, 1, 1, 1]} : vector<2x10x10x16xbf16> to vector<2x8x8x16xbf16>
    %61 = vector.shape_cast %60 : vector<2x8x8x16xbf16> to vector<128x16xbf16>
    %62 = vector.extract_strided_slice %0 {offsets = [0, 1, 2, 0], sizes = [2, 8, 8, 16], strides = [1, 1, 1, 1]} : vector<2x10x10x16xbf16> to vector<2x8x8x16xbf16>
    %63 = vector.shape_cast %62 : vector<2x8x8x16xbf16> to vector<128x16xbf16>
    %64 = vector.extract_strided_slice %0 {offsets = [0, 2, 1, 0], sizes = [2, 8, 8, 16], strides = [1, 1, 1, 1]} : vector<2x10x10x16xbf16> to vector<2x8x8x16xbf16>
    %65 = vector.shape_cast %64 : vector<2x8x8x16xbf16> to vector<128x16xbf16>
    %66 = vector.extract_strided_slice %0 {offsets = [0, 2, 2, 0], sizes = [2, 8, 8, 16], strides = [1, 1, 1, 1]} : vector<2x10x10x16xbf16> to vector<2x8x8x16xbf16>
    %67 = vector.shape_cast %66 : vector<2x8x8x16xbf16> to vector<128x16xbf16>
    %68 = tpu.concatenate %61, %63, %65, %67 in 1 : vector<128x16xbf16>, vector<128x16xbf16>, vector<128x16xbf16>, vector<128x16xbf16> -> vector<128x64xbf16>
    %c1_24 = arith.constant 1 : index
    %c1_25 = arith.constant 1 : index
    %c0_26 = arith.constant 0 : index
    %c0_27 = arith.constant 0 : index
    %69 = vector.load %arg1[%c1_24, %c1_25, %c0_26, %c0_27] : memref<2x2x64x8xbf16, #tpu.memory_space<vmem>>, vector<1x1x64x8xbf16>
    %70 = vector.shape_cast %69 : vector<1x1x64x8xbf16> to vector<64x8xbf16>
    %cst_28 = arith.constant dense<0.000000e+00> : vector<128x8xf32>
    %71 = tpu.matmul %68, %70, %cst_28 {dimension_numbers = #tpu.dot_dimension_numbers<[1], [0], [0], [1], [0, 0, 1, 1], [], []>} : vector<128x64xbf16>, vector<64x8xbf16>, vector<128x8xf32> -> vector<128x8xf32>
    %cst_29 = arith.constant dense<0.000000e+00> : vector<8xf32>
    %72 = vector.multi_reduction <add>, %71, %cst_29 [0] : vector<128x8xf32> to vector<8xf32>
    %73 = vector.shape_cast %72 : vector<8xf32> to vector<1x8xf32>
    %74 = arith.addf %55, %73 : vector<1x8xf32>
    %75 = arith.mulf %71, %71 : vector<128x8xf32>
    %cst_30 = arith.constant dense<0.000000e+00> : vector<8xf32>
    %76 = vector.multi_reduction <add>, %75, %cst_30 [0] : vector<128x8xf32> to vector<8xf32>
    %77 = vector.shape_cast %76 : vector<8xf32> to vector<1x8xf32>
    %78 = arith.addf %59, %77 : vector<1x8xf32>
    %cst_31 = arith.constant 0.001953125 : f32
    %79 = vector.broadcast %cst_31 : f32 to vector<1x8xf32>
    %80 = arith.mulf %74, %79 : vector<1x8xf32>
    %cst_32 = arith.constant 0.001953125 : f32
    %81 = vector.broadcast %cst_32 : f32 to vector<1x8xf32>
    %82 = arith.mulf %78, %81 : vector<1x8xf32>
    %83 = arith.mulf %80, %80 : vector<1x8xf32>
    %84 = arith.subf %82, %83 : vector<1x8xf32>
    %cst_33 = arith.constant 9.99999974E-6 : f32
    %85 = vector.broadcast %cst_33 : f32 to vector<1x8xf32>
    %86 = arith.addf %84, %85 : vector<1x8xf32>
    %87 = math.rsqrt %86 : vector<1x8xf32>
    %c0_34 = arith.constant 0 : index
    %c0_35 = arith.constant 0 : index
    %88 = vector.load %arg2[%c0_34, %c0_35] : memref<1x8xf32, #tpu.memory_space<vmem>>, vector<1x8xf32>
    %89 = arith.mulf %87, %88 : vector<1x8xf32>
    %c0_36 = arith.constant 0 : index
    %c0_37 = arith.constant 0 : index
    %90 = vector.load %arg3[%c0_36, %c0_37] : memref<1x8xf32, #tpu.memory_space<vmem>>, vector<1x8xf32>
    %91 = arith.mulf %80, %89 : vector<1x8xf32>
    %92 = arith.subf %90, %91 : vector<1x8xf32>
    %93 = vector.broadcast %89 : vector<1x8xf32> to vector<128x8xf32>
    %94 = arith.mulf %14, %93 : vector<128x8xf32>
    %95 = vector.broadcast %92 : vector<1x8xf32> to vector<128x8xf32>
    %96 = arith.addf %94, %95 : vector<128x8xf32>
    %cst_38 = arith.constant 0.000000e+00 : f32
    %97 = vector.broadcast %cst_38 : f32 to vector<128x8xf32>
    %98 = arith.maximumf %96, %97 : vector<128x8xf32>
    %99 = arith.truncf %98 : vector<128x8xf32> to vector<128x8xbf16>
    %c0_39 = arith.constant 0 : index
    %c0_40 = arith.constant 0 : index
    %c0_41 = arith.constant 0 : index
    %c0_42 = arith.constant 0 : index
    %100 = vector.load %arg4[%c0_39, %c0_40, %c0_41, %c0_42] : memref<2x2x128x8xbf16, #tpu.memory_space<vmem>>, vector<1x1x128x8xbf16>
    %101 = vector.shape_cast %100 : vector<1x1x128x8xbf16> to vector<128x8xbf16>
    %102 = vector.shape_cast %99 : vector<128x8xbf16> to vector<1x1x128x8xbf16>
    tpu.vector_store %arg4[%c0_39, %c0_40, %c0_41, %c0_42], %102 {strides = array<i32>} : memref<2x2x128x8xbf16, #tpu.memory_space<vmem>>, vector<1x1x128x8xbf16>,
    %103 = vector.broadcast %89 : vector<1x8xf32> to vector<128x8xf32>
    %104 = arith.mulf %33, %103 : vector<128x8xf32>
    %105 = vector.broadcast %92 : vector<1x8xf32> to vector<128x8xf32>
    %106 = arith.addf %104, %105 : vector<128x8xf32>
    %cst_43 = arith.constant 0.000000e+00 : f32
    %107 = vector.broadcast %cst_43 : f32 to vector<128x8xf32>
    %108 = arith.maximumf %106, %107 : vector<128x8xf32>
    %109 = arith.truncf %108 : vector<128x8xf32> to vector<128x8xbf16>
    %c0_44 = arith.constant 0 : index
    %c1_45 = arith.constant 1 : index
    %c0_46 = arith.constant 0 : index
    %c0_47 = arith.constant 0 : index
    %110 = vector.load %arg4[%c0_44, %c1_45, %c0_46, %c0_47] : memref<2x2x128x8xbf16, #tpu.memory_space<vmem>>, vector<1x1x128x8xbf16>
    %111 = vector.shape_cast %110 : vector<1x1x128x8xbf16> to vector<128x8xbf16>
    %112 = vector.shape_cast %109 : vector<128x8xbf16> to vector<1x1x128x8xbf16>
    tpu.vector_store %arg4[%c0_44, %c1_45, %c0_46, %c0_47], %112 {strides = array<i32>} : memref<2x2x128x8xbf16, #tpu.memory_space<vmem>>, vector<1x1x128x8xbf16>,
    %113 = vector.broadcast %89 : vector<1x8xf32> to vector<128x8xf32>
    %114 = arith.mulf %52, %113 : vector<128x8xf32>
    %115 = vector.broadcast %92 : vector<1x8xf32> to vector<128x8xf32>
    %116 = arith.addf %114, %115 : vector<128x8xf32>
    %cst_48 = arith.constant 0.000000e+00 : f32
    %117 = vector.broadcast %cst_48 : f32 to vector<128x8xf32>
    %118 = arith.maximumf %116, %117 : vector<128x8xf32>
    %119 = arith.truncf %118 : vector<128x8xf32> to vector<128x8xbf16>
    %c1_49 = arith.constant 1 : index
    %c0_50 = arith.constant 0 : index
    %c0_51 = arith.constant 0 : index
    %c0_52 = arith.constant 0 : index
    %120 = vector.load %arg4[%c1_49, %c0_50, %c0_51, %c0_52] : memref<2x2x128x8xbf16, #tpu.memory_space<vmem>>, vector<1x1x128x8xbf16>
    %121 = vector.shape_cast %120 : vector<1x1x128x8xbf16> to vector<128x8xbf16>
    %122 = vector.shape_cast %119 : vector<128x8xbf16> to vector<1x1x128x8xbf16>
    tpu.vector_store %arg4[%c1_49, %c0_50, %c0_51, %c0_52], %122 {strides = array<i32>} : memref<2x2x128x8xbf16, #tpu.memory_space<vmem>>, vector<1x1x128x8xbf16>,
    %123 = vector.broadcast %89 : vector<1x8xf32> to vector<128x8xf32>
    %124 = arith.mulf %71, %123 : vector<128x8xf32>
    %125 = vector.broadcast %92 : vector<1x8xf32> to vector<128x8xf32>
    %126 = arith.addf %124, %125 : vector<128x8xf32>
    %cst_53 = arith.constant 0.000000e+00 : f32
    %127 = vector.broadcast %cst_53 : f32 to vector<128x8xf32>
    %128 = arith.maximumf %126, %127 : vector<128x8xf32>
    %129 = arith.truncf %128 : vector<128x8xf32> to vector<128x8xbf16>
    %c1_54 = arith.constant 1 : index
    %c1_55 = arith.constant 1 : index
    %c0_56 = arith.constant 0 : index
    %c0_57 = arith.constant 0 : index
    %130 = vector.load %arg4[%c1_54, %c1_55, %c0_56, %c0_57] : memref<2x2x128x8xbf16, #tpu.memory_space<vmem>>, vector<1x1x128x8xbf16>
    %131 = vector.shape_cast %130 : vector<1x1x128x8xbf16> to vector<128x8xbf16>
    %132 = vector.shape_cast %129 : vector<128x8xbf16> to vector<1x1x128x8xbf16>
    tpu.vector_store %arg4[%c1_54, %c1_55, %c0_56, %c0_57], %132 {strides = array<i32>} : memref<2x2x128x8xbf16, #tpu.memory_space<vmem>>, vector<1x1x128x8xbf16>,
    return
  }
}

module attributes {stable_mosaic.version = 11 : i64} {
  func.func @_convt_tanh_kernel(%arg0: memref<2x18x18x8xbf16, #tpu.memory_space<vmem>>, %arg1: memref<2x2x32x3xbf16, #tpu.memory_space<vmem>>, %arg2: memref<2x2x512x3xf32, #tpu.memory_space<vmem>>) attributes {dimension_semantics = [], scalar_prefetch = 0 : i64, scratch_operands = 0 : i64, tpu.core_type = #tpu.core_type<tc>} {
    %c0 = arith.constant 0 : index
    %c0_0 = arith.constant 0 : index
    %c0_1 = arith.constant 0 : index
    %c0_2 = arith.constant 0 : index
    %0 = vector.load %arg0[%c0, %c0_0, %c0_1, %c0_2] : memref<2x18x18x8xbf16, #tpu.memory_space<vmem>>, vector<2x18x18x8xbf16>
    %1 = vector.extract_strided_slice %0 {offsets = [0, 0, 0, 0], sizes = [2, 16, 16, 8], strides = [1, 1, 1, 1]} : vector<2x18x18x8xbf16> to vector<2x16x16x8xbf16>
    %2 = vector.shape_cast %1 : vector<2x16x16x8xbf16> to vector<512x8xbf16>
    %3 = vector.extract_strided_slice %0 {offsets = [0, 0, 1, 0], sizes = [2, 16, 16, 8], strides = [1, 1, 1, 1]} : vector<2x18x18x8xbf16> to vector<2x16x16x8xbf16>
    %4 = vector.shape_cast %3 : vector<2x16x16x8xbf16> to vector<512x8xbf16>
    %5 = vector.extract_strided_slice %0 {offsets = [0, 1, 0, 0], sizes = [2, 16, 16, 8], strides = [1, 1, 1, 1]} : vector<2x18x18x8xbf16> to vector<2x16x16x8xbf16>
    %6 = vector.shape_cast %5 : vector<2x16x16x8xbf16> to vector<512x8xbf16>
    %7 = vector.extract_strided_slice %0 {offsets = [0, 1, 1, 0], sizes = [2, 16, 16, 8], strides = [1, 1, 1, 1]} : vector<2x18x18x8xbf16> to vector<2x16x16x8xbf16>
    %8 = vector.shape_cast %7 : vector<2x16x16x8xbf16> to vector<512x8xbf16>
    %9 = tpu.concatenate %2, %4, %6, %8 in 1 : vector<512x8xbf16>, vector<512x8xbf16>, vector<512x8xbf16>, vector<512x8xbf16> -> vector<512x32xbf16>
    %c0_3 = arith.constant 0 : index
    %c0_4 = arith.constant 0 : index
    %c0_5 = arith.constant 0 : index
    %c0_6 = arith.constant 0 : index
    %10 = vector.load %arg1[%c0_3, %c0_4, %c0_5, %c0_6] : memref<2x2x32x3xbf16, #tpu.memory_space<vmem>>, vector<1x1x32x3xbf16>
    %11 = vector.shape_cast %10 : vector<1x1x32x3xbf16> to vector<32x3xbf16>
    %cst = arith.constant dense<0.000000e+00> : vector<512x3xf32>
    %12 = tpu.matmul %9, %11, %cst {dimension_numbers = #tpu.dot_dimension_numbers<[1], [0], [0], [1], [0, 0, 1, 1], [], []>} : vector<512x32xbf16>, vector<32x3xbf16>, vector<512x3xf32> -> vector<512x3xf32>
    %13 = math.tanh %12 : vector<512x3xf32>
    %c0_7 = arith.constant 0 : index
    %c0_8 = arith.constant 0 : index
    %c0_9 = arith.constant 0 : index
    %c0_10 = arith.constant 0 : index
    %14 = vector.load %arg2[%c0_7, %c0_8, %c0_9, %c0_10] : memref<2x2x512x3xf32, #tpu.memory_space<vmem>>, vector<1x1x512x3xf32>
    %15 = vector.shape_cast %14 : vector<1x1x512x3xf32> to vector<512x3xf32>
    %16 = vector.shape_cast %13 : vector<512x3xf32> to vector<1x1x512x3xf32>
    tpu.vector_store %arg2[%c0_7, %c0_8, %c0_9, %c0_10], %16 {strides = array<i32>} : memref<2x2x512x3xf32, #tpu.memory_space<vmem>>, vector<1x1x512x3xf32>,
    %17 = vector.extract_strided_slice %0 {offsets = [0, 0, 1, 0], sizes = [2, 16, 16, 8], strides = [1, 1, 1, 1]} : vector<2x18x18x8xbf16> to vector<2x16x16x8xbf16>
    %18 = vector.shape_cast %17 : vector<2x16x16x8xbf16> to vector<512x8xbf16>
    %19 = vector.extract_strided_slice %0 {offsets = [0, 0, 2, 0], sizes = [2, 16, 16, 8], strides = [1, 1, 1, 1]} : vector<2x18x18x8xbf16> to vector<2x16x16x8xbf16>
    %20 = vector.shape_cast %19 : vector<2x16x16x8xbf16> to vector<512x8xbf16>
    %21 = vector.extract_strided_slice %0 {offsets = [0, 1, 1, 0], sizes = [2, 16, 16, 8], strides = [1, 1, 1, 1]} : vector<2x18x18x8xbf16> to vector<2x16x16x8xbf16>
    %22 = vector.shape_cast %21 : vector<2x16x16x8xbf16> to vector<512x8xbf16>
    %23 = vector.extract_strided_slice %0 {offsets = [0, 1, 2, 0], sizes = [2, 16, 16, 8], strides = [1, 1, 1, 1]} : vector<2x18x18x8xbf16> to vector<2x16x16x8xbf16>
    %24 = vector.shape_cast %23 : vector<2x16x16x8xbf16> to vector<512x8xbf16>
    %25 = tpu.concatenate %18, %20, %22, %24 in 1 : vector<512x8xbf16>, vector<512x8xbf16>, vector<512x8xbf16>, vector<512x8xbf16> -> vector<512x32xbf16>
    %c0_11 = arith.constant 0 : index
    %c1 = arith.constant 1 : index
    %c0_12 = arith.constant 0 : index
    %c0_13 = arith.constant 0 : index
    %26 = vector.load %arg1[%c0_11, %c1, %c0_12, %c0_13] : memref<2x2x32x3xbf16, #tpu.memory_space<vmem>>, vector<1x1x32x3xbf16>
    %27 = vector.shape_cast %26 : vector<1x1x32x3xbf16> to vector<32x3xbf16>
    %cst_14 = arith.constant dense<0.000000e+00> : vector<512x3xf32>
    %28 = tpu.matmul %25, %27, %cst_14 {dimension_numbers = #tpu.dot_dimension_numbers<[1], [0], [0], [1], [0, 0, 1, 1], [], []>} : vector<512x32xbf16>, vector<32x3xbf16>, vector<512x3xf32> -> vector<512x3xf32>
    %29 = math.tanh %28 : vector<512x3xf32>
    %c0_15 = arith.constant 0 : index
    %c1_16 = arith.constant 1 : index
    %c0_17 = arith.constant 0 : index
    %c0_18 = arith.constant 0 : index
    %30 = vector.load %arg2[%c0_15, %c1_16, %c0_17, %c0_18] : memref<2x2x512x3xf32, #tpu.memory_space<vmem>>, vector<1x1x512x3xf32>
    %31 = vector.shape_cast %30 : vector<1x1x512x3xf32> to vector<512x3xf32>
    %32 = vector.shape_cast %29 : vector<512x3xf32> to vector<1x1x512x3xf32>
    tpu.vector_store %arg2[%c0_15, %c1_16, %c0_17, %c0_18], %32 {strides = array<i32>} : memref<2x2x512x3xf32, #tpu.memory_space<vmem>>, vector<1x1x512x3xf32>,
    %33 = vector.extract_strided_slice %0 {offsets = [0, 1, 0, 0], sizes = [2, 16, 16, 8], strides = [1, 1, 1, 1]} : vector<2x18x18x8xbf16> to vector<2x16x16x8xbf16>
    %34 = vector.shape_cast %33 : vector<2x16x16x8xbf16> to vector<512x8xbf16>
    %35 = vector.extract_strided_slice %0 {offsets = [0, 1, 1, 0], sizes = [2, 16, 16, 8], strides = [1, 1, 1, 1]} : vector<2x18x18x8xbf16> to vector<2x16x16x8xbf16>
    %36 = vector.shape_cast %35 : vector<2x16x16x8xbf16> to vector<512x8xbf16>
    %37 = vector.extract_strided_slice %0 {offsets = [0, 2, 0, 0], sizes = [2, 16, 16, 8], strides = [1, 1, 1, 1]} : vector<2x18x18x8xbf16> to vector<2x16x16x8xbf16>
    %38 = vector.shape_cast %37 : vector<2x16x16x8xbf16> to vector<512x8xbf16>
    %39 = vector.extract_strided_slice %0 {offsets = [0, 2, 1, 0], sizes = [2, 16, 16, 8], strides = [1, 1, 1, 1]} : vector<2x18x18x8xbf16> to vector<2x16x16x8xbf16>
    %40 = vector.shape_cast %39 : vector<2x16x16x8xbf16> to vector<512x8xbf16>
    %41 = tpu.concatenate %34, %36, %38, %40 in 1 : vector<512x8xbf16>, vector<512x8xbf16>, vector<512x8xbf16>, vector<512x8xbf16> -> vector<512x32xbf16>
    %c1_19 = arith.constant 1 : index
    %c0_20 = arith.constant 0 : index
    %c0_21 = arith.constant 0 : index
    %c0_22 = arith.constant 0 : index
    %42 = vector.load %arg1[%c1_19, %c0_20, %c0_21, %c0_22] : memref<2x2x32x3xbf16, #tpu.memory_space<vmem>>, vector<1x1x32x3xbf16>
    %43 = vector.shape_cast %42 : vector<1x1x32x3xbf16> to vector<32x3xbf16>
    %cst_23 = arith.constant dense<0.000000e+00> : vector<512x3xf32>
    %44 = tpu.matmul %41, %43, %cst_23 {dimension_numbers = #tpu.dot_dimension_numbers<[1], [0], [0], [1], [0, 0, 1, 1], [], []>} : vector<512x32xbf16>, vector<32x3xbf16>, vector<512x3xf32> -> vector<512x3xf32>
    %45 = math.tanh %44 : vector<512x3xf32>
    %c1_24 = arith.constant 1 : index
    %c0_25 = arith.constant 0 : index
    %c0_26 = arith.constant 0 : index
    %c0_27 = arith.constant 0 : index
    %46 = vector.load %arg2[%c1_24, %c0_25, %c0_26, %c0_27] : memref<2x2x512x3xf32, #tpu.memory_space<vmem>>, vector<1x1x512x3xf32>
    %47 = vector.shape_cast %46 : vector<1x1x512x3xf32> to vector<512x3xf32>
    %48 = vector.shape_cast %45 : vector<512x3xf32> to vector<1x1x512x3xf32>
    tpu.vector_store %arg2[%c1_24, %c0_25, %c0_26, %c0_27], %48 {strides = array<i32>} : memref<2x2x512x3xf32, #tpu.memory_space<vmem>>, vector<1x1x512x3xf32>,
    %49 = vector.extract_strided_slice %0 {offsets = [0, 1, 1, 0], sizes = [2, 16, 16, 8], strides = [1, 1, 1, 1]} : vector<2x18x18x8xbf16> to vector<2x16x16x8xbf16>
    %50 = vector.shape_cast %49 : vector<2x16x16x8xbf16> to vector<512x8xbf16>
    %51 = vector.extract_strided_slice %0 {offsets = [0, 1, 2, 0], sizes = [2, 16, 16, 8], strides = [1, 1, 1, 1]} : vector<2x18x18x8xbf16> to vector<2x16x16x8xbf16>
    %52 = vector.shape_cast %51 : vector<2x16x16x8xbf16> to vector<512x8xbf16>
    %53 = vector.extract_strided_slice %0 {offsets = [0, 2, 1, 0], sizes = [2, 16, 16, 8], strides = [1, 1, 1, 1]} : vector<2x18x18x8xbf16> to vector<2x16x16x8xbf16>
    %54 = vector.shape_cast %53 : vector<2x16x16x8xbf16> to vector<512x8xbf16>
    %55 = vector.extract_strided_slice %0 {offsets = [0, 2, 2, 0], sizes = [2, 16, 16, 8], strides = [1, 1, 1, 1]} : vector<2x18x18x8xbf16> to vector<2x16x16x8xbf16>
    %56 = vector.shape_cast %55 : vector<2x16x16x8xbf16> to vector<512x8xbf16>
    %57 = tpu.concatenate %50, %52, %54, %56 in 1 : vector<512x8xbf16>, vector<512x8xbf16>, vector<512x8xbf16>, vector<512x8xbf16> -> vector<512x32xbf16>
    %c1_28 = arith.constant 1 : index
    %c1_29 = arith.constant 1 : index
    %c0_30 = arith.constant 0 : index
    %c0_31 = arith.constant 0 : index
    %58 = vector.load %arg1[%c1_28, %c1_29, %c0_30, %c0_31] : memref<2x2x32x3xbf16, #tpu.memory_space<vmem>>, vector<1x1x32x3xbf16>
    %59 = vector.shape_cast %58 : vector<1x1x32x3xbf16> to vector<32x3xbf16>
    %cst_32 = arith.constant dense<0.000000e+00> : vector<512x3xf32>
    %60 = tpu.matmul %57, %59, %cst_32 {dimension_numbers = #tpu.dot_dimension_numbers<[1], [0], [0], [1], [0, 0, 1, 1], [], []>} : vector<512x32xbf16>, vector<32x3xbf16>, vector<512x3xf32> -> vector<512x3xf32>
    %61 = math.tanh %60 : vector<512x3xf32>
    %c1_33 = arith.constant 1 : index
    %c1_34 = arith.constant 1 : index
    %c0_35 = arith.constant 0 : index
    %c0_36 = arith.constant 0 : index
    %62 = vector.load %arg2[%c1_33, %c1_34, %c0_35, %c0_36] : memref<2x2x512x3xf32, #tpu.memory_space<vmem>>, vector<1x1x512x3xf32>
    %63 = vector.shape_cast %62 : vector<1x1x512x3xf32> to vector<512x3xf32>
    %64 = vector.shape_cast %61 : vector<512x3xf32> to vector<1x1x512x3xf32>
    tpu.vector_store %arg2[%c1_33, %c1_34, %c0_35, %c0_36], %64 {strides = array<i32>} : memref<2x2x512x3xf32, #tpu.memory_space<vmem>>, vector<1x1x512x3xf32>,
    return
  }
}

</mosaic_0001>

<bundles_post_ra>
// kernel: generator_forward.5
= control target key start
LH: loop header
LB: loop body
LE: loop exit
PB: predicated region body
PF: predicated region fallthrough
CT: control target
= control target key end

     0   :  { %9 = vsyncpa [#allocation3], 0  ;;  %s1035_s0 = inlined_call_operand.vmem [shape: bf16[2,3,3,16], index: 0, kind: input, shape index: {}]   ;;  %s1036_s1 = inlined_call_operand.hbm [shape: bf16[2,2,64,64], index: 1, kind: input, shape index: {}]   ;;  %s1037_s2 = inlined_call_operand.hbm [shape: f32[1,64], index: 2, kind: input, shape index: {}]   ;;  %s1038_s3 = inlined_call_operand.hbm [shape: f32[1,64], index: 3, kind: input, shape index: {}]   ;;  %s1039_s4 = inlined_call_operand.vmem [shape: bf16[2,2,2,64], index: 4, kind: output, shape index: {}]  }
   0x1   :  { %10 = vsyncpa [#allocation5], 0  ;;  %s831_s15 = smov [#allocation4]   ;;  %s832_s17 = smov [#allocation2]  }
   0x2   :  { %s31_s16 = sshll.u32 %s831_s15, 4  ;;  %s18_s18 = sshll.u32 %s832_s17, 4  ;;  %s32_s16 = int_to_ptr.vmem [resolvable:$true] %s31_s16  ;;  %s866_s18 = int_to_ptr.vmem [resolvable:$true] %s18_s18 }
   0x3   :  { %s761_s21 = scalar_lea.hbm %s1037_s2, 16 }
   0x4   :  { %p762_p0 = scmp.ne.s32.totalorder %s1037_s2, %s761_s21  ;;  %p765_p1 = scmp.lt.u32.totalorder %s761_s21, %s1037_s2 }
   0x6   :  { %p767_p2 = pnand %p765_p1, %p762_p0 }
   0x8   :  { %770 = shalt.err (!%p767_p2)
}
   0x9   :  { %s771_s26 = scalar_lea.vmem %s32_s16, 16  ;;  %s775_s27 = scalar_lea.vmem %s32_s16, 32 }
   0xa   :  { %p772_p3 = scmp.ne.s32.totalorder %s32_s16, %s771_s26  ;;  %p776_p4 = scmp.lt.s32.totalorder %s32_s16, %s32_s16 }
   0xb   :  { %p777_p5 = scmp.lt.s32.totalorder %s775_s27, %s771_s26 }
   0xd   :  { %p778_p6 = por %p777_p5, %p776_p4 }
   0xf   :  { %p779_p7 = pnand %p778_p6, %p772_p3 }
  0x11   :  { %782 = shalt.err (!%p779_p7)
}
  0x12   :  { %34 = dma.hbm_to_vmem [thread:$0]  %s1037_s2, 16, %s32_s16, [#allocation5]  }
  0x13   :  { %s783_s6 = scalar_lea.hbm %s1036_s1, 2048 }
  0x14   :  { %p784_p8 = scmp.ne.s32.totalorder %s1036_s1, %s783_s6  ;;  %p787_p9 = scmp.lt.u32.totalorder %s783_s6, %s1036_s1 }
  0x16   :  { %p789_p10 = pnand %p787_p9, %p784_p8 }
  0x18   :  { %792 = shalt.err (!%p789_p10)
}
  0x19   :  { %s793_s11 = scalar_lea.vmem %s866_s18, 2048  ;;  %p798_p12 = scmp.lt.s32.totalorder %s866_s18, %s866_s18 }
  0x1a   :  { %p794_p11 = scmp.ne.s32.totalorder %s866_s18, %s793_s11  ;;  %p799_p13 = scmp.lt.s32.totalorder %s793_s11, %s793_s11 }
  0x1c   :  { %p800_p0 = por %p799_p13, %p798_p12 }
  0x1e   :  { %p801_p1 = pnand %p800_p0, %p794_p11 }
  0x20   :  { %804 = shalt.err (!%p801_p1)
}
  0x21   :  { %s833_s2 = smov 64   ;;  %s834_s12 = smov 4  }
  0x22   :  { %24 = dma.hbm_to_vmem [thread:$0]  %s1036_s1, 2048, %s866_s18, [#allocation3], %s833_s2, %s833_s2, %s834_s12  }
  0x23   :  { %s835_s15 = smov [#allocation6]   ;;  %s805_s20 = scalar_lea.hbm %s1038_s3, 16 }
  0x24   :  { %s41_s16 = sshll.u32 %s835_s15, 4  ;;  %p806_p2 = scmp.ne.s32.totalorder %s1038_s3, %s805_s20  ;;  %s42_s16 = int_to_ptr.vmem [resolvable:$true] %s41_s16 }
  0x25   :  { %p809_p3 = scmp.lt.u32.totalorder %s805_s20, %s1038_s3 }
  0x27   :  { %p811_p4 = pnand %p809_p3, %p806_p2 }
  0x29   :  { %814 = shalt.err (!%p811_p4)
}
  0x2a   :  { %s815_s25 = scalar_lea.vmem %s42_s16, 16  ;;  %s819_s1 = scalar_lea.vmem %s42_s16, 32 }
  0x2b   :  { %p816_p5 = scmp.ne.s32.totalorder %s42_s16, %s815_s25  ;;  %p820_p6 = scmp.lt.s32.totalorder %s42_s16, %s42_s16 }
  0x2c   :  { %p821_p7 = scmp.lt.s32.totalorder %s819_s1, %s815_s25 }
  0x2e   :  { %p822_p8 = por %p821_p7, %p820_p6 }
  0x30   :  { %p823_p9 = pnand %p822_p8, %p816_p5 }
  0x32   :  { %826 = shalt.err (!%p823_p9)
}
  0x33   :  { %44 = dma.hbm_to_vmem [thread:$0]  %s1038_s3, 16, %s42_s16, [#allocation5]  }
  0x34   :  { %827 = dma.done.wait [#allocation3], 2048  }
  0x35   :  { %828 = vsyncadd [#allocation3], 4294965248 }
  0x36   :  { %829 = dma.done.wait [#allocation5], 32  }
  0x37   :  { %830 = vsyncadd [#allocation5], 4294967264  ;;  %v836_v0 = vmov 0.0   ;;  %vm219_vm0 = vcmask 1042434   ;;  %v743_v6 = vld [vmem:[#allocation2] sm:$0xff]   ;;  %vm80_vm1 = vcmask 1041409  }
  0x38   :  { %685 = vmatprep.subr.bf16.mxu0 %v836_v0  ;;  %697 = vmatprep.subr.bf16.mxu1 %v836_v0  ;;  %v636_v1 = vld.sshfl [vmem:[%s1035_s0] sm:$0x3 pattern:$0x76325410]  ;;  %v745_v14 = vld [vmem:[#allocation2 + $0x8] sm:$0xff]   ;;  %v747_v25 = vld [vmem:[#allocation2 + $0x10] sm:$0xff]  }
  0x39   :  { %v637_v2 = vld.sshfl [vmem:[%s1035_s0 + $0x6] sm:$0x3 pattern:$0x76325410]  ;;  %v77_v3 = vunpack.c.l.b16 %v636_v1  ;;  %686 = vmatpush3.bf16.msra.mxu0 %v743_v6  ;;  %v746_v18 = vld [vmem:[#allocation2 + $0x28] sm:$0xff]   ;;  %s837_s2 = smov 16  }
  0x3a   :  { %v78_v4 = vunpack.c.l.b16 %v637_v2  ;;  %v638_v5 = vld.sshfl [vmem:[%s1035_s0 + $0x2] sm:$0x3 pattern:$0x76325410]  ;;  %687 = vmatprep.subr.bf16.mxu0 %v836_v0  ;;  %v748_v32 = vld [vmem:[#allocation2 + $0x30] sm:$0xff]   ;;  %s839_s12 = smov 32  }
  0x3b   :  { %v744_v7 = vld [vmem:[#allocation2 + $0x20] sm:$0xff]   ;;  %v83_v8 = vrot.slane %v77_v3, 1  ;;  %v639_v9 = vld.sshfl [vmem:[%s1035_s0 + $0x8] sm:$0x3 pattern:$0x76325410]  ;;  %v104_v10 = vunpack.c.l.b16 %v638_v5 }
  0x3c   :  { %v79_v11 = vrot.slane %v78_v4, 7  ;;  %v105_v12 = vunpack.c.l.b16 %v639_v9  ;;  %v650_v13 = vld.sshfl [vmem:[%s1035_s0 + $0x4] sm:$0x3 pattern:$0x76325410]  ;;  %698 = vmatpush3.bf16.msra.mxu1 %v744_v7  ;;  %v749_v37 = vld [vmem:[#allocation2 + $0x18] sm:$0xff]  }
  0x3d   :  { %v222_v15 = vsel %vm219_vm0, %v78_v4, %v83_v8  ;;  %v111_v16 = vrot.slane %v104_v10, 1  ;;  %v651_v17 = vld.sshfl [vmem:[%s1035_s0 + $0xa] sm:$0x3 pattern:$0x76325410]  ;;  %699 = vmatprep.subr.bf16.mxu1 %v836_v0  ;;  %v84_v23 = vsel %vm80_vm1, %v78_v4, %v83_v8  ;;  %v358_v30 = vunpack.c.l.b16 %v650_v13  ;;  %688 = vmatpush3.bf16.msra.mxu0 %v745_v14  ;;  %s838_s0 = smov 48  }
  0x3e   :  { %v223_v19 = vpack.c.b16 %v222_v15, %v222_v15  ;;  %v106_v20 = vrot.slane %v105_v12, 7  ;;  %v359_v21 = vunpack.c.l.b16 %v651_v17  ;;  %v935_v24 = vsel %vm219_vm0, %v79_v11, %v77_v3  ;;  %689 = vmatprep.subr.bf16.mxu0 %v836_v0  ;;  %v750_v39 = vld [vmem:[#allocation2 + $0x38] sm:$0xff]   ;;  %v751_v1 = vld [vmem:[#allocation2 + $0x40] sm:$0xff]   ;;  %v753_v8 = vld [vmem:[#allocation2 + $0x48] sm:$0xff]  }
  0x3f   :  { %v230_v22 = vsel %vm219_vm0, %v105_v12, %v111_v16  ;;  %v85_v33 = vpack.c.b16 %v84_v23, %v84_v23  ;;  %v112_v34 = vsel %vm80_vm1, %v105_v12, %v111_v16  ;;  %v81_v35 = vsel %vm80_vm1, %v79_v11, %v77_v3  ;;  %v752_v3 = vld [vmem:[#allocation2 + $0x60] sm:$0xff]   ;;  %v755_v14 = vld [vmem:[#allocation2 + $0x50] sm:$0xff]  }
  0x40   :  { %224 = vrot.lane.b32.xlu0 %v223_v19, %s837_s2  ;;  %v231_v26 = vpack.c.b16 %v230_v22, %v230_v22  ;;  %v226_v27 = vsel %vm219_vm0, %v106_v20, %v104_v10  ;;  %v107_v29 = vsel %vm80_vm1, %v106_v20, %v104_v10  ;;  %v360_v31 = vrot.slane %v359_v21, 7  ;;  %700 = vmatpush3.bf16.msra.mxu1 %v746_v18  ;;  %v754_v10 = vld [vmem:[#allocation2 + $0x68] sm:$0xff]   ;;  %v756_v16 = vld [vmem:[#allocation2 + $0x70] sm:$0xff]   ;;  %v757_v20 = vld [vmem:[#allocation2 + $0x58] sm:$0xff]  }
  0x41   :  { %v939_v28 = vpack.c.b16 %v226_v27, %v226_v27  ;;  %701 = vmatprep.subr.bf16.mxu1 %v836_v0  ;;  %v949_v36 = vpack.c.b16 %v107_v29, %v107_v29  ;;  %v365_v38 = vrot.slane %v358_v30, 1  ;;  %690 = vmatpush3.bf16.msra.mxu0 %v747_v25  ;;  %v113_v40 = vpack.c.b16 %v112_v34, %v112_v34 }
  0x42   :  { %232 = vrot.lane.b32.xlu1 %v231_v26, %s838_s0  ;;  %691 = vmatprep.subr.bf16.mxu0 %v836_v0  ;;  %v471_v41 = vsel %vm219_vm0, %v360_v31, %v358_v30  ;;  %vm840_vm2 = vmmov 0   ;;  %v361_v45 = vsel %vm80_vm1, %v360_v31, %v358_v30  ;;  %v221_v49 = vpack.c.b16 %v935_v24, %v935_v24 }
  0x43   :  { %693 = vmatprep.mubr.msk.bf16.mxu0 %vm840_vm2, %v836_v0  ;;  %705 = vmatprep.mubr.msk.bf16.mxu1 %vm840_vm2, %v836_v0  ;;  %v475_v42 = vsel %vm219_vm0, %v359_v21, %v365_v38  ;;  %v472_v43 = vpack.c.b16 %v471_v41, %v471_v41  ;;  %v366_v46 = vsel %vm80_vm1, %v359_v21, %v365_v38  ;;  %vm116_vm3 = vcmask 130048   ;;  %v758_v21 = vld [vmem:[#allocation2 + $0x78] sm:$0xff]  }
  0x44   :  { %228 = vrot.lane.b32.xlu0 %v939_v28, %s839_s12  ;;  %702 = vmatpush3.bf16.msra.mxu1 %v748_v32  ;;  %v476_v44 = vpack.c.b16 %v475_v42, %v475_v42  ;;  %v362_v47 = vpack.c.b16 %v361_v45, %v361_v45  ;;  %v367_v48 = vpack.c.b16 %v366_v46, %v366_v46  ;;  %vm120_vm4 = vcmask 261120  }
  0x45   :  { %703 = vmatprep.subr.bf16.mxu1 %v836_v0  ;;  %692 = vmatpush3.bf16.msra.mxu0 %v749_v37  ;;  %vm123_vm5 = vcmask 392192   ;;  %v82_v54 = vpack.c.b16 %v81_v35, %v81_v35  ;;  %vm158_vm6 = vcmask 523264   ;;  %vm201_vm7 = vcmask 517120  }
  0x46   :  { %86 = vrot.lane.b32.xlu1 %v85_v33, %s837_s2  ;;  %709 = vmatprep.subr.bf16.mxu0 %v836_v0  ;;  %vm610_vm8 = vcmask 516096  }
  0x48   :  { %109 = vrot.lane.b32.xlu0 %v949_v36, %s839_s12  ;;  %704 = vmatpush3.bf16.msra.mxu1 %v750_v39 }
  0x49   :  { %721 = vmatprep.subr.bf16.mxu1 %v836_v0 }
  0x4a   :  { %114 = vrot.lane.b32.xlu1 %v113_v40, %s838_s0 }
  0x4c   :  { %469 = vrot.lane.b32.xlu0 %v231_v26, %s837_s2 }
  0x4e   :  { %473 = vrot.lane.b32.xlu1 %v472_v43, %s839_s12 }
  0x50   :  { %477 = vrot.lane.b32.xlu0 %v476_v44, %s838_s0 }
  0x52   :  { %340 = vrot.lane.b32.xlu1 %v113_v40, %s837_s2 }
  0x54   :  { %363 = vrot.lane.b32.xlu0 %v362_v47, %s839_s12 }
  0x56   :  { %368 = vrot.lane.b32.xlu1 %v367_v48, %s838_s0 }
  0xb2   :  { %v225_v50 = vpop.permute.xlu0 %224 }
  0xb3   :  { %v236_v52 = vsel %vm116_vm3, %v221_v49, %v225_v50 }
  0xb4   :  { %v233_v51 = vpop.permute.xlu1 %232 }
  0xb6   :  { %v229_v53 = vpop.permute.xlu0 %228 }
  0xb7   :  { %v238_v55 = vsel %vm120_vm4, %v236_v52, %v229_v53 }
  0xb8   :  { %v240_v56 = vsel %vm123_vm5, %v238_v55, %v233_v51  ;;  %v87_v57 = vpop.permute.xlu1 %86 }
  0xb9   :  { %v252_v58 = vshll.u32 %v240_v56, 16  ;;  %v119_v59 = vsel %vm116_vm3, %v82_v54, %v87_v57  ;;  %v250_v61 = vshrl.u32 %v240_v56, 16 }
  0xba   :  { %v110_v60 = vpop.permute.xlu0 %109 }
  0xbb   :  { %v254_v62 = vrot.slane %v252_v58, 1  ;;  %v122_v63 = vsel %vm120_vm4, %v119_v59, %v110_v60 }
  0xbc   :  { %v115_v2 = vpop.permute.xlu1 %114 }
  0xbd   :  { %v255_v4 = vor.u32 %v254_v62, %v250_v61  ;;  %v125_v5 = vsel %vm123_vm5, %v122_v63, %v115_v2 }
  0xbe   :  { %694 = vmatmul.mubr.msk.bf16.vlgmr.msra.gmra.mrb[0].mxu0 %vm158_vm6, %v125_v5  ;;  %v470_v6 = vpop.permute.xlu0 %469 }
  0xbf   :  { %710 = vmatpush3.bf16.msra.mxu0 %v751_v1  ;;  %v481_v7 = vsel %vm116_vm3, %v939_v28, %v470_v6  ;;  %706 = vmatmul.mubr.msk.bf16.vlgmr.msra.gmra.mrb[0].mxu1 %vm158_vm6, %v255_v4 }
  0xc0   :  { %722 = vmatpush3.bf16.msra.mxu1 %v752_v3  ;;  %v474_v9 = vpop.permute.xlu1 %473  ;;  %711 = vmatprep.subr.bf16.mxu0 %v836_v0 }
  0xc1   :  { %v483_v11 = vsel %vm120_vm4, %v481_v7, %v474_v9  ;;  %723 = vmatprep.subr.bf16.mxu1 %v836_v0  ;;  %717 = vmatprep.mubr.msk.bf16.mxu0 %vm840_vm2, %v836_v0 }
  0xc2   :  { %v478_v12 = vpop.permute.xlu0 %477  ;;  %729 = vmatprep.mubr.msk.bf16.mxu1 %vm840_vm2, %v836_v0 }
  0xc3   :  { %712 = vmatpush3.bf16.msra.mxu0 %v753_v8  ;;  %v485_v13 = vsel %vm123_vm5, %v483_v11, %v478_v12 }
  0xc4   :  { %724 = vmatpush3.bf16.msra.mxu1 %v754_v10  ;;  %v341_v15 = vpop.permute.xlu1 %340  ;;  %713 = vmatprep.subr.bf16.mxu0 %v836_v0  ;;  %v497_v17 = vshll.u32 %v485_v13, 16  ;;  %v495_v22 = vshrl.u32 %v485_v13, 16 }
  0xc5   :  { %725 = vmatprep.subr.bf16.mxu1 %v836_v0  ;;  %v372_v18 = vsel %vm116_vm3, %v949_v36, %v341_v15 }
  0xc6   :  { %v364_v19 = vpop.permute.xlu0 %363  ;;  %v499_v23 = vrot.slane %v497_v17, 1 }
  0xc7   :  { %714 = vmatpush3.bf16.msra.mxu0 %v755_v14  ;;  %v374_v24 = vsel %vm120_vm4, %v372_v18, %v364_v19 }
  0xc8   :  { %726 = vmatpush3.bf16.msra.mxu1 %v756_v16  ;;  %715 = vmatprep.subr.bf16.mxu0 %v836_v0  ;;  %v369_v25 = vpop.permute.xlu1 %368  ;;  %v500_v26 = vor.u32 %v499_v23, %v495_v22 }
  0xc9   :  { %727 = vmatprep.subr.bf16.mxu1 %v836_v0  ;;  %v376_v27 = vsel %vm123_vm5, %v374_v24, %v369_v25 }
  0xcb   :  { %716 = vmatpush3.bf16.msra.mxu0 %v757_v20 }
  0xcc   :  { %728 = vmatpush3.bf16.msra.mxu1 %v758_v21 }
  0xce   :  { %718 = vmatmul.mubr.msk.bf16.vlgmr.msra.gmra.mrb[4].mxu0 %vm158_vm6, %v376_v27 }
  0xcf   :  { %730 = vmatmul.mubr.msk.bf16.vlgmr.msra.gmra.mrb[4].mxu1 %vm158_vm6, %v500_v26 }
 0x191   :  { %v1003_v28 = vpop.f32.mrb[0].mxu0 }
 0x192   :  { %v202_v29 = vsel %vm201_vm7, %v1003_v28, 0.0  ;;  %v210_v0 = vmul.f32 %v1003_v28, %v1003_v28  ;;  %v695_v30 = vpop.f32.mrb[1].mxu0  ;;  %v1009_v31 = vpop.f32.mrb[0].mxu1 }
 0x193   :  { %v203_v32 = vrot.slane %v202_v29, 4  ;;  %v198_v33 = vpop.f32.mrb[2].mxu0  ;;  %v323_v34 = vsel %vm201_vm7, %v1009_v31, 0.0  ;;  %v331_v35 = vmul.f32 %v1009_v31, %v1009_v31  ;;  %v707_v36 = vpop.f32.mrb[1].mxu1 }
 0x194   :  { %v211_v37 = vsel %vm201_vm7, %v210_v0, 0.0  ;;  %v324_v38 = vrot.slane %v323_v34, 4  ;;  %v696_v39 = vpop.f32.mrb[3].mxu0  ;;  %v320_v40 = vpop.f32.mrb[2].mxu1 }
 0x195   :  { %v204_v41 = vadd.f32 %v203_v32, %v202_v29  ;;  %v212_v42 = vrot.slane %v211_v37, 4  ;;  %v332_v43 = vsel %vm201_vm7, %v331_v35, 0.0  ;;  %v708_v44 = vpop.f32.mrb[3].mxu1 }
 0x196   :  { %v325_v45 = vadd.f32 %v324_v38, %v323_v34  ;;  %v333_v46 = vrot.slane %v332_v43, 4 }
 0x197   :  { %v205_v47 = vrot.slane %v204_v41, 2  ;;  %v213_v48 = vadd.f32 %v212_v42, %v211_v37 }
 0x198   :  { %v326_v49 = vrot.slane %v325_v45, 2  ;;  %v334_v50 = vadd.f32 %v333_v46, %v332_v43 }
 0x199   :  { %v206_v51 = vadd.f32 %v205_v47, %v204_v41  ;;  %v214_v52 = vrot.slane %v213_v48, 2 }
 0x19a   :  { %v327_v53 = vadd.f32 %v326_v49, %v325_v45  ;;  %v335_v54 = vrot.slane %v334_v50, 2 }
 0x19b   :  { %v207_v55 = vrot.slane %v206_v51, 1  ;;  %v215_v56 = vadd.f32 %v214_v52, %v213_v48  ;;  %v596_v52 = vlaneseq }
 0x19c   :  { %v328_v57 = vrot.slane %v327_v53, 1  ;;  %v336_v58 = vadd.f32 %v335_v54, %v334_v50  ;;  %v591_v54 = vld [vmem:[#allocation4] sm:$0x1] }
 0x19d   :  { %v216_v59 = vrot.slane %v215_v56, 1  ;;  %v208_v60 = vadd.f32 %v207_v55, %v206_v51 }
 0x19e   :  { %v329_v61 = vadd.f32 %v328_v57, %v327_v53  ;;  %v337_v62 = vrot.slane %v336_v58, 1  ;;  %v597_v53 = vshrl.u32 %v596_v52, 7 }
 0x19f   :  { %v217_v63 = vadd.f32 %v216_v59, %v215_v56 }
 0x1a0   :  { %v330_v1 = vadd.f32 %v329_v61, %v208_v60  ;;  %v338_v2 = vadd.f32 %v337_v62, %v336_v58  ;;  %v598_v55 = vsub.s32 0, %v597_v53  ;;  %v593_v58 = vld [vmem:[#allocation6] sm:$0x1] }
 0x1a1   :  { %v446_v3 = vpop.f32.mrb[4].mxu0 }
 0x1a2   :  { %v339_v4 = vadd.f32 %v338_v2, %v217_v63  ;;  %v452_v5 = vsel %vm201_vm7, %v446_v3, 0.0  ;;  %v460_v6 = vmul.f32 %v446_v3, %v446_v3  ;;  %v719_v7 = vpop.f32.mrb[5].mxu0  ;;  %v562_v8 = vpop.f32.mrb[4].mxu1 }
 0x1a3   :  { %v453_v9 = vrot.slane %v452_v5, 4  ;;  %v449_v10 = vpop.f32.mrb[6].mxu0  ;;  %v568_v11 = vsel %vm201_vm7, %v562_v8, 0.0  ;;  %v576_v12 = vmul.f32 %v562_v8, %v562_v8  ;;  %v731_v13 = vpop.f32.mrb[5].mxu1 }
 0x1a4   :  { %v461_v14 = vsel %vm201_vm7, %v460_v6, 0.0  ;;  %v569_v15 = vrot.slane %v568_v11, 4  ;;  %v720_v16 = vpop.f32.mrb[7].mxu0  ;;  %v565_v17 = vpop.f32.mrb[6].mxu1 }
 0x1a5   :  { %v454_v18 = vadd.f32 %v453_v9, %v452_v5  ;;  %v462_v19 = vrot.slane %v461_v14, 4  ;;  %v577_v20 = vsel %vm201_vm7, %v576_v12, 0.0  ;;  %v732_v21 = vpop.f32.mrb[7].mxu1 }
 0x1a6   :  { %v570_v22 = vadd.f32 %v569_v15, %v568_v11  ;;  %v578_v23 = vrot.slane %v577_v20, 4 }
 0x1a7   :  { %v455_v24 = vrot.slane %v454_v18, 2  ;;  %v463_v25 = vadd.f32 %v462_v19, %v461_v14 }
 0x1a8   :  { %v571_v26 = vrot.slane %v570_v22, 2  ;;  %v579_v27 = vadd.f32 %v578_v23, %v577_v20 }
 0x1a9   :  { %v456_v29 = vadd.f32 %v455_v24, %v454_v18  ;;  %v464_v0 = vrot.slane %v463_v25, 2 }
 0x1aa   :  { %v572_v30 = vadd.f32 %v571_v26, %v570_v22  ;;  %v580_v32 = vrot.slane %v579_v27, 2 }
 0x1ab   :  { %v457_v33 = vrot.slane %v456_v29, 1  ;;  %v465_v34 = vadd.f32 %v464_v0, %v463_v25 }
 0x1ac   :  { %v573_v35 = vrot.slane %v572_v30, 1  ;;  %v581_v36 = vadd.f32 %v580_v32, %v579_v27 }
 0x1ad   :  { %v458_v37 = vadd.f32 %v457_v33, %v456_v29  ;;  %v466_v38 = vrot.slane %v465_v34, 1 }
 0x1ae   :  { %v574_v39 = vadd.f32 %v573_v35, %v572_v30  ;;  %v582_v40 = vrot.slane %v581_v36, 1 }
 0x1af   :  { %v459_v41 = vadd.f32 %v458_v37, %v330_v1  ;;  %v467_v42 = vadd.f32 %v466_v38, %v465_v34 }
 0x1b0   :  { %v583_v43 = vadd.f32 %v582_v40, %v581_v36 }
 0x1b1   :  { %v468_v44 = vadd.f32 %v467_v42, %v339_v4  ;;  %v575_v45 = vadd.f32 %v574_v39, %v459_v41 }
 0x1b3   :  { %v584_v46 = vadd.f32 %v583_v43, %v468_v44  ;;  %v585_v47 = vmul.f32 0.125, %v575_v45 }
 0x1b5   :  { %v586_v48 = vmul.f32 0.125, %v584_v46  ;;  %v587_v49 = vmul.f32 %v585_v47, %v585_v47 }
 0x1b7   :  { %v588_v50 = vsub.f32 %v586_v48, %v587_v49 }
 0x1b9   :  { %v589_v51 = vadd.f32 1e-05, %v588_v50 }
 0x1bb   :  { %759 = vrsqrt.f32 %v589_v51 }
 0x1c5   :  { %v760_v56 = vpop.eup %759 }
 0x1c6   :  { %v592_v57 = vmul.f32 %v760_v56, %v591_v54 }
 0x1c8   :  { %v594_v59 = vmul.f32 %v592_v57, %v585_v47  ;;  %v599_v60 = vrot.slane %v592_v57, %v598_v55 }
 0x1ca   :  { %v595_v61 = vsub.f32 %v593_v58, %v594_v59  ;;  %v600_v62 = vmul.f32 %v599_v60, %v1003_v28  ;;  %v612_v63 = vmul.f32 %v599_v60, %v1009_v31  ;;  %v618_v1 = vmul.f32 %v599_v60, %v446_v3 }
 0x1cb   :  { %v624_v2 = vmul.f32 %v599_v60, %v562_v8 }
 0x1cc   :  { %v605_v4 = vrot.slane %v595_v61, %v598_v55 }
 0x1ce   :  { %v607_v5 = vadd.f32 %v605_v4, %v600_v62  ;;  %v613_v6 = vadd.f32 %v612_v63, %v605_v4  ;;  %v619_v7 = vadd.f32 %v618_v1, %v605_v4  ;;  %v625_v9 = vadd.f32 %v624_v2, %v605_v4 }
 0x1d0   :  { %v608_v10 = vmax.f32 %v607_v5, 0.0  ;;  %v614_v11 = vmax.f32 %v613_v6, 0.0  ;;  %v620_v12 = vmax.f32 %v619_v7, 0.0  ;;  %v626_v13 = vmax.f32 %v625_v9, 0.0 }
 0x1d2   :  { %v609_v14 = vpack.c.bf16 %v608_v10, %v608_v10  ;;  %v615_v15 = vpack.c.bf16 %v614_v11, %v614_v11  ;;  %v621_v16 = vpack.c.bf16 %v620_v12, %v620_v12  ;;  %v627_v17 = vpack.c.bf16 %v626_v13, %v626_v13 }
 0x1d4   :  { %611 = vst.msk [vmem:[%s1039_s4] sm:$0x1] %vm610_vm8, %v609_v14  ;;  %662 = vst.msk [vmem:[%s1039_s4 + $0x1] sm:$0x1] %vm610_vm8, %v615_v15 }
 0x1d5   :  { %663 = vst.msk [vmem:[%s1039_s4 + $0x2] sm:$0x1] %vm610_vm8, %v621_v16  ;;  %664 = vst.msk [vmem:[%s1039_s4 + $0x3] sm:$0x1] %vm610_vm8, %v627_v17 }
 0x1d6   :  { %634 = vsyncpa [#allocation3], 1 }
 0x1d7   :  { %635 = vsyncpa [#allocation5], 1 }

// kernel: generator_forward.6
= control target key start
LH: loop header
LB: loop body
LE: loop exit
PB: predicated region body
PF: predicated region fallthrough
CT: control target
= control target key end

     0   :  { %9 = vsyncpa [#allocation3], 0  ;;  %s2104_s0 = inlined_call_operand.vmem [shape: bf16[2,4,4,64], index: 0, kind: input, shape index: {}]   ;;  %s2105_s1 = inlined_call_operand.vmem [shape: bf16[2,2,256,32], index: 1, kind: input, shape index: {}]   ;;  %s2106_s2 = inlined_call_operand.hbm [shape: f32[1,32], index: 2, kind: input, shape index: {}]   ;;  %s2107_s3 = inlined_call_operand.hbm [shape: f32[1,32], index: 3, kind: input, shape index: {}]   ;;  %s2108_s4 = inlined_call_operand.vmem [shape: bf16[2,2,8,32], index: 4, kind: output, shape index: {}]  }
   0x1   :  { %10 = vsyncpa [#allocation5], 0  ;;  %s1640_s15 = smov [#allocation2]   ;;  %s1641_s17 = smov [#allocation4]  }
   0x2   :  { %s21_s16 = sshll.u32 %s1640_s15, 4  ;;  %s31_s18 = sshll.u32 %s1641_s17, 4  ;;  %s22_s16 = int_to_ptr.vmem [resolvable:$true] %s21_s16  ;;  %s32_s18 = int_to_ptr.vmem [resolvable:$true] %s31_s18 }
   0x3   :  { %s1592_s21 = scalar_lea.hbm %s2106_s2, 16 }
   0x4   :  { %p1593_p0 = scmp.ne.s32.totalorder %s2106_s2, %s1592_s21  ;;  %p1596_p1 = scmp.lt.u32.totalorder %s1592_s21, %s2106_s2 }
   0x6   :  { %p1598_p2 = pnand %p1596_p1, %p1593_p0 }
   0x8   :  { %1601 = shalt.err (!%p1598_p2)
}
   0x9   :  { %s1602_s26 = scalar_lea.vmem %s22_s16, 16  ;;  %s1606_s27 = scalar_lea.vmem %s22_s16, 32 }
   0xa   :  { %p1603_p3 = scmp.ne.s32.totalorder %s22_s16, %s1602_s26  ;;  %p1607_p4 = scmp.lt.s32.totalorder %s22_s16, %s22_s16 }
   0xb   :  { %p1608_p5 = scmp.lt.s32.totalorder %s1606_s27, %s1602_s26 }
   0xd   :  { %p1609_p6 = por %p1608_p5, %p1607_p4 }
   0xf   :  { %p1610_p7 = pnand %p1609_p6, %p1603_p3 }
  0x11   :  { %1613 = shalt.err (!%p1610_p7)
}
  0x12   :  { %24 = dma.hbm_to_vmem [thread:$0]  %s2106_s2, 16, %s22_s16, [#allocation3]  }
  0x13   :  { %s1614_s6 = scalar_lea.hbm %s2107_s3, 16 }
  0x14   :  { %p1615_p8 = scmp.ne.s32.totalorder %s2107_s3, %s1614_s6  ;;  %p1618_p9 = scmp.lt.u32.totalorder %s1614_s6, %s2107_s3 }
  0x16   :  { %p1620_p10 = pnand %p1618_p9, %p1615_p8 }
  0x18   :  { %1623 = shalt.err (!%p1620_p10)
}
  0x19   :  { %s1624_s11 = scalar_lea.vmem %s32_s18, 16  ;;  %s1628_s12 = scalar_lea.vmem %s32_s18, 32 }
  0x1a   :  { %p1625_p11 = scmp.ne.s32.totalorder %s32_s18, %s1624_s11  ;;  %p1629_p12 = scmp.lt.s32.totalorder %s32_s18, %s32_s18 }
  0x1b   :  { %p1630_p13 = scmp.lt.s32.totalorder %s1628_s12, %s1624_s11 }
  0x1d   :  { %p1631_p0 = por %p1630_p13, %p1629_p12 }
  0x1f   :  { %p1632_p1 = pnand %p1631_p0, %p1625_p11 }
  0x21   :  { %1635 = shalt.err (!%p1632_p1)
}
  0x22   :  { %34 = dma.hbm_to_vmem [thread:$0]  %s2107_s3, 16, %s32_s18, [#allocation5]  }
  0x23   :  { %1636 = dma.done.wait [#allocation3], 16  }
  0x24   :  { %1637 = vsyncadd [#allocation3], 4294967280 }
  0x25   :  { %1638 = dma.done.wait [#allocation5], 16  }
  0x26   :  { %1639 = vsyncadd [#allocation5], 4294967280  ;;  %v57_v0 = vlaneseq  ;;  %v1642_v1 = vmov 1966171168   ;;  %vm86_vm0 = vsmask.f32 256 }
  0x27   :  { %v55_v2 = vunpack.c.l.s4 %v1642_v1  ;;  %vm87_vm1 = vsmask.f32 1284  ;;  %vm89_vm2 = vsmask.f32 2312  ;;  %vm91_vm4 = vsmask.f32 3340 }
  0x28   :  { %v1693_v3 = vshrl.u32 %v57_v0, 7  ;;  %vm88_vm3 = vmor %vm86_vm0, %vm87_vm1  ;;  %vm93_vm5 = vsmask.f32 4368  ;;  %vm95_vm7 = vsmask.f32 5396  ;;  %v1526_v30 = vld [vmem:[%s2105_s1 + $0xc0] sm:$0xff]  }
  0x29   :  { %v56_v4 = vunpack.c.0.s8 %v55_v2  ;;  %vm90_vm6 = vmor %vm88_vm3, %vm89_vm2  ;;  %vm97_vm11 = vsmask.f32 6424  ;;  %vm99_vm12 = vsmask.f32 7452  ;;  %v1705_v7 = vld [vmem:[%s2104_s0 + $0x2] sm:$0x3]  ;;  %1456 = vmatprep.subr.bf16.mxu1 %v1526_v30 }
  0x2a   :  { %vm92_vm8 = vmor %vm90_vm6, %vm91_vm4  ;;  %v1710_v8 = vld [vmem:[%s2104_s0 + $0x4] sm:$0x3]  ;;  %v1715_v9 = vld [vmem:[%s2104_s0 + $0xa] sm:$0x3]  ;;  %s1643_s16 = smov 64   ;;  %vm273_vm15 = vcmask 523264  }
  0x2b   :  { %v1696_v5 = vsub.s32 %v56_v4, %v1693_v3  ;;  %vm94_vm9 = vmor %vm92_vm8, %vm93_vm5  ;;  %v1720_v10 = vld [vmem:[%s2104_s0 + $0xc] sm:$0x3]  ;;  %v1733_v14 = vld [vmem:[%s2104_s0] sm:$0x3]  ;;  %v223_v16 = vcombine.low %v1705_v7, %v1710_v8  ;;  %vm450_vm0 = vcmask 261120   ;;  %vm1231_vm1 = vcmask 257024  }
  0x2c   :  { %vm1698_vm10 = vmor %vm94_vm9, %vm95_vm7  ;;  %v1738_v15 = vld [vmem:[%s2104_s0 + $0x8] sm:$0x3]  ;;  %v224_v20 = vcombine.low %v1715_v9, %v1720_v10  ;;  %v1772_v32 = vld [vmem:[%s2104_s0 + $0x6] sm:$0x3] }
  0x2d   :  { %v68_v11 = vrot.slane %v1705_v7, %v1696_v5  ;;  %v84_v12 = vrot.slane %v1715_v9, %v1696_v5  ;;  %v1728_v13 = vrot.slane %v1710_v8, %v1696_v5  ;;  %v1744_v17 = vrot.slane %v1720_v10, %v1696_v5  ;;  %vm98_vm13 = vmor %vm1698_vm10, %vm97_vm11  ;;  %v1527_v36 = vld [vmem:[%s2105_s1 + $0x80] sm:$0xff]   ;;  %v1783_v40 = vld [vmem:[%s2104_s0 + $0xe] sm:$0x3] }
  0x2e   :  { %v1748_v18 = vrot.slane %v1733_v14, %v1696_v5  ;;  %v76_v19 = vrot.slane %v1738_v15, %v1696_v5  ;;  %vm1759_vm14 = vmor %vm98_vm13, %vm99_vm12  ;;  %v1528_v42 = vld [vmem:[%s2105_s1 + $0xc8] sm:$0xff]   ;;  %1457 = vmatpush3.bf16.msra.mxu1 %v1527_v36  ;;  %v1529_v47 = vld [vmem:[%s2105_s1 + $0x40] sm:$0xff]   ;;  %v722_v61 = vrot.slane %v1772_v32, %v1696_v5  ;;  %v730_v1 = vrot.slane %v1783_v40, %v1696_v5 }
  0x2f   :  { %v1281_v21 = vcombine.high %v68_v11, %v1728_v13  ;;  %v69_v22 = vcombine.high %v68_v11, %v68_v11  ;;  %v85_v23 = vcombine.high %v84_v12, %v84_v12  ;;  %v111_v25 = vshrl.u32 %v68_v11, 16  ;;  %1458 = vmatprep.subr.bf16.mxu1 %v1528_v42  ;;  %v1530_v52 = vld [vmem:[%s2105_s1 + $0x88] sm:$0xff]   ;;  %1434 = vmatprep.subr.bf16.mxu0 %v1529_v47  ;;  %v1531_v57 = vld [vmem:[%s2105_s1] sm:$0xff]   ;;  %v1532_v62 = vld [vmem:[%s2105_s1 + $0xd0] sm:$0xff]  }
  0x30   :  { %v1282_v26 = vcombine.high %v84_v12, %v1744_v17  ;;  %v1279_v27 = vcombine.high %v1748_v18, %v68_v11  ;;  %v1280_v28 = vcombine.high %v76_v19, %v84_v12  ;;  %v77_v29 = vcombine.high %v76_v19, %v76_v19  ;;  %v1533_v4 = vld [vmem:[%s2105_s1 + $0x48] sm:$0xff]   ;;  %1435 = vmatpush3.bf16.msra.mxu0 %v1531_v57  ;;  %v1539_v24 = vld [vmem:[%s2105_s1 + $0x10] sm:$0xff]  }
  0x31   :  { %v502_v31 = vrot.slane %v1281_v21, %v1696_v5  ;;  %v116_v33 = vshll.u32 %v69_v22, 16  ;;  %v120_v34 = vshrl.u32 %v76_v19, 16  ;;  %v129_v35 = vshrl.u32 %v84_v12, 16  ;;  %v1534_v21 = vld [vmem:[%s2105_s1 + $0x90] sm:$0xff]   ;;  %1436 = vmatprep.subr.bf16.mxu0 %v1533_v4 }
  0x32   :  { %v509_v37 = vrot.slane %v1282_v26, %v1696_v5  ;;  %v476_v38 = vrot.slane %v1279_v27, %v1696_v5  ;;  %v483_v39 = vrot.slane %v1280_v28, %v1696_v5  ;;  %v125_v41 = vshll.u32 %v77_v29, 16  ;;  %1459 = vmatpush3.bf16.msra.mxu1 %v1530_v52  ;;  %v1535_v27 = vld [vmem:[%s2105_s1 + $0x8] sm:$0xff]   ;;  %v1548_v4 = vld [vmem:[%s2105_s1 + $0xf0] sm:$0xff]  }
  0x33   :  { %v1790_v43 = vsel %vm1759_vm14, %v111_v25, %v116_v33  ;;  %v134_v44 = vshll.u32 %v85_v23, 16  ;;  %v146_v45 = vcombine.high %v1728_v13, %v1728_v13  ;;  %v154_v46 = vcombine.high %v1744_v17, %v1744_v17  ;;  %1460 = vmatprep.subr.bf16.mxu1 %v1532_v62  ;;  %v1536_v33 = vld [vmem:[%s2105_s1 + $0xd8] sm:$0xff]  }
  0x34   :  { %v510_v48 = vcombine.low %v502_v31, %v509_v37  ;;  %v484_v49 = vcombine.low %v476_v38, %v483_v39  ;;  %v127_v50 = vsel %vm1759_vm14, %v120_v34, %v125_v41  ;;  %v156_v51 = vshrl.u32 %v1728_v13, 16  ;;  %v1537_v37 = vld [vmem:[%s2105_s1 + $0x50] sm:$0xff]   ;;  %1437 = vmatpush3.bf16.msra.mxu0 %v1535_v27 }
  0x35   :  { %v136_v53 = vsel %vm1759_vm14, %v129_v35, %v134_v44  ;;  %v161_v54 = vshll.u32 %v146_v45, 16  ;;  %v165_v55 = vshrl.u32 %v1744_v17, 16  ;;  %v170_v56 = vshll.u32 %v154_v46, 16  ;;  %v1538_v45 = vld [vmem:[%s2105_s1 + $0x98] sm:$0xff]   ;;  %1438 = vmatprep.subr.bf16.mxu0 %v1537_v37  ;;  %v1562_v37 = vld [vmem:[%s2105_s1 + $0x188] sm:$0xff]  }
  0x36   :  { %v517_v58 = vrot.slane %v510_v48, %v1696_v5  ;;  %v491_v59 = vrot.slane %v484_v49, %v1696_v5  ;;  %v198_v60 = vcombine.low %v127_v50, %v136_v53  ;;  %v61_v2 = vcombine.high %v1748_v18, %v1748_v18  ;;  %1461 = vmatpush3.bf16.msra.mxu1 %v1534_v21  ;;  %v1540_v50 = vld [vmem:[%s2105_s1 + $0xe0] sm:$0xff]   ;;  %v1552_v21 = vld [vmem:[%s2105_s1 + $0xf8] sm:$0xff]  }
  0x37   :  { %v163_v63 = vsel %vm1759_vm14, %v156_v51, %v161_v54  ;;  %v172_v0 = vsel %vm1759_vm14, %v165_v55, %v170_v56  ;;  %v723_v12 = vcombine.high %v722_v61, %v722_v61  ;;  %v733_v19 = vshrl.u32 %v722_v61, 16  ;;  %1462 = vmatprep.subr.bf16.mxu1 %v1536_v33  ;;  %v1541_v55 = vld [vmem:[%s2105_s1 + $0x58] sm:$0xff]  }
  0x38   :  { %518 = vrot.lane.b32.xlu1 %v517_v58, %s1643_s16  ;;  %v247_v6 = vcombine.low %v1790_v43, %v163_v63  ;;  %v248_v11 = vcombine.low %v136_v53, %v172_v0  ;;  %v731_v22 = vcombine.high %v730_v1, %v730_v1  ;;  %v742_v23 = vshrl.u32 %v730_v1, 16  ;;  %1439 = vmatpush3.bf16.msra.mxu0 %v1539_v24  ;;  %v1567_v24 = vld [vmem:[%s2105_s1 + $0x108] sm:$0xff]  }
  0x39   :  { %v102_v25 = vshrl.u32 %v1748_v18, 16  ;;  %v107_v26 = vshll.u32 %v61_v2, 16  ;;  %v738_v30 = vshll.u32 %v723_v12, 16  ;;  %v212_v31 = vrot.slane %v198_v60, %v1696_v5  ;;  %1440 = vmatprep.subr.bf16.mxu0 %v1541_v55  ;;  %v1547_v2 = vld [vmem:[%s2105_s1 + $0x20] sm:$0xff]   ;;  %v1550_v12 = vld [vmem:[%s2105_s1 + $0xb0] sm:$0xff]   ;;  %v1573_v55 = vld [vmem:[%s2105_s1 + $0x158] sm:$0xff]  }
  0x3a   :  { %v255_v28 = vrot.slane %v247_v6, %v1696_v5  ;;  %v262_v29 = vrot.slane %v248_v11, %v1696_v5  ;;  %v747_v34 = vshll.u32 %v731_v22, 16  ;;  %v1381_v35 = vcombine.high %v1728_v13, %v722_v61  ;;  %1463 = vmatpush3.bf16.msra.mxu1 %v1538_v45  ;;  %v1543_v61 = vld [vmem:[%s2105_s1 + $0x18] sm:$0xff]   ;;  %v1549_v11 = vld [vmem:[%s2105_s1 + $0x68] sm:$0xff]   ;;  %v1553_v22 = vld [vmem:[%s2105_s1 + $0x70] sm:$0xff]  }
  0x3b   :  { %v109_v18 = vsel %vm1759_vm14, %v102_v25, %v107_v26  ;;  %v1382_v36 = vcombine.high %v1744_v17, %v730_v1  ;;  %v740_v39 = vsel %vm1759_vm14, %v733_v19, %v738_v30  ;;  %v231_v51 = vrot.slane %v223_v16, %v1696_v5  ;;  %1464 = vmatprep.subr.bf16.mxu1 %v1540_v50  ;;  %v1551_v19 = vld [vmem:[%s2105_s1 + $0x28] sm:$0xff]   ;;  %v1555_v25 = vld [vmem:[%s2105_s1 + $0x30] sm:$0xff]   ;;  %v1572_v50 = vld [vmem:[%s2105_s1 + $0x1e0] sm:$0xff]  }
  0x3c   :  { %492 = vrot.lane.b32.xlu1 %v491_v59, %s1643_s16  ;;  %v263_v38 = vcombine.low %v255_v28, %v262_v29  ;;  %v197_v41 = vcombine.low %v109_v18, %v1790_v43  ;;  %v749_v42 = vsel %vm1759_vm14, %v742_v23, %v747_v34  ;;  %v774_v13 = vcombine.low %v163_v63, %v740_v39  ;;  %v1545_v63 = vld [vmem:[%s2105_s1 + $0x60] sm:$0xff]   ;;  %v1554_v23 = vld [vmem:[%s2105_s1 + $0xb8] sm:$0xff]   ;;  %v1564_v39 = vld [vmem:[%s2105_s1 + $0x1d0] sm:$0xff]  }
  0x3d   :  { %v998_v17 = vrot.slane %v1381_v35, %v1696_v5  ;;  %v1005_v44 = vrot.slane %v1382_v36, %v1696_v5  ;;  %v775_v47 = vcombine.low %v172_v0, %v749_v42  ;;  %v238_v52 = vrot.slane %v224_v20, %v1696_v5  ;;  %v1542_v20 = vld [vmem:[%s2105_s1 + $0xa0] sm:$0xff]   ;;  %1441 = vmatpush3.bf16.msra.mxu0 %v1543_v61  ;;  %v1546_v0 = vld [vmem:[%s2105_s1 + $0xa8] sm:$0xff]   ;;  %v1557_v29 = vld [vmem:[%s2105_s1 + $0x78] sm:$0xff]  }
  0x3e   :  { %v1863_v46 = vrot.slane %v263_v38, %v1696_v5  ;;  %v205_v43 = vrot.slane %v197_v41, %v1696_v5  ;;  %v782_v49 = vrot.slane %v774_v13, %v1696_v5  ;;  %v173_v56 = vcombine.low %v1733_v14, %v1705_v7  ;;  %1465 = vmatpush3.bf16.msra.mxu1 %v1542_v20  ;;  %v1544_v14 = vld [vmem:[%s2105_s1 + $0xe8] sm:$0xff]   ;;  %v1556_v28 = vld [vmem:[%s2105_s1 + $0x1c0] sm:$0xff]   ;;  %v1566_v13 = vld [vmem:[%s2105_s1 + $0x190] sm:$0xff]  }
  0x3f   :  { %v1006_v48 = vcombine.low %v998_v17, %v1005_v44  ;;  %v789_v54 = vrot.slane %v775_v47, %v1696_v5  ;;  %v239_v57 = vcombine.low %v231_v51, %v238_v52  ;;  %v174_v58 = vcombine.low %v1738_v15, %v1715_v9  ;;  %1466 = vmatprep.subr.bf16.mxu1 %v1544_v14  ;;  %v1558_v18 = vld [vmem:[%s2105_s1 + $0x180] sm:$0xff]   ;;  %v1560_v36 = vld [vmem:[%s2105_s1 + $0x1c8] sm:$0xff]  }
  0x40   :  { %271 = vrot.lane.b32.xlu0 %v1863_v46, %s1643_s16  ;;  %v213_v53 = vcombine.low %v205_v43, %v212_v31  ;;  %v181_v7 = vrot.slane %v173_v56, %v1696_v5  ;;  %1442 = vmatprep.subr.bf16.mxu0 %v1545_v63  ;;  %v750_v26 = vcombine.low %v1710_v8, %v1772_v32  ;;  %v1559_v8 = vld [vmem:[%s2105_s1 + $0x38] sm:$0xff]   ;;  %v1561_v32 = vld [vmem:[%s2105_s1 + $0x140] sm:$0xff]   ;;  %v1565_v45 = vld [vmem:[%s2105_s1 + $0x148] sm:$0xff]  }
  0x41   :  { %v1013_v16 = vrot.slane %v1006_v48, %v1696_v5  ;;  %v790_v60 = vcombine.low %v782_v49, %v789_v54  ;;  %v246_v62 = vrot.slane %v239_v57, %v1696_v5  ;;  %v188_v9 = vrot.slane %v174_v58, %v1696_v5  ;;  %1443 = vmatpush3.bf16.msra.mxu0 %v1547_v2  ;;  %v1563_v42 = vld [vmem:[%s2105_s1 + $0x100] sm:$0xff]   ;;  %v1570_v48 = vld [vmem:[%s2105_s1 + $0x198] sm:$0xff]   ;;  %v1569_v49 = vld [vmem:[%s2105_s1 + $0x150] sm:$0xff]  }
  0x42   :  { %v220_v59 = vrot.slane %v213_v53, %v1696_v5  ;;  %1467 = vmatpush3.bf16.msra.mxu1 %v1546_v0  ;;  %1444 = vmatprep.subr.bf16.mxu0 %v1549_v11  ;;  %v751_v27 = vcombine.low %v1720_v10, %v1783_v40  ;;  %v758_v30 = vrot.slane %v750_v26, %v1696_v5  ;;  %v1571_v53 = vld [vmem:[%s2105_s1 + $0x110] sm:$0xff]   ;;  %v1574_v54 = vld [vmem:[%s2105_s1 + $0x1a0] sm:$0xff]   ;;  %v1576_v56 = vld [vmem:[%s2105_s1 + $0x1e8] sm:$0xff]  }
  0x43   :  { %1014 = vrot.lane.b32.xlu1 %v1013_v16, %s1643_s16  ;;  %v1908_v15 = vrot.slane %v790_v60, %v1696_v5  ;;  %v189_v1 = vcombine.low %v181_v7, %v188_v9  ;;  %1468 = vmatprep.subr.bf16.mxu1 %v1548_v4  ;;  %v1575_v16 = vld [vmem:[%s2105_s1 + $0x118] sm:$0xff]   ;;  %v1578_v20 = vld [vmem:[%s2105_s1 + $0x1a8] sm:$0xff]   ;;  %v1577_v57 = vld [vmem:[%s2105_s1 + $0x160] sm:$0xff]  }
  0x44   :  { %221 = vrot.lane.b32.xlu0 %v220_v59, %s1643_s16  ;;  %v765_v31 = vrot.slane %v751_v27, %v1696_v5  ;;  %v1580_v58 = vld [vmem:[%s2105_s1 + $0x1f0] sm:$0xff]   ;;  %v1581_v61 = vld [vmem:[%s2105_s1 + $0x168] sm:$0xff]   ;;  %v1584_v7 = vld [vmem:[%s2105_s1 + $0x1f8] sm:$0xff]  }
  0x45   :  { %v196_v6 = vrot.slane %v189_v1, %v1696_v5  ;;  %1445 = vmatpush3.bf16.msra.mxu0 %v1551_v19  ;;  %v1582_v60 = vld [vmem:[%s2105_s1 + $0x1b0] sm:$0xff]   ;;  %v1583_v14 = vld [vmem:[%s2105_s1 + $0x128] sm:$0xff]   ;;  %v1588_v63 = vld [vmem:[%s2105_s1 + $0x178] sm:$0xff]  }
  0x46   :  { %1469 = vmatpush3.bf16.msra.mxu1 %v1550_v12  ;;  %1446 = vmatprep.subr.bf16.mxu0 %v1553_v22  ;;  %v766_v10 = vcombine.low %v758_v30, %v765_v31  ;;  %v1585_v9 = vld [vmem:[%s2105_s1 + $0x170] sm:$0xff]   ;;  %v1589_v0 = vld [vmem:[%s2105_s1 + $0x138] sm:$0xff]  }
  0x47   :  { %1470 = vmatprep.subr.bf16.mxu1 %v1552_v21 }
  0x48   :  { %798 = vrot.lane.b32.xlu0 %v1908_v15, %s1643_s16  ;;  %v773_v40 = vrot.slane %v766_v10, %v1696_v5 }
  0x49   :  { %1447 = vmatpush3.bf16.msra.mxu0 %v1555_v25 }
  0x4a   :  { %1471 = vmatpush3.bf16.msra.mxu1 %v1554_v23  ;;  %1448 = vmatprep.subr.bf16.mxu0 %v1557_v29 }
  0x4b   :  { %1500 = vmatprep.subr.bf16.mxu1 %v1556_v28 }
  0x4d   :  { %1449 = vmatpush3.bf16.msra.mxu0 %v1559_v8 }
  0x4e   :  { %1478 = vmatprep.subr.bf16.mxu0 %v1561_v32 }
  0xaa   :  { %v519_v33 = vpop.permute.xlu1 %518 }
  0xab   :  { %v1967_v34 = vsel %vm273_vm15, %v1863_v46, %v519_v33  ;;  %v1568_v46 = vld [vmem:[%s2105_s1 + $0x1d8] sm:$0xff]  }
  0xac   :  { %689 = vmatprep.mubr.bf16.mxu1 %v1967_v34 }
  0xae   :  { %v493_v35 = vpop.permute.xlu1 %492 }
  0xaf   :  { %v522_v5 = vsel %vm273_vm15, %v220_v59, %v493_v35  ;;  %v1579_v59 = vld [vmem:[%s2105_s1 + $0x120] sm:$0xff]  }
  0xb0   :  { %690 = vmatmul.mubr.bf16.vlgmr.msra.gmra.mrb[0].mxu1 %v522_v5 }
  0xb1   :  { %1501 = vmatpush3.bf16.msra.mxu1 %v1558_v18 }
  0xb2   :  { %v272_v38 = vpop.permute.xlu0 %271  ;;  %1502 = vmatprep.subr.bf16.mxu1 %v1560_v36 }
  0xb3   :  { %v1984_v41 = vsel %vm273_vm15, %v246_v62, %v272_v38  ;;  %v1586_v62 = vld [vmem:[%s2105_s1 + $0x1b8] sm:$0xff]  }
  0xb4   :  { %442 = vmatprep.mubr.bf16.mxu0 %v1984_v41 }
  0xb5   :  { %1503 = vmatpush3.bf16.msra.mxu1 %v1562_v37  ;;  %v1015_v17 = vpop.permute.xlu1 %1014 }
  0xb6   :  { %v222_v44 = vpop.permute.xlu0 %221  ;;  %1504 = vmatprep.subr.bf16.mxu1 %v1564_v39  ;;  %v1018_v47 = vsel %vm273_vm15, %v1908_v15, %v1015_v17  ;;  %v1587_v15 = vld [vmem:[%s2105_s1 + $0x130] sm:$0xff]  }
  0xb7   :  { %v276_v43 = vsel %vm273_vm15, %v196_v6, %v222_v44  ;;  %1181 = vmatprep.mubr.bf16.mxu1 %v1018_v47 }
  0xb8   :  { %443 = vmatmul.mubr.bf16.vlgmr.msra.gmra.mrb[0].mxu0 %v276_v43 }
  0xb9   :  { %1479 = vmatpush3.bf16.msra.mxu0 %v1563_v42  ;;  %1505 = vmatpush3.bf16.msra.mxu1 %v1566_v13 }
  0xba   :  { %1480 = vmatprep.subr.bf16.mxu0 %v1565_v45  ;;  %1506 = vmatprep.subr.bf16.mxu1 %v1568_v46  ;;  %v799_v51 = vpop.permute.xlu0 %798 }
  0xbb   :  { %v802_v52 = vsel %vm273_vm15, %v773_v40, %v799_v51 }
  0xbc   :  { %965 = vmatprep.mubr.bf16.mxu0 %v802_v52 }
  0xbd   :  { %1481 = vmatpush3.bf16.msra.mxu0 %v1567_v24  ;;  %1507 = vmatpush3.bf16.msra.mxu1 %v1570_v48 }
  0xbe   :  { %1482 = vmatprep.subr.bf16.mxu0 %v1569_v49  ;;  %1508 = vmatprep.subr.bf16.mxu1 %v1572_v50 }
  0xc1   :  { %1483 = vmatpush3.bf16.msra.mxu0 %v1571_v53  ;;  %1509 = vmatpush3.bf16.msra.mxu1 %v1574_v54 }
  0xc2   :  { %1484 = vmatprep.subr.bf16.mxu0 %v1573_v55  ;;  %1510 = vmatprep.subr.bf16.mxu1 %v1576_v56 }
  0xc5   :  { %1485 = vmatpush3.bf16.msra.mxu0 %v1575_v16  ;;  %1511 = vmatpush3.bf16.msra.mxu1 %v1578_v20 }
  0xc6   :  { %1486 = vmatprep.subr.bf16.mxu0 %v1577_v57  ;;  %1512 = vmatprep.subr.bf16.mxu1 %v1580_v58 }
  0xc9   :  { %1487 = vmatpush3.bf16.msra.mxu0 %v1579_v59  ;;  %1513 = vmatpush3.bf16.msra.mxu1 %v1582_v60 }
  0xca   :  { %1488 = vmatprep.subr.bf16.mxu0 %v1581_v61  ;;  %1514 = vmatprep.subr.bf16.mxu1 %v1584_v7 }
  0xcd   :  { %1489 = vmatpush3.bf16.msra.mxu0 %v1583_v14  ;;  %1515 = vmatpush3.bf16.msra.mxu1 %v1586_v62 }
  0xce   :  { %1490 = vmatprep.subr.bf16.mxu0 %v1585_v9 }
  0xd0   :  { %1182 = vmatmul.mubr.bf16.vlgmr.msra.gmra.mrb[4].mxu1 %v1967_v34 }
  0xd1   :  { %1491 = vmatpush3.bf16.msra.mxu0 %v1587_v15 }
  0xd2   :  { %1492 = vmatprep.subr.bf16.mxu0 %v1588_v63 }
  0xd5   :  { %1493 = vmatpush3.bf16.msra.mxu0 %v1589_v0 }
  0xd8   :  { %966 = vmatmul.mubr.bf16.vlgmr.msra.gmra.mrb[4].mxu0 %v1984_v41 }
 0x183   :  { %v1472_v1 = vpop.f32.mrb[0].mxu1 }
 0x184   :  { %v1473_v2 = vpop.f32.mrb[1].mxu1 }
 0x185   :  { %v2071_v4 = vadd.f32 %v1473_v2, %v1472_v1  ;;  %v1475_v6 = vpop.f32.mrb[2].mxu1 }
 0x186   :  { %v1476_v11 = vpop.f32.mrb[3].mxu1 }
 0x187   :  { %v697_v12 = vsel %vm450_vm0, %v2071_v4, 0.0  ;;  %v705_v19 = vmul.f32 %v2071_v4, %v2071_v4 }
 0x188   :  { %v698_v21 = vrot.slane %v697_v12, 4 }
 0x189   :  { %v706_v22 = vsel %vm450_vm0, %v705_v19, 0.0 }
 0x18a   :  { %v699_v23 = vadd.f32 %v698_v21, %v697_v12  ;;  %v707_v25 = vrot.slane %v706_v22, 4 }
 0x18b   :  { %v1450_v26 = vpop.f32.mrb[0].mxu0 }
 0x18c   :  { %v708_v27 = vadd.f32 %v707_v25, %v706_v22  ;;  %v1451_v28 = vpop.f32.mrb[1].mxu0  ;;  %v700_v31 = vrot.slane %v699_v23, 2 }
 0x18d   :  { %v2078_v29 = vadd.f32 %v1451_v28, %v1450_v26  ;;  %v1453_v30 = vpop.f32.mrb[2].mxu0 }
 0x18e   :  { %v1454_v8 = vpop.f32.mrb[3].mxu0  ;;  %v709_v40 = vrot.slane %v708_v27, 2  ;;  %v701_v18 = vadd.f32 %v700_v31, %v699_v23 }
 0x18f   :  { %v451_v10 = vsel %vm450_vm0, %v2078_v29, 0.0  ;;  %v459_v32 = vmul.f32 %v2078_v29, %v2078_v29 }
 0x190   :  { %v452_v33 = vrot.slane %v451_v10, 4  ;;  %v710_v5 = vadd.f32 %v709_v40, %v708_v27  ;;  %v702_v39 = vrot.slane %v701_v18, 1 }
 0x191   :  { %v460_v34 = vsel %vm450_vm0, %v459_v32, 0.0 }
 0x192   :  { %v453_v35 = vadd.f32 %v452_v33, %v451_v10  ;;  %v461_v36 = vrot.slane %v460_v34, 4  ;;  %v711_v13 = vrot.slane %v710_v5, 1  ;;  %v703_v45 = vadd.f32 %v702_v39, %v701_v18 }
 0x194   :  { %v454_v37 = vrot.slane %v453_v35, 2  ;;  %v462_v38 = vadd.f32 %v461_v36, %v460_v34  ;;  %v712_v43 = vadd.f32 %v711_v13, %v710_v5 }
 0x196   :  { %v455_v41 = vadd.f32 %v454_v37, %v453_v35  ;;  %v463_v42 = vrot.slane %v462_v38, 2 }
 0x198   :  { %v456_v17 = vrot.slane %v455_v41, 1  ;;  %v464_v44 = vadd.f32 %v463_v42, %v462_v38  ;;  %v1219_v42 = vsub.s32 0, %v1693_v3 }
 0x19a   :  { %v457_v46 = vadd.f32 %v456_v17, %v455_v41  ;;  %v465_v47 = vrot.slane %v464_v44, 1  ;;  %v1212_v41 = vld [vmem:[#allocation2] sm:$0x1] }
 0x19c   :  { %v466_v24 = vadd.f32 %v465_v47, %v464_v44  ;;  %v704_v48 = vadd.f32 %v703_v45, %v457_v46  ;;  %v1214_v44 = vld [vmem:[#allocation4] sm:$0x1] }
 0x19e   :  { %v713_v49 = vadd.f32 %v712_v43, %v466_v24 }
 0x1a3   :  { %v1516_v50 = vpop.f32.mrb[4].mxu1 }
 0x1a4   :  { %v1517_v51 = vpop.f32.mrb[5].mxu1 }
 0x1a5   :  { %v1518_v52 = vadd.f32 %v1517_v51, %v1516_v50  ;;  %v1519_v53 = vpop.f32.mrb[6].mxu1 }
 0x1a6   :  { %v1520_v54 = vpop.f32.mrb[7].mxu1 }
 0x1a7   :  { %v1189_v55 = vsel %vm450_vm0, %v1518_v52, 0.0  ;;  %v1197_v56 = vmul.f32 %v1518_v52, %v1518_v52 }
 0x1a8   :  { %v1190_v16 = vrot.slane %v1189_v55, 4 }
 0x1a9   :  { %v1198_v20 = vsel %vm450_vm0, %v1197_v56, 0.0 }
 0x1aa   :  { %v1199_v57 = vrot.slane %v1198_v20, 4  ;;  %v1191_v59 = vadd.f32 %v1190_v16, %v1189_v55 }
 0x1ab   :  { %v1494_v58 = vpop.f32.mrb[4].mxu0 }
 0x1ac   :  { %v1495_v60 = vpop.f32.mrb[5].mxu0  ;;  %v1200_v14 = vadd.f32 %v1199_v57, %v1198_v20  ;;  %v1192_v63 = vrot.slane %v1191_v59, 2 }
 0x1ad   :  { %v1496_v61 = vadd.f32 %v1495_v60, %v1494_v58  ;;  %v1497_v7 = vpop.f32.mrb[6].mxu0 }
 0x1ae   :  { %v1498_v62 = vpop.f32.mrb[7].mxu0  ;;  %v1201_v2 = vrot.slane %v1200_v14, 2  ;;  %v1193_v12 = vadd.f32 %v1192_v63, %v1191_v59 }
 0x1af   :  { %v973_v9 = vsel %vm450_vm0, %v1496_v61, 0.0  ;;  %v981_v15 = vmul.f32 %v1496_v61, %v1496_v61 }
 0x1b0   :  { %v974_v0 = vrot.slane %v973_v9, 4  ;;  %v1202_v22 = vadd.f32 %v1201_v2, %v1200_v14  ;;  %v1194_v26 = vrot.slane %v1193_v12, 1 }
 0x1b1   :  { %v982_v1 = vsel %vm450_vm0, %v981_v15, 0.0 }
 0x1b2   :  { %v975_v6 = vadd.f32 %v974_v0, %v973_v9  ;;  %v983_v11 = vrot.slane %v982_v1, 4  ;;  %v1203_v30 = vrot.slane %v1202_v22, 1  ;;  %v1195_v10 = vadd.f32 %v1194_v26, %v1193_v12 }
 0x1b4   :  { %v976_v19 = vrot.slane %v975_v6, 2  ;;  %v984_v21 = vadd.f32 %v983_v11, %v982_v1  ;;  %v1204_v33 = vadd.f32 %v1203_v30, %v1202_v22 }
 0x1b6   :  { %v977_v23 = vadd.f32 %v976_v19, %v975_v6  ;;  %v985_v25 = vrot.slane %v984_v21, 2 }
 0x1b8   :  { %v978_v27 = vrot.slane %v977_v23, 1  ;;  %v986_v28 = vadd.f32 %v985_v25, %v984_v21 }
 0x1ba   :  { %v979_v31 = vadd.f32 %v978_v27, %v977_v23  ;;  %v987_v8 = vrot.slane %v986_v28, 1 }
 0x1bc   :  { %v980_v32 = vadd.f32 %v979_v31, %v704_v48  ;;  %v988_v40 = vadd.f32 %v987_v8, %v986_v28 }
 0x1be   :  { %v989_v34 = vadd.f32 %v988_v40, %v713_v49  ;;  %v1196_v18 = vadd.f32 %v1195_v10, %v980_v32 }
 0x1c0   :  { %v1205_v35 = vadd.f32 %v1204_v33, %v989_v34  ;;  %v1206_v36 = vmul.f32 0.03125, %v1196_v18 }
 0x1c2   :  { %v1207_v5 = vmul.f32 0.03125, %v1205_v35  ;;  %v1208_v37 = vmul.f32 %v1206_v36, %v1206_v36 }
 0x1c4   :  { %v1209_v38 = vsub.f32 %v1207_v5, %v1208_v37 }
 0x1c6   :  { %v1210_v39 = vadd.f32 1e-05, %v1209_v38 }
 0x1c8   :  { %1590 = vrsqrt.f32 %v1210_v39 }
 0x1d2   :  { %v1591_v13 = vpop.eup %1590 }
 0x1d3   :  { %v1213_v17 = vmul.f32 %v1591_v13, %v1212_v41 }
 0x1d5   :  { %v1215_v45 = vmul.f32 %v1213_v17, %v1206_v36  ;;  %v1220_v46 = vrot.slane %v1213_v17, %v1219_v42 }
 0x1d7   :  { %v1216_v47 = vsub.f32 %v1214_v44, %v1215_v45  ;;  %v1221_v43 = vmul.f32 %v2078_v29, %v1220_v46  ;;  %v1233_v24 = vmul.f32 %v2071_v4, %v1220_v46  ;;  %v1239_v48 = vmul.f32 %v1496_v61, %v1220_v46 }
 0x1d8   :  { %v1245_v49 = vmul.f32 %v1518_v52, %v1220_v46 }
 0x1d9   :  { %v1226_v50 = vrot.slane %v1216_v47, %v1219_v42 }
 0x1db   :  { %v1228_v51 = vadd.f32 %v1226_v50, %v1221_v43  ;;  %v1234_v53 = vadd.f32 %v1233_v24, %v1226_v50  ;;  %v1240_v54 = vadd.f32 %v1239_v48, %v1226_v50  ;;  %v1246_v55 = vadd.f32 %v1245_v49, %v1226_v50 }
 0x1dd   :  { %v1229_v56 = vmax.f32 %v1228_v51, 0.0  ;;  %v1235_v16 = vmax.f32 %v1234_v53, 0.0  ;;  %v1241_v3 = vmax.f32 %v1240_v54, 0.0  ;;  %v1247_v20 = vmax.f32 %v1246_v55, 0.0 }
 0x1df   :  { %v1230_v57 = vpack.c.bf16 %v1229_v56, %v1229_v56  ;;  %v1236_v58 = vpack.c.bf16 %v1235_v16, %v1235_v16  ;;  %v1242_v59 = vpack.c.bf16 %v1241_v3, %v1241_v3  ;;  %v1248_v60 = vpack.c.bf16 %v1247_v20, %v1247_v20 }
 0x1e1   :  { %1232 = vst.msk [vmem:[%s2108_s4] sm:$0xf] %vm1231_vm1, %v1230_v57  ;;  %1431 = vst.msk [vmem:[%s2108_s4 + $0x4] sm:$0xf] %vm1231_vm1, %v1236_v58 }
 0x1e2   :  { %1432 = vst.msk [vmem:[%s2108_s4 + $0x8] sm:$0xf] %vm1231_vm1, %v1242_v59  ;;  %1433 = vst.msk [vmem:[%s2108_s4 + $0xc] sm:$0xf] %vm1231_vm1, %v1248_v60 }
 0x1e3   :  { %1255 = vsyncpa [#allocation3], 1 }
 0x1e4   :  { %1256 = vsyncpa [#allocation5], 1 }

// kernel: generator_forward.7
= control target key start
LH: loop header
LB: loop body
LE: loop exit
PB: predicated region body
PF: predicated region fallthrough
CT: control target
= control target key end

     0   :  { %9 = vsyncpa [#allocation3], 0  ;;  %s2703_s0 = inlined_call_operand.vmem [shape: bf16[2,6,6,32], index: 0, kind: input, shape index: {}]   ;;  %s2704_s1 = inlined_call_operand.vmem [shape: bf16[2,2,128,16], index: 1, kind: input, shape index: {}]   ;;  %s2705_s2 = inlined_call_operand.hbm [shape: f32[1,16], index: 2, kind: input, shape index: {}]   ;;  %s2706_s3 = inlined_call_operand.hbm [shape: f32[1,16], index: 3, kind: input, shape index: {}]   ;;  %s2707_s4 = inlined_call_operand.vmem [shape: bf16[2,2,32,16], index: 4, kind: output, shape index: {}]  }
   0x1   :  { %10 = vsyncpa [#allocation5], 0  ;;  %s1862_s15 = smov [#allocation2]   ;;  %s1863_s17 = smov [#allocation4]  }
   0x2   :  { %s21_s16 = sshll.u32 %s1862_s15, 4  ;;  %s31_s18 = sshll.u32 %s1863_s17, 4  ;;  %s22_s16 = int_to_ptr.vmem [resolvable:$true] %s21_s16  ;;  %s32_s18 = int_to_ptr.vmem [resolvable:$true] %s31_s18 }
   0x3   :  { %s1814_s21 = scalar_lea.hbm %s2705_s2, 16 }
   0x4   :  { %p1815_p0 = scmp.ne.s32.totalorder %s2705_s2, %s1814_s21  ;;  %p1818_p1 = scmp.lt.u32.totalorder %s1814_s21, %s2705_s2 }
   0x6   :  { %p1820_p2 = pnand %p1818_p1, %p1815_p0 }
   0x8   :  { %1823 = shalt.err (!%p1820_p2)
}
   0x9   :  { %s1824_s26 = scalar_lea.vmem %s22_s16, 16  ;;  %s1828_s27 = scalar_lea.vmem %s22_s16, 32 }
   0xa   :  { %p1825_p3 = scmp.ne.s32.totalorder %s22_s16, %s1824_s26  ;;  %p1829_p4 = scmp.lt.s32.totalorder %s22_s16, %s22_s16 }
   0xb   :  { %p1830_p5 = scmp.lt.s32.totalorder %s1828_s27, %s1824_s26 }
   0xd   :  { %p1831_p6 = por %p1830_p5, %p1829_p4 }
   0xf   :  { %p1832_p7 = pnand %p1831_p6, %p1825_p3 }
  0x11   :  { %1835 = shalt.err (!%p1832_p7)
}
  0x12   :  { %24 = dma.hbm_to_vmem [thread:$0]  %s2705_s2, 16, %s22_s16, [#allocation3]  }
  0x13   :  { %s1836_s6 = scalar_lea.hbm %s2706_s3, 16 }
  0x14   :  { %p1837_p8 = scmp.ne.s32.totalorder %s2706_s3, %s1836_s6  ;;  %p1840_p9 = scmp.lt.u32.totalorder %s1836_s6, %s2706_s3 }
  0x16   :  { %p1842_p10 = pnand %p1840_p9, %p1837_p8 }
  0x18   :  { %1845 = shalt.err (!%p1842_p10)
}
  0x19   :  { %s1846_s11 = scalar_lea.vmem %s32_s18, 16  ;;  %s1850_s12 = scalar_lea.vmem %s32_s18, 32 }
  0x1a   :  { %p1847_p11 = scmp.ne.s32.totalorder %s32_s18, %s1846_s11  ;;  %p1851_p12 = scmp.lt.s32.totalorder %s32_s18, %s32_s18 }
  0x1b   :  { %p1852_p13 = scmp.lt.s32.totalorder %s1850_s12, %s1846_s11 }
  0x1d   :  { %p1853_p0 = por %p1852_p13, %p1851_p12 }
  0x1f   :  { %p1854_p1 = pnand %p1853_p0, %p1847_p11 }
  0x21   :  { %1857 = shalt.err (!%p1854_p1)
}
  0x22   :  { %34 = dma.hbm_to_vmem [thread:$0]  %s2706_s3, 16, %s32_s18, [#allocation5]  }
  0x23   :  { %1858 = dma.done.wait [#allocation3], 16  }
  0x24   :  { %1859 = vsyncadd [#allocation3], 4294967280 }
  0x25   :  { %1860 = dma.done.wait [#allocation5], 16  }
  0x26   :  { %1861 = vsyncadd [#allocation5], 4294967280  ;;  %v65_v0 = vlaneseq  ;;  %v1864_v1 = vmov 1983009808   ;;  %vm126_vm0 = vsmask.f32 1280 }
  0x27   :  { %v63_v2 = vunpack.c.l.s4 %v1864_v1  ;;  %vm127_vm1 = vsmask.f32 3336  ;;  %vm129_vm2 = vsmask.f32 5392  ;;  %vm604_vm3 = vcmask 1040384   ;;  %v1779_v36 = vld [vmem:[%s2704_s1] sm:$0xff]  }
  0x28   :  { %v1917_v3 = vshrl.u32 %v65_v0, 7  ;;  %vm605_vm4 = vcmask 1042434   ;;  %v1925_v6 = vld [vmem:[%s2703_s0 + $0x4] sm:$0x7]  ;;  %v1930_v7 = vld [vmem:[%s2703_s0 + $0x8] sm:$0x7]  ;;  %vm2017_vm7 = vmor %vm126_vm0, %vm127_vm1  ;;  %1684 = vmatprep.subr.bf16.mxu0 %v1779_v36 }
  0x29   :  { %v64_v4 = vunpack.c.0.s8 %v63_v2  ;;  %v1935_v8 = vld [vmem:[%s2703_s0 + $0xc] sm:$0x7]  ;;  %v1940_v9 = vld [vmem:[%s2703_s0 + $0x10] sm:$0x7]  ;;  %v363_v12 = vcombine.low %v1925_v6, %v1930_v7  ;;  %v1955_v13 = vld [vmem:[%s2703_s0] sm:$0x7]  ;;  %1685 = vmatpush3.bf16.msra.mxu0 %v1779_v36 }
  0x2a   :  { %v1964_v15 = vld [vmem:[%s2703_s0 + $0x1c] sm:$0x7]  ;;  %vm131_vm5 = vsmask.f32 7448  ;;  %v364_v17 = vcombine.low %v1935_v8, %v1940_v9  ;;  %v291_v19 = vcombine.low %v1955_v13, %v1925_v6  ;;  %v1981_v20 = vld [vmem:[%s2703_s0 + $0x20] sm:$0x7]  ;;  %vm2067_vm9 = vmor %vm2017_vm7, %vm129_vm2 }
  0x2b   :  { %v1920_v5 = vsub.s32 %v64_v4, %v1917_v3  ;;  %v1986_v21 = vld [vmem:[%s2703_s0 + $0x24] sm:$0x7]  ;;  %v1991_v22 = vld [vmem:[%s2703_s0 + $0x28] sm:$0x7]  ;;  %vm607_vm6 = vcmask 1044484   ;;  %v380_v29 = vcombine.low %v1964_v15, %v1981_v20  ;;  %vm609_vm8 = vcmask 1046534   ;;  %vm2075_vm10 = vmor %vm604_vm3, %vm605_vm4 }
  0x2c   :  { %v381_v30 = vcombine.low %v1986_v21, %v1991_v22  ;;  %v1780_v41 = vld [vmem:[%s2704_s1 + $0x8] sm:$0xff]   ;;  %v1782_v46 = vld [vmem:[%s2704_s1 + $0x40] sm:$0xff]   ;;  %s1865_s11 = smov 64   ;;  %v1781_v51 = vld [vmem:[%s2704_s1 + $0x10] sm:$0xff]   ;;  %s1866_s26 = smov 32   ;;  %vm439_vm14 = vcmask 261120  }
  0x2d   :  { %v1944_v10 = vrot.slane %v1930_v7, %v1920_v5  ;;  %v1948_v11 = vrot.slane %v1935_v8, %v1920_v5  ;;  %v1959_v14 = vrot.slane %v1925_v6, %v1920_v5  ;;  %v1968_v16 = vrot.slane %v1940_v9, %v1920_v5  ;;  %1686 = vmatprep.subr.bf16.mxu0 %v1780_v41  ;;  %v1783_v2 = vld [vmem:[%s2704_s1 + $0x18] sm:$0xff]   ;;  %vm2089_vm11 = vmor %vm2067_vm9, %vm131_vm5  ;;  %s1867_s19 = smov 96  }
  0x2e   :  { %v1974_v18 = vrot.slane %v1955_v13, %v1920_v5  ;;  %v371_v23 = vrot.slane %v363_v12, %v1920_v5  ;;  %v1996_v24 = vrot.slane %v1964_v15, %v1920_v5  ;;  %v2000_v25 = vrot.slane %v1981_v20, %v1920_v5  ;;  %1704 = vmatprep.subr.bf16.mxu1 %v1782_v46  ;;  %vm2104_vm12 = vmor %vm2075_vm10, %vm607_vm6 }
  0x2f   :  { %v2004_v26 = vrot.slane %v1986_v21, %v1920_v5  ;;  %v378_v27 = vrot.slane %v364_v17, %v1920_v5  ;;  %v2009_v28 = vrot.slane %v1991_v22, %v1920_v5  ;;  %v2027_v33 = vcombine.high %v1959_v14, %v1959_v14  ;;  %1705 = vmatpush3.bf16.msra.mxu1 %v1782_v46  ;;  %vm2124_vm13 = vmor %vm2104_vm12, %vm609_vm8 }
  0x30   :  { %v2023_v32 = vcombine.high %v1974_v18, %v1974_v18  ;;  %v2031_v34 = vcombine.high %v1944_v10, %v1944_v10  ;;  %v2035_v35 = vcombine.high %v1948_v11, %v1948_v11  ;;  %v388_v38 = vrot.slane %v380_v29, %v1920_v5  ;;  %1687 = vmatpush3.bf16.msra.mxu0 %v1780_v41  ;;  %v1784_v29 = vld [vmem:[%s2704_s1 + $0x48] sm:$0xff]  }
  0x31   :  { %v2040_v37 = vcombine.low %v371_v23, %v378_v27  ;;  %v395_v39 = vrot.slane %v381_v30, %v1920_v5  ;;  %v134_v40 = vshrl.u32 %v1974_v18, 16  ;;  %v137_v42 = vshll.u32 %v1974_v18, 16  ;;  %1688 = vmatprep.subr.bf16.mxu0 %v1781_v51  ;;  %1706 = vmatprep.subr.bf16.mxu1 %v1784_v29 }
  0x32   :  { %v143_v43 = vshll.u32 %v2023_v32, 16  ;;  %v148_v44 = vshrl.u32 %v1959_v14, 16  ;;  %v151_v45 = vshll.u32 %v1959_v14, 16  ;;  %v157_v49 = vshll.u32 %v2027_v33, 16 }
  0x33   :  { %397 = vrot.lane.b32.xlu1 %v2040_v37, %s1865_s11  ;;  %v2057_v47 = vcombine.low %v388_v38, %v395_v39  ;;  %v136_v48 = vrot.slane %v134_v40, 6  ;;  %v162_v50 = vshrl.u32 %v1944_v10, 16  ;;  %v139_v53 = vrot.slane %v137_v42, 7  ;;  %1707 = vmatpush3.bf16.msra.mxu1 %v1784_v29 }
  0x34   :  { %v145_v54 = vrot.slane %v143_v43, 7  ;;  %v150_v55 = vrot.slane %v148_v44, 6  ;;  %v153_v56 = vrot.slane %v151_v45, 7  ;;  %v159_v57 = vrot.slane %v157_v49, 7  ;;  %v1786_v49 = vld [vmem:[%s2704_s1 + $0x50] sm:$0xff]   ;;  %1689 = vmatpush3.bf16.msra.mxu0 %v1781_v51 }
  0x35   :  { %v164_v58 = vrot.slane %v162_v50, 6  ;;  %v165_v59 = vshll.u32 %v1944_v10, 16  ;;  %v171_v60 = vshll.u32 %v2031_v34, 16  ;;  %v140_v62 = vor.u32 %v139_v53, %v136_v48  ;;  %1690 = vmatprep.subr.bf16.mxu0 %v1783_v2  ;;  %1708 = vmatprep.subr.bf16.mxu1 %v1786_v49 }
  0x36   :  { %v154_v63 = vor.u32 %v153_v56, %v150_v55  ;;  %v176_v0 = vshrl.u32 %v1948_v11, 16  ;;  %v179_v1 = vshll.u32 %v1948_v11, 16  ;;  %v185_v23 = vshll.u32 %v2035_v35, 16  ;;  %v2131_v56 = vld [vmem:[%s2703_s0 + $0x18] sm:$0x7] }
  0x37   :  { %399 = vrot.lane.b32.xlu1 %v2057_v47, %s1865_s11  ;;  %v167_v12 = vrot.slane %v165_v59, 7  ;;  %v173_v17 = vrot.slane %v171_v60, 7  ;;  %v2096_v27 = vcombine.high %v1968_v16, %v1968_v16  ;;  %v141_v30 = vrot.slane %v140_v62, 2  ;;  %1709 = vmatpush3.bf16.msra.mxu1 %v1786_v49 }
  0x38   :  { %v155_v31 = vrot.slane %v154_v63, 2  ;;  %v178_v36 = vrot.slane %v176_v0, 6  ;;  %v181_v38 = vrot.slane %v179_v1, 7  ;;  %v187_v42 = vrot.slane %v185_v23, 7  ;;  %v1788_v1 = vld [vmem:[%s2704_s1 + $0x58] sm:$0xff]   ;;  %1691 = vmatpush3.bf16.msra.mxu0 %v1783_v2 }
  0x39   :  { %v168_v40 = vor.u32 %v167_v12, %v164_v58  ;;  %v264_v41 = vshrl.u32 %v1968_v16, 16  ;;  %v267_v43 = vshll.u32 %v1968_v16, 16  ;;  %v146_v44 = vsel %vm2089_vm11, %v141_v30, %v145_v54  ;;  %1710 = vmatprep.subr.bf16.mxu1 %v1788_v1 }
  0x3a   :  { %v2114_v45 = vsel %vm2089_vm11, %v155_v31, %v159_v57  ;;  %v182_v46 = vor.u32 %v181_v38, %v178_v36  ;;  %v273_v48 = vshll.u32 %v2096_v27, 16  ;;  %v1785_v57 = vld [vmem:[%s2704_s1 + $0x20] sm:$0xff]   ;;  %v1516_v60 = vrot.slane %v1974_v18, 9  ;;  %v1787_v31 = vld [vmem:[%s2704_s1 + $0x28] sm:$0xff]  }
  0x3b   :  { %v169_v50 = vrot.slane %v168_v40, 2  ;;  %v266_v52 = vrot.slane %v264_v41, 6  ;;  %v269_v53 = vrot.slane %v267_v43, 7  ;;  %v325_v55 = vcombine.low %v146_v44, %v2114_v45  ;;  %1692 = vmatprep.subr.bf16.mxu0 %v1785_v57  ;;  %1711 = vmatpush3.bf16.msra.mxu1 %v1788_v1 }
  0x3c   :  { %v183_v58 = vrot.slane %v182_v46, 2  ;;  %v275_v59 = vrot.slane %v273_v48, 7  ;;  %v613_v61 = vrot.slane %v2023_v32, 7  ;;  %v1517_v51 = vrot.slane %v1959_v14, 9  ;;  %1693 = vmatpush3.bf16.msra.mxu0 %v1785_v57 }
  0x3d   :  { %v2140_v62 = vsel %vm2089_vm11, %v169_v50, %v173_v17  ;;  %v270_v63 = vor.u32 %v269_v53, %v266_v52  ;;  %v333_v0 = vrot.slane %v325_v55, %v1920_v5  ;;  %v617_v17 = vrot.slane %v2027_v33, 7  ;;  %1694 = vmatprep.subr.bf16.mxu0 %v1787_v31 }
  0x3e   :  { %v2149_v18 = vsel %vm2089_vm11, %v183_v58, %v187_v42  ;;  %v401_v32 = vcombine.low %v2114_v45, %v2140_v62  ;;  %v614_v12 = vsel %vm2124_vm13, %v1516_v60, %v613_v61  ;;  %v1518_v29 = vrot.slane %v1944_v10, 9 }
  0x3f   :  { %v271_v23 = vrot.slane %v270_v63, 2  ;;  %v326_v14 = vcombine.low %v2140_v62, %v2149_v18  ;;  %v621_v30 = vrot.slane %v2031_v34, 7  ;;  %v2165_v36 = vsel %vm2124_vm13, %v1517_v51, %v617_v17  ;;  %v2300_v62 = vld [vmem:[%s2703_s0 + $0x14] sm:$0x7] }
  0x40   :  { %v1519_v33 = vrot.slane %v1948_v11, 9  ;;  %v625_v38 = vrot.slane %v2035_v35, 7  ;;  %v2171_v39 = vrot.slane %v2131_v56, %v1920_v5  ;;  %v651_v11 = vcombine.low %v614_v12, %v2165_v36  ;;  %1695 = vmatpush3.bf16.msra.mxu0 %v1787_v31 }
  0x41   :  { %v2175_v10 = vsel %vm2089_vm11, %v271_v23, %v275_v59  ;;  %v2178_v34 = vrot.slane %v326_v14, %v1920_v5  ;;  %v2182_v2 = vsel %vm2124_vm13, %v1518_v29, %v621_v30  ;;  %v2197_v41 = vcombine.high %v1996_v24, %v1996_v24 }
  0x42   :  { %v402_v35 = vcombine.low %v2149_v18, %v2175_v10  ;;  %v2189_v40 = vsel %vm2124_vm13, %v1519_v33, %v625_v38  ;;  %v2193_v42 = vcombine.high %v2171_v39, %v2171_v39  ;;  %v659_v46 = vrot.slane %v651_v11, %v1920_v5 }
  0x43   :  { %v2200_v43 = vcombine.low %v333_v0, %v2178_v34  ;;  %v652_v44 = vcombine.low %v2182_v2, %v2189_v40  ;;  %v2207_v48 = vcombine.high %v2000_v25, %v2000_v25  ;;  %v2211_v49 = vcombine.high %v2004_v26, %v2004_v26 }
  0x44   :  { %v190_v50 = vshrl.u32 %v2171_v39, 16  ;;  %v193_v52 = vshll.u32 %v2171_v39, 16  ;;  %v199_v53 = vshll.u32 %v2193_v42, 16  ;;  %v204_v57 = vshrl.u32 %v1996_v24, 16 }
  0x45   :  { %359 = vrot.lane.b32.xlu0 %v2200_v43, %s1866_s26  ;;  %v2219_v55 = vrot.slane %v652_v44, %v1920_v5  ;;  %v207_v58 = vshll.u32 %v1996_v24, 16  ;;  %v213_v59 = vshll.u32 %v2197_v41, 16  ;;  %v218_v0 = vshrl.u32 %v2000_v25, 16 }
  0x46   :  { %v192_v60 = vrot.slane %v190_v50, 6  ;;  %v195_v61 = vrot.slane %v193_v52, 7  ;;  %v201_v63 = vrot.slane %v199_v53, 7  ;;  %v206_v1 = vrot.slane %v204_v57, 6  ;;  %v1790_v53 = vld [vmem:[%s2704_s1 + $0x30] sm:$0xff]  }
  0x47   :  { %v667_v51 = vcombine.low %v659_v46, %v2219_v55  ;;  %v209_v12 = vrot.slane %v207_v58, 7  ;;  %v215_v17 = vrot.slane %v213_v59, 7  ;;  %v220_v14 = vrot.slane %v218_v0, 6  ;;  %1696 = vmatprep.subr.bf16.mxu0 %v1790_v53 }
  0x48   :  { %v196_v23 = vor.u32 %v195_v61, %v192_v60  ;;  %v221_v29 = vshll.u32 %v2000_v25, 16  ;;  %v227_v30 = vshll.u32 %v2207_v48, 16  ;;  %v232_v38 = vshrl.u32 %v2004_v26, 16  ;;  %v1791_v61 = vld [vmem:[%s2704_s1 + $0x60] sm:$0xff]   ;;  %1697 = vmatpush3.bf16.msra.mxu0 %v1790_v53 }
  0x49   :  { %685 = vrot.lane.b32.xlu1 %v667_v51, %s1866_s26  ;;  %v210_v33 = vor.u32 %v209_v12, %v206_v1  ;;  %v235_v11 = vshll.u32 %v2004_v26, 16  ;;  %v241_v44 = vshll.u32 %v2211_v49, 16  ;;  %v2234_v31 = vcombine.high %v2009_v28, %v2009_v28  ;;  %1712 = vmatprep.subr.bf16.mxu1 %v1791_v61 }
  0x4a   :  { %v197_v46 = vrot.slane %v196_v23, 2  ;;  %v223_v50 = vrot.slane %v221_v29, 7  ;;  %v229_v52 = vrot.slane %v227_v30, 7  ;;  %v234_v58 = vrot.slane %v232_v38, 6  ;;  %1713 = vmatpush3.bf16.msra.mxu1 %v1791_v61 }
  0x4b   :  { %v211_v57 = vrot.slane %v210_v33, 2  ;;  %v237_v59 = vrot.slane %v235_v11, 7  ;;  %v243_v60 = vrot.slane %v241_v44, 7  ;;  %v278_v1 = vshrl.u32 %v2009_v28, 16 }
  0x4c   :  { %v202_v0 = vsel %vm2089_vm11, %v197_v46, %v201_v63  ;;  %v224_v51 = vor.u32 %v223_v50, %v220_v14  ;;  %v281_v12 = vshll.u32 %v2009_v28, 16  ;;  %v287_v30 = vshll.u32 %v2234_v31, 16  ;;  %v1792_v14 = vld [vmem:[%s2704_s1 + $0x38] sm:$0xff]  }
  0x4d   :  { %v216_v23 = vsel %vm2089_vm11, %v211_v57, %v215_v17  ;;  %v238_v29 = vor.u32 %v237_v59, %v234_v58  ;;  %v1520_v33 = vrot.slane %v2171_v39, 9  ;;  %v280_v11 = vrot.slane %v278_v1, 6  ;;  %v1793_v39 = vld [vmem:[%s2704_s1 + $0x68] sm:$0xff]   ;;  %1698 = vmatprep.subr.bf16.mxu0 %v1792_v14 }
  0x4e   :  { %v225_v38 = vrot.slane %v224_v51, 2  ;;  %v283_v44 = vrot.slane %v281_v12, 7  ;;  %v342_v63 = vcombine.low %v202_v0, %v216_v23  ;;  %v289_v50 = vrot.slane %v287_v30, 7  ;;  %1699 = vmatpush3.bf16.msra.mxu0 %v1792_v14  ;;  %1714 = vmatprep.subr.bf16.mxu1 %v1793_v39 }
  0x4f   :  { %v239_v46 = vrot.slane %v238_v29, 2  ;;  %v629_v17 = vrot.slane %v2193_v42, 7  ;;  %v1521_v57 = vrot.slane %v1996_v24, 9  ;;  %v633_v61 = vrot.slane %v2197_v41, 7  ;;  %1715 = vmatpush3.bf16.msra.mxu1 %v1793_v39  ;;  %v2273_v41 = vld [vmem:[%s2704_s1 + $0x80] sm:$0xff]  }
  0x50   :  { %v230_v53 = vsel %vm2089_vm11, %v225_v38, %v229_v52  ;;  %v284_v58 = vor.u32 %v283_v44, %v280_v11  ;;  %v350_v59 = vrot.slane %v342_v63, %v1920_v5  ;;  %v1522_v42 = vrot.slane %v2000_v25, 9  ;;  %1724 = vmatprep.subr.bf16.mxu0 %v2273_v41 }
  0x51   :  { %v244_v0 = vsel %vm2089_vm11, %v239_v46, %v243_v60  ;;  %v418_v51 = vcombine.low %v216_v23, %v230_v53  ;;  %v630_v24 = vsel %vm2124_vm13, %v1520_v33, %v629_v17  ;;  %v634_v52 = vsel %vm2124_vm13, %v1521_v57, %v633_v61  ;;  %v1797_v17 = vld [vmem:[%s2704_s1 + $0x78] sm:$0xff]  }
  0x52   :  { %v285_v1 = vrot.slane %v284_v58, 2  ;;  %v343_v12 = vcombine.low %v230_v53, %v244_v0  ;;  %v637_v29 = vrot.slane %v2207_v48, 7  ;;  %v1523_v60 = vrot.slane %v2004_v26, 9  ;;  %v1795_v48 = vld [vmem:[%s2704_s1 + $0x70] sm:$0xff]   ;;  %v53_v58 = vld [vmem:[%s2703_s0 + $0x2c] sm:$0x7] }
  0x53   :  { %v641_v23 = vrot.slane %v2211_v49, 7  ;;  %v668_v25 = vcombine.low %v630_v24, %v634_v52  ;;  %v409_v30 = vrot.slane %v401_v32, %v1920_v5  ;;  %v416_v45 = vrot.slane %v402_v35, %v1920_v5  ;;  %1716 = vmatprep.subr.bf16.mxu1 %v1795_v48 }
  0x54   :  { %v2286_v33 = vsel %vm2089_vm11, %v285_v1, %v289_v50  ;;  %v2289_v38 = vrot.slane %v343_v12, %v1920_v5  ;;  %v638_v26 = vsel %vm2124_vm13, %v1522_v42, %v637_v29  ;;  %v1525_v35 = vrot.slane %v2009_v28, 9  ;;  %1717 = vmatpush3.bf16.msra.mxu1 %v1795_v48  ;;  %v2352_v42 = vld [vmem:[%s2704_s1 + $0xc0] sm:$0xff]  }
  0x55   :  { %v419_v32 = vcombine.low %v244_v0, %v2286_v33  ;;  %v642_v49 = vsel %vm2124_vm13, %v1523_v60, %v641_v23  ;;  %v676_v18 = vrot.slane %v668_v25, %v1920_v5  ;;  %v426_v63 = vrot.slane %v418_v51, %v1920_v5  ;;  %1718 = vmatprep.subr.bf16.mxu1 %v1797_v17 }
  0x56   :  { %v2307_v11 = vcombine.low %v350_v59, %v2289_v38  ;;  %v669_v44 = vcombine.low %v638_v26, %v642_v49  ;;  %v649_v46 = vrot.slane %v2234_v31, 7  ;;  %v1524_v50 = vrot.slane %v1968_v16, 9 }
  0x57   :  { %v433_v14 = vrot.slane %v419_v32, %v1920_v5  ;;  %v2323_v28 = vcombine.low %v409_v30, %v416_v45  ;;  %v710_v39 = vcombine.low %v634_v52, %v638_v26  ;;  %v645_v53 = vrot.slane %v2096_v27, 7 }
  0x58   :  { %361 = vrot.lane.b32.xlu0 %v2307_v11, %s1866_s26  ;;  %v2321_v57 = vrot.slane %v669_v44, %v1920_v5  ;;  %v2328_v31 = vsel %vm2124_vm13, %v1525_v35, %v649_v46  ;;  %v2332_v16 = vrot.slane %v2300_v62, %v1920_v5  ;;  %v693_v0 = vcombine.low %v2165_v36, %v2182_v2 }
  0x59   :  { %v711_v61 = vcombine.low %v642_v49, %v2328_v31  ;;  %v2341_v27 = vsel %vm2124_vm13, %v1524_v50, %v645_v53  ;;  %1719 = vmatpush3.bf16.msra.mxu1 %v1797_v17  ;;  %v2345_v51 = vcombine.low %v426_v63, %v433_v14  ;;  %v718_v1 = vrot.slane %v710_v39, %v1920_v5 }
  0x5a   :  { %v684_v59 = vcombine.low %v676_v18, %v2321_v57  ;;  %v694_v24 = vcombine.low %v2189_v40, %v2341_v27  ;;  %v909_v2 = vrot.slane %v53_v58, %v1920_v5  ;;  %v912_v12 = vshrl.u32 %v2332_v16, 16  ;;  %1744 = vmatprep.subr.bf16.mxu1 %v2352_v42 }
  0x5b   :  { %v725_v36 = vrot.slane %v711_v61, %v1920_v5  ;;  %v292_v40 = vcombine.low %v1930_v7, %v1935_v8  ;;  %v902_v52 = vcombine.high %v2332_v16, %v2332_v16  ;;  %v701_v29 = vrot.slane %v693_v0, %v1920_v5 }
  0x5c   :  { %687 = vrot.lane.b32.xlu1 %v684_v59, %s1866_s26  ;;  %435 = vrot.lane.b32.xlu0 %v2323_v28, %s1867_s19  ;;  %v309_v60 = vcombine.low %v1981_v20, %v1986_v21  ;;  %v914_v23 = vrot.slane %v912_v12, 6  ;;  %v915_v25 = vshll.u32 %v2332_v16, 16  ;;  %v708_v30 = vrot.slane %v694_v24, %v1920_v5 }
  0x5d   :  { %v952_v48 = vcombine.low %v1991_v22, %v53_v58  ;;  %v921_v26 = vshll.u32 %v902_v52, 16  ;;  %v910_v45 = vcombine.high %v909_v2, %v909_v2  ;;  %v726_v7 = vcombine.low %v718_v1, %v725_v36 }
  0x5e   :  { %v917_v8 = vrot.slane %v915_v25, 7  ;;  %v926_v32 = vshrl.u32 %v909_v2, 16  ;;  %v929_v49 = vshll.u32 %v909_v2, 16  ;;  %v2377_v20 = vrot.slane %v292_v40, %v1920_v5 }
  0x5f   :  { %v935_v21 = vshll.u32 %v910_v45, 16  ;;  %v923_v18 = vrot.slane %v921_v26, 7  ;;  %v943_v63 = vcombine.low %v1940_v9, %v2300_v62  ;;  %v2382_v14 = vrot.slane %v309_v60, %v1920_v5 }
  0x60   :  { %691 = vrot.lane.b32.xlu1 %v2345_v51, %s1865_s11  ;;  %437 = vrot.lane.b32.xlu0 %v2345_v51, %s1867_s19  ;;  %v918_v44 = vor.u32 %v917_v8, %v914_v23  ;;  %v928_v35 = vrot.slane %v926_v32, 6  ;;  %v931_v22 = vrot.slane %v929_v49, 7  ;;  %v959_v46 = vrot.slane %v952_v48, %v1920_v5 }
  0x61   :  { %v299_v50 = vrot.slane %v291_v19, %v1920_v5  ;;  %v709_v17 = vcombine.low %v701_v29, %v708_v30  ;;  %v308_v9 = vcombine.low %v2131_v56, %v1964_v15  ;;  %v937_v62 = vrot.slane %v935_v21, 7  ;;  %v1796_v21 = vld [vmem:[%s2704_s1 + $0x88] sm:$0xff]  }
  0x62   :  { %v919_v39 = vrot.slane %v918_v44, 2  ;;  %v932_v53 = vor.u32 %v931_v22, %v928_v35  ;;  %v950_v13 = vrot.slane %v943_v63, %v1920_v5  ;;  %v960_v19 = vcombine.low %v2382_v14, %v959_v46  ;;  %v1798_v22 = vld [vmem:[%s2704_s1 + $0x90] sm:$0xff]  }
  0x63   :  { %v307_v58 = vcombine.low %v299_v50, %v2377_v20  ;;  %v316_v6 = vrot.slane %v308_v9, %v1920_v5  ;;  %v1575_v0 = vrot.slane %v909_v2, 9  ;;  %v1155_v24 = vrot.slane %v910_v45, 7 }
  0x64   :  { %729 = vrot.lane.b32.xlu1 %v726_v7, %s1867_s19  ;;  %689 = vrot.lane.b32.xlu0 %v2323_v28, %s1865_s11  ;;  %v924_v59 = vsel %vm2089_vm11, %v919_v39, %v923_v18  ;;  %v933_v61 = vrot.slane %v932_v53, 2  ;;  %v951_v36 = vcombine.low %v2377_v20, %v950_v13  ;;  %v1151_v29 = vrot.slane %v902_v52, 7  ;;  %v1801_v53 = vld [vmem:[%s2704_s1 + $0xc8] sm:$0xff]   ;;  %v1805_v13 = vld [vmem:[%s2704_s1 + $0xd8] sm:$0xff]  }
  0x65   :  { %v965_v15 = vcombine.low %v2175_v10, %v924_v59  ;;  %v324_v1 = vcombine.low %v316_v6, %v2382_v14  ;;  %v1574_v10 = vrot.slane %v2332_v16, 9  ;;  %v1156_v4 = vsel %vm2124_vm13, %v1575_v0, %v1155_v24  ;;  %v1807_v24 = vld [vmem:[%s2704_s1 + $0xe0] sm:$0xff]  }
  0x66   :  { %v938_v56 = vsel %vm2089_vm11, %v933_v61, %v937_v62  ;;  %v1174_v23 = vcombine.low %v2328_v31, %v1156_v4  ;;  %vm446_vm15 = vcmask 523264   ;;  %vm451_vm0 = vcmask 785408   ;;  %v1802_v62 = vld [vmem:[%s2704_s1 + $0xa0] sm:$0xff]  }
  0x67   :  { %v972_v12 = vrot.slane %v965_v15, %v1920_v5  ;;  %v974_v40 = vcombine.low %v2286_v33, %v938_v56  ;;  %v1152_v25 = vsel %vm2124_vm13, %v1574_v10, %v1151_v29  ;;  %vm571_vm1 = vcmask 130048  }
  0x68   :  { %727 = vrot.lane.b32.xlu0 %v709_v17, %s1867_s19  ;;  %941 = vrot.lane.b32.xlu1 %v2345_v51, %s1866_s26  ;;  %v1165_v16 = vcombine.low %v2341_v27, %v1152_v25  ;;  %v1181_v52 = vrot.slane %v1174_v23, %v1920_v5  ;;  %vm1398_vm2 = vcmask 125952  }
  0x69   :  { %v973_v2 = vcombine.low %v2178_v34, %v972_v12  ;;  %v981_v60 = vrot.slane %v974_v40, %v1920_v5  ;;  %v1809_v12 = vld [vmem:[%s2704_s1 + $0xe8] sm:$0xff]  }
  0x6a   :  { %v1172_v34 = vrot.slane %v1165_v16, %v1920_v5  ;;  %v1182_v31 = vcombine.low %v2321_v57, %v1181_v52 }
  0x6b   :  { %v982_v33 = vcombine.low %v2289_v38, %v981_v60 }
  0x6c   :  { %939 = vrot.lane.b32.xlu0 %v2323_v28, %s1866_s26  ;;  %963 = vrot.lane.b32.xlu1 %v960_v19, %s1865_s11  ;;  %v1173_v54 = vcombine.low %v2219_v55, %v1172_v34 }
  0x70   :  { %961 = vrot.lane.b32.xlu0 %v951_v36, %s1865_s11  ;;  %1157 = vrot.lane.b32.xlu1 %v709_v17, %s1866_s26  ;;  %v1808_v36 = vld [vmem:[%s2704_s1 + $0xb8] sm:$0xff]  }
  0x74   :  { %983 = vrot.lane.b32.xlu0 %v973_v2, %s1867_s19  ;;  %1159 = vrot.lane.b32.xlu1 %v726_v7, %s1866_s26 }
  0x78   :  { %985 = vrot.lane.b32.xlu0 %v982_v33, %s1867_s19  ;;  %1163 = vrot.lane.b32.xlu1 %v982_v33, %s1865_s11 }
  0x7c   :  { %1161 = vrot.lane.b32.xlu0 %v973_v2, %s1865_s11  ;;  %1185 = vrot.lane.b32.xlu1 %v1182_v31, %s1867_s19  ;;  %v1810_v2 = vld [vmem:[%s2704_s1 + $0xf0] sm:$0xff]  }
  0x80   :  { %1183 = vrot.lane.b32.xlu0 %v1173_v54, %s1867_s19 }
  0xa5   :  { %v398_v38 = vpop.permute.xlu1 %397 }
  0xa9   :  { %v400_v27 = vpop.permute.xlu1 %399 }
  0xb7   :  { %v360_v30 = vpop.permute.xlu0 %359 }
  0xb8   :  { %v442_v45 = vsel %vm439_vm14, %v307_v58, %v360_v30  ;;  %v1803_v58 = vld [vmem:[%s2704_s1 + $0xd0] sm:$0xff]  }
  0xb9   :  { %v448_v7 = vsel %vm446_vm15, %v442_v45, %v398_v38 }
  0xbb   :  { %v686_v48 = vpop.permute.xlu1 %685 }
  0xbc   :  { %v733_v14 = vsel %vm439_vm14, %v2200_v43, %v686_v48 }
  0xca   :  { %v362_v26 = vpop.permute.xlu0 %361 }
  0xcb   :  { %v445_v55 = vsel %vm439_vm14, %v324_v1, %v362_v26 }
  0xcc   :  { %v450_v20 = vsel %vm446_vm15, %v445_v55, %v400_v27 }
  0xce   :  { %v688_v5 = vpop.permute.xlu1 %687  ;;  %v436_v57 = vpop.permute.xlu0 %435 }
  0xcf   :  { %v453_v8 = vsel %vm451_vm0, %v448_v7, %v436_v57  ;;  %v736_v18 = vsel %vm439_vm14, %v2307_v11, %v688_v5 }
  0xd0   :  { %1700 = vmatprep.mubr.bf16.mxu0 %v453_v8 }
  0xd2   :  { %v692_v32 = vpop.permute.xlu1 %691  ;;  %v438_v49 = vpop.permute.xlu0 %437 }
  0xd3   :  { %v456_v44 = vsel %vm451_vm0, %v450_v20, %v438_v49  ;;  %v740_v46 = vsel %vm446_vm15, %v736_v18, %v692_v32 }
  0xd4   :  { %1701 = vmatmul.mubr.bf16.vlgmr.msra.gmra.mrb[0].mxu0 %v456_v44 }
  0xd5   :  { %1725 = vmatpush3.bf16.msra.mxu0 %v2273_v41  ;;  %v1800_v41 = vld [vmem:[%s2704_s1 + $0x98] sm:$0xff]  }
  0xd6   :  { %v690_v35 = vpop.permute.xlu0 %689  ;;  %1726 = vmatprep.subr.bf16.mxu0 %v1796_v21  ;;  %v730_v63 = vpop.permute.xlu1 %729 }
  0xd7   :  { %v738_v50 = vsel %vm446_vm15, %v733_v14, %v690_v35  ;;  %v745_v43 = vsel %vm451_vm0, %v740_v46, %v730_v63 }
  0xd9   :  { %1727 = vmatpush3.bf16.msra.mxu0 %v1796_v21 }
  0xda   :  { %v728_v17 = vpop.permute.xlu0 %727  ;;  %1728 = vmatprep.subr.bf16.mxu0 %v1798_v22  ;;  %v942_v39 = vpop.permute.xlu1 %941 }
  0xdb   :  { %v742_v11 = vsel %vm451_vm0, %v738_v50, %v728_v17  ;;  %v992_v29 = vsel %vm439_vm14, %v2057_v47, %v942_v39 }
  0xdc   :  { %1720 = vmatprep.mubr.bf16.mxu1 %v742_v11 }
  0xdd   :  { %1729 = vmatpush3.bf16.msra.mxu0 %v1798_v22  ;;  %1721 = vmatmul.mubr.bf16.vlgmr.msra.gmra.mrb[0].mxu1 %v745_v43 }
  0xde   :  { %1745 = vmatpush3.bf16.msra.mxu1 %v2352_v42  ;;  %v940_v9 = vpop.permute.xlu0 %939  ;;  %1730 = vmatprep.subr.bf16.mxu0 %v1800_v41  ;;  %v964_v61 = vpop.permute.xlu1 %963  ;;  %v1804_v42 = vld [vmem:[%s2704_s1 + $0xa8] sm:$0xff]  }
  0xdf   :  { %1746 = vmatprep.subr.bf16.mxu1 %v1801_v53  ;;  %v989_v59 = vsel %vm439_vm14, %v2040_v37, %v940_v9  ;;  %v1806_v37 = vld [vmem:[%s2704_s1 + $0xb0] sm:$0xff]   ;;  %v996_v60 = vsel %vm446_vm15, %v992_v29, %v964_v61 }
  0xe1   :  { %1731 = vmatpush3.bf16.msra.mxu0 %v1800_v41 }
  0xe2   :  { %1747 = vmatpush3.bf16.msra.mxu1 %v1801_v53  ;;  %v962_v6 = vpop.permute.xlu0 %961  ;;  %1732 = vmatprep.subr.bf16.mxu0 %v1802_v62  ;;  %v1158_v56 = vpop.permute.xlu1 %1157 }
  0xe3   :  { %1748 = vmatprep.subr.bf16.mxu1 %v1803_v58  ;;  %v994_v19 = vsel %vm446_vm15, %v989_v59, %v962_v6  ;;  %v1189_v4 = vsel %vm439_vm14, %v2323_v28, %v1158_v56  ;;  %v1811_v28 = vld [vmem:[%s2704_s1 + $0xf8] sm:$0xff]  }
  0xe5   :  { %1733 = vmatpush3.bf16.msra.mxu0 %v1802_v62 }
  0xe6   :  { %1749 = vmatpush3.bf16.msra.mxu1 %v1803_v58  ;;  %v984_v15 = vpop.permute.xlu0 %983  ;;  %1734 = vmatprep.subr.bf16.mxu0 %v1804_v42  ;;  %v1160_v40 = vpop.permute.xlu1 %1159 }
  0xe7   :  { %1750 = vmatprep.subr.bf16.mxu1 %v1805_v13  ;;  %v998_v0 = vsel %vm451_vm0, %v994_v19, %v984_v15  ;;  %v1192_v52 = vsel %vm439_vm14, %v2345_v51, %v1160_v40 }
  0xe8   :  { %1740 = vmatprep.mubr.bf16.mxu0 %v998_v0 }
  0xe9   :  { %1735 = vmatpush3.bf16.msra.mxu0 %v1804_v42 }
  0xea   :  { %1751 = vmatpush3.bf16.msra.mxu1 %v1805_v13  ;;  %v986_v1 = vpop.permute.xlu0 %985  ;;  %1736 = vmatprep.subr.bf16.mxu0 %v1806_v37  ;;  %v1164_v16 = vpop.permute.xlu1 %1163 }
  0xeb   :  { %1752 = vmatprep.subr.bf16.mxu1 %v1807_v24  ;;  %v1001_v33 = vsel %vm451_vm0, %v996_v60, %v986_v1  ;;  %v1196_v34 = vsel %vm446_vm15, %v1192_v52, %v1164_v16 }
  0xed   :  { %1737 = vmatpush3.bf16.msra.mxu0 %v1806_v37 }
  0xee   :  { %1753 = vmatpush3.bf16.msra.mxu1 %v1807_v24  ;;  %v1162_v10 = vpop.permute.xlu0 %1161  ;;  %1738 = vmatprep.subr.bf16.mxu0 %v1808_v36  ;;  %v1186_v31 = vpop.permute.xlu1 %1185 }
  0xef   :  { %1754 = vmatprep.subr.bf16.mxu1 %v1809_v12  ;;  %v1194_v23 = vsel %vm446_vm15, %v1189_v4, %v1162_v10  ;;  %v1201_v54 = vsel %vm451_vm0, %v1196_v34, %v1186_v31 }
  0xf1   :  { %1739 = vmatpush3.bf16.msra.mxu0 %v1808_v36 }
  0xf2   :  { %1755 = vmatpush3.bf16.msra.mxu1 %v1809_v12  ;;  %v1184_v25 = vpop.permute.xlu0 %1183 }
  0xf3   :  { %1756 = vmatprep.subr.bf16.mxu1 %v1810_v2  ;;  %v1198_v47 = vsel %vm451_vm0, %v1194_v23, %v1184_v25 }
  0xf4   :  { %1741 = vmatmul.mubr.bf16.vlgmr.msra.gmra.mrb[4].mxu0 %v1001_v33  ;;  %1760 = vmatprep.mubr.bf16.mxu1 %v1198_v47 }
  0xf6   :  { %1757 = vmatpush3.bf16.msra.mxu1 %v1810_v2 }
  0xf7   :  { %1758 = vmatprep.subr.bf16.mxu1 %v1811_v28 }
  0xfa   :  { %1759 = vmatpush3.bf16.msra.mxu1 %v1811_v28 }
  0xfd   :  { %1761 = vmatmul.mubr.bf16.vlgmr.msra.gmra.mrb[4].mxu1 %v1201_v54 }
 0x1a7   :  { %v2510_v38 = vpop.f32.mrb[0].mxu0 }
 0x1a8   :  { %v2512_v27 = vpop.f32.mrb[1].mxu0  ;;  %v588_v26 = vmul.f32 %v2510_v38, %v2510_v38  ;;  %v575_v55 = vsel %vm571_vm1, %v2510_v38, 0.0 }
 0x1a9   :  { %v586_v30 = vmul.f32 %v2512_v27, %v2512_v27  ;;  %v2516_v48 = vpop.f32.mrb[2].mxu0  ;;  %v572_v45 = vsel %vm571_vm1, %v2512_v27, 0.0 }
 0x1aa   :  { %v2518_v51 = vpop.f32.mrb[3].mxu0  ;;  %v589_v32 = vmul.f32 %v2516_v48, %v2516_v48  ;;  %v593_v44 = vsel %vm571_vm1, %v588_v26, 0.0  ;;  %v577_v18 = vsel %vm571_vm1, %v2516_v48, 0.0 }
 0x1ab   :  { %v573_v5 = vsel %vm571_vm1, %v2518_v51, 0.0  ;;  %v587_v57 = vmul.f32 %v2518_v51, %v2518_v51  ;;  %v590_v8 = vsel %vm571_vm1, %v586_v30, 0.0 }
 0x1ac   :  { %v574_v7 = vadd.f32 %v573_v5, %v572_v45  ;;  %v595_v14 = vsel %vm571_vm1, %v589_v32, 0.0 }
 0x1ad   :  { %v591_v49 = vsel %vm571_vm1, %v587_v57, 0.0 }
 0x1ae   :  { %v576_v20 = vadd.f32 %v575_v55, %v574_v7  ;;  %v592_v21 = vadd.f32 %v591_v49, %v590_v8 }
 0x1b0   :  { %v578_v35 = vadd.f32 %v577_v18, %v576_v20  ;;  %v594_v22 = vadd.f32 %v593_v44, %v592_v21  ;;  %v2537_v63 = vpop.f32.mrb[0].mxu1 }
 0x1b1   :  { %v2540_v46 = vpop.f32.mrb[1].mxu1  ;;  %v877_v58 = vmul.f32 %v2537_v63, %v2537_v63  ;;  %v864_v6 = vsel %vm571_vm1, %v2537_v63, 0.0 }
 0x1b2   :  { %v579_v50 = vrot.slane %v578_v35, 4  ;;  %v596_v17 = vadd.f32 %v595_v14, %v594_v22  ;;  %v2542_v41 = vpop.f32.mrb[2].mxu1  ;;  %v875_v11 = vmul.f32 %v2540_v46, %v2540_v46  ;;  %v861_v43 = vsel %vm571_vm1, %v2540_v46, 0.0 }
 0x1b3   :  { %v2546_v39 = vpop.f32.mrb[3].mxu1  ;;  %v878_v13 = vmul.f32 %v2542_v41, %v2542_v41  ;;  %v866_v56 = vsel %vm571_vm1, %v2542_v41, 0.0  ;;  %v882_v1 = vsel %vm571_vm1, %v877_v58, 0.0 }
 0x1b4   :  { %v597_v53 = vrot.slane %v596_v17, 4  ;;  %v862_v9 = vsel %vm571_vm1, %v2546_v39, 0.0  ;;  %v580_v62 = vadd.f32 %v579_v50, %v578_v35  ;;  %v876_v61 = vmul.f32 %v2546_v39, %v2546_v39 }
 0x1b5   :  { %v863_v59 = vadd.f32 %v862_v9, %v861_v43  ;;  %v879_v42 = vsel %vm571_vm1, %v875_v11, 0.0  ;;  %v884_v40 = vsel %vm571_vm1, %v878_v13, 0.0 }
 0x1b6   :  { %v880_v15 = vsel %vm571_vm1, %v876_v61, 0.0  ;;  %v598_v37 = vadd.f32 %v597_v53, %v596_v17  ;;  %v581_v24 = vrot.slane %v580_v62, 2 }
 0x1b7   :  { %v865_v19 = vadd.f32 %v864_v6, %v863_v59  ;;  %v881_v0 = vadd.f32 %v880_v15, %v879_v42 }
 0x1b8   :  { %v599_v29 = vrot.slane %v598_v37, 2  ;;  %v582_v2 = vadd.f32 %v581_v24, %v580_v62 }
 0x1b9   :  { %v867_v36 = vadd.f32 %v866_v56, %v865_v19  ;;  %v883_v12 = vadd.f32 %v882_v1, %v881_v0 }
 0x1ba   :  { %v600_v33 = vadd.f32 %v599_v29, %v598_v37  ;;  %v583_v47 = vrot.slane %v582_v2, 1 }
 0x1bb   :  { %v868_v10 = vrot.slane %v867_v36, 4  ;;  %v885_v4 = vadd.f32 %v884_v40, %v883_v12 }
 0x1bc   :  { %v601_v31 = vrot.slane %v600_v33, 1  ;;  %v584_v30 = vadd.f32 %v583_v47, %v582_v2 }
 0x1bd   :  { %v869_v60 = vadd.f32 %v868_v10, %v867_v36  ;;  %v886_v23 = vrot.slane %v885_v4, 4 }
 0x1be   :  { %v602_v7 = vadd.f32 %v601_v31, %v600_v33 }
 0x1bf   :  { %v870_v25 = vrot.slane %v869_v60, 2  ;;  %v887_v16 = vadd.f32 %v886_v23, %v885_v4 }
 0x1c1   :  { %v871_v28 = vadd.f32 %v870_v25, %v869_v60  ;;  %v888_v52 = vrot.slane %v887_v16, 2 }
 0x1c3   :  { %v872_v34 = vrot.slane %v871_v28, 1  ;;  %v889_v54 = vadd.f32 %v888_v52, %v887_v16 }
 0x1c5   :  { %v873_v26 = vadd.f32 %v872_v34, %v871_v28  ;;  %v890_v45 = vrot.slane %v889_v54, 1 }
 0x1c7   :  { %v874_v5 = vadd.f32 %v873_v26, %v584_v30  ;;  %v2566_v57 = vpop.f32.mrb[4].mxu0  ;;  %v891_v55 = vadd.f32 %v890_v45, %v889_v54 }
 0x1c8   :  { %v2568_v8 = vpop.f32.mrb[5].mxu0  ;;  %v1133_v44 = vmul.f32 %v2566_v57, %v2566_v57  ;;  %v1120_v50 = vsel %vm571_vm1, %v2566_v57, 0.0 }
 0x1c9   :  { %v1131_v32 = vmul.f32 %v2568_v8, %v2568_v8  ;;  %v2572_v49 = vpop.f32.mrb[6].mxu0  ;;  %v892_v20 = vadd.f32 %v891_v55, %v602_v7  ;;  %v1117_v18 = vsel %vm571_vm1, %v2568_v8, 0.0 }
 0x1ca   :  { %v2574_v21 = vpop.f32.mrb[7].mxu0  ;;  %v1134_v11 = vmul.f32 %v2572_v49, %v2572_v49  ;;  %v1138_v62 = vsel %vm571_vm1, %v1133_v44, 0.0  ;;  %v1122_v58 = vsel %vm571_vm1, %v2572_v49, 0.0 }
 0x1cb   :  { %v1118_v35 = vsel %vm571_vm1, %v2574_v21, 0.0  ;;  %v1132_v22 = vmul.f32 %v2574_v21, %v2574_v21  ;;  %v1135_v17 = vsel %vm571_vm1, %v1131_v32, 0.0 }
 0x1cc   :  { %v1119_v14 = vadd.f32 %v1118_v35, %v1117_v18  ;;  %v1140_v42 = vsel %vm571_vm1, %v1134_v11, 0.0 }
 0x1cd   :  { %v1136_v53 = vsel %vm571_vm1, %v1132_v22, 0.0 }
 0x1ce   :  { %v1121_v43 = vadd.f32 %v1120_v50, %v1119_v14  ;;  %v1137_v9 = vadd.f32 %v1136_v53, %v1135_v17 }
 0x1d0   :  { %v1123_v59 = vadd.f32 %v1122_v58, %v1121_v43  ;;  %v1139_v61 = vadd.f32 %v1138_v62, %v1137_v9  ;;  %v2593_v6 = vpop.f32.mrb[4].mxu1 }
 0x1d1   :  { %v2596_v13 = vpop.f32.mrb[5].mxu1  ;;  %v1333_v40 = vmul.f32 %v2593_v6, %v2593_v6  ;;  %v1320_v60 = vsel %vm571_vm1, %v2593_v6, 0.0 }
 0x1d2   :  { %v1124_v19 = vrot.slane %v1123_v59, 4  ;;  %v1141_v15 = vadd.f32 %v1140_v42, %v1139_v61  ;;  %v2598_v37 = vpop.f32.mrb[6].mxu1  ;;  %v1331_v56 = vmul.f32 %v2596_v13, %v2596_v13  ;;  %v1317_v36 = vsel %vm571_vm1, %v2596_v13, 0.0 }
 0x1d3   :  { %v2602_v0 = vpop.f32.mrb[7].mxu1  ;;  %v1334_v25 = vmul.f32 %v2598_v37, %v2598_v37  ;;  %v1322_v52 = vsel %vm571_vm1, %v2598_v37, 0.0  ;;  %v1338_v31 = vsel %vm571_vm1, %v1333_v40, 0.0  ;;  %v1362_v40 = vsub.s32 0, %v1917_v3 }
 0x1d4   :  { %v1125_v24 = vadd.f32 %v1124_v19, %v1123_v59  ;;  %v1142_v1 = vrot.slane %v1141_v15, 4  ;;  %v1318_v12 = vsel %vm571_vm1, %v2602_v0, 0.0  ;;  %v1332_v29 = vmul.f32 %v2602_v0, %v2602_v0 }
 0x1d5   :  { %v1319_v10 = vadd.f32 %v1318_v12, %v1317_v36  ;;  %v1335_v23 = vsel %vm571_vm1, %v1331_v56, 0.0  ;;  %v1340_v7 = vsel %vm571_vm1, %v1334_v25, 0.0 }
 0x1d6   :  { %v1126_v4 = vrot.slane %v1125_v24, 2  ;;  %v1143_v2 = vadd.f32 %v1142_v1, %v1141_v15  ;;  %v1336_v16 = vsel %vm571_vm1, %v1332_v29, 0.0  ;;  %v1357_v29 = vld [vmem:[#allocation4] sm:$0x1] }
 0x1d7   :  { %v1321_v33 = vadd.f32 %v1320_v60, %v1319_v10  ;;  %v1337_v34 = vadd.f32 %v1336_v16, %v1335_v23 }
 0x1d8   :  { %v1127_v47 = vadd.f32 %v1126_v4, %v1125_v24  ;;  %v1144_v28 = vrot.slane %v1143_v2, 2 }
 0x1d9   :  { %v1323_v54 = vadd.f32 %v1322_v52, %v1321_v33  ;;  %v1339_v45 = vadd.f32 %v1338_v31, %v1337_v34 }
 0x1da   :  { %v1128_v30 = vrot.slane %v1127_v47, 1  ;;  %v1145_v26 = vadd.f32 %v1144_v28, %v1143_v2 }
 0x1db   :  { %v1324_v55 = vrot.slane %v1323_v54, 4  ;;  %v1341_v18 = vadd.f32 %v1340_v7, %v1339_v45 }
 0x1dc   :  { %v1129_v32 = vadd.f32 %v1128_v30, %v1127_v47  ;;  %v1146_v44 = vrot.slane %v1145_v26, 1 }
 0x1dd   :  { %v1325_v35 = vadd.f32 %v1324_v55, %v1323_v54  ;;  %v1342_v50 = vrot.slane %v1341_v18, 4 }
 0x1de   :  { %v1130_v22 = vadd.f32 %v1129_v32, %v874_v5  ;;  %v1147_v14 = vadd.f32 %v1146_v44, %v1145_v26  ;;  %v1355_v5 = vld [vmem:[#allocation2] sm:$0x1] }
 0x1df   :  { %v1326_v17 = vrot.slane %v1325_v35, 2  ;;  %v1343_v53 = vadd.f32 %v1342_v50, %v1341_v18 }
 0x1e0   :  { %v1148_v11 = vadd.f32 %v1147_v14, %v892_v20 }
 0x1e1   :  { %v1327_v43 = vadd.f32 %v1326_v17, %v1325_v35  ;;  %v1344_v9 = vrot.slane %v1343_v53, 2 }
 0x1e3   :  { %v1328_v62 = vrot.slane %v1327_v43, 1  ;;  %v1345_v58 = vadd.f32 %v1344_v9, %v1343_v53 }
 0x1e5   :  { %v1329_v59 = vadd.f32 %v1328_v62, %v1327_v43  ;;  %v1346_v61 = vrot.slane %v1345_v58, 1 }
 0x1e7   :  { %v1330_v42 = vadd.f32 %v1329_v59, %v1130_v22  ;;  %v1347_v19 = vadd.f32 %v1346_v61, %v1345_v58 }
 0x1e9   :  { %v1349_v15 = vmul.f32 0.0078125, %v1330_v42  ;;  %v1348_v56 = vadd.f32 %v1347_v19, %v1148_v11 }
 0x1eb   :  { %v1351_v24 = vmul.f32 %v1349_v15, %v1349_v15  ;;  %v1350_v1 = vmul.f32 0.0078125, %v1348_v56 }
 0x1ed   :  { %v1352_v36 = vsub.f32 %v1350_v1, %v1351_v24 }
 0x1ef   :  { %v1353_v12 = vadd.f32 1e-05, %v1352_v36 }
 0x1f1   :  { %1812 = vrsqrt.f32 %v1353_v12 }
 0x1fb   :  { %v1813_v20 = vpop.eup %1812 }
 0x1fc   :  { %v1356_v10 = vmul.f32 %v1813_v20, %v1355_v5 }
 0x1fe   :  { %v1358_v4 = vmul.f32 %v1356_v10, %v1349_v15  ;;  %v1363_v2 = vrot.slane %v1356_v10, %v1362_v40 }
 0x200   :  { %v1359_v60 = vsub.f32 %v1357_v29, %v1358_v4  ;;  %v1364_v23 = vmul.f32 %v1363_v2, %v2512_v27  ;;  %v1365_v25 = vmul.f32 %v1363_v2, %v2518_v51  ;;  %v1366_v33 = vmul.f32 %v2510_v38, %v1363_v2 }
 0x201   :  { %v1367_v16 = vmul.f32 %v2516_v48, %v1363_v2  ;;  %v1403_v47 = vmul.f32 %v1363_v2, %v2540_v46  ;;  %v1404_v28 = vmul.f32 %v1363_v2, %v2546_v39  ;;  %v1405_v3 = vmul.f32 %v2537_v63, %v1363_v2 }
 0x202   :  { %v1372_v52 = vrot.slane %v1359_v60, %v1362_v40  ;;  %v1406_v34 = vmul.f32 %v2542_v41, %v1363_v2  ;;  %v1436_v31 = vmul.f32 %v1363_v2, %v2568_v8  ;;  %v1437_v54 = vmul.f32 %v1363_v2, %v2574_v21 }
 0x203   :  { %v1438_v27 = vmul.f32 %v2566_v57, %v1363_v2  ;;  %v1439_v51 = vmul.f32 %v2572_v49, %v1363_v2  ;;  %v1469_v38 = vmul.f32 %v1363_v2, %v2596_v13  ;;  %v1470_v48 = vmul.f32 %v1363_v2, %v2602_v0 }
 0x204   :  { %v1374_v46 = vadd.f32 %v1372_v52, %v1364_v23  ;;  %v1375_v30 = vadd.f32 %v1372_v52, %v1365_v25  ;;  %v1376_v39 = vadd.f32 %v1372_v52, %v1366_v33  ;;  %v1377_v26 = vadd.f32 %v1372_v52, %v1367_v16 }
 0x205   :  { %v1407_v63 = vadd.f32 %v1403_v47, %v1372_v52  ;;  %v1408_v45 = vadd.f32 %v1404_v28, %v1372_v52  ;;  %v1409_v7 = vadd.f32 %v1405_v3, %v1372_v52  ;;  %v1410_v41 = vadd.f32 %v1406_v34, %v1372_v52 }
 0x206   :  { %v1378_v55 = vmax.f32 %v1374_v46, 0.0  ;;  %v1379_v8 = vmax.f32 %v1375_v30, 0.0  ;;  %v1380_v32 = vmax.f32 %v1376_v39, 0.0  ;;  %v1381_v21 = vmax.f32 %v1377_v26, 0.0 }
 0x207   :  { %v1411_v44 = vmax.f32 %v1407_v63, 0.0  ;;  %v1412_v57 = vmax.f32 %v1408_v45, 0.0  ;;  %v1413_v18 = vmax.f32 %v1409_v7, 0.0  ;;  %v1414_v49 = vmax.f32 %v1410_v41, 0.0 }
 0x208   :  { %v1628_v35 = vpack.c.bf16 %v1378_v55, %v1378_v55  ;;  %v1629_v13 = vpack.c.bf16 %v1379_v8, %v1379_v8  ;;  %v1630_v22 = vpack.c.bf16 %v1380_v32, %v1380_v32  ;;  %v1631_v0 = vpack.c.bf16 %v1381_v21, %v1381_v21 }
 0x209   :  { %v1632_v14 = vpack.c.bf16 %v1411_v44, %v1411_v44  ;;  %v1633_v50 = vpack.c.bf16 %v1412_v57, %v1412_v57  ;;  %v1634_v17 = vpack.c.bf16 %v1413_v18, %v1413_v18  ;;  %v1635_v11 = vpack.c.bf16 %v1414_v49, %v1414_v49 }
 0x20a   :  { %1399 = vst.msk [vmem:[%s2707_s4] sm:$0xf] %vm1398_vm2, %v1628_v35  ;;  %1400 = vst.msk [vmem:[%s2707_s4 + $0x4] sm:$0xf] %vm1398_vm2, %v1629_v13  ;;  %v1440_v53 = vadd.f32 %v1436_v31, %v1372_v52  ;;  %v1441_v43 = vadd.f32 %v1437_v54, %v1372_v52  ;;  %v1442_v9 = vadd.f32 %v1438_v27, %v1372_v52 }
 0x20b   :  { %1401 = vst.msk [vmem:[%s2707_s4 + $0x8] sm:$0xf] %vm1398_vm2, %v1630_v22  ;;  %1402 = vst.msk [vmem:[%s2707_s4 + $0xc] sm:$0xf] %vm1398_vm2, %v1631_v0  ;;  %v1443_v62 = vadd.f32 %v1439_v51, %v1372_v52  ;;  %v1471_v58 = vmul.f32 %v2593_v6, %v1363_v2  ;;  %v1472_v59 = vmul.f32 %v2598_v37, %v1363_v2 }
 0x20c   :  { %1608 = vst.msk [vmem:[%s2707_s4 + $0x10] sm:$0xf] %vm1398_vm2, %v1632_v14  ;;  %1609 = vst.msk [vmem:[%s2707_s4 + $0x14] sm:$0xf] %vm1398_vm2, %v1633_v50  ;;  %v1473_v61 = vadd.f32 %v1469_v38, %v1372_v52  ;;  %v1474_v42 = vadd.f32 %v1470_v48, %v1372_v52  ;;  %v1444_v19 = vmax.f32 %v1440_v53, 0.0  ;;  %v1445_v15 = vmax.f32 %v1441_v43, 0.0 }
 0x20d   :  { %1610 = vst.msk [vmem:[%s2707_s4 + $0x18] sm:$0xf] %vm1398_vm2, %v1634_v17  ;;  %1611 = vst.msk [vmem:[%s2707_s4 + $0x1c] sm:$0xf] %vm1398_vm2, %v1635_v11  ;;  %v1446_v56 = vmax.f32 %v1442_v9, 0.0  ;;  %v1447_v24 = vmax.f32 %v1443_v62, 0.0  ;;  %v1475_v1 = vadd.f32 %v1471_v58, %v1372_v52  ;;  %v1476_v36 = vadd.f32 %v1472_v59, %v1372_v52 }
 0x20e   :  { %v1477_v12 = vmax.f32 %v1473_v61, 0.0  ;;  %v1478_v5 = vmax.f32 %v1474_v42, 0.0  ;;  %v1636_v40 = vpack.c.bf16 %v1444_v19, %v1444_v19  ;;  %v1637_v20 = vpack.c.bf16 %v1445_v15, %v1445_v15 }
 0x20f   :  { %v1638_v10 = vpack.c.bf16 %v1446_v56, %v1446_v56  ;;  %v1639_v29 = vpack.c.bf16 %v1447_v24, %v1447_v24  ;;  %v1479_v4 = vmax.f32 %v1475_v1, 0.0  ;;  %v1480_v60 = vmax.f32 %v1476_v36, 0.0 }
 0x210   :  { %v1640_v23 = vpack.c.bf16 %v1477_v12, %v1477_v12  ;;  %v1641_v6 = vpack.c.bf16 %v1478_v5, %v1478_v5  ;;  %1616 = vst.msk [vmem:[%s2707_s4 + $0x20] sm:$0xf] %vm1398_vm2, %v1636_v40  ;;  %1617 = vst.msk [vmem:[%s2707_s4 + $0x24] sm:$0xf] %vm1398_vm2, %v1637_v20 }
 0x211   :  { %1618 = vst.msk [vmem:[%s2707_s4 + $0x28] sm:$0xf] %vm1398_vm2, %v1638_v10  ;;  %1619 = vst.msk [vmem:[%s2707_s4 + $0x2c] sm:$0xf] %vm1398_vm2, %v1639_v29  ;;  %v1642_v37 = vpack.c.bf16 %v1479_v4, %v1479_v4  ;;  %v1643_v2 = vpack.c.bf16 %v1480_v60, %v1480_v60 }
 0x212   :  { %1624 = vst.msk [vmem:[%s2707_s4 + $0x30] sm:$0xf] %vm1398_vm2, %v1640_v23  ;;  %1625 = vst.msk [vmem:[%s2707_s4 + $0x34] sm:$0xf] %vm1398_vm2, %v1641_v6 }
 0x213   :  { %1626 = vst.msk [vmem:[%s2707_s4 + $0x38] sm:$0xf] %vm1398_vm2, %v1642_v37  ;;  %1627 = vst.msk [vmem:[%s2707_s4 + $0x3c] sm:$0xf] %vm1398_vm2, %v1643_v2 }
 0x214   :  { %1506 = vsyncpa [#allocation3], 1 }
 0x215   :  { %1507 = vsyncpa [#allocation5], 1 }

// kernel: generator_forward.8
= control target key start
LH: loop header
LB: loop body
LE: loop exit
PB: predicated region body
PF: predicated region fallthrough
CT: control target
= control target key end

     0   :  { %9 = vsyncpa [#allocation3], 0  ;;  %s5000_s0 = inlined_call_operand.vmem [shape: bf16[2,10,10,16], index: 0, kind: input, shape index: {}]   ;;  %s5001_s1 = inlined_call_operand.vmem [shape: bf16[2,2,64,8], index: 1, kind: input, shape index: {}]   ;;  %s5002_s2 = inlined_call_operand.hbm [shape: f32[1,8], index: 2, kind: input, shape index: {}]   ;;  %s5003_s3 = inlined_call_operand.hbm [shape: f32[1,8], index: 3, kind: input, shape index: {}]   ;;  %s5004_s4 = inlined_call_operand.vmem [shape: bf16[2,2,128,8], index: 4, kind: output, shape index: {}]  }
   0x1   :  { %10 = vsyncpa [#allocation5], 0  ;;  %s3072_s15 = smov [#allocation2]   ;;  %s3073_s17 = smov [#allocation4]  }
   0x2   :  { %s21_s16 = sshll.u32 %s3072_s15, 4  ;;  %s31_s18 = sshll.u32 %s3073_s17, 4  ;;  %s22_s16 = int_to_ptr.vmem [resolvable:$true] %s21_s16  ;;  %s32_s18 = int_to_ptr.vmem [resolvable:$true] %s31_s18 }
   0x3   :  { %s3024_s21 = scalar_lea.hbm %s5002_s2, 16 }
   0x4   :  { %p3025_p0 = scmp.ne.s32.totalorder %s5002_s2, %s3024_s21  ;;  %p3028_p1 = scmp.lt.u32.totalorder %s3024_s21, %s5002_s2 }
   0x6   :  { %p3030_p2 = pnand %p3028_p1, %p3025_p0 }
   0x8   :  { %3033 = shalt.err (!%p3030_p2)
}
   0x9   :  { %s3034_s26 = scalar_lea.vmem %s22_s16, 16  ;;  %s3038_s27 = scalar_lea.vmem %s22_s16, 32 }
   0xa   :  { %p3035_p3 = scmp.ne.s32.totalorder %s22_s16, %s3034_s26  ;;  %p3039_p4 = scmp.lt.s32.totalorder %s22_s16, %s22_s16 }
   0xb   :  { %p3040_p5 = scmp.lt.s32.totalorder %s3038_s27, %s3034_s26 }
   0xd   :  { %p3041_p6 = por %p3040_p5, %p3039_p4 }
   0xf   :  { %p3042_p7 = pnand %p3041_p6, %p3035_p3 }
  0x11   :  { %3045 = shalt.err (!%p3042_p7)
}
  0x12   :  { %24 = dma.hbm_to_vmem [thread:$0]  %s5002_s2, 16, %s22_s16, [#allocation3]  }
  0x13   :  { %s3046_s6 = scalar_lea.hbm %s5003_s3, 16 }
  0x14   :  { %p3047_p8 = scmp.ne.s32.totalorder %s5003_s3, %s3046_s6  ;;  %p3050_p9 = scmp.lt.u32.totalorder %s3046_s6, %s5003_s3 }
  0x16   :  { %p3052_p10 = pnand %p3050_p9, %p3047_p8 }
  0x18   :  { %3055 = shalt.err (!%p3052_p10)
}
  0x19   :  { %s3056_s11 = scalar_lea.vmem %s32_s18, 16  ;;  %s3060_s12 = scalar_lea.vmem %s32_s18, 32 }
  0x1a   :  { %p3057_p11 = scmp.ne.s32.totalorder %s32_s18, %s3056_s11  ;;  %p3061_p12 = scmp.lt.s32.totalorder %s32_s18, %s32_s18 }
  0x1b   :  { %p3062_p13 = scmp.lt.s32.totalorder %s3060_s12, %s3056_s11 }
  0x1d   :  { %p3063_p0 = por %p3062_p13, %p3061_p12 }
  0x1f   :  { %p3064_p1 = pnand %p3063_p0, %p3057_p11 }
  0x21   :  { %3067 = shalt.err (!%p3064_p1)
}
  0x22   :  { %34 = dma.hbm_to_vmem [thread:$0]  %s5003_s3, 16, %s32_s18, [#allocation5]  }
  0x23   :  { %3068 = dma.done.wait [#allocation3], 16  }
  0x24   :  { %3069 = vsyncadd [#allocation3], 4294967280 }
  0x25   :  { %3070 = dma.done.wait [#allocation5], 16  }
  0x26   :  { %3071 = vsyncadd [#allocation5], 4294967280  ;;  %vm82_vm0 = vsmask.f32 3328  ;;  %vm83_vm1 = vsmask.f32 7440 }
  0x27   :  { %v3129_v0 = vld [vmem:[%s5000_s0 + $0x8] sm:$0xf]  ;;  %v3134_v1 = vld [vmem:[%s5000_s0 + $0x10] sm:$0xf]  ;;  %v3139_v2 = vld [vmem:[%s5000_s0 + $0x18] sm:$0xf] }
  0x28   :  { %v3143_v3 = vcombine.low %v3129_v0, %v3134_v1  ;;  %v3148_v4 = vld [vmem:[%s5000_s0 + $0x20] sm:$0xf]  ;;  %v43_v6 = vld [vmem:[%s5000_s0 + $0x4] sm:$0x1]  ;;  %v3160_v7 = vcombine.low %v3134_v1, %v3139_v2  ;;  %v45_v9 = vld [vmem:[%s5000_s0 + $0xc] sm:$0x1] }
  0x29   :  { %v3153_v5 = vld [vmem:[%s5000_s0] sm:$0xf]  ;;  %v3164_v8 = vcombine.low %v3139_v2, %v3148_v4  ;;  %vm785_vm2 = vcmask 1042432   ;;  %vm786_vm3 = vcmask 1046532   ;;  %s3074_s27 = smov 32   ;;  %v95_v13 = vshll.u32 %v43_v6, 16  ;;  %vm3199_vm4 = vmor %vm82_vm0, %vm83_vm1 }
  0x2a   :  { %5046 = vst [vmem:[#allocation8_spill] sm:$0xff] %v3143_v3  ;;  %429 = vrot.lane.b32.xlu1 %v3143_v3, %s3074_s27  ;;  %v86_v11 = vshrl.u32 %v3153_v5, 16  ;;  %v89_v12 = vshll.u32 %v3153_v5, 16  ;;  %v100_v14 = vshrl.u32 %v3129_v0, 16  ;;  %v3179_v15 = vld [vmem:[%s5000_s0 + $0x14] sm:$0x1]  ;;  %vm3207_vm5 = vmor %vm785_vm2, %vm786_vm3 }
  0x2b   :  { %5047 = vst [vmem:[#allocation9_spill] sm:$0xff] %v3164_v8  ;;  %v103_v16 = vshll.u32 %v3129_v0, 16  ;;  %v109_v17 = vshll.u32 %v45_v9, 16  ;;  %v114_v18 = vshrl.u32 %v3134_v1, 16  ;;  %v117_v19 = vshll.u32 %v3134_v1, 16  ;;  %v2998_v33 = vld [vmem:[%s5001_s1] sm:$0xff]  }
  0x2c   :  { %v3187_v20 = vld [vmem:[%s5000_s0 + $0x1c] sm:$0x1]  ;;  %v88_v21 = vrot.slane %v86_v11, 4  ;;  %v91_v22 = vrot.slane %v89_v12, 5  ;;  %v97_v23 = vrot.slane %v95_v13, 5  ;;  %v102_v24 = vrot.slane %v100_v14, 4  ;;  %2887 = vmatprep.subr.bf16.mxu0 %v2998_v33 }
  0x2d   :  { %v105_v25 = vrot.slane %v103_v16, 5  ;;  %v111_v26 = vrot.slane %v109_v17, 5  ;;  %v116_v27 = vrot.slane %v114_v18, 4  ;;  %v119_v28 = vrot.slane %v117_v19, 5  ;;  %2888 = vmatpush3.bf16.msra.mxu0 %v2998_v33  ;;  %v51_v56 = vld [vmem:[%s5000_s0 + $0x24] sm:$0x1] }
  0x2e   :  { %431 = vrot.lane.b32.xlu1 %v3164_v8, %s3074_s27  ;;  %v92_v29 = vor.u32 %v91_v22, %v88_v21  ;;  %v123_v30 = vshll.u32 %v3179_v15, 16  ;;  %v128_v31 = vshrl.u32 %v3139_v2, 16  ;;  %v131_v32 = vshll.u32 %v3139_v2, 16  ;;  %v3000_v57 = vld [vmem:[%s5001_s1 + $0x8] sm:$0xff]   ;;  %v3002_v62 = vld [vmem:[%s5001_s1 + $0x10] sm:$0xff]   ;;  %v3003_v12 = vld [vmem:[%s5001_s1 + $0x20] sm:$0xff]  }
  0x2f   :  { %v106_v35 = vor.u32 %v105_v25, %v102_v24  ;;  %v120_v36 = vor.u32 %v119_v28, %v116_v27  ;;  %v137_v37 = vshll.u32 %v3187_v20, 16  ;;  %v2561_v38 = vrot.slane %v3153_v5, 9  ;;  %v3245_v11 = vld [vmem:[%s5000_s0 + $0x30] sm:$0xf]  ;;  %2889 = vmatprep.subr.bf16.mxu0 %v3000_v57  ;;  %s3075_s17 = smov 16   ;;  %2911 = vmatprep.subr.bf16.mxu1 %v3003_v12  ;;  %v3006_v28 = vld [vmem:[%s5001_s1 + $0x28] sm:$0xff]  }
  0x30   :  { %v93_v39 = vrot.slane %v92_v29, 4  ;;  %v125_v40 = vrot.slane %v123_v30, 5  ;;  %v130_v41 = vrot.slane %v128_v31, 4  ;;  %v133_v42 = vrot.slane %v131_v32, 5  ;;  %v3259_v16 = vld [vmem:[%s5000_s0 + $0x34] sm:$0x1]  ;;  %2912 = vmatpush3.bf16.msra.mxu1 %v3003_v12 }
  0x31   :  { %v107_v44 = vrot.slane %v106_v35, 4  ;;  %v121_v45 = vrot.slane %v120_v36, 4  ;;  %v139_v46 = vrot.slane %v137_v37, 5  ;;  %v790_v47 = vrot.slane %v43_v6, 5  ;;  %2890 = vmatpush3.bf16.msra.mxu0 %v3000_v57  ;;  %v3274_v21 = vld [vmem:[%s5000_s0 + $0x38] sm:$0xf]  ;;  %2913 = vmatprep.subr.bf16.mxu1 %v3006_v28 }
  0x32   :  { %v98_v48 = vsel %vm3199_vm4, %v93_v39, %v97_v23  ;;  %v134_v49 = vor.u32 %v133_v42, %v130_v41  ;;  %v2562_v50 = vrot.slane %v3129_v0, 9  ;;  %v794_v51 = vrot.slane %v45_v9, 5  ;;  %v3279_v22 = vld [vmem:[%s5000_s0 + $0x3c] sm:$0x1]  ;;  %2891 = vmatprep.subr.bf16.mxu0 %v3002_v62  ;;  %v3007_v41 = vld [vmem:[%s5001_s1 + $0x30] sm:$0xff]   ;;  %s3076_s8 = smov 48  }
  0x33   :  { %v112_v52 = vsel %vm3199_vm4, %v107_v44, %v111_v26  ;;  %v126_v53 = vsel %vm3199_vm4, %v121_v45, %v125_v40  ;;  %v791_v54 = vsel %vm3207_vm5, %v2561_v38, %v790_v47  ;;  %v2563_v55 = vrot.slane %v3134_v1, 9  ;;  %v3004_v23 = vld [vmem:[%s5001_s1 + $0x18] sm:$0xff]   ;;  %v3303_v40 = vld [vmem:[%s5000_s0 + $0x28] sm:$0xf]  ;;  %v3559_v10 = vld [vmem:[%s5000_s0 + $0x84] sm:$0x1] }
  0x34   :  { %v135_v58 = vrot.slane %v134_v49, 4  ;;  %v3227_v59 = vcombine.low %v98_v48, %v112_v52  ;;  %v3229_v60 = vcombine.low %v112_v52, %v126_v53  ;;  %v3233_v61 = vsel %vm3207_vm5, %v2562_v50, %v794_v51  ;;  %2914 = vmatpush3.bf16.msra.mxu1 %v3006_v28  ;;  %v3360_v28 = vld [vmem:[%s5000_s0 + $0x60] sm:$0xf] }
  0x35   :  { %v2579_v63 = vcombine.low %v791_v54, %v3233_v61  ;;  %v798_v1 = vrot.slane %v3179_v15, 5  ;;  %v2564_v6 = vrot.slane %v3139_v2, 9  ;;  %v802_v9 = vrot.slane %v3187_v20, 5  ;;  %2892 = vmatpush3.bf16.msra.mxu0 %v3002_v62  ;;  %2915 = vmatprep.subr.bf16.mxu1 %v3007_v41  ;;  %v3751_v43 = vld [vmem:[%s5001_s1 + $0x40] sm:$0xff]  }
  0x36   :  { %v140_v13 = vsel %vm3199_vm4, %v135_v58, %v139_v46  ;;  %401 = vrot.lane.b32.xlu0 %v3227_v59, %s3075_s17  ;;  %v142_v2 = vshrl.u32 %v3148_v4, 16  ;;  %v145_v14 = vshll.u32 %v3148_v4, 16  ;;  %v151_v15 = vshll.u32 %v51_v56, 16  ;;  %2893 = vmatprep.subr.bf16.mxu0 %v3004_v23  ;;  %v53_v46 = vld [vmem:[%s5000_s0 + $0x2c] sm:$0x1] }
  0x37   :  { %v3261_v17 = vcombine.low %v126_v53, %v140_v13  ;;  %886 = vrot.lane.b32.xlu1 %v2579_v63, %s3075_s17  ;;  %v3266_v18 = vsel %vm3207_vm5, %v2563_v55, %v798_v1  ;;  %v803_v19 = vsel %vm3207_vm5, %v2564_v6, %v802_v9  ;;  %v2565_v20 = vrot.slane %v3148_v4, 9  ;;  %v3008_v55 = vld [vmem:[%s5001_s1 + $0x38] sm:$0xff]  }
  0x38   :  { %v3285_v24 = vcombine.low %v3266_v18, %v803_v19  ;;  %v144_v25 = vrot.slane %v142_v2, 4  ;;  %v147_v26 = vrot.slane %v145_v14, 5  ;;  %v153_v27 = vrot.slane %v151_v15, 5  ;;  %2916 = vmatpush3.bf16.msra.mxu1 %v3007_v41 }
  0x39   :  { %v806_v29 = vrot.slane %v51_v56, 5  ;;  %v170_v30 = vshrl.u32 %v3245_v11, 16  ;;  %v173_v31 = vshll.u32 %v3245_v11, 16  ;;  %v179_v32 = vshll.u32 %v3259_v16, 16  ;;  %2894 = vmatpush3.bf16.msra.mxu0 %v3004_v23  ;;  %2917 = vmatprep.subr.bf16.mxu1 %v3008_v55 }
  0x3a   :  { %403 = vrot.lane.b32.xlu0 %v3261_v17, %s3075_s17  ;;  %v148_v33 = vor.u32 %v147_v26, %v144_v25  ;;  %v184_v35 = vshrl.u32 %v3274_v21, 16  ;;  %v187_v36 = vshll.u32 %v3274_v21, 16  ;;  %v193_v37 = vshll.u32 %v3279_v22, 16  ;;  %2935 = vmatprep.subr.bf16.mxu0 %v3751_v43 }
  0x3b   :  { %888 = vrot.lane.b32.xlu1 %v3285_v24, %s3075_s17  ;;  %v172_v38 = vrot.slane %v170_v30, 4  ;;  %v175_v39 = vrot.slane %v173_v31, 5  ;;  %v3313_v47 = vsel %vm3207_vm5, %v2565_v20, %v806_v29  ;;  %v181_v49 = vrot.slane %v179_v32, 5  ;;  %v3365_v29 = vld [vmem:[%s5000_s0 + $0x68] sm:$0xf] }
  0x3c   :  { %v149_v42 = vrot.slane %v148_v33, 4  ;;  %v186_v44 = vrot.slane %v184_v35, 4  ;;  %v189_v45 = vrot.slane %v187_v36, 5  ;;  %v195_v50 = vrot.slane %v193_v37, 5  ;;  %2918 = vmatpush3.bf16.msra.mxu1 %v3008_v55 }
  0x3d   :  { %v176_v48 = vor.u32 %v175_v39, %v172_v38  ;;  %v156_v53 = vshrl.u32 %v3303_v40, 16  ;;  %v159_v54 = vshll.u32 %v3303_v40, 16  ;;  %v165_v58 = vshll.u32 %v53_v46, 16 }
  0x3e   :  { %455 = vrot.lane.b32.xlu0 %v3229_v60, %s3076_s8  ;;  %v154_v51 = vsel %vm3199_vm4, %v149_v42, %v153_v27  ;;  %v190_v52 = vor.u32 %v189_v45, %v186_v44  ;;  %v3329_v6 = vcombine.low %v803_v19, %v3313_v47  ;;  %v2566_v15 = vrot.slane %v3303_v40, 9  ;;  %v3348_v19 = vld [vmem:[%s5000_s0 + $0x44] sm:$0x1] }
  0x3f   :  { %v3324_v56 = vcombine.low %v140_v13, %v154_v51  ;;  %v177_v57 = vrot.slane %v176_v48, 4  ;;  %v158_v63 = vrot.slane %v156_v53, 4  ;;  %v161_v1 = vrot.slane %v159_v54, 5  ;;  %v3342_v13 = vld [vmem:[%s5000_s0 + $0x40] sm:$0xf] }
  0x40   :  { %v191_v62 = vrot.slane %v190_v52, 4  ;;  %v167_v14 = vrot.slane %v165_v58, 5  ;;  %v810_v23 = vrot.slane %v53_v46, 5  ;;  %v310_v25 = vshrl.u32 %v3342_v13, 16  ;;  %v3401_v48 = vld [vmem:[%s5000_s0 + $0x50] sm:$0xf] }
  0x41   :  { %904 = vrot.lane.b32.xlu1 %v3324_v56, %s3074_s27  ;;  %v182_v9 = vsel %vm3199_vm4, %v177_v57, %v181_v49  ;;  %v162_v2 = vor.u32 %v161_v1, %v158_v63  ;;  %v313_v26 = vshll.u32 %v3342_v13, 16  ;;  %v3371_v30 = vcombine.low %v3233_v61, %v3266_v18  ;;  %5053 = vst [vmem:[#allocation11_spill] sm:$0xff] %v3401_v48  ;;  %v3419_v53 = vld [vmem:[%s5000_s0 + $0x64] sm:$0x1]  ;;  %v3424_v54 = vld [vmem:[%s5000_s0 + $0x6c] sm:$0x1] }
  0x42   :  { %457 = vrot.lane.b32.xlu0 %v3324_v56, %s3076_s8  ;;  %v3337_v12 = vsel %vm3199_vm4, %v191_v62, %v195_v50  ;;  %v312_v31 = vrot.slane %v310_v25, 4  ;;  %v3375_v33 = vcombine.low %v3274_v21, %v3342_v13  ;;  %v2567_v36 = vrot.slane %v3245_v11, 9 }
  0x43   :  { %v163_v20 = vrot.slane %v162_v2, 4  ;;  %v3355_v27 = vcombine.low %v182_v9, %v3337_v12  ;;  %v315_v32 = vrot.slane %v313_v26, 5  ;;  %v3382_v37 = vsel %vm3207_vm5, %v2566_v15, %v810_v23  ;;  %v63_v26 = vld [vmem:[%s5000_s0 + $0x54] sm:$0x1] }
  0x44   :  { %5052 = vst [vmem:[#allocation10_spill] sm:$0xff] %v3375_v33  ;;  %v814_v38 = vrot.slane %v3259_v16, 5  ;;  %v319_v61 = vshll.u32 %v3348_v19, 16  ;;  %v2568_v18 = vrot.slane %v3274_v21, 9  ;;  %v818_v41 = vrot.slane %v3279_v22, 5 }
  0x45   :  { %930 = vrot.lane.b32.xlu1 %v3329_v6, %s3076_s8  ;;  %v168_v35 = vsel %vm3199_vm4, %v163_v20, %v167_v14  ;;  %v316_v39 = vor.u32 %v315_v32, %v312_v31  ;;  %v226_v42 = vshrl.u32 %v3360_v28, 16  ;;  %v229_v44 = vshll.u32 %v3360_v28, 16  ;;  %v3406_v22 = vld [vmem:[%s5000_s0 + $0x58] sm:$0xf] }
  0x46   :  { %902 = vrot.lane.b32.xlu0 %v3229_v60, %s3074_s27  ;;  %v3394_v45 = vcombine.low %v154_v51, %v168_v35  ;;  %v240_v16 = vshrl.u32 %v3365_v29, 16  ;;  %v243_v46 = vshll.u32 %v3365_v29, 16  ;;  %5054 = vst [vmem:[#allocation12_spill] sm:$0xff] %v3406_v22  ;;  %v3410_v49 = vcombine.low %v3313_v47, %v3382_v37 }
  0x47   :  { %v3414_v50 = vcombine.low %v3303_v40, %v3245_v11  ;;  %v317_v51 = vrot.slane %v316_v39, 4  ;;  %v321_v52 = vrot.slane %v319_v61, 5  ;;  %v815_v47 = vsel %vm3207_vm5, %v2567_v36, %v814_v38 }
  0x48   :  { %v819_v55 = vsel %vm3207_vm5, %v2568_v18, %v818_v41  ;;  %v228_v57 = vrot.slane %v226_v42, 4  ;;  %v231_v58 = vrot.slane %v229_v44, 5  ;;  %v242_v62 = vrot.slane %v240_v16, 4 }
  0x49   :  { %407 = vrot.lane.b32.xlu1 %v3355_v27, %s3075_s17  ;;  %5055 = vst [vmem:[#allocation13_spill] sm:$0xff] %v3414_v50  ;;  %v245_v63 = vrot.slane %v243_v46, 5  ;;  %v198_v1 = vshrl.u32 %v3401_v48, 16  ;;  %v201_v2 = vshll.u32 %v3401_v48, 16  ;;  %v212_v14 = vshrl.u32 %v3406_v22, 16 }
  0x4a   :  { %928 = vrot.lane.b32.xlu0 %v3371_v30, %s3076_s8  ;;  %v215_v15 = vshll.u32 %v3406_v22, 16  ;;  %v3438_v20 = vcombine.low %v815_v47, %v819_v55  ;;  %v2577_v23 = vrot.slane %v3342_v13, 9  ;;  %v856_v25 = vrot.slane %v3348_v19, 5 }
  0x4b   :  { %v3447_v31 = vcombine.low %v168_v35, %v182_v9  ;;  %v232_v32 = vor.u32 %v231_v58, %v228_v57  ;;  %v235_v36 = vshll.u32 %v3419_v53, 16  ;;  %v249_v38 = vshll.u32 %v3424_v54, 16  ;;  %v65_v9 = vld [vmem:[%s5000_s0 + $0x5c] sm:$0x1] }
  0x4c   :  { %5056 = vst [vmem:[#allocation14_spill] sm:$0xff] %v3438_v20  ;;  %v3455_v19 = vsel %vm3199_vm4, %v317_v51, %v321_v52  ;;  %v246_v39 = vor.u32 %v245_v63, %v242_v62  ;;  %v200_v61 = vrot.slane %v198_v1, 4  ;;  %v203_v18 = vrot.slane %v201_v2, 5  ;;  %v3484_v2 = vld [vmem:[%s5000_s0 + $0x70] sm:$0xf] }
  0x4d   :  { %435 = vrot.lane.b32.xlu1 %v3375_v33, %s3074_s27  ;;  %v214_v41 = vrot.slane %v212_v14, 4  ;;  %v217_v42 = vrot.slane %v215_v15, 5  ;;  %v3464_v35 = vcombine.low %v3337_v12, %v3455_v19  ;;  %v233_v44 = vrot.slane %v232_v32, 4 }
  0x4e   :  { %405 = vrot.lane.b32.xlu0 %v3394_v45, %s3075_s17  ;;  %v237_v16 = vrot.slane %v235_v36, 5  ;;  %v207_v46 = vshll.u32 %v63_v26, 16  ;;  %v3470_v51 = vsel %vm3207_vm5, %v2577_v23, %v856_v25  ;;  %v247_v52 = vrot.slane %v246_v39, 4 }
  0x4f   :  { %v251_v57 = vrot.slane %v249_v38, 5  ;;  %v204_v58 = vor.u32 %v203_v18, %v200_v61  ;;  %v218_v62 = vor.u32 %v217_v42, %v214_v41  ;;  %v221_v63 = vshll.u32 %v65_v9, 16 }
  0x50   :  { %v3475_v12 = vcombine.low %v819_v55, %v3470_v51  ;;  %v3479_v1 = vsel %vm3199_vm4, %v233_v44, %v237_v16  ;;  %v209_v14 = vrot.slane %v207_v46, 5  ;;  %v2569_v55 = vrot.slane %v3401_v48, 9 }
  0x51   :  { %890 = vrot.lane.b32.xlu1 %v3410_v49, %s3075_s17  ;;  %v3490_v15 = vsel %vm3199_vm4, %v247_v52, %v251_v57  ;;  %v254_v23 = vshrl.u32 %v3484_v2, 16  ;;  %v257_v25 = vshll.u32 %v3484_v2, 16  ;;  %v205_v32 = vrot.slane %v204_v58, 4  ;;  %v3530_v57 = vld [vmem:[%s5000_s0 + $0x74] sm:$0x1] }
  0x52   :  { %433 = vrot.lane.b32.xlu0 %v3414_v50, %s3074_s27  ;;  %v219_v36 = vrot.slane %v218_v62, 4  ;;  %v223_v38 = vrot.slane %v221_v63, 5  ;;  %v822_v39 = vrot.slane %v63_v26, 5  ;;  %v2570_v61 = vrot.slane %v3406_v22, 9  ;;  %v3510_v26 = vld [vmem:[%s5000_s0 + $0x80] sm:$0xf] }
  0x53   :  { %v826_v18 = vrot.slane %v65_v9, 5  ;;  %v3500_v41 = vcombine.low %v3479_v1, %v3490_v15  ;;  %v3505_v42 = vcombine.low %v3382_v37, %v815_v47  ;;  %v256_v44 = vrot.slane %v254_v23, 4  ;;  %v3515_v9 = vld [vmem:[%s5000_s0 + $0x88] sm:$0xf] }
  0x54   :  { %v259_v16 = vrot.slane %v257_v25, 5  ;;  %v3519_v46 = vcombine.low %v3365_v29, %v3484_v2  ;;  %v210_v37 = vsel %vm3199_vm4, %v205_v32, %v209_v14  ;;  %v224_v47 = vsel %vm3199_vm4, %v219_v36, %v223_v38 }
  0x55   :  { %892 = vrot.lane.b32.xlu1 %v3438_v20, %s3075_s17  ;;  %5057 = vst [vmem:[#allocation15_spill] sm:$0xff] %v3500_v41  ;;  %v823_v52 = vsel %vm3207_vm5, %v2569_v55, %v822_v39  ;;  %v3534_v58 = vsel %vm3207_vm5, %v2570_v61, %v826_v18  ;;  %v2571_v62 = vrot.slane %v3360_v28, 9  ;;  %v830_v63 = vrot.slane %v3419_v53, 5 }
  0x56   :  { %459 = vrot.lane.b32.xlu0 %v3447_v31, %s3076_s8  ;;  %5058 = vst [vmem:[#allocation16_spill] sm:$0xff] %v3519_v46  ;;  %v2572_v14 = vrot.slane %v3365_v29, 9  ;;  %v282_v55 = vshrl.u32 %v3510_v26, 16  ;;  %v285_v23 = vshll.u32 %v3510_v26, 16  ;;  %v296_v25 = vshrl.u32 %v3515_v9, 16 }
  0x57   :  { %v299_v32 = vshll.u32 %v3515_v9, 16  ;;  %v3547_v36 = vcombine.low %v210_v37, %v224_v47  ;;  %v834_v53 = vrot.slane %v3424_v54, 5  ;;  %v260_v38 = vor.u32 %v259_v16, %v256_v44  ;;  %v3564_v37 = vld [vmem:[%s5000_s0 + $0x78] sm:$0xf]  ;;  %v3571_v54 = vld [vmem:[%s5000_s0 + $0x8c] sm:$0x1] }
  0x58   :  { %v263_v39 = vshll.u32 %v3530_v57, 16  ;;  %v2583_v61 = vcombine.low %v823_v52, %v3534_v58  ;;  %v3554_v18 = vcombine.low %v3406_v22, %v3360_v28  ;;  %v284_v44 = vrot.slane %v282_v55, 4 }
  0x59   :  { %908 = vrot.lane.b32.xlu1 %v3464_v35, %s3074_s27  ;;  %5059 = vst [vmem:[#allocation17_spill] sm:$0xff] %v3547_v36  ;;  %v287_v16 = vrot.slane %v285_v23, 5  ;;  %v298_v52 = vrot.slane %v296_v25, 4  ;;  %v301_v33 = vrot.slane %v299_v32, 5  ;;  %v3577_v50 = vsel %vm3207_vm5, %v2571_v62, %v830_v63 }
  0x5a   :  { %461 = vrot.lane.b32.xlu0 %v3464_v35, %s3076_s8  ;;  %5060 = vst [vmem:[#allocation18_spill] sm:$0xff] %v3554_v18  ;;  %v835_v8 = vsel %vm3207_vm5, %v2572_v14, %v834_v53  ;;  %v265_v3 = vrot.slane %v263_v39, 5  ;;  %v268_v20 = vshrl.u32 %v3564_v37, 16  ;;  %v271_v55 = vshll.u32 %v3564_v37, 16 }
  0x5b   :  { %v305_v23 = vshll.u32 %v3571_v54, 16  ;;  %v3587_v25 = vcombine.low %v3148_v4, %v3303_v40  ;;  %v3591_v62 = vcombine.low %v3577_v50, %v835_v8  ;;  %v288_v63 = vor.u32 %v287_v16, %v284_v44 }
  0x5c   :  { %v302_v14 = vor.u32 %v301_v33, %v298_v52  ;;  %v3595_v32 = vcombine.low %v3245_v11, %v3274_v21  ;;  %v3598_v53 = vcombine.low %v224_v47, %v3479_v1  ;;  %v2573_v40 = vrot.slane %v3484_v2, 9  ;;  %v3609_v33 = vld [vmem:[%s5000_s0 + $0x48] sm:$0xf]  ;;  %v3614_v1 = vld [vmem:[%s5000_s0 + $0x4c] sm:$0x1] }
  0x5d   :  { %934 = vrot.lane.b32.xlu1 %v3475_v12, %s3076_s8  ;;  %v270_v21 = vrot.slane %v268_v20, 4  ;;  %v273_v39 = vrot.slane %v271_v55, 5  ;;  %v2639_v47 = vrot.slane %v3609_v33, 9  ;;  %v3627_v20 = vcombine.low %v3360_v28, %v3365_v29  ;;  %v3637_v52 = vld [vmem:[%s5000_s0 + $0x90] sm:$0xf] }
  0x5e   :  { %906 = vrot.lane.b32.xlu0 %v3447_v31, %s3074_s27  ;;  %v289_v44 = vrot.slane %v288_v63, 4  ;;  %v303_v16 = vrot.slane %v302_v14, 4  ;;  %v3658_v28 = vld [vmem:[%s5000_s0 + $0x98] sm:$0xf]  ;;  %vm471_vm6 = vcmask 130048   ;;  %vm496_vm7 = vcmask 261120  }
  0x5f   :  { %v274_v63 = vor.u32 %v273_v39, %v270_v21  ;;  %v2640_v21 = vrot.slane %v3658_v28, 9  ;;  %vm513_vm8 = vcmask 392192   ;;  %vm562_vm9 = vcmask 523264  }
  0x60   :  { %vm676_vm10 = vcmask 64512   ;;  %vm2107_vm11 = vcmask 60416  }
  0x61   :  { %411 = vrot.lane.b32.xlu1 %v3500_v41, %s3075_s17  ;;  %v291_v41 = vshll.u32 %v3559_v10, 16  ;;  %v275_v48 = vrot.slane %v274_v63, 4 }
  0x62   :  { %932 = vrot.lane.b32.xlu0 %v3505_v42, %s3076_s8 }
  0x63   :  { %v293_v11 = vrot.slane %v291_v41, 5 }
  0x65   :  { %439 = vrot.lane.b32.xlu1 %v3519_v46, %s3074_s27  ;;  %v261_v46 = vrot.slane %v260_v38, 4  ;;  %v838_v38 = vrot.slane %v3530_v57, 5  ;;  %v1622_v57 = vrot.slane %v3614_v1, 5 }
  0x66   :  { %409 = vrot.lane.b32.xlu0 %v3547_v36, %s3075_s17  ;;  %v324_v36 = vshrl.u32 %v3637_v52, 16 }
  0x67   :  { %v266_v4 = vsel %vm3199_vm4, %v261_v46, %v265_v3  ;;  %v307_v3 = vrot.slane %v305_v23, 5  ;;  %v73_v46 = vld [vmem:[%s5000_s0 + $0x7c] sm:$0x1]  ;;  %v839_v29 = vsel %vm3207_vm5, %v2573_v40, %v838_v38  ;;  %v3651_v23 = vsel %vm3207_vm5, %v2639_v47, %v1622_v57 }
  0x68   :  { %v3632_v41 = vcombine.low %v3490_v15, %v266_v4  ;;  %v2578_v15 = vrot.slane %v3637_v52, 9  ;;  %v277_v14 = vshll.u32 %v73_v46, 16  ;;  %v3662_v40 = vcombine.low %v3510_v26, %v3515_v9  ;;  %v3667_v38 = vld [vmem:[%s5000_s0 + $0x9c] sm:$0x1] }
  0x69   :  { %894 = vrot.lane.b32.xlu1 %v2583_v61, %s3075_s17  ;;  %v3623_v61 = vcombine.low %v3484_v2, %v3564_v37  ;;  %v79_v2 = vld [vmem:[%s5000_s0 + $0x94] sm:$0x1]  ;;  %5062 = vst [vmem:[#allocation20_spill] sm:$0xff] %v3667_v38  ;;  %v1626_v39 = vrot.slane %v3667_v38, 5  ;;  %v3673_v47 = vcombine.low %v835_v8, %v839_v29  ;;  %v294_v57 = vsel %vm3199_vm4, %v289_v44, %v293_v11 }
  0x6a   :  { %437 = vrot.lane.b32.xlu0 %v3554_v18, %s3074_s27  ;;  %v860_v55 = vrot.slane %v79_v2, 5  ;;  %5061 = vst [vmem:[#allocation19_spill] sm:$0xff] %v3662_v40  ;;  %v308_v18 = vsel %vm3199_vm4, %v303_v16, %v307_v3  ;;  %v327_v40 = vshll.u32 %v3637_v52, 16  ;;  %v279_v11 = vrot.slane %v277_v14, 5 }
  0x6b   :  { %v3689_v8 = vsel %vm3207_vm5, %v2640_v21, %v1626_v39  ;;  %v3695_v44 = vcombine.low %v294_v57, %v308_v18  ;;  %v2574_v16 = vrot.slane %v3564_v37, 9  ;;  %v842_v38 = vrot.slane %v73_v46, 5 }
  0x6c   :  { %v3685_v22 = vsel %vm3207_vm5, %v2578_v15, %v860_v55  ;;  %v3702_v15 = vcombine.low %v3534_v58, %v3577_v50  ;;  %v326_v55 = vrot.slane %v324_v36, 4  ;;  %v329_v63 = vrot.slane %v327_v40, 5 }
  0x6d   :  { %896 = vrot.lane.b32.xlu1 %v3591_v62, %s3075_s17  ;;  %v280_v14 = vsel %vm3199_vm4, %v275_v48, %v279_v11  ;;  %v3708_v21 = vcombine.low %v3515_v9, %v3637_v52  ;;  %v843_v46 = vsel %vm3207_vm5, %v2574_v16, %v842_v38  ;;  %v2575_v39 = vrot.slane %v3510_v26, 9 }
  0x6e   :  { %463 = vrot.lane.b32.xlu0 %v3598_v53, %s3076_s8  ;;  %v846_v50 = vrot.slane %v3559_v10, 5  ;;  %v2576_v58 = vrot.slane %v3515_v9, 9  ;;  %v3719_v48 = vcombine.low %v266_v4, %v280_v14  ;;  %v850_v36 = vrot.slane %v3571_v54, 5 }
  0x6f   :  { %v330_v40 = vor.u32 %v329_v63, %v326_v55  ;;  %v333_v11 = vshll.u32 %v79_v2, 16  ;;  %v3724_v3 = vcombine.low %v839_v29, %v843_v46  ;;  %v3728_v38 = vcombine.low %v3564_v37, %v3510_v26 }
  0x70   :  { %v847_v10 = vsel %vm3207_vm5, %v2575_v39, %v846_v50  ;;  %v851_v9 = vsel %vm3207_vm5, %v2576_v58, %v850_v36  ;;  %v3742_v26 = vcombine.low %v280_v14, %v294_v57  ;;  %v1239_v63 = vshrl.u32 %v3609_v33, 16 }
  0x71   :  { %912 = vrot.lane.b32.xlu1 %v3632_v41, %s3074_s27  ;;  %v331_v54 = vrot.slane %v330_v40, 4  ;;  %v335_v4 = vrot.slane %v333_v11, 5  ;;  %v3738_v2 = vcombine.low %v847_v10, %v851_v9  ;;  %v3764_v57 = vcombine.low %v851_v9, %v3685_v22 }
  0x72   :  { %465 = vrot.lane.b32.xlu0 %v3632_v41, %s3076_s8  ;;  %v3777_v16 = vcombine.low %v843_v46, %v847_v10  ;;  %v2615_v58 = vcombine.low %v3342_v13, %v3609_v33  ;;  %v5063_v11 = vcombine.low %v3153_v5, %v3129_v0 }
  0x73   :  { %v3746_v37 = vsel %vm3199_vm4, %v331_v54, %v335_v4 }
  0x74   :  { %v3756_v29 = vcombine.low %v308_v18, %v3746_v37  ;;  %v3773_v18 = vld [vmem:[%s5001_s1 + $0x60] sm:$0xff]  }
  0x75   :  { %938 = vrot.lane.b32.xlu1 %v3673_v47, %s3076_s8  ;;  %2959 = vmatprep.subr.bf16.mxu1 %v3773_v18 }
  0x76   :  { %910 = vrot.lane.b32.xlu0 %v3598_v53, %s3074_s27 }
  0x79   :  { %415 = vrot.lane.b32.xlu1 %v3695_v44, %s3075_s17 }
  0x7a   :  { %936 = vrot.lane.b32.xlu0 %v3702_v15, %s3076_s8 }
  0x7d   :  { %443 = vrot.lane.b32.xlu1 %v3708_v21, %s3074_s27 }
  0x7e   :  { %413 = vrot.lane.b32.xlu0 %v3719_v48, %s3075_s17 }
  0x81   :  { %898 = vrot.lane.b32.xlu1 %v3724_v3, %s3075_s17 }
  0x82   :  { %441 = vrot.lane.b32.xlu0 %v3728_v38, %s3074_s27 }
  0x85   :  { %900 = vrot.lane.b32.xlu1 %v3738_v2, %s3075_s17 }
  0x86   :  { %467 = vrot.lane.b32.xlu0 %v3742_v26, %s3076_s8 }
  0x89   :  { %916 = vrot.lane.b32.xlu1 %v3756_v29, %s3074_s27 }
  0x8a   :  { %469 = vrot.lane.b32.xlu0 %v3756_v29, %s3076_s8 }
  0x8d   :  { %942 = vrot.lane.b32.xlu1 %v3764_v57, %s3076_s8 }
  0x8e   :  { %914 = vrot.lane.b32.xlu0 %v3742_v26, %s3074_s27 }
  0x91   :  { %1268 = vrot.lane.b32.xlu1 %v3324_v56, %s3075_s17 }
  0x92   :  { %940 = vrot.lane.b32.xlu0 %v3777_v16, %s3076_s8 }
  0x95   :  { %1290 = vrot.lane.b32.xlu1 %v3587_v25, %s3074_s27 }
  0x96   :  { %1266 = vrot.lane.b32.xlu0 %v3229_v60, %s3075_s17 }
  0x99   :  { %1628 = vrot.lane.b32.xlu1 %v3371_v30, %s3075_s17  ;;  %v1242_v30 = vshll.u32 %v3609_v33, 16 }
  0x9a   :  { %1288 = vrot.lane.b32.xlu0 %v3160_v7, %s3074_s27 }
  0x9b   :  { %v1244_v46 = vrot.slane %v1242_v30, 5 }
  0x9c   :  { %v430_v55 = vpop.permute.xlu1 %429 }
  0x9d   :  { %1630 = vrot.lane.b32.xlu1 %v3329_v6, %s3075_s17  ;;  %v1241_v6 = vrot.slane %v1239_v63, 4 }
  0x9e   :  { %1308 = vrot.lane.b32.xlu0 %v3261_v17, %s3076_s8 }
  0x9f   :  { %v1245_v36 = vor.u32 %v1244_v46, %v1241_v6 }
  0xa0   :  { %v432_v14 = vpop.permute.xlu1 %431 }
  0xa1   :  { %1646 = vrot.lane.b32.xlu1 %v3394_v45, %s3074_s27  ;;  %v1246_v13 = vrot.slane %v1245_v36, 4  ;;  %v3018_v36 = vld [vmem:[%s5001_s1 + $0x58] sm:$0xff]  }
  0xa2   :  { %1310 = vrot.lane.b32.xlu0 %v3394_v45, %s3076_s8 }
  0xa5   :  { %1666 = vrot.lane.b32.xlu1 %v3410_v49, %s3076_s8  ;;  %v1248_v49 = vshll.u32 %v3614_v1, 16 }
  0xa6   :  { %1644 = vrot.lane.b32.xlu0 %v3261_v17, %s3074_s27 }
  0xa7   :  { %v1250_v33 = vrot.slane %v1248_v49, 5  ;;  %v5064_v49 = vcombine.low %v3470_v51, %v3651_v23  ;;  %v3020_v51 = vld [vmem:[%s5001_s1 + $0x70] sm:$0xff]  }
  0xa8   :  { %v402_v39 = vpop.permute.xlu0 %401  ;;  %v5065_v23 = vld [vmem:[#allocation14_spill] sm:$0xff] }
  0xa9   :  { %1272 = vrot.lane.b32.xlu1 %v3464_v35, %s3075_s17  ;;  %v887_v50 = vpop.permute.xlu1 %886  ;;  %v474_v10 = vsel %vm471_vm6, %v5063_v11, %v402_v39  ;;  %v1251_v5 = vsel %vm3199_vm4, %v1246_v13, %v1250_v33  ;;  %v3016_v39 = vld [vmem:[%s5001_s1 + $0x50] sm:$0xff]  }
  0xaa   :  { %1664 = vrot.lane.b32.xlu0 %v3285_v24, %s3076_s8  ;;  %v498_v1 = vsel %vm496_vm7, %v474_v10, %v430_v55  ;;  %v2617_v30 = vcombine.low %v3455_v19, %v1251_v5  ;;  %v946_v19 = vsel %vm471_vm6, %v3227_v59, %v887_v50  ;;  %v3019_v59 = vld [vmem:[%s5001_s1 + $0x68] sm:$0xff]  }
  0xac   :  { %v404_v40 = vpop.permute.xlu0 %403 }
  0xad   :  { %1294 = vrot.lane.b32.xlu1 %v2615_v58, %s3074_s27  ;;  %v889_v9 = vpop.permute.xlu1 %888  ;;  %v477_v54 = vsel %vm471_vm6, %v3160_v7, %v404_v40  ;;  %v3015_v7 = vld [vmem:[%s5001_s1 + $0x48] sm:$0xff]  }
  0xae   :  { %1270 = vrot.lane.b32.xlu0 %v3447_v31, %s3075_s17  ;;  %v500_v63 = vsel %vm496_vm7, %v477_v54, %v432_v14  ;;  %v949_v14 = vsel %vm471_vm6, %v3261_v17, %v889_v9 }
  0xb0   :  { %v456_v24 = vpop.permute.xlu0 %455 }
  0xb1   :  { %1632 = vrot.lane.b32.xlu1 %v3505_v42, %s3075_s17  ;;  %v515_v0 = vsel %vm513_vm8, %v498_v1, %v456_v24 }
  0xb2   :  { %1292 = vrot.lane.b32.xlu0 %v3595_v32, %s3074_s27  ;;  %2895 = vmatprep.mubr.msk.bf16.mxu0 %vm562_vm9, %v515_v0 }
  0xb3   :  { %v905_v4 = vpop.permute.xlu1 %904 }
  0xb4   :  { %v458_v55 = vpop.permute.xlu0 %457 }
  0xb5   :  { %v517_v42 = vsel %vm513_vm8, %v500_v63, %v458_v55  ;;  %1634 = vrot.lane.b32.xlu1 %v3475_v12, %s3075_s17  ;;  %v971_v12 = vsel %vm496_vm7, %v949_v14, %v905_v4 }
  0xb6   :  { %1312 = vrot.lane.b32.xlu0 %v3355_v27, %s3076_s8  ;;  %2896 = vmatmul.mubr.msk.bf16.vlgmr.msra.gmra.mrb[0].mxu0 %vm562_vm9, %v517_v42 }
  0xb7   :  { %v931_v6 = vpop.permute.xlu1 %930  ;;  %2936 = vmatpush3.bf16.msra.mxu0 %v3751_v43 }
  0xb8   :  { %v903_v46 = vpop.permute.xlu0 %902  ;;  %2937 = vmatprep.subr.bf16.mxu0 %v3015_v7  ;;  %v987_v50 = vsel %vm513_vm8, %v971_v12, %v931_v6 }
  0xb9   :  { %1650 = vrot.lane.b32.xlu1 %v2617_v30, %s3074_s27  ;;  %v969_v43 = vsel %vm496_vm7, %v946_v19, %v903_v46 }
  0xba   :  { %1314 = vrot.lane.b32.xlu0 %v2617_v30, %s3076_s8  ;;  %v1253_v30 = vshrl.u32 %v3658_v28, 16 }
  0xbb   :  { %v408_v58 = vpop.permute.xlu1 %407  ;;  %2938 = vmatpush3.bf16.msra.mxu0 %v3015_v7 }
  0xbc   :  { %v929_v17 = vpop.permute.xlu0 %928  ;;  %2939 = vmatprep.subr.bf16.mxu0 %v3016_v39  ;;  %v483_v0 = vsel %vm471_vm6, %v3595_v32, %v408_v58  ;;  %v5066_v32 = vld [vmem:[#allocation15_spill] sm:$0xff]  ;;  %v1255_v58 = vrot.slane %v1253_v30, 4 }
  0xbd   :  { %1670 = vrot.lane.b32.xlu1 %v5064_v49, %s3076_s8  ;;  %v985_v40 = vsel %vm513_vm8, %v969_v43, %v929_v17  ;;  %v5067_v49 = vld [vmem:[#allocation20_spill] sm:$0xff] }
  0xbe   :  { %1648 = vrot.lane.b32.xlu0 %v3355_v27, %s3074_s27  ;;  %2919 = vmatprep.mubr.msk.bf16.mxu1 %vm562_vm9, %v985_v40  ;;  %v1262_v40 = vshll.u32 %v5067_v49, 16 }
  0xbf   :  { %v436_v11 = vpop.permute.xlu1 %435  ;;  %2920 = vmatmul.mubr.msk.bf16.vlgmr.msra.gmra.mrb[0].mxu1 %vm562_vm9, %v987_v50  ;;  %2940 = vmatpush3.bf16.msra.mxu0 %v3016_v39 }
  0xc0   :  { %v406_v10 = vpop.permute.xlu0 %405  ;;  %2960 = vmatpush3.bf16.msra.mxu1 %v3773_v18  ;;  %2941 = vmatprep.subr.bf16.mxu0 %v3018_v36  ;;  %v3021_v18 = vld [vmem:[%s5001_s1 + $0x78] sm:$0xff]   ;;  %v504_v4 = vsel %vm496_vm7, %v483_v0, %v436_v11 }
  0xc1   :  { %1276 = vrot.lane.b32.xlu1 %v3632_v41, %s3075_s17  ;;  %2961 = vmatprep.subr.bf16.mxu1 %v3019_v59  ;;  %v480_v33 = vsel %vm471_vm6, %v3587_v25, %v406_v10  ;;  %v1264_v10 = vrot.slane %v1262_v40, 5 }
  0xc2   :  { %1668 = vrot.lane.b32.xlu0 %v5065_v23, %s3076_s8  ;;  %v5069_v23 = vld [vmem:[#allocation12_spill] sm:$0xff] }
  0xc3   :  { %v891_v9 = vpop.permute.xlu1 %890  ;;  %2942 = vmatpush3.bf16.msra.mxu0 %v3018_v36  ;;  %v2616_v36 = vcombine.low %v3637_v52, %v3658_v28 }
  0xc4   :  { %v434_v13 = vpop.permute.xlu0 %433  ;;  %2962 = vmatpush3.bf16.msra.mxu1 %v3019_v59  ;;  %v952_v6 = vsel %vm471_vm6, %v3394_v45, %v891_v9 }
  0xc5   :  { %1298 = vrot.lane.b32.xlu1 %v3623_v61, %s3074_s27  ;;  %2963 = vmatprep.subr.bf16.mxu1 %v3020_v51  ;;  %v502_v1 = vsel %vm496_vm7, %v480_v33, %v434_v13 }
  0xc6   :  { %1274 = vrot.lane.b32.xlu0 %v3598_v53, %s3075_s17 }
  0xc7   :  { %v893_v24 = vpop.permute.xlu1 %892 }
  0xc8   :  { %v460_v54 = vpop.permute.xlu0 %459  ;;  %2964 = vmatpush3.bf16.msra.mxu1 %v3020_v51  ;;  %v955_v7 = vsel %vm471_vm6, %v3355_v27, %v893_v24  ;;  %v5068_v51 = vld [vmem:[#allocation11_spill] sm:$0xff] }
  0xc9   :  { %v519_v5 = vsel %vm513_vm8, %v502_v1, %v460_v54  ;;  %1636 = vrot.lane.b32.xlu1 %v3702_v15, %s3075_s17  ;;  %2965 = vmatprep.subr.bf16.mxu1 %v3021_v18  ;;  %v5070_v9 = vcombine.low %v5068_v51, %v5069_v23  ;;  %v5071_v24 = vld [vmem:[#allocation19_spill] sm:$0xff] }
  0xca   :  { %1296 = vrot.lane.b32.xlu0 %v3627_v20, %s3074_s27  ;;  %2899 = vmatprep.mubr.msk.bf16.mxu0 %vm562_vm9, %v519_v5 }
  0xcb   :  { %v909_v25 = vpop.permute.xlu1 %908 }
  0xcc   :  { %v462_v63 = vpop.permute.xlu0 %461  ;;  %2966 = vmatpush3.bf16.msra.mxu1 %v3021_v18  ;;  %v975_v14 = vsel %vm496_vm7, %v955_v7, %v909_v25 }
  0xcd   :  { %v521_v55 = vsel %vm513_vm8, %v504_v4, %v462_v63  ;;  %1638 = vrot.lane.b32.xlu1 %v3673_v47, %s3075_s17  ;;  %v1256_v47 = vshll.u32 %v3658_v28, 16  ;;  %v5072_v63 = vld [vmem:[#allocation17_spill] sm:$0xff] }
  0xce   :  { %1316 = vrot.lane.b32.xlu0 %v5066_v32, %s3076_s8  ;;  %2900 = vmatmul.mubr.msk.bf16.gmra.mrb[4].mxu0 %vm562_vm9, %v521_v55 }
  0xcf   :  { %v935_v15 = vpop.permute.xlu1 %934  ;;  %v1258_v45 = vrot.slane %v1256_v47, 5 }
  0xd0   :  { %v907_v42 = vpop.permute.xlu0 %906  ;;  %v991_v12 = vsel %vm513_vm8, %v975_v14, %v935_v15 }
  0xd1   :  { %1654 = vrot.lane.b32.xlu1 %v3719_v48, %s3074_s27  ;;  %v973_v39 = vsel %vm496_vm7, %v952_v6, %v907_v42 }
  0xd2   :  { %1318 = vrot.lane.b32.xlu0 %v3719_v48, %s3076_s8 }
  0xd3   :  { %v412_v46 = vpop.permute.xlu1 %411 }
  0xd4   :  { %v933_v27 = vpop.permute.xlu0 %932  ;;  %v489_v18 = vsel %vm471_vm6, %v3627_v20, %v412_v46 }
  0xd5   :  { %v989_v19 = vsel %vm513_vm8, %v973_v39, %v933_v27  ;;  %1674 = vrot.lane.b32.xlu1 %v3724_v3, %s3076_s8  ;;  %v1259_v3 = vor.u32 %v1258_v45, %v1255_v58 }
  0xd6   :  { %1652 = vrot.lane.b32.xlu0 %v5066_v32, %s3074_s27  ;;  %2923 = vmatprep.mubr.msk.bf16.mxu1 %vm562_vm9, %v989_v19 }
  0xd7   :  { %v440_v43 = vpop.permute.xlu1 %439  ;;  %2924 = vmatmul.mubr.msk.bf16.gmra.mrb[4].mxu1 %vm562_vm9, %v991_v12  ;;  %v1260_v11 = vrot.slane %v1259_v3, 4 }
  0xd8   :  { %v410_v17 = vpop.permute.xlu0 %409  ;;  %v508_v0 = vsel %vm496_vm7, %v489_v18, %v440_v43  ;;  %v5075_v18 = vld [vmem:[#allocation9_spill] sm:$0xff] }
  0xd9   :  { %1280 = vrot.lane.b32.xlu1 %v3756_v29, %s3075_s17  ;;  %v486_v52 = vsel %vm471_vm6, %v5070_v9, %v410_v17  ;;  %v1265_v1 = vsel %vm3199_vm4, %v1260_v11, %v1264_v10 }
  0xda   :  { %1672 = vrot.lane.b32.xlu0 %v3591_v62, %s3076_s8  ;;  %v2618_v20 = vcombine.low %v3746_v37, %v1265_v1 }
  0xdb   :  { %v895_v59 = vpop.permute.xlu1 %894 }
  0xdc   :  { %v438_v50 = vpop.permute.xlu0 %437  ;;  %v958_v55 = vsel %vm471_vm6, %v5072_v63, %v895_v59 }
  0xdd   :  { %1302 = vrot.lane.b32.xlu1 %v2616_v36, %s3074_s27  ;;  %v506_v62 = vsel %vm496_vm7, %v486_v52, %v438_v50  ;;  %v5074_v52 = vld [vmem:[#allocation8_spill] sm:$0xff] }
  0xde   :  { %1278 = vrot.lane.b32.xlu0 %v3742_v26, %s3075_s17 }
  0xdf   :  { %v897_v28 = vpop.permute.xlu1 %896 }
  0xe0   :  { %v464_v13 = vpop.permute.xlu0 %463  ;;  %v961_v34 = vsel %vm471_vm6, %v5066_v32, %v897_v28  ;;  %v5073_v32 = vcombine.low %v3685_v22, %v3689_v8 }
  0xe1   :  { %v523_v33 = vsel %vm513_vm8, %v506_v62, %v464_v13  ;;  %1640 = vrot.lane.b32.xlu1 %v3777_v16, %s3075_s17 }
  0xe2   :  { %1300 = vrot.lane.b32.xlu0 %v5071_v24, %s3074_s27  ;;  %2903 = vmatprep.mubr.msk.bf16.mxu0 %vm562_vm9, %v523_v33 }
  0xe3   :  { %v913_v54 = vpop.permute.xlu1 %912 }
  0xe4   :  { %v466_v5 = vpop.permute.xlu0 %465 }
  0xe5   :  { %v525_v25 = vsel %vm513_vm8, %v508_v0, %v466_v5  ;;  %1642 = vrot.lane.b32.xlu1 %v3764_v57, %s3075_s17  ;;  %v979_v57 = vsel %vm496_vm7, %v961_v34, %v913_v54 }
  0xe6   :  { %1320 = vrot.lane.b32.xlu0 %v3695_v44, %s3076_s8  ;;  %2904 = vmatmul.mubr.msk.bf16.gmra.mrb[8].mxu0 %vm562_vm9, %v525_v25 }
  0xe7   :  { %v939_v16 = vpop.permute.xlu1 %938 }
  0xe8   :  { %v911_v4 = vpop.permute.xlu0 %910  ;;  %v995_v30 = vsel %vm513_vm8, %v979_v57, %v939_v16 }
  0xe9   :  { %1658 = vrot.lane.b32.xlu1 %v2618_v20, %s3074_s27  ;;  %v977_v15 = vsel %vm496_vm7, %v958_v55, %v911_v4 }
  0xea   :  { %1322 = vrot.lane.b32.xlu0 %v2618_v20, %s3076_s8 }
  0xeb   :  { %v416_v37 = vpop.permute.xlu1 %415 }
  0xec   :  { %v937_v7 = vpop.permute.xlu0 %936  ;;  %v495_v19 = vsel %vm471_vm6, %v5071_v24, %v416_v37 }
  0xed   :  { %v993_v42 = vsel %vm513_vm8, %v977_v15, %v937_v7  ;;  %1678 = vrot.lane.b32.xlu1 %v5073_v32, %s3076_s8 }
  0xee   :  { %1656 = vrot.lane.b32.xlu0 %v3695_v44, %s3074_s27  ;;  %2927 = vmatprep.mubr.msk.bf16.mxu1 %vm562_vm9, %v993_v42 }
  0xef   :  { %v444_v47 = vpop.permute.xlu1 %443  ;;  %2928 = vmatmul.mubr.msk.bf16.gmra.mrb[8].mxu1 %vm562_vm9, %v995_v30  ;;  %v5076_v30 = vld [vmem:[#allocation13_spill] sm:$0xff] }
  0xf0   :  { %v414_v6 = vpop.permute.xlu0 %413  ;;  %v512_v45 = vsel %vm496_vm7, %v495_v19, %v444_v47 }
  0xf1   :  { %v492_v22 = vsel %vm471_vm6, %v3623_v61, %v414_v6 }
  0xf2   :  { %1676 = vrot.lane.b32.xlu0 %v3738_v2, %s3076_s8 }
  0xf3   :  { %v899_v14 = vpop.permute.xlu1 %898 }
  0xf4   :  { %v442_v46 = vpop.permute.xlu0 %441  ;;  %v964_v3 = vsel %vm471_vm6, %v3719_v48, %v899_v14 }
  0xf5   :  { %v510_v39 = vsel %vm496_vm7, %v492_v22, %v442_v46  ;;  %v5077_v46 = vld [vmem:[#allocation10_spill] sm:$0xff] }
  0xf7   :  { %v901_v8 = vpop.permute.xlu1 %900 }
  0xf8   :  { %v468_v27 = vpop.permute.xlu0 %467  ;;  %v967_v17 = vsel %vm471_vm6, %v3695_v44, %v901_v8 }
  0xf9   :  { %v527_v12 = vsel %vm513_vm8, %v510_v39, %v468_v27 }
  0xfa   :  { %2907 = vmatprep.mubr.msk.bf16.mxu0 %vm562_vm9, %v527_v12 }
  0xfb   :  { %v917_v58 = vpop.permute.xlu1 %916 }
  0xfc   :  { %v470_v2 = vpop.permute.xlu0 %469  ;;  %v983_v49 = vsel %vm496_vm7, %v967_v17, %v917_v58 }
  0xfd   :  { %v529_v43 = vsel %vm513_vm8, %v512_v45, %v470_v2 }
  0xfe   :  { %2908 = vmatmul.mubr.msk.bf16.gmra.mrb[12].mxu0 %vm562_vm9, %v529_v43 }
  0xff   :  { %v943_v61 = vpop.permute.xlu1 %942 }
 0x100   :  { %v915_v36 = vpop.permute.xlu0 %914  ;;  %v999_v10 = vsel %vm513_vm8, %v983_v49, %v943_v61 }
 0x101   :  { %v981_v59 = vsel %vm496_vm7, %v964_v3, %v915_v36 }
 0x103   :  { %v1269_v40 = vpop.permute.xlu1 %1268 }
 0x104   :  { %v941_v50 = vpop.permute.xlu0 %940  ;;  %v1329_v33 = vsel %vm471_vm6, %v5075_v18, %v1269_v40 }
 0x105   :  { %v997_v11 = vsel %vm513_vm8, %v981_v59, %v941_v50 }
 0x106   :  { %2931 = vmatprep.mubr.msk.bf16.mxu1 %vm562_vm9, %v997_v11 }
 0x107   :  { %v1291_v51 = vpop.permute.xlu1 %1290  ;;  %2932 = vmatmul.mubr.msk.bf16.gmra.mrb[12].mxu1 %vm562_vm9, %v999_v10  ;;  %v5078_v10 = vld [vmem:[#allocation18_spill] sm:$0xff] }
 0x108   :  { %v1267_v44 = vpop.permute.xlu0 %1266  ;;  %v1351_v54 = vsel %vm496_vm7, %v1329_v33, %v1291_v51 }
 0x109   :  { %v1326_v48 = vsel %vm471_vm6, %v5074_v52, %v1267_v44 }
 0x10b   :  { %v1629_v23 = vpop.permute.xlu1 %1628 }
 0x10c   :  { %v1289_v9 = vpop.permute.xlu0 %1288  ;;  %v1682_v34 = vsel %vm471_vm6, %v3229_v60, %v1629_v23 }
 0x10d   :  { %v1349_v62 = vsel %vm496_vm7, %v1326_v48, %v1289_v9  ;;  %v5079_v9 = vld [vmem:[#allocation16_spill] sm:$0xff] }
 0x10f   :  { %v1631_v28 = vpop.permute.xlu1 %1630 }
 0x110   :  { %v1309_v13 = vpop.permute.xlu0 %1308  ;;  %v1685_v20 = vsel %vm471_vm6, %v3324_v56, %v1631_v28 }
 0x111   :  { %v1365_v24 = vsel %vm513_vm8, %v1349_v62, %v1309_v13 }
 0x112   :  { %2943 = vmatprep.mubr.msk.bf16.mxu0 %vm562_vm9, %v1365_v24 }
 0x113   :  { %v1647_v1 = vpop.permute.xlu1 %1646 }
 0x114   :  { %v1311_v0 = vpop.permute.xlu0 %1310  ;;  %v1707_v4 = vsel %vm496_vm7, %v1685_v20, %v1647_v1 }
 0x115   :  { %v1367_v5 = vsel %vm513_vm8, %v1351_v54, %v1311_v0 }
 0x116   :  { %2944 = vmatmul.mubr.msk.bf16.vlgmr.msra.gmra.mrb[16].mxu0 %vm562_vm9, %v1367_v5 }
 0x117   :  { %v1667_v25 = vpop.permute.xlu1 %1666 }
 0x118   :  { %v1645_v16 = vpop.permute.xlu0 %1644  ;;  %v1723_v15 = vsel %vm513_vm8, %v1707_v4, %v1667_v25 }
 0x119   :  { %v1705_v55 = vsel %vm496_vm7, %v1682_v34, %v1645_v16 }
 0x11b   :  { %v1273_v63 = vpop.permute.xlu1 %1272 }
 0x11c   :  { %v1665_v57 = vpop.permute.xlu0 %1664  ;;  %v1335_v22 = vsel %vm471_vm6, %v5077_v46, %v1273_v63 }
 0x11d   :  { %v1721_v37 = vsel %vm513_vm8, %v1705_v55, %v1665_v57 }
 0x11e   :  { %2967 = vmatprep.mubr.msk.bf16.mxu1 %vm562_vm9, %v1721_v37 }
 0x11f   :  { %v1295_v7 = vpop.permute.xlu1 %1294  ;;  %2968 = vmatmul.mubr.msk.bf16.vlgmr.msra.gmra.mrb[16].mxu1 %vm562_vm9, %v1723_v15 }
 0x120   :  { %v1271_v56 = vpop.permute.xlu0 %1270  ;;  %v1355_v27 = vsel %vm496_vm7, %v1335_v22, %v1295_v7 }
 0x121   :  { %v1332_v60 = vsel %vm471_vm6, %v5076_v30, %v1271_v56 }
 0x123   :  { %v1633_v42 = vpop.permute.xlu1 %1632 }
 0x124   :  { %v1293_v32 = vpop.permute.xlu0 %1292  ;;  %v1688_v43 = vsel %vm471_vm6, %v3447_v31, %v1633_v42 }
 0x125   :  { %v1353_v6 = vsel %vm496_vm7, %v1332_v60, %v1293_v32 }
 0x127   :  { %v1635_v47 = vpop.permute.xlu1 %1634 }
 0x128   :  { %v1313_v14 = vpop.permute.xlu0 %1312  ;;  %v1691_v45 = vsel %vm471_vm6, %v3464_v35, %v1635_v47 }
 0x129   :  { %v1369_v8 = vsel %vm513_vm8, %v1353_v6, %v1313_v14 }
 0x12a   :  { %2947 = vmatprep.mubr.msk.bf16.mxu0 %vm562_vm9, %v1369_v8 }
 0x12b   :  { %v1651_v39 = vpop.permute.xlu1 %1650 }
 0x12c   :  { %v1315_v19 = vpop.permute.xlu0 %1314  ;;  %v1711_v61 = vsel %vm496_vm7, %v1691_v45, %v1651_v39 }
 0x12d   :  { %v1371_v12 = vsel %vm513_vm8, %v1355_v27, %v1315_v19 }
 0x12e   :  { %2948 = vmatmul.mubr.msk.bf16.gmra.mrb[20].mxu0 %vm562_vm9, %v1371_v12 }
 0x12f   :  { %v1671_v58 = vpop.permute.xlu1 %1670 }
 0x130   :  { %v1649_v2 = vpop.permute.xlu0 %1648  ;;  %v1727_v40 = vsel %vm513_vm8, %v1711_v61, %v1671_v58 }
 0x131   :  { %v1709_v36 = vsel %vm496_vm7, %v1688_v43, %v1649_v2 }
 0x133   :  { %v1277_v17 = vpop.permute.xlu1 %1276 }
 0x134   :  { %v1669_v3 = vpop.permute.xlu0 %1668  ;;  %v1341_v52 = vsel %vm471_vm6, %v5079_v9, %v1277_v17 }
 0x135   :  { %v1725_v49 = vsel %vm513_vm8, %v1709_v36, %v1669_v3 }
 0x136   :  { %2971 = vmatprep.mubr.msk.bf16.mxu1 %vm562_vm9, %v1725_v49 }
 0x137   :  { %v1299_v59 = vpop.permute.xlu1 %1298  ;;  %2972 = vmatmul.mubr.msk.bf16.gmra.mrb[20].mxu1 %vm562_vm9, %v1727_v40 }
 0x138   :  { %v1275_v35 = vpop.permute.xlu0 %1274  ;;  %v1359_v62 = vsel %vm496_vm7, %v1341_v52, %v1299_v59 }
 0x139   :  { %v1338_v31 = vsel %vm471_vm6, %v5078_v10, %v1275_v35 }
 0x13b   :  { %v1637_v50 = vpop.permute.xlu1 %1636 }
 0x13c   :  { %v1297_v11 = vpop.permute.xlu0 %1296  ;;  %v1694_v54 = vsel %vm471_vm6, %v3598_v53, %v1637_v50 }
 0x13d   :  { %v1357_v44 = vsel %vm496_vm7, %v1338_v31, %v1297_v11 }
 0x13f   :  { %v1639_v51 = vpop.permute.xlu1 %1638 }
 0x140   :  { %v1317_v23 = vpop.permute.xlu0 %1316  ;;  %v1697_v24 = vsel %vm471_vm6, %v3632_v41, %v1639_v51 }
 0x141   :  { %v1373_v48 = vsel %vm513_vm8, %v1357_v44, %v1317_v23 }
 0x142   :  { %2951 = vmatprep.mubr.msk.bf16.mxu0 %vm562_vm9, %v1373_v48 }
 0x143   :  { %v1655_v28 = vpop.permute.xlu1 %1654 }
 0x144   :  { %v1319_v13 = vpop.permute.xlu0 %1318  ;;  %v1715_v0 = vsel %vm496_vm7, %v1697_v24, %v1655_v28 }
 0x145   :  { %v1375_v18 = vsel %vm513_vm8, %v1359_v62, %v1319_v13 }
 0x146   :  { %2952 = vmatmul.mubr.msk.bf16.gmra.mrb[24].mxu0 %vm562_vm9, %v1375_v18 }
 0x147   :  { %v1675_v33 = vpop.permute.xlu1 %1674 }
 0x148   :  { %v1653_v1 = vpop.permute.xlu0 %1652  ;;  %v1731_v34 = vsel %vm513_vm8, %v1715_v0, %v1675_v33 }
 0x149   :  { %v1713_v25 = vsel %vm496_vm7, %v1694_v54, %v1653_v1 }
 0x14b   :  { %v1281_v5 = vpop.permute.xlu1 %1280 }
 0x14c   :  { %v1673_v20 = vpop.permute.xlu0 %1672  ;;  %v1347_v7 = vsel %vm471_vm6, %v3708_v21, %v1281_v5 }
 0x14d   :  { %v1729_v16 = vsel %vm513_vm8, %v1713_v25, %v1673_v20 }
 0x14e   :  { %2975 = vmatprep.mubr.msk.bf16.mxu1 %vm562_vm9, %v1729_v16 }
 0x14f   :  { %v1303_v4 = vpop.permute.xlu1 %1302  ;;  %2976 = vmatmul.mubr.msk.bf16.gmra.mrb[24].mxu1 %vm562_vm9, %v1731_v34 }
 0x150   :  { %v1279_v41 = vpop.permute.xlu0 %1278  ;;  %v1363_v42 = vsel %vm496_vm7, %v1347_v7, %v1303_v4 }
 0x151   :  { %v1344_v53 = vsel %vm471_vm6, %v3728_v38, %v1279_v41 }
 0x153   :  { %v1641_v63 = vpop.permute.xlu1 %1640 }
 0x154   :  { %v1301_v55 = vpop.permute.xlu0 %1300  ;;  %v1700_v6 = vsel %vm471_vm6, %v3742_v26, %v1641_v63 }
 0x155   :  { %v1361_v37 = vsel %vm496_vm7, %v1344_v53, %v1301_v55 }
 0x157   :  { %v1643_v57 = vpop.permute.xlu1 %1642 }
 0x158   :  { %v1321_v15 = vpop.permute.xlu0 %1320  ;;  %v1703_v38 = vsel %vm471_vm6, %v3756_v29, %v1643_v57 }
 0x159   :  { %v1377_v56 = vsel %vm513_vm8, %v1361_v37, %v1321_v15 }
 0x15a   :  { %2955 = vmatprep.mubr.msk.bf16.mxu0 %vm562_vm9, %v1377_v56 }
 0x15b   :  { %v1659_v30 = vpop.permute.xlu1 %1658 }
 0x15c   :  { %v1323_v32 = vpop.permute.xlu0 %1322  ;;  %v1719_v21 = vsel %vm496_vm7, %v1703_v38, %v1659_v30 }
 0x15d   :  { %v1379_v60 = vsel %vm513_vm8, %v1363_v42, %v1323_v32 }
 0x15e   :  { %2956 = vmatmul.mubr.msk.bf16.gmra.mrb[28].mxu0 %vm562_vm9, %v1379_v60 }
 0x15f   :  { %v1679_v14 = vpop.permute.xlu1 %1678 }
 0x160   :  { %v1657_v47 = vpop.permute.xlu0 %1656  ;;  %v1735_v39 = vsel %vm513_vm8, %v1719_v21, %v1679_v14 }
 0x161   :  { %v1717_v46 = vsel %vm496_vm7, %v1700_v6, %v1657_v47 }
 0x164   :  { %v1677_v22 = vpop.permute.xlu0 %1676 }
 0x165   :  { %v1733_v8 = vsel %vm513_vm8, %v1717_v46, %v1677_v22 }
 0x166   :  { %2979 = vmatprep.mubr.msk.bf16.mxu1 %vm562_vm9, %v1733_v8 }
 0x167   :  { %2980 = vmatmul.mubr.msk.bf16.gmra.mrb[28].mxu1 %vm562_vm9, %v1735_v39 }
 0x189   :  { %v4076_v27 = vpop.f32.mrb[0].mxu0 }
 0x18a   :  { %v4078_v29 = vpop.f32.mrb[1].mxu0  ;;  %v717_v58 = vmul.f32 %v4076_v27, %v4076_v27  ;;  %v680_v17 = vsel %vm676_vm10, %v4076_v27, 0.0 }
 0x18b   :  { %v715_v26 = vmul.f32 %v4078_v29, %v4078_v29  ;;  %v4082_v19 = vpop.f32.mrb[2].mxu0  ;;  %v677_v45 = vsel %vm676_vm10, %v4078_v29, 0.0 }
 0x18c   :  { %v4084_v12 = vpop.f32.mrb[3].mxu0  ;;  %v718_v3 = vmul.f32 %v4082_v19, %v4082_v19  ;;  %v734_v35 = vsel %vm676_vm10, %v717_v58, 0.0  ;;  %v682_v50 = vsel %vm676_vm10, %v4082_v19, 0.0 }
 0x18d   :  { %v678_v2 = vsel %vm676_vm10, %v4084_v12, 0.0  ;;  %v716_v43 = vmul.f32 %v4084_v12, %v4084_v12  ;;  %v731_v36 = vsel %vm676_vm10, %v715_v26, 0.0 }
 0x18e   :  { %v679_v61 = vadd.f32 %v678_v2, %v677_v45  ;;  %v736_v51 = vsel %vm676_vm10, %v718_v3, 0.0 }
 0x18f   :  { %v732_v49 = vsel %vm676_vm10, %v716_v43, 0.0 }
 0x190   :  { %v681_v40 = vadd.f32 %v680_v17, %v679_v61  ;;  %v733_v59 = vadd.f32 %v732_v49, %v731_v36 }
 0x192   :  { %v735_v11 = vadd.f32 %v734_v35, %v733_v59  ;;  %v4103_v10 = vpop.f32.mrb[0].mxu1  ;;  %v683_v31 = vadd.f32 %v682_v50, %v681_v40 }
 0x193   :  { %v4106_v44 = vpop.f32.mrb[1].mxu1  ;;  %v1186_v28 = vmul.f32 %v4103_v10, %v4103_v10  ;;  %v1149_v24 = vsel %vm676_vm10, %v4103_v10, 0.0 }
 0x194   :  { %v1184_v23 = vmul.f32 %v4106_v44, %v4106_v44  ;;  %v4110_v9 = vpop.f32.mrb[2].mxu1  ;;  %v737_v52 = vadd.f32 %v736_v51, %v735_v11  ;;  %v1146_v62 = vsel %vm676_vm10, %v4106_v44, 0.0 }
 0x195   :  { %v4112_v48 = vpop.f32.mrb[3].mxu1  ;;  %v1187_v54 = vmul.f32 %v4110_v9, %v4110_v9  ;;  %v1203_v20 = vsel %vm676_vm10, %v1186_v28, 0.0  ;;  %v1151_v16 = vsel %vm676_vm10, %v4110_v9, 0.0 }
 0x196   :  { %v1147_v13 = vsel %vm676_vm10, %v4112_v48, 0.0  ;;  %v1185_v18 = vmul.f32 %v4112_v48, %v4112_v48  ;;  %v1200_v1 = vsel %vm676_vm10, %v1184_v23, 0.0 }
 0x197   :  { %v1148_v33 = vadd.f32 %v1147_v13, %v1146_v62  ;;  %v1205_v41 = vsel %vm676_vm10, %v1187_v54, 0.0 }
 0x198   :  { %v1201_v0 = vsel %vm676_vm10, %v1185_v18, 0.0 }
 0x199   :  { %v1150_v5 = vadd.f32 %v1149_v24, %v1148_v33  ;;  %v1202_v25 = vadd.f32 %v1201_v0, %v1200_v1 }
 0x19b   :  { %v1204_v34 = vadd.f32 %v1203_v20, %v1202_v25  ;;  %v1152_v4 = vadd.f32 %v1151_v16, %v1150_v5 }
 0x19d   :  { %v1206_v63 = vadd.f32 %v1205_v41, %v1204_v34 }
 0x1a1   :  { %v4132_v55 = vpop.f32.mrb[4].mxu0 }
 0x1a2   :  { %v4134_v53 = vpop.f32.mrb[5].mxu0  ;;  %v721_v42 = vmul.f32 %v4132_v55, %v4132_v55  ;;  %v688_v6 = vsel %vm676_vm10, %v4132_v55, 0.0 }
 0x1a3   :  { %v684_v57 = vsel %vm676_vm10, %v4134_v53, 0.0  ;;  %v719_v37 = vmul.f32 %v4134_v53, %v4134_v53  ;;  %v4140_v15 = vpop.f32.mrb[6].mxu0 }
 0x1a4   :  { %v685_v7 = vadd.f32 %v684_v57, %v683_v31  ;;  %v4142_v56 = vpop.f32.mrb[7].mxu0  ;;  %v722_v21 = vmul.f32 %v4140_v15, %v4140_v15  ;;  %v742_v8 = vsel %vm676_vm10, %v721_v42, 0.0  ;;  %v690_v39 = vsel %vm676_vm10, %v4140_v15, 0.0 }
 0x1a5   :  { %v738_v32 = vsel %vm676_vm10, %v719_v37, 0.0  ;;  %v686_v30 = vsel %vm676_vm10, %v4142_v56, 0.0  ;;  %v720_v60 = vmul.f32 %v4142_v56, %v4142_v56 }
 0x1a6   :  { %v739_v38 = vadd.f32 %v738_v32, %v737_v52  ;;  %v687_v47 = vadd.f32 %v686_v30, %v685_v7  ;;  %v744_v2 = vsel %vm676_vm10, %v722_v21, 0.0 }
 0x1a7   :  { %v740_v14 = vsel %vm676_vm10, %v720_v60, 0.0 }
 0x1a8   :  { %v689_v46 = vadd.f32 %v688_v6, %v687_v47  ;;  %v741_v22 = vadd.f32 %v740_v14, %v739_v38 }
 0x1aa   :  { %v743_v26 = vadd.f32 %v742_v8, %v741_v22  ;;  %v4159_v58 = vpop.f32.mrb[4].mxu1  ;;  %v691_v45 = vadd.f32 %v690_v39, %v689_v46 }
 0x1ab   :  { %v4162_v43 = vpop.f32.mrb[5].mxu1  ;;  %v1190_v59 = vmul.f32 %v4159_v58, %v4159_v58  ;;  %v1157_v23 = vsel %vm676_vm10, %v4159_v58, 0.0 }
 0x1ac   :  { %v1153_v61 = vsel %vm676_vm10, %v4162_v43, 0.0  ;;  %v1188_v17 = vmul.f32 %v4162_v43, %v4162_v43  ;;  %v4168_v36 = vpop.f32.mrb[6].mxu1  ;;  %v745_v3 = vadd.f32 %v744_v2, %v743_v26 }
 0x1ad   :  { %v1154_v49 = vadd.f32 %v1153_v61, %v1152_v4  ;;  %v4170_v40 = vpop.f32.mrb[7].mxu1  ;;  %v1191_v52 = vmul.f32 %v4168_v36, %v4168_v36  ;;  %v1211_v18 = vsel %vm676_vm10, %v1190_v59, 0.0  ;;  %v1159_v33 = vsel %vm676_vm10, %v4168_v36, 0.0 }
 0x1ae   :  { %v1207_v35 = vsel %vm676_vm10, %v1188_v17, 0.0  ;;  %v1155_v50 = vsel %vm676_vm10, %v4170_v40, 0.0  ;;  %v1189_v11 = vmul.f32 %v4170_v40, %v4170_v40 }
 0x1af   :  { %v1208_v31 = vadd.f32 %v1207_v35, %v1206_v63  ;;  %v1156_v51 = vadd.f32 %v1155_v50, %v1154_v49  ;;  %v1213_v54 = vsel %vm676_vm10, %v1191_v52, 0.0 }
 0x1b0   :  { %v1209_v28 = vsel %vm676_vm10, %v1189_v11, 0.0 }
 0x1b1   :  { %v1158_v62 = vadd.f32 %v1157_v23, %v1156_v51  ;;  %v1210_v13 = vadd.f32 %v1209_v28, %v1208_v31 }
 0x1b3   :  { %v1212_v24 = vadd.f32 %v1211_v18, %v1210_v13  ;;  %v1160_v1 = vadd.f32 %v1159_v33, %v1158_v62 }
 0x1b5   :  { %v1214_v0 = vadd.f32 %v1213_v54, %v1212_v24 }
 0x1b9   :  { %v4188_v5 = vpop.f32.mrb[8].mxu0 }
 0x1ba   :  { %v4190_v25 = vpop.f32.mrb[9].mxu0  ;;  %v725_v63 = vmul.f32 %v4188_v5, %v4188_v5  ;;  %v696_v30 = vsel %vm676_vm10, %v4188_v5, 0.0 }
 0x1bb   :  { %v692_v20 = vsel %vm676_vm10, %v4190_v25, 0.0  ;;  %v723_v16 = vmul.f32 %v4190_v25, %v4190_v25  ;;  %v4196_v34 = vpop.f32.mrb[10].mxu0 }
 0x1bc   :  { %v693_v4 = vadd.f32 %v692_v20, %v691_v45  ;;  %v4198_v41 = vpop.f32.mrb[11].mxu0  ;;  %v726_v60 = vmul.f32 %v4196_v34, %v4196_v34  ;;  %v750_v21 = vsel %vm676_vm10, %v725_v63, 0.0  ;;  %v698_v14 = vsel %vm676_vm10, %v4196_v34, 0.0 }
 0x1bd   :  { %v746_v57 = vsel %vm676_vm10, %v723_v16, 0.0  ;;  %v694_v37 = vsel %vm676_vm10, %v4198_v41, 0.0  ;;  %v724_v7 = vmul.f32 %v4198_v41, %v4198_v41 }
 0x1be   :  { %v747_v42 = vadd.f32 %v746_v57, %v745_v3  ;;  %v695_v32 = vadd.f32 %v694_v37, %v693_v4  ;;  %v752_v39 = vsel %vm676_vm10, %v726_v60, 0.0 }
 0x1bf   :  { %v748_v38 = vsel %vm676_vm10, %v724_v7, 0.0 }
 0x1c0   :  { %v697_v47 = vadd.f32 %v696_v30, %v695_v32  ;;  %v749_v6 = vadd.f32 %v748_v38, %v747_v42 }
 0x1c2   :  { %v751_v46 = vadd.f32 %v750_v21, %v749_v6  ;;  %v4215_v22 = vpop.f32.mrb[8].mxu1  ;;  %v699_v8 = vadd.f32 %v698_v14, %v697_v47 }
 0x1c3   :  { %v4218_v26 = vpop.f32.mrb[9].mxu1  ;;  %v1194_v59 = vmul.f32 %v4215_v22, %v4215_v22  ;;  %v1165_v23 = vsel %vm676_vm10, %v4215_v22, 0.0 }
 0x1c4   :  { %v1161_v45 = vsel %vm676_vm10, %v4218_v26, 0.0  ;;  %v1192_v2 = vmul.f32 %v4218_v26, %v4218_v26  ;;  %v4224_v61 = vpop.f32.mrb[10].mxu1  ;;  %v753_v17 = vadd.f32 %v752_v39, %v751_v46 }
 0x1c5   :  { %v1162_v3 = vadd.f32 %v1161_v45, %v1160_v1  ;;  %v4226_v49 = vpop.f32.mrb[11].mxu1  ;;  %v1195_v52 = vmul.f32 %v4224_v61, %v4224_v61  ;;  %v1219_v18 = vsel %vm676_vm10, %v1194_v59, 0.0  ;;  %v1167_v33 = vsel %vm676_vm10, %v4224_v61, 0.0 }
 0x1c6   :  { %v1215_v35 = vsel %vm676_vm10, %v1192_v2, 0.0  ;;  %v1163_v50 = vsel %vm676_vm10, %v4226_v49, 0.0  ;;  %v1193_v11 = vmul.f32 %v4226_v49, %v4226_v49 }
 0x1c7   :  { %v1216_v31 = vadd.f32 %v1215_v35, %v1214_v0  ;;  %v1164_v51 = vadd.f32 %v1163_v50, %v1162_v3  ;;  %v1221_v54 = vsel %vm676_vm10, %v1195_v52, 0.0 }
 0x1c8   :  { %v1217_v28 = vsel %vm676_vm10, %v1193_v11, 0.0 }
 0x1c9   :  { %v1166_v62 = vadd.f32 %v1165_v23, %v1164_v51  ;;  %v1218_v13 = vadd.f32 %v1217_v28, %v1216_v31 }
 0x1cb   :  { %v1220_v24 = vadd.f32 %v1219_v18, %v1218_v13  ;;  %v1168_v1 = vadd.f32 %v1167_v33, %v1166_v62 }
 0x1cd   :  { %v1222_v0 = vadd.f32 %v1221_v54, %v1220_v24 }
 0x1d1   :  { %v4244_v20 = vpop.f32.mrb[12].mxu0 }
 0x1d2   :  { %v4246_v16 = vpop.f32.mrb[13].mxu0  ;;  %v729_v42 = vmul.f32 %v4244_v20, %v4244_v20  ;;  %v704_v6 = vsel %vm676_vm10, %v4244_v20, 0.0 }
 0x1d3   :  { %v700_v4 = vsel %vm676_vm10, %v4246_v16, 0.0  ;;  %v727_v63 = vmul.f32 %v4246_v16, %v4246_v16  ;;  %v4252_v57 = vpop.f32.mrb[14].mxu0 }
 0x1d4   :  { %v701_v37 = vadd.f32 %v700_v4, %v699_v8  ;;  %v4254_v7 = vpop.f32.mrb[15].mxu0  ;;  %v730_v21 = vmul.f32 %v4252_v57, %v4252_v57  ;;  %v758_v39 = vsel %vm676_vm10, %v729_v42, 0.0  ;;  %v706_v45 = vsel %vm676_vm10, %v4252_v57, 0.0 }
 0x1d5   :  { %v754_v32 = vsel %vm676_vm10, %v727_v63, 0.0  ;;  %v702_v30 = vsel %vm676_vm10, %v4254_v7, 0.0  ;;  %v728_v60 = vmul.f32 %v4254_v7, %v4254_v7 }
 0x1d6   :  { %v755_v38 = vadd.f32 %v754_v32, %v753_v17  ;;  %v703_v47 = vadd.f32 %v702_v30, %v701_v37  ;;  %v760_v17 = vsel %vm676_vm10, %v730_v21, 0.0 }
 0x1d7   :  { %v756_v14 = vsel %vm676_vm10, %v728_v60, 0.0 }
 0x1d8   :  { %v705_v46 = vadd.f32 %v704_v6, %v703_v47  ;;  %v757_v8 = vadd.f32 %v756_v14, %v755_v38 }
 0x1da   :  { %v707_v2 = vadd.f32 %v706_v45, %v705_v46  ;;  %v759_v3 = vadd.f32 %v758_v39, %v757_v8  ;;  %v4271_v59 = vpop.f32.mrb[12].mxu1 }
 0x1db   :  { %v4274_v35 = vpop.f32.mrb[13].mxu1  ;;  %v1198_v24 = vmul.f32 %v4271_v59, %v4271_v59 }
 0x1dc   :  { %v708_v50 = vrot.slane %v707_v2, 4  ;;  %v761_v11 = vadd.f32 %v760_v17, %v759_v3  ;;  %v1169_v31 = vsel %vm676_vm10, %v4274_v35, 0.0  ;;  %v1196_v51 = vmul.f32 %v4274_v35, %v4274_v35  ;;  %v4280_v23 = vpop.f32.mrb[14].mxu1 }
 0x1dd   :  { %v1170_v52 = vadd.f32 %v1169_v31, %v1168_v1  ;;  %v4282_v28 = vpop.f32.mrb[15].mxu1  ;;  %v1173_v1 = vsel %vm676_vm10, %v4271_v59, 0.0  ;;  %v1199_v42 = vmul.f32 %v4280_v23, %v4280_v23  ;;  %v1175_v38 = vsel %vm676_vm10, %v4280_v23, 0.0 }
 0x1de   :  { %v709_v62 = vadd.f32 %v708_v50, %v707_v2  ;;  %v762_v13 = vrot.slane %v761_v11, 4  ;;  %v1223_v18 = vsel %vm676_vm10, %v1196_v51, 0.0  ;;  %v1171_v33 = vsel %vm676_vm10, %v4282_v28, 0.0 }
 0x1df   :  { %v1224_v54 = vadd.f32 %v1223_v18, %v1222_v0  ;;  %v1172_v4 = vadd.f32 %v1171_v33, %v1170_v52  ;;  %v1197_v63 = vmul.f32 %v4282_v28, %v4282_v28  ;;  %v1227_v0 = vsel %vm676_vm10, %v1198_v24, 0.0 }
 0x1e0   :  { %v710_v37 = vrot.slane %v709_v62, 2  ;;  %v763_v60 = vadd.f32 %v762_v13, %v761_v11  ;;  %v1229_v46 = vsel %vm676_vm10, %v1199_v42, 0.0 }
 0x1e1   :  { %v1174_v32 = vadd.f32 %v1173_v1, %v1172_v4  ;;  %v1225_v30 = vsel %vm676_vm10, %v1197_v63, 0.0 }
 0x1e2   :  { %v1226_v47 = vadd.f32 %v1225_v30, %v1224_v54  ;;  %v711_v21 = vadd.f32 %v710_v37, %v709_v62  ;;  %v764_v39 = vrot.slane %v763_v60, 2 }
 0x1e3   :  { %v1176_v6 = vadd.f32 %v1175_v38, %v1174_v32 }
 0x1e4   :  { %v1228_v14 = vadd.f32 %v1227_v0, %v1226_v47  ;;  %v712_v3 = vrot.slane %v711_v21, 1  ;;  %v765_v11 = vadd.f32 %v764_v39, %v763_v60 }
 0x1e5   :  { %v1177_v8 = vrot.slane %v1176_v6, 4 }
 0x1e6   :  { %v1230_v45 = vadd.f32 %v1229_v46, %v1228_v14  ;;  %v713_v33 = vadd.f32 %v712_v3, %v711_v21  ;;  %v766_v32 = vrot.slane %v765_v11, 1 }
 0x1e7   :  { %v1178_v2 = vadd.f32 %v1177_v8, %v1176_v6 }
 0x1e8   :  { %v1231_v17 = vrot.slane %v1230_v45, 4  ;;  %v767_v3 = vadd.f32 %v766_v32, %v765_v11 }
 0x1e9   :  { %v1179_v50 = vrot.slane %v1178_v2, 2  ;;  %v4300_v31 = vpop.f32.mrb[16].mxu0 }
 0x1ea   :  { %v1232_v51 = vadd.f32 %v1231_v17, %v1230_v45  ;;  %v4302_v52 = vpop.f32.mrb[17].mxu0  ;;  %v1566_v54 = vmul.f32 %v4300_v31, %v4300_v31  ;;  %v1529_v60 = vsel %vm676_vm10, %v4300_v31, 0.0 }
 0x1eb   :  { %v1180_v13 = vadd.f32 %v1179_v50, %v1178_v2  ;;  %v1564_v62 = vmul.f32 %v4302_v52, %v4302_v52  ;;  %v4306_v18 = vpop.f32.mrb[18].mxu0  ;;  %v1526_v37 = vsel %vm676_vm10, %v4302_v52, 0.0 }
 0x1ec   :  { %v1233_v24 = vrot.slane %v1232_v51, 2  ;;  %v4310_v4 = vpop.f32.mrb[19].mxu0  ;;  %v1567_v6 = vmul.f32 %v4306_v18, %v4306_v18  ;;  %v1583_v45 = vsel %vm676_vm10, %v1566_v54, 0.0  ;;  %v1531_v2 = vsel %vm676_vm10, %v4306_v18, 0.0 }
 0x1ed   :  { %v1181_v63 = vrot.slane %v1180_v13, 1  ;;  %v1527_v1 = vsel %vm676_vm10, %v4310_v4, 0.0  ;;  %v1565_v42 = vmul.f32 %v4310_v4, %v4310_v4  ;;  %v1580_v0 = vsel %vm676_vm10, %v1564_v62, 0.0 }
 0x1ee   :  { %v1234_v30 = vadd.f32 %v1233_v24, %v1232_v51  ;;  %v1528_v38 = vadd.f32 %v1527_v1, %v1526_v37  ;;  %v1585_v62 = vsel %vm676_vm10, %v1567_v6, 0.0 }
 0x1ef   :  { %v1182_v47 = vadd.f32 %v1181_v63, %v1180_v13  ;;  %v1581_v21 = vsel %vm676_vm10, %v1565_v42, 0.0 }
 0x1f0   :  { %v1235_v14 = vrot.slane %v1234_v30, 1  ;;  %v1530_v46 = vadd.f32 %v1529_v60, %v1528_v38  ;;  %v1582_v8 = vadd.f32 %v1581_v21, %v1580_v0 }
 0x1f1   :  { %v4324_v39 = vadd.f32 %v1182_v47, %v713_v33 }
 0x1f2   :  { %v1236_v17 = vadd.f32 %v1235_v14, %v1234_v30  ;;  %v1584_v50 = vadd.f32 %v1583_v45, %v1582_v8  ;;  %v4329_v51 = vpop.f32.mrb[16].mxu1  ;;  %v1532_v13 = vadd.f32 %v1531_v2, %v1530_v46 }
 0x1f3   :  { %5080 = vst [vmem:[#allocation14_spill] sm:$0xff] %v4329_v51  ;;  %v4332_v24 = vpop.f32.mrb[17].mxu1  ;;  %v1922_v11 = vmul.f32 %v4329_v51, %v4329_v51  ;;  %v1885_v38 = vsel %vm676_vm10, %v4329_v51, 0.0 }
 0x1f4   :  { %5081 = vst [vmem:[#allocation15_spill] sm:$0xff] %v4332_v24  ;;  %v4334_v63 = vadd.f32 %v1236_v17, %v767_v3  ;;  %v1920_v33 = vmul.f32 %v4332_v24, %v4332_v24  ;;  %v4338_v37 = vpop.f32.mrb[18].mxu1  ;;  %v1586_v54 = vadd.f32 %v1585_v62, %v1584_v50  ;;  %v1882_v42 = vsel %vm676_vm10, %v4332_v24, 0.0 }
 0x1f5   :  { %5082 = vst [vmem:[#allocation20_spill] sm:$0xff] %v4338_v37  ;;  %v4340_v1 = vpop.f32.mrb[19].mxu1  ;;  %v1923_v0 = vmul.f32 %v4338_v37, %v4338_v37  ;;  %v1939_v46 = vsel %vm676_vm10, %v1922_v11, 0.0  ;;  %v1887_v8 = vsel %vm676_vm10, %v4338_v37, 0.0 }
 0x1f6   :  { %5083 = vst [vmem:[#allocation11_spill] sm:$0xff] %v4340_v1  ;;  %v1883_v32 = vsel %vm676_vm10, %v4340_v1, 0.0  ;;  %v1921_v30 = vmul.f32 %v4340_v1, %v4340_v1  ;;  %v1936_v47 = vsel %vm676_vm10, %v1920_v33, 0.0 }
 0x1f7   :  { %v1884_v60 = vadd.f32 %v1883_v32, %v1882_v42  ;;  %v1941_v3 = vsel %vm676_vm10, %v1923_v0, 0.0 }
 0x1f8   :  { %v1937_v6 = vsel %vm676_vm10, %v1921_v30, 0.0 }
 0x1f9   :  { %v1886_v21 = vadd.f32 %v1885_v38, %v1884_v60  ;;  %v1938_v14 = vadd.f32 %v1937_v6, %v1936_v47 }
 0x1fb   :  { %v1940_v45 = vadd.f32 %v1939_v46, %v1938_v14  ;;  %v1888_v2 = vadd.f32 %v1887_v8, %v1886_v21 }
 0x1fd   :  { %v1942_v17 = vadd.f32 %v1941_v3, %v1940_v45 }
 0x201   :  { %v4360_v50 = vpop.f32.mrb[20].mxu0 }
 0x202   :  { %5084 = vst [vmem:[#allocation12_spill] sm:$0xff] %v4360_v50  ;;  %v4362_v62 = vpop.f32.mrb[21].mxu0  ;;  %v1570_v60 = vmul.f32 %v4360_v50, %v4360_v50  ;;  %v1537_v14 = vsel %vm676_vm10, %v4360_v50, 0.0 }
 0x203   :  { %5085 = vst [vmem:[#allocation19_spill] sm:$0xff] %v4362_v62  ;;  %v1533_v33 = vsel %vm676_vm10, %v4362_v62, 0.0  ;;  %v1568_v42 = vmul.f32 %v4362_v62, %v4362_v62  ;;  %v4368_v32 = vpop.f32.mrb[22].mxu0 }
 0x204   :  { %5086 = vst [vmem:[#allocation17_spill] sm:$0xff] %v4368_v32  ;;  %v1534_v11 = vadd.f32 %v1533_v33, %v1532_v13  ;;  %v4370_v30 = vpop.f32.mrb[23].mxu0  ;;  %v1571_v13 = vmul.f32 %v4368_v32, %v4368_v32  ;;  %v1591_v3 = vsel %vm676_vm10, %v1570_v60, 0.0  ;;  %v1539_v33 = vsel %vm676_vm10, %v4368_v32, 0.0 }
 0x205   :  { %5087 = vst [vmem:[#allocation8_spill] sm:$0xff] %v4370_v30  ;;  %v1587_v38 = vsel %vm676_vm10, %v1568_v42, 0.0  ;;  %v1535_v47 = vsel %vm676_vm10, %v4370_v30, 0.0  ;;  %v1569_v0 = vmul.f32 %v4370_v30, %v4370_v30 }
 0x206   :  { %v1588_v6 = vadd.f32 %v1587_v38, %v1586_v54  ;;  %v1536_v21 = vadd.f32 %v1535_v47, %v1534_v11  ;;  %v1593_v11 = vsel %vm676_vm10, %v1571_v13, 0.0 }
 0x207   :  { %v1589_v46 = vsel %vm676_vm10, %v1569_v0, 0.0 }
 0x208   :  { %v1538_v8 = vadd.f32 %v1537_v14, %v1536_v21  ;;  %v1590_v45 = vadd.f32 %v1589_v46, %v1588_v6 }
 0x20a   :  { %v1592_v42 = vadd.f32 %v1591_v3, %v1590_v45  ;;  %v4387_v37 = vpop.f32.mrb[20].mxu1  ;;  %v1540_v54 = vadd.f32 %v1539_v33, %v1538_v8 }
 0x20b   :  { %5088 = vst [vmem:[#allocation9_spill] sm:$0xff] %v4387_v37  ;;  %v4390_v38 = vpop.f32.mrb[21].mxu1  ;;  %v1926_v46 = vmul.f32 %v4387_v37, %v4387_v37 }
 0x20c   :  { %5089 = vst [vmem:[#allocation13_spill] sm:$0xff] %v4390_v38  ;;  %v1889_v47 = vsel %vm676_vm10, %v4390_v38, 0.0  ;;  %v1924_v0 = vmul.f32 %v4390_v38, %v4390_v38  ;;  %v4396_v6 = vpop.f32.mrb[22].mxu1  ;;  %v1594_v60 = vadd.f32 %v1593_v11, %v1592_v42  ;;  %v1893_v38 = vsel %vm676_vm10, %v4387_v37, 0.0 }
 0x20d   :  { %5090 = vst [vmem:[#allocation10_spill] sm:$0xff] %v4396_v6  ;;  %v1890_v21 = vadd.f32 %v1889_v47, %v1888_v2  ;;  %v4398_v14 = vpop.f32.mrb[23].mxu1  ;;  %v1927_v2 = vmul.f32 %v4396_v6, %v4396_v6  ;;  %v1895_v51 = vsel %vm676_vm10, %v4396_v6, 0.0 }
 0x20e   :  { %5091 = vst [vmem:[#allocation18_spill] sm:$0xff] %v4398_v14  ;;  %v1943_v8 = vsel %vm676_vm10, %v1924_v0, 0.0  ;;  %v1891_v13 = vsel %vm676_vm10, %v4398_v14, 0.0  ;;  %v1925_v45 = vmul.f32 %v4398_v14, %v4398_v14  ;;  %v1947_v0 = vsel %vm676_vm10, %v1926_v46, 0.0 }
 0x20f   :  { %v1944_v3 = vadd.f32 %v1943_v8, %v1942_v17  ;;  %v1892_v33 = vadd.f32 %v1891_v13, %v1890_v21  ;;  %v1949_v17 = vsel %vm676_vm10, %v1927_v2, 0.0 }
 0x210   :  { %v1945_v42 = vsel %vm676_vm10, %v1925_v45, 0.0 }
 0x211   :  { %v1894_v11 = vadd.f32 %v1893_v38, %v1892_v33  ;;  %v1946_v47 = vadd.f32 %v1945_v42, %v1944_v3 }
 0x213   :  { %v1948_v1 = vadd.f32 %v1947_v0, %v1946_v47  ;;  %v1896_v24 = vadd.f32 %v1895_v51, %v1894_v11 }
 0x215   :  { %v1950_v21 = vadd.f32 %v1949_v17, %v1948_v1 }
 0x219   :  { %v4416_v8 = vpop.f32.mrb[24].mxu0 }
 0x21a   :  { %5092 = vst [vmem:[#allocation16_spill] sm:$0xff] %v4416_v8  ;;  %v4418_v13 = vpop.f32.mrb[25].mxu0  ;;  %v1574_v51 = vmul.f32 %v4416_v8, %v4416_v8  ;;  %v1545_v47 = vsel %vm676_vm10, %v4416_v8, 0.0 }
 0x21b   :  { %5093 = vst [vmem:[#allocation21_spill] sm:$0xff] %v4418_v13  ;;  %v1541_v37 = vsel %vm676_vm10, %v4418_v13, 0.0  ;;  %v1572_v38 = vmul.f32 %v4418_v13, %v4418_v13  ;;  %v4424_v45 = vpop.f32.mrb[26].mxu0 }
 0x21c   :  { %5094 = vst [vmem:[#allocation22_spill] sm:$0xff] %v4424_v45  ;;  %v1542_v46 = vadd.f32 %v1541_v37, %v1540_v54  ;;  %v4426_v3 = vpop.f32.mrb[27].mxu0  ;;  %v1575_v37 = vmul.f32 %v4424_v45, %v4424_v45  ;;  %v1547_v6 = vsel %vm676_vm10, %v4424_v45, 0.0 }
 0x21d   :  { %5095 = vst [vmem:[#allocation23_spill] sm:$0xff] %v4426_v3  ;;  %v1595_v1 = vsel %vm676_vm10, %v1572_v38, 0.0  ;;  %v1543_v33 = vsel %vm676_vm10, %v4426_v3, 0.0  ;;  %v1573_v2 = vmul.f32 %v4426_v3, %v4426_v3  ;;  %v1599_v38 = vsel %vm676_vm10, %v1574_v51, 0.0 }
 0x21e   :  { %v1596_v42 = vadd.f32 %v1595_v1, %v1594_v60  ;;  %v1544_v11 = vadd.f32 %v1543_v33, %v1542_v46  ;;  %v1601_v46 = vsel %vm676_vm10, %v1575_v37, 0.0 }
 0x21f   :  { %v1597_v54 = vsel %vm676_vm10, %v1573_v2, 0.0 }
 0x220   :  { %v1546_v0 = vadd.f32 %v1545_v47, %v1544_v11  ;;  %v1598_v17 = vadd.f32 %v1597_v54, %v1596_v42 }
 0x222   :  { %v1600_v14 = vadd.f32 %v1599_v38, %v1598_v17  ;;  %v4443_v13 = vpop.f32.mrb[24].mxu1  ;;  %v1548_v60 = vadd.f32 %v1547_v6, %v1546_v0 }
 0x223   :  { %5096 = vst [vmem:[#allocation24_spill] sm:$0xff] %v4443_v13  ;;  %v4446_v1 = vpop.f32.mrb[25].mxu1  ;;  %v1930_v54 = vmul.f32 %v4443_v13, %v4443_v13 }
 0x224   :  { %5097 = vst [vmem:[#allocation25_spill] sm:$0xff] %v4446_v1  ;;  %v1897_v33 = vsel %vm676_vm10, %v4446_v1, 0.0  ;;  %v1928_v2 = vmul.f32 %v4446_v1, %v4446_v1  ;;  %v4452_v42 = vpop.f32.mrb[26].mxu1  ;;  %v1602_v51 = vadd.f32 %v1601_v46, %v1600_v14  ;;  %v1901_v1 = vsel %vm676_vm10, %v4443_v13, 0.0 }
 0x225   :  { %5098 = vst [vmem:[#allocation26_spill] sm:$0xff] %v4452_v42  ;;  %v1898_v11 = vadd.f32 %v1897_v33, %v1896_v24  ;;  %v4454_v47 = vpop.f32.mrb[27].mxu1  ;;  %v1931_v24 = vmul.f32 %v4452_v42, %v4452_v42  ;;  %v1903_v45 = vsel %vm676_vm10, %v4452_v42, 0.0 }
 0x226   :  { %5099 = vst [vmem:[#allocation27_spill] sm:$0xff] %v4454_v47  ;;  %v1951_v6 = vsel %vm676_vm10, %v1928_v2, 0.0  ;;  %v1899_v37 = vsel %vm676_vm10, %v4454_v47, 0.0  ;;  %v1929_v0 = vmul.f32 %v4454_v47, %v4454_v47  ;;  %v1955_v2 = vsel %vm676_vm10, %v1930_v54, 0.0 }
 0x227   :  { %v1952_v17 = vadd.f32 %v1951_v6, %v1950_v21  ;;  %v1900_v38 = vadd.f32 %v1899_v37, %v1898_v11  ;;  %v1957_v21 = vsel %vm676_vm10, %v1931_v24, 0.0 }
 0x228   :  { %v1953_v14 = vsel %vm676_vm10, %v1929_v0, 0.0 }
 0x229   :  { %v1902_v46 = vadd.f32 %v1901_v1, %v1900_v38  ;;  %v1954_v33 = vadd.f32 %v1953_v14, %v1952_v17 }
 0x22b   :  { %v1956_v8 = vadd.f32 %v1955_v2, %v1954_v33  ;;  %v1904_v3 = vadd.f32 %v1903_v45, %v1902_v46 }
 0x22d   :  { %v1958_v11 = vadd.f32 %v1957_v21, %v1956_v8 }
 0x231   :  { %v4472_v6 = vpop.f32.mrb[28].mxu0 }
 0x232   :  { %5100 = vst [vmem:[#allocation28_spill] sm:$0xff] %v4472_v6  ;;  %v4474_v37 = vpop.f32.mrb[29].mxu0  ;;  %v1578_v45 = vmul.f32 %v4472_v6, %v4472_v6  ;;  %v1553_v33 = vsel %vm676_vm10, %v4472_v6, 0.0 }
 0x233   :  { %5101 = vst [vmem:[#allocation29_spill] sm:$0xff] %v4474_v37  ;;  %v1549_v13 = vsel %vm676_vm10, %v4474_v37, 0.0  ;;  %v1576_v1 = vmul.f32 %v4474_v37, %v4474_v37  ;;  %v4480_v0 = vpop.f32.mrb[30].mxu0 }
 0x234   :  { %5102 = vst [vmem:[#allocation30_spill] sm:$0xff] %v4480_v0  ;;  %v1550_v54 = vadd.f32 %v1549_v13, %v1548_v60  ;;  %v4482_v17 = vpop.f32.mrb[31].mxu0  ;;  %v1579_v13 = vmul.f32 %v4480_v0, %v4480_v0  ;;  %v1555_v42 = vsel %vm676_vm10, %v4480_v0, 0.0 }
 0x235   :  { %5103 = vst [vmem:[#allocation31_spill] sm:$0xff] %v4482_v17  ;;  %v1603_v8 = vsel %vm676_vm10, %v1576_v1, 0.0  ;;  %v1551_v38 = vsel %vm676_vm10, %v4482_v17, 0.0  ;;  %v1577_v24 = vmul.f32 %v4482_v17, %v4482_v17  ;;  %v1607_v1 = vsel %vm676_vm10, %v1578_v45, 0.0 }
 0x236   :  { %v1604_v14 = vadd.f32 %v1603_v8, %v1602_v51  ;;  %v1552_v46 = vadd.f32 %v1551_v38, %v1550_v54  ;;  %v1609_v51 = vsel %vm676_vm10, %v1579_v13, 0.0 }
 0x237   :  { %v1605_v60 = vsel %vm676_vm10, %v1577_v24, 0.0 }
 0x238   :  { %v1554_v2 = vadd.f32 %v1553_v33, %v1552_v46  ;;  %v1606_v21 = vadd.f32 %v1605_v60, %v1604_v14 }
 0x23a   :  { %v1556_v47 = vadd.f32 %v1555_v42, %v1554_v2  ;;  %v1608_v37 = vadd.f32 %v1607_v1, %v1606_v21  ;;  %v4499_v17 = vpop.f32.mrb[28].mxu1 }
 0x23b   :  { %5104 = vst [vmem:[#allocation32_spill] sm:$0xff] %v4499_v17  ;;  %v4502_v54 = vpop.f32.mrb[29].mxu1 }
 0x23c   :  { %5105 = vst [vmem:[#allocation33_spill] sm:$0xff] %v4502_v54  ;;  %v1557_v8 = vrot.slane %v1556_v47, 4  ;;  %v1610_v38 = vadd.f32 %v1609_v51, %v1608_v37  ;;  %v1905_v24 = vsel %vm676_vm10, %v4502_v54, 0.0  ;;  %v1932_v14 = vmul.f32 %v4502_v54, %v4502_v54  ;;  %v4508_v45 = vpop.f32.mrb[30].mxu1 }
 0x23d   :  { %v1906_v46 = vadd.f32 %v1905_v24, %v1904_v3  ;;  %v4510_v33 = vpop.f32.mrb[31].mxu1  ;;  %v1934_v37 = vmul.f32 %v4499_v17, %v4499_v17  ;;  %v1909_v3 = vsel %vm676_vm10, %v4499_v17, 0.0 }
 0x23e   :  { %5106 = vst [vmem:[#allocation34_spill] sm:$0xff] %v4510_v33  ;;  %v1558_v42 = vadd.f32 %v1557_v8, %v1556_v47  ;;  %v1611_v60 = vrot.slane %v1610_v38, 4  ;;  %v1959_v2 = vsel %vm676_vm10, %v1932_v14, 0.0  ;;  %v1907_v13 = vsel %vm676_vm10, %v4510_v33, 0.0 }
 0x23f   :  { %v1960_v21 = vadd.f32 %v1959_v2, %v1958_v11  ;;  %v1908_v1 = vadd.f32 %v1907_v13, %v1906_v46  ;;  %v1933_v51 = vmul.f32 %v4510_v33, %v4510_v33  ;;  %v1935_v47 = vmul.f32 %v4508_v45, %v4508_v45 }
 0x240   :  { %v1559_v54 = vrot.slane %v1558_v42, 2  ;;  %v1612_v0 = vadd.f32 %v1611_v60, %v1610_v38  ;;  %v1911_v11 = vsel %vm676_vm10, %v4508_v45, 0.0  ;;  %v1963_v2 = vsel %vm676_vm10, %v1934_v37, 0.0 }
 0x241   :  { %v1910_v8 = vadd.f32 %v1909_v3, %v1908_v1  ;;  %v1961_v24 = vsel %vm676_vm10, %v1933_v51, 0.0  ;;  %v1965_v17 = vsel %vm676_vm10, %v1935_v47, 0.0 }
 0x242   :  { %v1560_v14 = vadd.f32 %v1559_v54, %v1558_v42  ;;  %v1613_v6 = vrot.slane %v1612_v0, 2  ;;  %v1962_v46 = vadd.f32 %v1961_v24, %v1960_v21 }
 0x243   :  { %v1912_v13 = vadd.f32 %v1911_v11, %v1910_v8 }
 0x244   :  { %v1561_v33 = vrot.slane %v1560_v14, 1  ;;  %v1614_v38 = vadd.f32 %v1613_v6, %v1612_v0  ;;  %v1964_v60 = vadd.f32 %v1963_v2, %v1962_v46 }
 0x245   :  { %v1913_v32 = vrot.slane %v1912_v13, 4 }
 0x246   :  { %v1562_v50 = vadd.f32 %v1561_v33, %v1560_v14  ;;  %v1615_v30 = vrot.slane %v1614_v38, 1  ;;  %v1966_v1 = vadd.f32 %v1965_v17, %v1964_v60 }
 0x247   :  { %v1914_v3 = vadd.f32 %v1913_v32, %v1912_v13 }
 0x248   :  { %v1563_v54 = vadd.f32 %v1562_v50, %v4324_v39  ;;  %v1616_v42 = vadd.f32 %v1615_v30, %v1614_v38  ;;  %v1967_v51 = vrot.slane %v1966_v1, 4  ;;  %v1985_v50 = vlaneseq  ;;  %v1980_v38 = vld [vmem:[#allocation2] sm:$0x1] }
 0x249   :  { %v1915_v62 = vrot.slane %v1914_v3, 2 }
 0x24a   :  { %v1617_v21 = vadd.f32 %v1616_v42, %v4334_v63  ;;  %v1968_v24 = vadd.f32 %v1967_v51, %v1966_v1  ;;  %v1986_v30 = vshrl.u32 %v1985_v50, 7  ;;  %v1982_v1 = vld [vmem:[#allocation4] sm:$0x1] }
 0x24b   :  { %v1916_v37 = vadd.f32 %v1915_v62, %v1914_v3 }
 0x24c   :  { %v1969_v8 = vrot.slane %v1968_v24, 2  ;;  %v1987_v63 = vsub.s32 0, %v1986_v30 }
 0x24d   :  { %v1917_v11 = vrot.slane %v1916_v37, 1 }
 0x24e   :  { %v1970_v6 = vadd.f32 %v1969_v8, %v1968_v24 }
 0x24f   :  { %v1918_v0 = vadd.f32 %v1917_v11, %v1916_v37 }
 0x250   :  { %v1971_v46 = vrot.slane %v1970_v6, 1 }
 0x251   :  { %v1919_v47 = vadd.f32 %v1918_v0, %v1563_v54 }
 0x252   :  { %v1972_v2 = vadd.f32 %v1971_v46, %v1970_v6 }
 0x253   :  { %v1974_v33 = vmul.f32 0.001953125, %v1919_v47 }
 0x254   :  { %v1973_v14 = vadd.f32 %v1972_v2, %v1617_v21 }
 0x255   :  { %v1976_v17 = vmul.f32 %v1974_v33, %v1974_v33 }
 0x256   :  { %v1975_v32 = vmul.f32 0.001953125, %v1973_v14 }
 0x258   :  { %v1977_v13 = vsub.f32 %v1975_v32, %v1976_v17 }
 0x25a   :  { %v1978_v39 = vadd.f32 1e-05, %v1977_v13 }
 0x25c   :  { %3022 = vrsqrt.f32 %v1978_v39 }
 0x266   :  { %v3023_v60 = vpop.eup %3022 }
 0x267   :  { %v1981_v62 = vmul.f32 %v3023_v60, %v1980_v38 }
 0x269   :  { %v1983_v3 = vmul.f32 %v1981_v62, %v1974_v33  ;;  %v4530_v42 = vrot.slane %v1981_v62, %v1987_v63 }
 0x26b   :  { %v1984_v51 = vsub.f32 %v1982_v1, %v1983_v3  ;;  %v1989_v54 = vmul.f32 %v4530_v42, %v4078_v29  ;;  %v1990_v21 = vmul.f32 %v4530_v42, %v4084_v12  ;;  %v1991_v24 = vmul.f32 %v4076_v27, %v4530_v42 }
 0x26c   :  { %v1992_v37 = vmul.f32 %v4082_v19, %v4530_v42  ;;  %v1993_v8 = vmul.f32 %v4530_v42, %v4134_v53  ;;  %v1994_v11 = vmul.f32 %v4530_v42, %v4142_v56  ;;  %v1995_v6 = vmul.f32 %v4132_v55, %v4530_v42 }
 0x26d   :  { %v1996_v29 = vmul.f32 %v4140_v15, %v4530_v42  ;;  %v1997_v12 = vmul.f32 %v4530_v42, %v4190_v25  ;;  %v1998_v27 = vmul.f32 %v4530_v42, %v4198_v41  ;;  %v1999_v19 = vmul.f32 %v4188_v5, %v4530_v42 }
 0x26e   :  { %v2000_v53 = vmul.f32 %v4196_v34, %v4530_v42  ;;  %v2001_v56 = vmul.f32 %v4530_v42, %v4246_v16  ;;  %v2002_v55 = vmul.f32 %v4530_v42, %v4254_v7  ;;  %v2003_v15 = vmul.f32 %v4244_v20, %v4530_v42 }
 0x26f   :  { %v2004_v25 = vmul.f32 %v4252_v57, %v4530_v42  ;;  %v4564_v0 = vrot.slane %v1984_v51, %v1987_v63  ;;  %v4568_v5 = vmul.f32 %v4530_v42, %v4106_v44  ;;  %v4572_v34 = vmul.f32 %v4530_v42, %v4112_v48 }
 0x270   :  { %v4576_v41 = vmul.f32 %v4103_v10, %v4530_v42  ;;  %v4580_v20 = vmul.f32 %v4110_v9, %v4530_v42  ;;  %v4584_v16 = vmul.f32 %v4530_v42, %v4162_v43  ;;  %v4588_v44 = vmul.f32 %v4530_v42, %v4170_v40 }
 0x271   :  { %v2011_v48 = vadd.f32 %v4564_v0, %v1989_v54  ;;  %v2012_v57 = vadd.f32 %v4564_v0, %v1990_v21  ;;  %v2013_v7 = vadd.f32 %v4564_v0, %v1991_v24  ;;  %v2014_v10 = vadd.f32 %v4564_v0, %v1992_v37 }
 0x272   :  { %v2015_v46 = vadd.f32 %v4564_v0, %v1993_v8  ;;  %v2016_v9 = vadd.f32 %v4564_v0, %v1994_v11  ;;  %v2017_v47 = vadd.f32 %v4564_v0, %v1995_v6  ;;  %v2018_v43 = vadd.f32 %v4564_v0, %v1996_v29 }
 0x273   :  { %v2019_v2 = vadd.f32 %v4564_v0, %v1997_v12  ;;  %v2020_v40 = vadd.f32 %v4564_v0, %v1998_v27  ;;  %v2021_v33 = vadd.f32 %v4564_v0, %v1999_v19  ;;  %v2022_v14 = vadd.f32 %v4564_v0, %v2000_v53 }
 0x274   :  { %v2023_v17 = vadd.f32 %v4564_v0, %v2001_v56  ;;  %v2024_v32 = vadd.f32 %v4564_v0, %v2002_v55  ;;  %v2025_v13 = vadd.f32 %v4564_v0, %v2003_v15  ;;  %v2026_v39 = vadd.f32 %v4564_v0, %v2004_v25 }
 0x275   :  { %v2027_v50 = vmax.f32 %v2011_v48, 0.0  ;;  %v2028_v30 = vmax.f32 %v2012_v57, 0.0  ;;  %v2029_v38 = vmax.f32 %v2013_v7, 0.0  ;;  %v2030_v63 = vmax.f32 %v2014_v10, 0.0 }
 0x276   :  { %v2031_v60 = vmax.f32 %v2015_v46, 0.0  ;;  %v2032_v62 = vmax.f32 %v2016_v9, 0.0  ;;  %v2033_v1 = vmax.f32 %v2017_v47, 0.0  ;;  %v2034_v3 = vmax.f32 %v2018_v43, 0.0 }
 0x277   :  { %v2035_v51 = vmax.f32 %v2019_v2, 0.0  ;;  %v2036_v54 = vmax.f32 %v2020_v40, 0.0  ;;  %v2037_v21 = vmax.f32 %v2021_v33, 0.0  ;;  %v2038_v24 = vmax.f32 %v2022_v14, 0.0 }
 0x278   :  { %v2039_v37 = vmax.f32 %v2023_v17, 0.0  ;;  %v2040_v8 = vmax.f32 %v2024_v32, 0.0  ;;  %v2041_v11 = vmax.f32 %v2025_v13, 0.0  ;;  %v2042_v6 = vmax.f32 %v2026_v39, 0.0 }
 0x279   :  { %v2775_v29 = vpack.c.bf16 %v2027_v50, %v2027_v50  ;;  %v2776_v12 = vpack.c.bf16 %v2028_v30, %v2028_v30  ;;  %v2777_v27 = vpack.c.bf16 %v2029_v38, %v2029_v38  ;;  %v2778_v19 = vpack.c.bf16 %v2030_v63, %v2030_v63 }
 0x27a   :  { %v2779_v53 = vpack.c.bf16 %v2031_v60, %v2031_v60  ;;  %v2780_v56 = vpack.c.bf16 %v2032_v62, %v2032_v62  ;;  %v2781_v55 = vpack.c.bf16 %v2033_v1, %v2033_v1  ;;  %v2782_v15 = vpack.c.bf16 %v2034_v3, %v2034_v3 }
 0x27b   :  { %v2783_v25 = vpack.c.bf16 %v2035_v51, %v2035_v51  ;;  %v2784_v48 = vpack.c.bf16 %v2036_v54, %v2036_v54  ;;  %v2785_v57 = vpack.c.bf16 %v2037_v21, %v2037_v21  ;;  %v2786_v7 = vpack.c.bf16 %v2038_v24, %v2038_v24  ;;  %2108 = vst.msk [vmem:[%s5004_s4] sm:$0xf] %vm2107_vm11, %v2775_v29 }
 0x27c   :  { %2109 = vst.msk [vmem:[%s5004_s4 + $0x4] sm:$0xf] %vm2107_vm11, %v2776_v12  ;;  %2110 = vst.msk [vmem:[%s5004_s4 + $0x8] sm:$0xf] %vm2107_vm11, %v2777_v27  ;;  %v2787_v10 = vpack.c.bf16 %v2039_v37, %v2039_v37  ;;  %v2788_v46 = vpack.c.bf16 %v2040_v8, %v2040_v8  ;;  %v2789_v9 = vpack.c.bf16 %v2041_v11, %v2041_v11 }
 0x27d   :  { %2111 = vst.msk [vmem:[%s5004_s4 + $0xc] sm:$0xf] %vm2107_vm11, %v2778_v19  ;;  %v2790_v47 = vpack.c.bf16 %v2042_v6, %v2042_v6  ;;  %2112 = vst.msk [vmem:[%s5004_s4 + $0x10] sm:$0xf] %vm2107_vm11, %v2779_v53  ;;  %v2130_v43 = vmul.f32 %v4159_v58, %v4530_v42  ;;  %v2131_v2 = vmul.f32 %v4168_v36, %v4530_v42 }
 0x27e   :  { %2113 = vst.msk [vmem:[%s5004_s4 + $0x14] sm:$0xf] %vm2107_vm11, %v2780_v56  ;;  %2114 = vst.msk [vmem:[%s5004_s4 + $0x18] sm:$0xf] %vm2107_vm11, %v2781_v55  ;;  %v2132_v40 = vmul.f32 %v4530_v42, %v4218_v26  ;;  %v2133_v33 = vmul.f32 %v4530_v42, %v4226_v49  ;;  %v2134_v58 = vmul.f32 %v4215_v22, %v4530_v42 }
 0x27f   :  { %2115 = vst.msk [vmem:[%s5004_s4 + $0x1c] sm:$0xf] %vm2107_vm11, %v2782_v15  ;;  %2116 = vst.msk [vmem:[%s5004_s4 + $0x20] sm:$0xf] %vm2107_vm11, %v2783_v25  ;;  %v2135_v36 = vmul.f32 %v4224_v61, %v4530_v42  ;;  %v2136_v26 = vmul.f32 %v4530_v42, %v4274_v35  ;;  %v2137_v49 = vmul.f32 %v4530_v42, %v4282_v28 }
 0x280   :  { %2117 = vst.msk [vmem:[%s5004_s4 + $0x24] sm:$0xf] %vm2107_vm11, %v2784_v48  ;;  %2118 = vst.msk [vmem:[%s5004_s4 + $0x28] sm:$0xf] %vm2107_vm11, %v2785_v57  ;;  %v2138_v14 = vmul.f32 %v4271_v59, %v4530_v42  ;;  %v2139_v17 = vmul.f32 %v4280_v23, %v4530_v42  ;;  %v2140_v32 = vadd.f32 %v4568_v5, %v4564_v0 }
 0x281   :  { %2119 = vst.msk [vmem:[%s5004_s4 + $0x2c] sm:$0xf] %vm2107_vm11, %v2786_v7  ;;  %2120 = vst.msk [vmem:[%s5004_s4 + $0x30] sm:$0xf] %vm2107_vm11, %v2787_v10  ;;  %v2141_v22 = vadd.f32 %v4572_v34, %v4564_v0  ;;  %v2142_v61 = vadd.f32 %v4576_v41, %v4564_v0  ;;  %v2143_v35 = vadd.f32 %v4580_v20, %v4564_v0 }
 0x282   :  { %2121 = vst.msk [vmem:[%s5004_s4 + $0x34] sm:$0xf] %vm2107_vm11, %v2788_v46  ;;  %2122 = vst.msk [vmem:[%s5004_s4 + $0x38] sm:$0xf] %vm2107_vm11, %v2789_v9  ;;  %v2144_v28 = vadd.f32 %v4584_v16, %v4564_v0  ;;  %v2145_v59 = vadd.f32 %v4588_v44, %v4564_v0  ;;  %v2146_v23 = vadd.f32 %v2130_v43, %v4564_v0  ;;  %v2156_v30 = vmax.f32 %v2140_v32, 0.0 }
 0x283   :  { %2123 = vst.msk [vmem:[%s5004_s4 + $0x3c] sm:$0xf] %vm2107_vm11, %v2790_v47  ;;  %v2147_v13 = vadd.f32 %v2131_v2, %v4564_v0  ;;  %v2148_v5 = vadd.f32 %v2132_v40, %v4564_v0  ;;  %v2149_v34 = vadd.f32 %v2133_v33, %v4564_v0  ;;  %v2150_v39 = vadd.f32 %v2134_v58, %v4564_v0  ;;  %v5107_v33 = vld [vmem:[#allocation19_spill] sm:$0xff] }
 0x284   :  { %v2151_v41 = vadd.f32 %v2135_v36, %v4564_v0  ;;  %v2152_v20 = vadd.f32 %v2136_v26, %v4564_v0  ;;  %v2153_v50 = vadd.f32 %v2137_v49, %v4564_v0  ;;  %v2154_v16 = vadd.f32 %v2138_v14, %v4564_v0  ;;  %v5108_v36 = vld [vmem:[#allocation8_spill] sm:$0xff] }
 0x285   :  { %v2155_v44 = vadd.f32 %v2139_v17, %v4564_v0  ;;  %v2157_v38 = vmax.f32 %v2141_v22, 0.0  ;;  %v2158_v63 = vmax.f32 %v2142_v61, 0.0  ;;  %v2159_v60 = vmax.f32 %v2143_v35, 0.0  ;;  %v5111_v17 = vld [vmem:[#allocation21_spill] sm:$0xff]  ;;  %v5112_v22 = vld [vmem:[#allocation23_spill] sm:$0xff]  ;;  %v5113_v35 = vld [vmem:[#allocation16_spill] sm:$0xff] }
 0x286   :  { %v2160_v62 = vmax.f32 %v2144_v28, 0.0  ;;  %v2161_v1 = vmax.f32 %v2145_v59, 0.0  ;;  %v2162_v3 = vmax.f32 %v2146_v23, 0.0  ;;  %v2163_v51 = vmax.f32 %v2147_v13, 0.0  ;;  %v5114_v59 = vld [vmem:[#allocation22_spill] sm:$0xff]  ;;  %v5115_v13 = vld [vmem:[#allocation29_spill] sm:$0xff] }
 0x287   :  { %v2164_v54 = vmax.f32 %v2148_v5, 0.0  ;;  %v2165_v21 = vmax.f32 %v2149_v34, 0.0  ;;  %v2166_v24 = vmax.f32 %v2150_v39, 0.0  ;;  %v2167_v37 = vmax.f32 %v2151_v41, 0.0  ;;  %v5116_v34 = vld [vmem:[#allocation31_spill] sm:$0xff]  ;;  %v5117_v41 = vld [vmem:[#allocation28_spill] sm:$0xff] }
 0x288   :  { %v2168_v8 = vmax.f32 %v2152_v20, 0.0  ;;  %v2169_v11 = vmax.f32 %v2153_v50, 0.0  ;;  %v2170_v6 = vmax.f32 %v2154_v16, 0.0  ;;  %v2171_v29 = vmax.f32 %v2155_v44, 0.0  ;;  %v5118_v50 = vld [vmem:[#allocation30_spill] sm:$0xff] }
 0x289   :  { %v2791_v12 = vpack.c.bf16 %v2156_v30, %v2156_v30  ;;  %v2792_v27 = vpack.c.bf16 %v2157_v38, %v2157_v38  ;;  %v2793_v19 = vpack.c.bf16 %v2158_v63, %v2158_v63  ;;  %v2794_v53 = vpack.c.bf16 %v2159_v60, %v2159_v60 }
 0x28a   :  { %v2795_v56 = vpack.c.bf16 %v2160_v62, %v2160_v62  ;;  %v2796_v55 = vpack.c.bf16 %v2161_v1, %v2161_v1  ;;  %v2797_v15 = vpack.c.bf16 %v2162_v3, %v2162_v3  ;;  %v2798_v25 = vpack.c.bf16 %v2163_v51, %v2163_v51 }
 0x28b   :  { %v2799_v48 = vpack.c.bf16 %v2164_v54, %v2164_v54  ;;  %v2800_v57 = vpack.c.bf16 %v2165_v21, %v2165_v21  ;;  %2695 = vst.msk [vmem:[%s5004_s4 + $0x40] sm:$0xf] %vm2107_vm11, %v2791_v12  ;;  %2696 = vst.msk [vmem:[%s5004_s4 + $0x44] sm:$0xf] %vm2107_vm11, %v2792_v27  ;;  %v2801_v7 = vpack.c.bf16 %v2166_v24, %v2166_v24 }
 0x28c   :  { %v2802_v10 = vpack.c.bf16 %v2167_v37, %v2167_v37  ;;  %v2803_v46 = vpack.c.bf16 %v2168_v8, %v2168_v8  ;;  %v2804_v9 = vpack.c.bf16 %v2169_v11, %v2169_v11  ;;  %2697 = vst.msk [vmem:[%s5004_s4 + $0x48] sm:$0xf] %vm2107_vm11, %v2793_v19  ;;  %2698 = vst.msk [vmem:[%s5004_s4 + $0x4c] sm:$0xf] %vm2107_vm11, %v2794_v53 }
 0x28d   :  { %2699 = vst.msk [vmem:[%s5004_s4 + $0x50] sm:$0xf] %vm2107_vm11, %v2795_v56  ;;  %2700 = vst.msk [vmem:[%s5004_s4 + $0x54] sm:$0xf] %vm2107_vm11, %v2796_v55  ;;  %v2805_v47 = vpack.c.bf16 %v2170_v6, %v2170_v6  ;;  %v2806_v43 = vpack.c.bf16 %v2171_v29, %v2171_v29  ;;  %v2253_v2 = vmul.f32 %v4530_v42, %v4302_v52 }
 0x28e   :  { %2701 = vst.msk [vmem:[%s5004_s4 + $0x58] sm:$0xf] %vm2107_vm11, %v2797_v15  ;;  %2702 = vst.msk [vmem:[%s5004_s4 + $0x5c] sm:$0xf] %vm2107_vm11, %v2798_v25  ;;  %v2254_v40 = vmul.f32 %v4530_v42, %v4310_v4  ;;  %v2255_v52 = vmul.f32 %v4300_v31, %v4530_v42  ;;  %v2256_v4 = vmul.f32 %v4306_v18, %v4530_v42  ;;  %v5109_v31 = vld [vmem:[#allocation12_spill] sm:$0xff]  ;;  %v5110_v18 = vld [vmem:[#allocation17_spill] sm:$0xff] }
 0x28f   :  { %2703 = vst.msk [vmem:[%s5004_s4 + $0x60] sm:$0xf] %vm2107_vm11, %v2799_v48  ;;  %2704 = vst.msk [vmem:[%s5004_s4 + $0x64] sm:$0xf] %vm2107_vm11, %v2800_v57  ;;  %v2257_v58 = vmul.f32 %v4530_v42, %v5107_v33  ;;  %v2258_v26 = vmul.f32 %v4530_v42, %v5108_v36  ;;  %v2259_v49 = vmul.f32 %v5109_v31, %v4530_v42 }
 0x290   :  { %2705 = vst.msk [vmem:[%s5004_s4 + $0x68] sm:$0xf] %vm2107_vm11, %v2801_v7  ;;  %2706 = vst.msk [vmem:[%s5004_s4 + $0x6c] sm:$0xf] %vm2107_vm11, %v2802_v10  ;;  %v2260_v14 = vmul.f32 %v5110_v18, %v4530_v42  ;;  %v2261_v32 = vmul.f32 %v4530_v42, %v5111_v17  ;;  %v2262_v61 = vmul.f32 %v4530_v42, %v5112_v22 }
 0x291   :  { %2707 = vst.msk [vmem:[%s5004_s4 + $0x70] sm:$0xf] %vm2107_vm11, %v2803_v46  ;;  %2708 = vst.msk [vmem:[%s5004_s4 + $0x74] sm:$0xf] %vm2107_vm11, %v2804_v9  ;;  %v2263_v28 = vmul.f32 %v5113_v35, %v4530_v42  ;;  %v2264_v23 = vmul.f32 %v5114_v59, %v4530_v42  ;;  %v2265_v5 = vmul.f32 %v4530_v42, %v5115_v13 }
 0x292   :  { %2709 = vst.msk [vmem:[%s5004_s4 + $0x78] sm:$0xf] %vm2107_vm11, %v2805_v47  ;;  %2710 = vst.msk [vmem:[%s5004_s4 + $0x7c] sm:$0xf] %vm2107_vm11, %v2806_v43  ;;  %v2266_v39 = vmul.f32 %v4530_v42, %v5116_v34  ;;  %v2267_v20 = vmul.f32 %v5117_v41, %v4530_v42  ;;  %v2268_v16 = vmul.f32 %v5118_v50, %v4530_v42 }
 0x293   :  { %v2269_v44 = vadd.f32 %v2253_v2, %v4564_v0  ;;  %v2270_v30 = vadd.f32 %v2254_v40, %v4564_v0  ;;  %v2271_v38 = vadd.f32 %v2255_v52, %v4564_v0  ;;  %v2272_v63 = vadd.f32 %v2256_v4, %v4564_v0 }
 0x294   :  { %v2273_v60 = vadd.f32 %v2257_v58, %v4564_v0  ;;  %v2274_v62 = vadd.f32 %v2258_v26, %v4564_v0  ;;  %v2275_v1 = vadd.f32 %v2259_v49, %v4564_v0  ;;  %v2276_v3 = vadd.f32 %v2260_v14, %v4564_v0 }
 0x295   :  { %v2277_v51 = vadd.f32 %v2261_v32, %v4564_v0  ;;  %v2278_v54 = vadd.f32 %v2262_v61, %v4564_v0  ;;  %v2279_v21 = vadd.f32 %v2263_v28, %v4564_v0  ;;  %v2280_v24 = vadd.f32 %v2264_v23, %v4564_v0  ;;  %v5119_v61 = vld [vmem:[#allocation15_spill] sm:$0xff]  ;;  %v5121_v23 = vld [vmem:[#allocation14_spill] sm:$0xff] }
 0x296   :  { %v2281_v37 = vadd.f32 %v2265_v5, %v4564_v0  ;;  %v2282_v8 = vadd.f32 %v2266_v39, %v4564_v0  ;;  %v2283_v11 = vadd.f32 %v2267_v20, %v4564_v0  ;;  %v2284_v6 = vadd.f32 %v2268_v16, %v4564_v0  ;;  %v5120_v28 = vld [vmem:[#allocation11_spill] sm:$0xff]  ;;  %v5122_v5 = vld [vmem:[#allocation20_spill] sm:$0xff]  ;;  %v5123_v39 = vld [vmem:[#allocation13_spill] sm:$0xff] }
 0x297   :  { %v2285_v29 = vmax.f32 %v2269_v44, 0.0  ;;  %v2286_v12 = vmax.f32 %v2270_v30, 0.0  ;;  %v2287_v27 = vmax.f32 %v2271_v38, 0.0  ;;  %v2288_v19 = vmax.f32 %v2272_v63, 0.0  ;;  %v5124_v20 = vld [vmem:[#allocation18_spill] sm:$0xff]  ;;  %v5125_v16 = vld [vmem:[#allocation9_spill] sm:$0xff] }
 0x298   :  { %v2289_v53 = vmax.f32 %v2273_v60, 0.0  ;;  %v2290_v56 = vmax.f32 %v2274_v62, 0.0  ;;  %v2291_v55 = vmax.f32 %v2275_v1, 0.0  ;;  %v2292_v15 = vmax.f32 %v2276_v3, 0.0  ;;  %v5126_v30 = vld [vmem:[#allocation10_spill] sm:$0xff]  ;;  %v5127_v63 = vld [vmem:[#allocation25_spill] sm:$0xff] }
 0x299   :  { %v2293_v25 = vmax.f32 %v2277_v51, 0.0  ;;  %v2294_v48 = vmax.f32 %v2278_v54, 0.0  ;;  %v2295_v57 = vmax.f32 %v2279_v21, 0.0  ;;  %v2296_v7 = vmax.f32 %v2280_v24, 0.0  ;;  %v5128_v62 = vld [vmem:[#allocation27_spill] sm:$0xff]  ;;  %v5129_v3 = vld [vmem:[#allocation24_spill] sm:$0xff] }
 0x29a   :  { %v2297_v10 = vmax.f32 %v2281_v37, 0.0  ;;  %v2298_v46 = vmax.f32 %v2282_v8, 0.0  ;;  %v2299_v9 = vmax.f32 %v2283_v11, 0.0  ;;  %v2300_v47 = vmax.f32 %v2284_v6, 0.0  ;;  %v5130_v54 = vld [vmem:[#allocation26_spill] sm:$0xff]  ;;  %v5131_v24 = vld [vmem:[#allocation33_spill] sm:$0xff] }
 0x29b   :  { %v2807_v43 = vpack.c.bf16 %v2285_v29, %v2285_v29  ;;  %v2808_v2 = vpack.c.bf16 %v2286_v12, %v2286_v12  ;;  %v2809_v40 = vpack.c.bf16 %v2287_v27, %v2287_v27  ;;  %v2810_v52 = vpack.c.bf16 %v2288_v19, %v2288_v19  ;;  %v5132_v8 = vld [vmem:[#allocation34_spill] sm:$0xff]  ;;  %v5133_v6 = vld [vmem:[#allocation32_spill] sm:$0xff] }
 0x29c   :  { %v2811_v4 = vpack.c.bf16 %v2289_v53, %v2289_v53  ;;  %v2812_v33 = vpack.c.bf16 %v2290_v56, %v2290_v56  ;;  %v2813_v58 = vpack.c.bf16 %v2291_v55, %v2291_v55  ;;  %v2814_v36 = vpack.c.bf16 %v2292_v15, %v2292_v15 }
 0x29d   :  { %v2815_v26 = vpack.c.bf16 %v2293_v25, %v2293_v25  ;;  %v2816_v31 = vpack.c.bf16 %v2294_v48, %v2294_v48  ;;  %2727 = vst.msk [vmem:[%s5004_s4 + $0x80] sm:$0xf] %vm2107_vm11, %v2807_v43  ;;  %2728 = vst.msk [vmem:[%s5004_s4 + $0x84] sm:$0xf] %vm2107_vm11, %v2808_v2  ;;  %v2817_v49 = vpack.c.bf16 %v2295_v57, %v2295_v57 }
 0x29e   :  { %v2818_v18 = vpack.c.bf16 %v2296_v7, %v2296_v7  ;;  %v2819_v14 = vpack.c.bf16 %v2297_v10, %v2297_v10  ;;  %v2820_v17 = vpack.c.bf16 %v2298_v46, %v2298_v46  ;;  %2729 = vst.msk [vmem:[%s5004_s4 + $0x88] sm:$0xf] %vm2107_vm11, %v2809_v40  ;;  %2730 = vst.msk [vmem:[%s5004_s4 + $0x8c] sm:$0xf] %vm2107_vm11, %v2810_v52 }
 0x29f   :  { %2731 = vst.msk [vmem:[%s5004_s4 + $0x90] sm:$0xf] %vm2107_vm11, %v2811_v4  ;;  %2732 = vst.msk [vmem:[%s5004_s4 + $0x94] sm:$0xf] %vm2107_vm11, %v2812_v33  ;;  %v2821_v32 = vpack.c.bf16 %v2299_v9, %v2299_v9  ;;  %v2822_v22 = vpack.c.bf16 %v2300_v47, %v2300_v47  ;;  %v2382_v35 = vmul.f32 %v4530_v42, %v5119_v61 }
 0x2a0   :  { %2733 = vst.msk [vmem:[%s5004_s4 + $0x98] sm:$0xf] %vm2107_vm11, %v2813_v58  ;;  %2734 = vst.msk [vmem:[%s5004_s4 + $0x9c] sm:$0xf] %vm2107_vm11, %v2814_v36  ;;  %v2383_v59 = vmul.f32 %v4530_v42, %v5120_v28  ;;  %v2384_v13 = vmul.f32 %v5121_v23, %v4530_v42  ;;  %v2385_v34 = vmul.f32 %v5122_v5, %v4530_v42 }
 0x2a1   :  { %2735 = vst.msk [vmem:[%s5004_s4 + $0xa0] sm:$0xf] %vm2107_vm11, %v2815_v26  ;;  %2736 = vst.msk [vmem:[%s5004_s4 + $0xa4] sm:$0xf] %vm2107_vm11, %v2816_v31  ;;  %v2386_v41 = vmul.f32 %v4530_v42, %v5123_v39  ;;  %v2387_v50 = vmul.f32 %v4530_v42, %v5124_v20  ;;  %v2388_v44 = vmul.f32 %v5125_v16, %v4530_v42 }
 0x2a2   :  { %2737 = vst.msk [vmem:[%s5004_s4 + $0xa8] sm:$0xf] %vm2107_vm11, %v2817_v49  ;;  %2738 = vst.msk [vmem:[%s5004_s4 + $0xac] sm:$0xf] %vm2107_vm11, %v2818_v18  ;;  %v2389_v38 = vmul.f32 %v5126_v30, %v4530_v42  ;;  %v2390_v60 = vmul.f32 %v4530_v42, %v5127_v63  ;;  %v2391_v1 = vmul.f32 %v4530_v42, %v5128_v62 }
 0x2a3   :  { %2739 = vst.msk [vmem:[%s5004_s4 + $0xb0] sm:$0xf] %vm2107_vm11, %v2819_v14  ;;  %2740 = vst.msk [vmem:[%s5004_s4 + $0xb4] sm:$0xf] %vm2107_vm11, %v2820_v17  ;;  %v2392_v51 = vmul.f32 %v5129_v3, %v4530_v42  ;;  %v2393_v21 = vmul.f32 %v5130_v54, %v4530_v42  ;;  %v2394_v37 = vmul.f32 %v4530_v42, %v5131_v24 }
 0x2a4   :  { %2741 = vst.msk [vmem:[%s5004_s4 + $0xb8] sm:$0xf] %vm2107_vm11, %v2821_v32  ;;  %2742 = vst.msk [vmem:[%s5004_s4 + $0xbc] sm:$0xf] %vm2107_vm11, %v2822_v22  ;;  %v2395_v11 = vmul.f32 %v4530_v42, %v5132_v8  ;;  %v2396_v29 = vmul.f32 %v5133_v6, %v4530_v42  ;;  %v2397_v12 = vmul.f32 %v4508_v45, %v4530_v42 }
 0x2a5   :  { %v2398_v27 = vadd.f32 %v2382_v35, %v4564_v0  ;;  %v2399_v19 = vadd.f32 %v2383_v59, %v4564_v0  ;;  %v2400_v53 = vadd.f32 %v2384_v13, %v4564_v0  ;;  %v2401_v56 = vadd.f32 %v2385_v34, %v4564_v0 }
 0x2a6   :  { %v2402_v55 = vadd.f32 %v2386_v41, %v4564_v0  ;;  %v2403_v15 = vadd.f32 %v2387_v50, %v4564_v0  ;;  %v2404_v25 = vadd.f32 %v2388_v44, %v4564_v0  ;;  %v2405_v48 = vadd.f32 %v2389_v38, %v4564_v0 }
 0x2a7   :  { %v2406_v57 = vadd.f32 %v2390_v60, %v4564_v0  ;;  %v2407_v45 = vadd.f32 %v2391_v1, %v4564_v0  ;;  %v2408_v42 = vadd.f32 %v2392_v51, %v4564_v0  ;;  %v2409_v7 = vadd.f32 %v2393_v21, %v4564_v0 }
 0x2a8   :  { %v2410_v10 = vadd.f32 %v2394_v37, %v4564_v0  ;;  %v2411_v46 = vadd.f32 %v2395_v11, %v4564_v0  ;;  %v2412_v9 = vadd.f32 %v2396_v29, %v4564_v0  ;;  %v2413_v47 = vadd.f32 %v2397_v12, %v4564_v0 }
 0x2a9   :  { %v2414_v43 = vmax.f32 %v2398_v27, 0.0  ;;  %v2415_v2 = vmax.f32 %v2399_v19, 0.0  ;;  %v2416_v40 = vmax.f32 %v2400_v53, 0.0  ;;  %v2417_v52 = vmax.f32 %v2401_v56, 0.0 }
 0x2aa   :  { %v2418_v4 = vmax.f32 %v2402_v55, 0.0  ;;  %v2419_v33 = vmax.f32 %v2403_v15, 0.0  ;;  %v2420_v58 = vmax.f32 %v2404_v25, 0.0  ;;  %v2421_v36 = vmax.f32 %v2405_v48, 0.0 }
 0x2ab   :  { %v2422_v26 = vmax.f32 %v2406_v57, 0.0  ;;  %v2423_v31 = vmax.f32 %v2407_v45, 0.0  ;;  %v2424_v49 = vmax.f32 %v2408_v42, 0.0  ;;  %v2425_v18 = vmax.f32 %v2409_v7, 0.0 }
 0x2ac   :  { %v2426_v14 = vmax.f32 %v2410_v10, 0.0  ;;  %v2427_v17 = vmax.f32 %v2411_v46, 0.0  ;;  %v2428_v32 = vmax.f32 %v2412_v9, 0.0  ;;  %v2429_v22 = vmax.f32 %v2413_v47, 0.0 }
 0x2ad   :  { %v2823_v61 = vpack.c.bf16 %v2414_v43, %v2414_v43  ;;  %v2824_v35 = vpack.c.bf16 %v2415_v2, %v2415_v2  ;;  %v2825_v28 = vpack.c.bf16 %v2416_v40, %v2416_v40  ;;  %v2826_v0 = vpack.c.bf16 %v2417_v52, %v2417_v52 }
 0x2ae   :  { %v2827_v59 = vpack.c.bf16 %v2418_v4, %v2418_v4  ;;  %v2828_v23 = vpack.c.bf16 %v2419_v33, %v2419_v33  ;;  %v2829_v13 = vpack.c.bf16 %v2420_v58, %v2420_v58  ;;  %v2830_v5 = vpack.c.bf16 %v2421_v36, %v2421_v36 }
 0x2af   :  { %v2831_v34 = vpack.c.bf16 %v2422_v26, %v2422_v26  ;;  %v2832_v39 = vpack.c.bf16 %v2423_v31, %v2423_v31  ;;  %2759 = vst.msk [vmem:[%s5004_s4 + $0xc0] sm:$0xf] %vm2107_vm11, %v2823_v61  ;;  %2760 = vst.msk [vmem:[%s5004_s4 + $0xc4] sm:$0xf] %vm2107_vm11, %v2824_v35  ;;  %v2833_v41 = vpack.c.bf16 %v2424_v49, %v2424_v49 }
 0x2b0   :  { %v2834_v20 = vpack.c.bf16 %v2425_v18, %v2425_v18  ;;  %v2835_v50 = vpack.c.bf16 %v2426_v14, %v2426_v14  ;;  %v2836_v16 = vpack.c.bf16 %v2427_v17, %v2427_v17  ;;  %2761 = vst.msk [vmem:[%s5004_s4 + $0xc8] sm:$0xf] %vm2107_vm11, %v2825_v28  ;;  %2762 = vst.msk [vmem:[%s5004_s4 + $0xcc] sm:$0xf] %vm2107_vm11, %v2826_v0 }
 0x2b1   :  { %2763 = vst.msk [vmem:[%s5004_s4 + $0xd0] sm:$0xf] %vm2107_vm11, %v2827_v59  ;;  %2764 = vst.msk [vmem:[%s5004_s4 + $0xd4] sm:$0xf] %vm2107_vm11, %v2828_v23  ;;  %v2837_v44 = vpack.c.bf16 %v2428_v32, %v2428_v32  ;;  %v2838_v30 = vpack.c.bf16 %v2429_v22, %v2429_v22 }
 0x2b2   :  { %2765 = vst.msk [vmem:[%s5004_s4 + $0xd8] sm:$0xf] %vm2107_vm11, %v2829_v13  ;;  %2766 = vst.msk [vmem:[%s5004_s4 + $0xdc] sm:$0xf] %vm2107_vm11, %v2830_v5 }
 0x2b3   :  { %2767 = vst.msk [vmem:[%s5004_s4 + $0xe0] sm:$0xf] %vm2107_vm11, %v2831_v34  ;;  %2768 = vst.msk [vmem:[%s5004_s4 + $0xe4] sm:$0xf] %vm2107_vm11, %v2832_v39 }
 0x2b4   :  { %2769 = vst.msk [vmem:[%s5004_s4 + $0xe8] sm:$0xf] %vm2107_vm11, %v2833_v41  ;;  %2770 = vst.msk [vmem:[%s5004_s4 + $0xec] sm:$0xf] %vm2107_vm11, %v2834_v20 }
 0x2b5   :  { %2771 = vst.msk [vmem:[%s5004_s4 + $0xf0] sm:$0xf] %vm2107_vm11, %v2835_v50  ;;  %2772 = vst.msk [vmem:[%s5004_s4 + $0xf4] sm:$0xf] %vm2107_vm11, %v2836_v16 }
 0x2b6   :  { %2773 = vst.msk [vmem:[%s5004_s4 + $0xf8] sm:$0xf] %vm2107_vm11, %v2837_v44  ;;  %2774 = vst.msk [vmem:[%s5004_s4 + $0xfc] sm:$0xf] %vm2107_vm11, %v2838_v30 }
 0x2b7   :  { %2515 = vsyncpa [#allocation3], 1 }
 0x2b8   :  { %2516 = vsyncpa [#allocation5], 1 }

// kernel: generator_forward.9
= control target key start
LH: loop header
LB: loop body
LE: loop exit
PB: predicated region body
PF: predicated region fallthrough
CT: control target
= control target key end

     0   :  { %vm2161_vm0 = vcmask 1042432   ;;  %vm2162_vm1 = vcmask 1046532   ;;  %vm120_vm2 = vsmask.f32 3328  ;;  %s5894_s19 = smov 16   ;;  %s5895_s26 = smov 8   ;;  %s9250_s0 = inlined_call_operand.vmem [shape: bf16[2,18,18,8], index: 0, kind: input, shape index: {}]   ;;  %s9251_s1 = inlined_call_operand.vmem [shape: bf16[2,2,32,3], index: 1, kind: input, shape index: {}]   ;;  %s9252_s2 = inlined_call_operand.vmem [shape: f32[2,2,512,3], index: 2, kind: output, shape index: {}]  }
   0x1   :  { %v15_v0 = vld [vmem:[%s9250_s0 + $0xc] sm:$0xf]  ;;  %v16_v1 = vld [vmem:[%s9250_s0 + $0x10] sm:$0xf]  ;;  %v5921_v2 = vld [vmem:[%s9250_s0] sm:$0xf] }
   0x2   :  { %v157_v3 = vshll.u32 %v16_v1, 16  ;;  %v161_v4 = vshrl.u32 %v16_v1, 16  ;;  %v5923_v5 = vcombine.low %v15_v0, %v16_v1  ;;  %v148_v6 = vshrl.u32 %v15_v0, 16  ;;  %v5928_v7 = vld [vmem:[%s9250_s0 + $0x4] sm:$0xf]  ;;  %vm5930_vm3 = vmor %vm2161_vm0, %vm2162_vm1  ;;  %s5896_s11 = smov 24  }
   0x3   :  { %v151_v9 = vshll.u32 %v15_v0, 16  ;;  %v14_v10 = vld [vmem:[%s9250_s0 + $0x8] sm:$0x1]  ;;  %v4543_v11 = vrot.slane %v5921_v2, 9  ;;  %v2166_v12 = vrot.slane %v5928_v7, 5  ;;  %v4544_v17 = vrot.slane %v15_v0, 9 }
   0x4   :  { %v159_v13 = vrot.slane %v157_v3, 5  ;;  %v163_v14 = vrot.slane %v161_v4, 4  ;;  %1269 = vrot.lane.b32.xlu1 %v5923_v5, %s5894_s19  ;;  %v150_v15 = vrot.slane %v148_v6, 4  ;;  %v17_v16 = vld [vmem:[%s9250_s0 + $0x14] sm:$0x1]  ;;  %v2169_v21 = vrot.slane %v14_v10, 5 }
   0x5   :  { %v153_v18 = vrot.slane %v151_v9, 5  ;;  %v2167_v19 = vsel %vm5930_vm3, %v4543_v11, %v2166_v12  ;;  %v2168_v20 = vrot.slane %v2166_v12, 4  ;;  %v5949_v22 = vld [vmem:[%s9250_s0 + $0x18] sm:$0xf]  ;;  %vm121_vm4 = vsmask.f32 7440 }
   0x6   :  { %v164_v23 = vor.u32 %v163_v14, %v159_v13  ;;  %v167_v24 = vshll.u32 %v17_v16, 16  ;;  %v2173_v25 = vrot.slane %v16_v1, 5  ;;  %vm5954_vm5 = vmor %vm120_vm2, %vm121_vm4  ;;  %v2176_v29 = vrot.slane %v17_v16, 5  ;;  %v5961_v30 = vld [vmem:[%s9250_s0 + $0x1c] sm:$0xf] }
   0x7   :  { %v154_v26 = vor.u32 %v153_v18, %v150_v15  ;;  %v2170_v27 = vsel %vm5930_vm3, %v2168_v20, %v2169_v21  ;;  %v172_v31 = vshrl.u32 %v5949_v22, 16  ;;  %v143_v33 = vshll.u32 %v14_v10, 16  ;;  %v20_v48 = vld [vmem:[%s9250_s0 + $0x20] sm:$0x1]  ;;  %v5998_v61 = vld [vmem:[%s9250_s0 + $0x24] sm:$0xf] }
   0x8   :  { %v165_v32 = vrot.slane %v164_v23, 4  ;;  %v4577_v34 = vcombine.low %v2167_v19, %v2170_v27  ;;  %v169_v35 = vrot.slane %v167_v24, 5  ;;  %v2174_v37 = vsel %vm5930_vm3, %v4544_v17, %v2173_v25  ;;  %v6004_v12 = vld [vmem:[%s9250_s0 + $0x28] sm:$0xf]  ;;  %v5348_v19 = vld [vmem:[%s9251_s1] sm:$0xff]  }
   0x9   :  { %v155_v36 = vrot.slane %v154_v26, 4  ;;  %v2175_v38 = vrot.slane %v2173_v25, 4  ;;  %v175_v39 = vshll.u32 %v5949_v22, 16  ;;  %v174_v41 = vrot.slane %v172_v31, 4  ;;  %v5349_v25 = vld [vmem:[%s9251_s1 + $0x10] sm:$0xff]   ;;  %5061 = vmatprep.subr.bf16.mxu0 %v5348_v19 }
   0xa   :  { %2500 = vrot.lane.b32.xlu0 %v4577_v34, %s5895_s26  ;;  %v170_v40 = vsel %vm5954_vm5, %v165_v32, %v169_v35  ;;  %v181_v42 = vshll.u32 %v5961_v30, 16  ;;  %v185_v43 = vshrl.u32 %v5961_v30, 16  ;;  %v124_v47 = vshrl.u32 %v5921_v2, 16  ;;  %5129 = vmatprep.subr.bf16.mxu1 %v5349_v25  ;;  %v5350_v35 = vld [vmem:[%s9251_s1 + $0x8] sm:$0xff]  }
   0xb   :  { %v160_v44 = vsel %vm5954_vm5, %v155_v36, %v159_v13  ;;  %v2177_v45 = vsel %vm5930_vm3, %v2175_v38, %v2176_v29  ;;  %v177_v46 = vrot.slane %v175_v39, 5  ;;  %v127_v54 = vshll.u32 %v5921_v2, 16  ;;  %v6049_v39 = vld [vmem:[%s9250_s0 + $0x30] sm:$0xf]  ;;  %5062 = vmatpush3.bf16.msra.mxu0 %v5348_v19  ;;  %5130 = vmatpush3.bf16.msra.mxu1 %v5349_v25 }
   0xc   :  { %v5980_v49 = vcombine.low %v160_v44, %v170_v40  ;;  %v5982_v50 = vcombine.low %v2174_v37, %v2177_v45  ;;  %v183_v51 = vrot.slane %v181_v42, 5  ;;  %v187_v52 = vrot.slane %v185_v43, 4  ;;  %5063 = vmatprep.subr.bf16.mxu0 %v5350_v35  ;;  %v5351_v43 = vld [vmem:[%s9251_s1 + $0x18] sm:$0xff]  }
   0xd   :  { %v126_v53 = vrot.slane %v124_v47, 4  ;;  %v133_v55 = vshll.u32 %v5928_v7, 16  ;;  %v137_v56 = vshrl.u32 %v5928_v7, 16  ;;  %v5993_v57 = vcombine.low %v5949_v22, %v5961_v30  ;;  %5131 = vmatprep.subr.bf16.mxu1 %v5351_v43 }
   0xe   :  { %1197 = vrot.lane.b32.xlu1 %v5980_v49, %s5895_s26  ;;  %2502 = vrot.lane.b32.xlu0 %v5982_v50, %s5895_s26  ;;  %v178_v58 = vor.u32 %v177_v46, %v174_v41  ;;  %v188_v59 = vor.u32 %v187_v52, %v183_v51  ;;  %v191_v60 = vshll.u32 %v20_v48, 16  ;;  %v129_v62 = vrot.slane %v127_v54, 5  ;;  %v25_v46 = vld [vmem:[%s9250_s0 + $0x34] sm:$0xf] }
   0xf   :  { %v135_v63 = vrot.slane %v133_v55, 5  ;;  %v139_v0 = vrot.slane %v137_v56, 4  ;;  %v145_v1 = vrot.slane %v143_v33, 5  ;;  %v2180_v6 = vrot.slane %v5961_v30, 5  ;;  %5064 = vmatpush3.bf16.msra.mxu0 %v5350_v35  ;;  %5132 = vmatpush3.bf16.msra.mxu1 %v5351_v43 }
  0x10   :  { %v179_v3 = vrot.slane %v178_v58, 4  ;;  %v189_v4 = vrot.slane %v188_v59, 4  ;;  %v130_v9 = vor.u32 %v129_v62, %v126_v53  ;;  %v193_v11 = vrot.slane %v191_v60, 5 }
  0x11   :  { %v140_v10 = vor.u32 %v139_v0, %v135_v63  ;;  %v196_v13 = vshrl.u32 %v5998_v61, 16  ;;  %v4545_v14 = vrot.slane %v5949_v22, 9  ;;  %v2182_v17 = vrot.slane %v2180_v6, 4  ;;  %v6023_v22 = vld [vmem:[%s9250_s0 + $0x2c] sm:$0x1] }
  0x12   :  { %2564 = vrot.lane.b32.xlu1 %v5980_v49, %s5894_s19  ;;  %1271 = vrot.lane.b32.xlu0 %v5993_v57, %s5894_s19  ;;  %v131_v15 = vrot.slane %v130_v9, 4  ;;  %v2183_v18 = vrot.slane %v20_v48, 5  ;;  %v184_v20 = vsel %vm5954_vm5, %v179_v3, %v183_v51  ;;  %v199_v21 = vshll.u32 %v5998_v61, 16  ;;  %v26_v3 = vld [vmem:[%s9250_s0 + $0x38] sm:$0x1] }
  0x13   :  { %v141_v16 = vrot.slane %v140_v10, 4  ;;  %v205_v23 = vshll.u32 %v6004_v12, 16  ;;  %v209_v24 = vshrl.u32 %v6004_v12, 16  ;;  %v194_v29 = vsel %vm5954_vm5, %v189_v4, %v193_v11 }
  0x14   :  { %v136_v26 = vsel %vm5954_vm5, %v131_v15, %v135_v63  ;;  %v198_v30 = vrot.slane %v196_v13, 4  ;;  %v201_v32 = vrot.slane %v199_v21, 5  ;;  %v2181_v36 = vsel %vm5930_vm3, %v4545_v14, %v2180_v6  ;;  %v6096_v15 = vld [vmem:[%s9250_s0 + $0x3c] sm:$0xf] }
  0x15   :  { %v146_v27 = vsel %vm5954_vm5, %v141_v16, %v145_v1  ;;  %v207_v33 = vrot.slane %v205_v23, 5  ;;  %v211_v34 = vrot.slane %v209_v24, 4  ;;  %v2184_v37 = vsel %vm5930_vm3, %v2182_v17, %v2183_v18 }
  0x16   :  { %1339 = vrot.lane.b32.xlu1 %v5980_v49, %s5896_s11  ;;  %v6036_v31 = vcombine.low %v136_v26, %v146_v27  ;;  %v215_v38 = vshll.u32 %v6023_v22, 16  ;;  %v6053_v40 = vcombine.low %v184_v20, %v194_v29  ;;  %v202_v41 = vor.u32 %v201_v32, %v198_v30 }
  0x17   :  { %v212_v42 = vor.u32 %v211_v34, %v207_v33  ;;  %v4579_v44 = vcombine.low %v2181_v36, %v2184_v37  ;;  %v2187_v45 = vrot.slane %v6004_v12, 5  ;;  %v220_v47 = vshrl.u32 %v6049_v39, 16  ;;  %v29_v36 = vld [vmem:[%s9250_s0 + $0x44] sm:$0x1] }
  0x18   :  { %1195 = vrot.lane.b32.xlu0 %v6036_v31, %s5895_s26  ;;  %v217_v48 = vrot.slane %v215_v38, 5  ;;  %v223_v51 = vshll.u32 %v6049_v39, 16  ;;  %v203_v52 = vrot.slane %v202_v41, 4  ;;  %v233_v54 = vshrl.u32 %v25_v46, 16 }
  0x19   :  { %v213_v53 = vrot.slane %v212_v42, 4  ;;  %v222_v55 = vrot.slane %v220_v47, 4  ;;  %v4546_v58 = vrot.slane %v5998_v61, 9  ;;  %v2189_v59 = vrot.slane %v2187_v45, 4 }
  0x1a   :  { %2634 = vrot.lane.b32.xlu1 %v5982_v50, %s5896_s11  ;;  %v229_v50 = vshll.u32 %v25_v46, 16  ;;  %v225_v56 = vrot.slane %v223_v51, 5  ;;  %v2190_v60 = vrot.slane %v6023_v22, 5  ;;  %v208_v62 = vsel %vm5954_vm5, %v203_v52, %v207_v33 }
  0x1b   :  { %v218_v63 = vsel %vm5954_vm5, %v213_v53, %v217_v48  ;;  %v235_v1 = vrot.slane %v233_v54, 4  ;;  %v6083_v4 = vcombine.low %v5998_v61, %v6004_v12  ;;  %v239_v10 = vshll.u32 %v26_v3, 16  ;;  %v6103_v61 = vld [vmem:[%s9250_s0 + $0x40] sm:$0xf] }
  0x1c   :  { %2566 = vrot.lane.b32.xlu0 %v6053_v40, %s5894_s19  ;;  %v231_v0 = vrot.slane %v229_v50, 5  ;;  %v226_v6 = vor.u32 %v225_v56, %v222_v55  ;;  %v6087_v9 = vcombine.low %v208_v62, %v218_v63  ;;  %v2188_v11 = vsel %vm5930_vm3, %v4546_v58, %v2187_v45 }
  0x1d   :  { %v2191_v13 = vsel %vm5930_vm3, %v2189_v59, %v2190_v60  ;;  %v2194_v16 = vrot.slane %v25_v46, 5  ;;  %v241_v18 = vrot.slane %v239_v10, 5  ;;  %v244_v19 = vshrl.u32 %v6096_v15, 16  ;;  %v32_v10 = vld [vmem:[%s9250_s0 + $0x50] sm:$0x1] }
  0x1e   :  { %2636 = vrot.lane.b32.xlu1 %v4579_v44, %s5896_s11  ;;  %v236_v14 = vor.u32 %v235_v1, %v231_v0  ;;  %v227_v12 = vrot.slane %v226_v6, 4  ;;  %v4580_v17 = vcombine.low %v2188_v11, %v2191_v13  ;;  %v247_v21 = vshll.u32 %v6096_v15, 16 }
  0x1f   :  { %v253_v23 = vshll.u32 %v6103_v61, 16  ;;  %v257_v24 = vshrl.u32 %v6103_v61, 16  ;;  %v4547_v22 = vrot.slane %v6049_v39, 9  ;;  %v2196_v25 = vrot.slane %v2194_v16, 4 }
  0x20   :  { %1341 = vrot.lane.b32.xlu0 %v6053_v40, %s5896_s11  ;;  %v237_v20 = vrot.slane %v236_v14, 4  ;;  %v2197_v26 = vrot.slane %v26_v3, 5  ;;  %v6116_v27 = vcombine.low %v6049_v39, %v25_v46  ;;  %v232_v29 = vsel %vm5954_vm5, %v227_v12, %v231_v0  ;;  %v31_v46 = vld [vmem:[%s9250_s0 + $0x4c] sm:$0xf] }
  0x21   :  { %v246_v30 = vrot.slane %v244_v19, 4  ;;  %v249_v33 = vrot.slane %v247_v21, 5  ;;  %v255_v34 = vrot.slane %v253_v23, 5  ;;  %v259_v35 = vrot.slane %v257_v24, 4 }
  0x22   :  { %2504 = vrot.lane.b32.xlu1 %v4579_v44, %s5895_s26  ;;  %v242_v32 = vsel %vm5954_vm5, %v237_v20, %v241_v18  ;;  %v2195_v37 = vsel %vm5930_vm3, %v4547_v22, %v2194_v16  ;;  %v2198_v38 = vsel %vm5930_vm3, %v2196_v25, %v2197_v26  ;;  %v263_v41 = vshll.u32 %v29_v36, 16  ;;  %v6138_v44 = vld [vmem:[%s9250_s0 + $0x48] sm:$0xf] }
  0x23   :  { %v6133_v39 = vcombine.low %v232_v29, %v242_v32  ;;  %v250_v42 = vor.u32 %v249_v33, %v246_v30  ;;  %v260_v43 = vor.u32 %v259_v35, %v255_v34  ;;  %v4581_v45 = vcombine.low %v2195_v37, %v2198_v38 }
  0x24   :  { %1199 = vrot.lane.b32.xlu0 %v6053_v40, %s5895_s26  ;;  %v265_v47 = vrot.slane %v263_v41, 5  ;;  %v2201_v48 = vrot.slane %v6103_v61, 5  ;;  %v268_v51 = vshrl.u32 %v6138_v44, 16  ;;  %v271_v52 = vshll.u32 %v6138_v44, 16 }
  0x25   :  { %v251_v53 = vrot.slane %v250_v42, 4  ;;  %v261_v50 = vrot.slane %v260_v43, 4  ;;  %v277_v54 = vshll.u32 %v31_v46, 16  ;;  %v281_v55 = vshrl.u32 %v31_v46, 16  ;;  %v35_v42 = vld [vmem:[%s9250_s0 + $0x5c] sm:$0x1] }
  0x26   :  { %1273 = vrot.lane.b32.xlu1 %v6083_v4, %s5894_s19  ;;  %v4548_v56 = vrot.slane %v6096_v15, 9  ;;  %v2203_v58 = vrot.slane %v2201_v48, 4  ;;  %v2204_v59 = vrot.slane %v29_v36, 5  ;;  %v270_v60 = vrot.slane %v268_v51, 4  ;;  %v6218_v51 = vld [vmem:[%s9250_s0 + $0x60] sm:$0xf] }
  0x27   :  { %v273_v62 = vrot.slane %v271_v52, 5  ;;  %v256_v63 = vsel %vm5954_vm5, %v251_v53, %v255_v34  ;;  %v266_v0 = vsel %vm5954_vm5, %v261_v50, %v265_v47  ;;  %v279_v1 = vrot.slane %v277_v54, 5  ;;  %v37_v53 = vld [vmem:[%s9250_s0 + $0x64] sm:$0xf] }
  0x28   :  { %1201 = vrot.lane.b32.xlu0 %v6087_v9, %s5895_s26  ;;  %v283_v3 = vrot.slane %v281_v55, 4  ;;  %v6160_v6 = vcombine.low %v6096_v15, %v6103_v61  ;;  %v6167_v11 = vcombine.low %v256_v63, %v266_v0  ;;  %v2202_v14 = vsel %vm5930_vm3, %v4548_v56, %v2201_v48  ;;  %v6176_v15 = vld [vmem:[%s9250_s0 + $0x54] sm:$0xf]  ;;  %v6183_v61 = vld [vmem:[%s9250_s0 + $0x58] sm:$0xf] }
  0x29   :  { %v274_v13 = vor.u32 %v273_v62, %v270_v60  ;;  %v2205_v12 = vsel %vm5930_vm3, %v2203_v58, %v2204_v59  ;;  %v2208_v18 = vrot.slane %v31_v46, 5  ;;  %v292_v21 = vshrl.u32 %v6176_v15, 16 }
  0x2a   :  { %2568 = vrot.lane.b32.xlu1 %v6087_v9, %s5894_s19  ;;  %v284_v16 = vor.u32 %v283_v3, %v279_v1  ;;  %v4582_v19 = vcombine.low %v2202_v14, %v2205_v12  ;;  %v295_v23 = vshll.u32 %v6176_v15, 16  ;;  %v301_v25 = vshll.u32 %v6183_v61, 16 }
  0x2b   :  { %v275_v20 = vrot.slane %v274_v13, 4  ;;  %v305_v26 = vshrl.u32 %v6183_v61, 16  ;;  %v4549_v29 = vrot.slane %v6138_v44, 9  ;;  %v2210_v30 = vrot.slane %v2208_v18, 4 }
  0x2c   :  { %2506 = vrot.lane.b32.xlu0 %v4580_v17, %s5895_s26  ;;  %v285_v24 = vrot.slane %v284_v16, 4  ;;  %v2211_v32 = vrot.slane %v32_v10, 5  ;;  %v6196_v33 = vcombine.low %v6138_v44, %v31_v46  ;;  %v294_v34 = vrot.slane %v292_v21, 4 }
  0x2d   :  { %v297_v35 = vrot.slane %v295_v23, 5  ;;  %v280_v36 = vsel %vm5954_vm5, %v275_v20, %v279_v1  ;;  %v303_v38 = vrot.slane %v301_v25, 5  ;;  %v307_v41 = vrot.slane %v305_v26, 4  ;;  %v6256_v25 = vld [vmem:[%s9250_s0 + $0x6c] sm:$0xf] }
  0x2e   :  { %1343 = vrot.lane.b32.xlu1 %v6087_v9, %s5896_s11  ;;  %v2209_v43 = vsel %vm5930_vm3, %v4549_v29, %v2208_v18  ;;  %v2212_v44 = vsel %vm5930_vm3, %v2210_v30, %v2211_v32  ;;  %v311_v48 = vshll.u32 %v35_v42, 16  ;;  %v2215_v54 = vrot.slane %v6183_v61, 5 }
  0x2f   :  { %v298_v46 = vor.u32 %v297_v35, %v294_v34  ;;  %v308_v47 = vor.u32 %v307_v41, %v303_v38  ;;  %v4583_v52 = vcombine.low %v2209_v43, %v2212_v44  ;;  %v316_v55 = vshrl.u32 %v6218_v51, 16 }
  0x30   :  { %1275 = vrot.lane.b32.xlu0 %v6116_v27, %s5894_s19  ;;  %v319_v56 = vshll.u32 %v6218_v51, 16  ;;  %v313_v59 = vrot.slane %v311_v48, 5  ;;  %v325_v60 = vshll.u32 %v37_v53, 16  ;;  %v329_v62 = vshrl.u32 %v37_v53, 16 }
  0x31   :  { %v299_v50 = vrot.slane %v298_v46, 4  ;;  %v309_v58 = vrot.slane %v308_v47, 4  ;;  %v4550_v63 = vrot.slane %v6176_v15, 9  ;;  %v2217_v0 = vrot.slane %v2215_v54, 4 }
  0x32   :  { %2638 = vrot.lane.b32.xlu1 %v4580_v17, %s5896_s11  ;;  %v287_v17 = vshll.u32 %v32_v10, 16  ;;  %v2218_v1 = vrot.slane %v35_v42, 5  ;;  %v318_v3 = vrot.slane %v316_v55, 4  ;;  %v321_v10 = vrot.slane %v319_v56, 5 }
  0x33   :  { %v304_v13 = vsel %vm5954_vm5, %v299_v50, %v303_v38  ;;  %v314_v14 = vsel %vm5954_vm5, %v309_v58, %v313_v59  ;;  %v327_v12 = vrot.slane %v325_v60, 5  ;;  %v331_v16 = vrot.slane %v329_v62, 4  ;;  %v6298_v60 = vld [vmem:[%s9250_s0 + $0x78] sm:$0xf] }
  0x34   :  { %2570 = vrot.lane.b32.xlu0 %v6133_v39, %s5894_s19  ;;  %v289_v22 = vrot.slane %v287_v17, 5  ;;  %v38_v17 = vld [vmem:[%s9250_s0 + $0x68] sm:$0x1]  ;;  %v6243_v18 = vcombine.low %v6176_v15, %v6183_v61  ;;  %v322_v20 = vor.u32 %v321_v10, %v318_v3  ;;  %v2216_v23 = vsel %vm5930_vm3, %v4550_v63, %v2215_v54  ;;  %v6263_v15 = vld [vmem:[%s9250_s0 + $0x70] sm:$0xf] }
  0x35   :  { %v335_v21 = vshll.u32 %v38_v17, 16  ;;  %v2222_v61 = vrot.slane %v37_v53, 5  ;;  %v340_v32 = vshrl.u32 %v6256_v25, 16  ;;  %v343_v35 = vshll.u32 %v6256_v25, 16  ;;  %v41_v54 = vld [vmem:[%s9250_s0 + $0x74] sm:$0x1] }
  0x36   :  { %2640 = vrot.lane.b32.xlu1 %v4581_v45, %s5896_s11  ;;  %v290_v37 = vsel %vm5954_vm5, %v285_v24, %v289_v22  ;;  %v2219_v24 = vsel %vm5930_vm3, %v2217_v0, %v2218_v1  ;;  %v332_v22 = vor.u32 %v331_v16, %v327_v12  ;;  %v323_v29 = vrot.slane %v322_v20, 4  ;;  %v43_v63 = vld [vmem:[%s9250_s0 + $0x7c] sm:$0xf] }
  0x37   :  { %v4584_v26 = vcombine.low %v2216_v23, %v2219_v24  ;;  %v337_v30 = vrot.slane %v335_v21, 5  ;;  %v4551_v38 = vrot.slane %v6218_v51, 9  ;;  %v2224_v41 = vrot.slane %v2222_v61, 4 }
  0x38   :  { %1345 = vrot.lane.b32.xlu0 %v6133_v39, %s5896_s11  ;;  %v333_v34 = vrot.slane %v332_v22, 4  ;;  %v2225_v42 = vrot.slane %v38_v17, 5  ;;  %v6276_v43 = vcombine.low %v6218_v51, %v37_v53  ;;  %v328_v44 = vsel %vm5954_vm5, %v323_v29, %v327_v12 }
  0x39   :  { %v342_v46 = vrot.slane %v340_v32, 4  ;;  %v345_v48 = vrot.slane %v343_v35, 5  ;;  %v2223_v51 = vsel %vm5930_vm3, %v4551_v38, %v2222_v61  ;;  %v359_v56 = vshll.u32 %v41_v54, 16  ;;  %v44_v32 = vld [vmem:[%s9250_s0 + $0x80] sm:$0x1] }
  0x3a   :  { %2508 = vrot.lane.b32.xlu1 %v4581_v45, %s5895_s26  ;;  %v6213_v45 = vcombine.low %v280_v36, %v290_v37  ;;  %v349_v36 = vshll.u32 %v6263_v15, 16  ;;  %v353_v37 = vshrl.u32 %v6263_v15, 16  ;;  %v338_v47 = vsel %vm5954_vm5, %v333_v34, %v337_v30 }
  0x3b   :  { %v2226_v53 = vsel %vm5930_vm3, %v2224_v41, %v2225_v42  ;;  %v6293_v55 = vcombine.low %v328_v44, %v338_v47  ;;  %v346_v58 = vor.u32 %v345_v48, %v342_v46  ;;  %v361_v0 = vrot.slane %v359_v56, 5 }
  0x3c   :  { %1203 = vrot.lane.b32.xlu0 %v6133_v39, %s5895_s26  ;;  %v355_v50 = vrot.slane %v353_v37, 4  ;;  %v4585_v62 = vcombine.low %v2223_v51, %v2226_v53  ;;  %v2229_v1 = vrot.slane %v6263_v15, 5  ;;  %v364_v3 = vshrl.u32 %v6298_v60, 16 }
  0x3d   :  { %v367_v10 = vshll.u32 %v6298_v60, 16  ;;  %v373_v12 = vshll.u32 %v43_v63, 16  ;;  %v377_v16 = vshrl.u32 %v43_v63, 16  ;;  %v4552_v17 = vrot.slane %v6256_v25, 9 }
  0x3e   :  { %1277 = vrot.lane.b32.xlu1 %v6160_v6, %s5894_s19  ;;  %v2231_v20 = vrot.slane %v2229_v1, 4  ;;  %v2232_v21 = vrot.slane %v41_v54, 5  ;;  %v366_v23 = vrot.slane %v364_v3, 4  ;;  %v6320_v30 = vcombine.low %v6256_v25, %v6263_v15  ;;  %v6336_v25 = vld [vmem:[%s9250_s0 + $0x84] sm:$0xf] }
  0x3f   :  { %v369_v24 = vrot.slane %v367_v10, 5  ;;  %v379_v29 = vrot.slane %v377_v16, 4  ;;  %v383_v41 = vshll.u32 %v44_v32, 16  ;;  %v6343_v15 = vld [vmem:[%s9250_s0 + $0x88] sm:$0xf]  ;;  %v2236_v42 = vrot.slane %v43_v63, 5 }
  0x40   :  { %1205 = vrot.lane.b32.xlu0 %v6167_v11, %s5895_s26  ;;  %v2233_v37 = vsel %vm5930_vm3, %v2231_v20, %v2232_v21  ;;  %v388_v47 = vshrl.u32 %v6336_v25, 16  ;;  %v391_v48 = vshll.u32 %v6336_v25, 16  ;;  %v397_v54 = vshll.u32 %v6343_v15, 16  ;;  %v6378_v21 = vld [vmem:[%s9250_s0 + $0x90] sm:$0xf] }
  0x41   :  { %v370_v35 = vor.u32 %v369_v24, %v366_v23  ;;  %v401_v51 = vshrl.u32 %v6343_v15, 16  ;;  %v4553_v53 = vrot.slane %v6298_v60, 9  ;;  %v2238_v56 = vrot.slane %v2236_v42, 4 }
  0x42   :  { %2572 = vrot.lane.b32.xlu1 %v6167_v11, %s5894_s19  ;;  %v399_v10 = vrot.slane %v397_v54, 5  ;;  %vm1403_vm6 = vcmask 64512   ;;  %vm1500_vm7 = vcmask 130048   ;;  %vm1565_vm8 = vcmask 195584  }
  0x43   :  { %v371_v46 = vrot.slane %v370_v35, 4  ;;  %v415_v35 = vshll.u32 %v6378_v21, 16  ;;  %vm1646_vm9 = vcmask 261120   ;;  %vm2064_vm10 = vcmask 23552  }
  0x44   :  { %2510 = vrot.lane.b32.xlu0 %v4582_v19, %s5895_s26 }
  0x46   :  { %1347 = vrot.lane.b32.xlu1 %v6167_v11, %s5896_s11 }
  0x48   :  { %1279 = vrot.lane.b32.xlu0 %v6196_v33, %s5894_s19 }
  0x4a   :  { %2642 = vrot.lane.b32.xlu1 %v4582_v19, %s5896_s11  ;;  %v6247_v19 = vcombine.low %v304_v13, %v314_v14  ;;  %v347_v13 = vrot.slane %v346_v58, 4  ;;  %v2239_v58 = vrot.slane %v44_v32, 5  ;;  %v412_v32 = vshrl.u32 %v6378_v21, 16 }
  0x4c   :  { %2574 = vrot.lane.b32.xlu0 %v6213_v45, %s5894_s19 }
  0x4e   :  { %2644 = vrot.lane.b32.xlu1 %v4583_v52, %s5896_s11 }
  0x50   :  { %1349 = vrot.lane.b32.xlu0 %v6213_v45, %s5896_s11 }
  0x52   :  { %2512 = vrot.lane.b32.xlu1 %v4583_v52, %s5895_s26  ;;  %v351_v52 = vrot.slane %v349_v36, 5  ;;  %v2230_v36 = vsel %vm5930_vm3, %v4552_v17, %v2229_v1 }
  0x53   :  { %v4586_v44 = vcombine.low %v2230_v36, %v2233_v37 }
  0x54   :  { %1207 = vrot.lane.b32.xlu0 %v6213_v45, %s5895_s26  ;;  %v356_v59 = vor.u32 %v355_v50, %v351_v52  ;;  %v352_v22 = vsel %vm5954_vm5, %v347_v13, %v351_v52  ;;  %v385_v50 = vrot.slane %v383_v41, 5  ;;  %v403_v13 = vrot.slane %v401_v51, 4 }
  0x56   :  { %1281 = vrot.lane.b32.xlu1 %v6243_v18, %s5894_s19  ;;  %v357_v14 = vrot.slane %v356_v59, 4  ;;  %v6356_v59 = vcombine.low %v6298_v60, %v43_v63  ;;  %v2237_v60 = vsel %vm5930_vm3, %v4553_v53, %v2236_v42  ;;  %v2240_v63 = vsel %vm5930_vm3, %v2238_v56, %v2239_v58 }
  0x57   :  { %v404_v17 = vor.u32 %v403_v13, %v399_v10  ;;  %v4587_v24 = vcombine.low %v2237_v60, %v2240_v63  ;;  %v4554_v42 = vrot.slane %v6336_v25, 9  ;;  %v6412_v58 = vcombine.low %v6336_v25, %v6343_v15  ;;  %v6426_v13 = vld [vmem:[%s9250_s0 + $0x9c] sm:$0xf]  ;;  %v6436_v63 = vld [vmem:[%s9250_s0 + $0xa0] sm:$0xf] }
  0x58   :  { %1209 = vrot.lane.b32.xlu0 %v6247_v19, %s5895_s26  ;;  %v362_v61 = vsel %vm5954_vm5, %v357_v14, %v361_v0  ;;  %v393_v0 = vrot.slane %v391_v48, 5  ;;  %v47_v14 = vld [vmem:[%s9250_s0 + $0x8c] sm:$0x1] }
  0x59   :  { %v6327_v34 = vcombine.low %v352_v22, %v362_v61  ;;  %v407_v20 = vshll.u32 %v47_v14, 16  ;;  %v6386_v22 = vld [vmem:[%s9250_s0 + $0x94] sm:$0xf]  ;;  %v405_v36 = vrot.slane %v404_v17, 4  ;;  %v2246_v48 = vrot.slane %v47_v14, 5 }
  0x5a   :  { %2576 = vrot.lane.b32.xlu1 %v6247_v19, %s5894_s19  ;;  %v425_v41 = vshrl.u32 %v6386_v22, 16  ;;  %v4441_v17 = vcombine.low %v5921_v2, %v5928_v7  ;;  %v6453_v2 = vcombine.low %v6378_v21, %v6386_v22  ;;  %v4555_v7 = vrot.slane %v6378_v21, 9 }
  0x5b   :  { %v409_v37 = vrot.slane %v407_v20, 5  ;;  %v436_v20 = vshrl.u32 %v6426_v13, 16 }
  0x5c   :  { %2514 = vrot.lane.b32.xlu0 %v4584_v26, %s5895_s26  ;;  %v427_v56 = vrot.slane %v425_v41, 4 }
  0x5d   :  { %v410_v51 = vsel %vm5954_vm5, %v405_v36, %v409_v37 }
  0x5e   :  { %1351 = vrot.lane.b32.xlu1 %v6247_v19, %s5896_s11 }
  0x60   :  { %1283 = vrot.lane.b32.xlu0 %v6276_v43, %s5894_s19 }
  0x62   :  { %2646 = vrot.lane.b32.xlu1 %v4584_v26, %s5896_s11  ;;  %v375_v26 = vrot.slane %v373_v12, 5 }
  0x64   :  { %2578 = vrot.lane.b32.xlu0 %v6293_v55, %s5894_s19  ;;  %v380_v38 = vor.u32 %v379_v29, %v375_v26  ;;  %v376_v1 = vsel %vm5954_vm5, %v371_v46, %v375_v26  ;;  %v2243_v29 = vrot.slane %v6343_v15, 5 }
  0x66   :  { %2648 = vrot.lane.b32.xlu1 %v4585_v62, %s5896_s11  ;;  %v381_v52 = vrot.slane %v380_v38, 4  ;;  %v421_v38 = vshll.u32 %v6386_v22, 16  ;;  %v2244_v25 = vsel %vm5930_vm3, %v4554_v42, %v2243_v29 }
  0x68   :  { %1353 = vrot.lane.b32.xlu0 %v6293_v55, %s5896_s11  ;;  %v386_v3 = vsel %vm5954_vm5, %v381_v52, %v385_v50  ;;  %v414_v52 = vrot.slane %v412_v32, 4  ;;  %v417_v50 = vrot.slane %v415_v35, 5  ;;  %v6407_v53 = vrot.slane %v421_v38, 5 }
  0x69   :  { %v6373_v12 = vcombine.low %v376_v1, %v386_v3  ;;  %v445_v35 = vshll.u32 %v6436_v63, 16  ;;  %v449_v38 = vshrl.u32 %v6436_v63, 16 }
  0x6a   :  { %2516 = vrot.lane.b32.xlu1 %v4585_v62, %s5895_s26  ;;  %v390_v62 = vrot.slane %v388_v47, 4  ;;  %v2245_v47 = vrot.slane %v2243_v29, 4  ;;  %v428_v14 = vor.u32 %v427_v56, %v6407_v53 }
  0x6c   :  { %1211 = vrot.lane.b32.xlu0 %v6293_v55, %s5895_s26  ;;  %v394_v16 = vor.u32 %v393_v0, %v390_v62  ;;  %v50_v62 = vld [vmem:[%s9250_s0 + $0x98] sm:$0x1]  ;;  %v2247_v15 = vsel %vm5930_vm3, %v2245_v47, %v2246_v48  ;;  %v429_v36 = vrot.slane %v428_v14, 4 }
  0x6d   :  { %v431_v60 = vshll.u32 %v50_v62, 16  ;;  %v4588_v29 = vcombine.low %v2244_v25, %v2247_v15  ;;  %v2253_v47 = vrot.slane %v50_v62, 5  ;;  %v447_v62 = vrot.slane %v445_v35, 5 }
  0x6e   :  { %1285 = vrot.lane.b32.xlu1 %v6320_v30, %s5894_s19  ;;  %v395_v26 = vrot.slane %v394_v16, 4  ;;  %v2250_v16 = vrot.slane %v6386_v22, 5  ;;  %v451_v25 = vrot.slane %v449_v38, 4  ;;  %v2257_v38 = vrot.slane %v6436_v63, 5 }
  0x6f   :  { %v433_v37 = vrot.slane %v431_v60, 5 }
  0x70   :  { %1213 = vrot.lane.b32.xlu0 %v6327_v34, %s5895_s26  ;;  %v400_v54 = vsel %vm5954_vm5, %v395_v26, %v399_v10  ;;  %v418_v10 = vor.u32 %v417_v50, %v414_v52  ;;  %v2252_v42 = vrot.slane %v2250_v16, 4  ;;  %v438_v50 = vrot.slane %v436_v20, 4 }
  0x71   :  { %v6421_v3 = vcombine.low %v400_v54, %v410_v51  ;;  %v2251_v15 = vsel %vm5930_vm3, %v4555_v7, %v2250_v16 }
  0x72   :  { %2580 = vrot.lane.b32.xlu1 %v6327_v34, %s5894_s19  ;;  %v419_v32 = vrot.slane %v418_v10, 4  ;;  %v2254_v14 = vsel %vm5930_vm3, %v2252_v42, %v2253_v47 }
  0x74   :  { %2518 = vrot.lane.b32.xlu0 %v4586_v44, %s5895_s26  ;;  %v424_v21 = vsel %vm5954_vm5, %v419_v32, %v6407_v53  ;;  %v6498_v32 = vld [vmem:[%s9250_s0 + $0xa8] sm:$0xf] }
  0x75   :  { %v463_v7 = vshll.u32 %v6498_v32, 16 }
  0x76   :  { %1355 = vrot.lane.b32.xlu1 %v6327_v34, %s5896_s11  ;;  %v6381_v23 = vpop.permute.xlu1 %1269 }
  0x78   :  { %1287 = vrot.lane.b32.xlu0 %v6356_v59, %s5894_s19 }
  0x7a   :  { %2650 = vrot.lane.b32.xlu1 %v4586_v44, %s5896_s11 }
  0x7c   :  { %2582 = vrot.lane.b32.xlu0 %v6373_v12, %s5894_s19  ;;  %v2501_v61 = vpop.permute.xlu0 %2500 }
  0x7d   :  { %v2700_v48 = vsel %vm1403_vm6, %v6036_v31, %v2501_v61  ;;  %v434_v61 = vsel %vm5954_vm5, %v429_v36, %v433_v37 }
  0x7e   :  { %2652 = vrot.lane.b32.xlu1 %v4587_v24, %s5896_s11  ;;  %v6487_v20 = vcombine.low %v424_v21, %v434_v61 }
  0x80   :  { %1357 = vrot.lane.b32.xlu0 %v6373_v12, %s5896_s11  ;;  %v6399_v44 = vpop.permute.xlu1 %1197  ;;  %v6401_v46 = vpop.permute.xlu0 %2502 }
  0x81   :  { %v2703_v53 = vsel %vm1403_vm6, %v5980_v49, %v6401_v46  ;;  %v1409_v49 = vsel %vm1403_vm6, %v5923_v5, %v6399_v44  ;;  %v4589_v5 = vcombine.low %v2251_v15, %v2254_v14  ;;  %v6508_v44 = vld [vmem:[%s9250_s0 + $0xac] sm:$0xf] }
  0x82   :  { %2520 = vrot.lane.b32.xlu1 %v4587_v24, %s5895_s26  ;;  %v439_v24 = vshll.u32 %v6426_v13, 16 }
  0x84   :  { %1215 = vrot.lane.b32.xlu0 %v6373_v12, %s5895_s26  ;;  %v2565_v0 = vpop.permute.xlu1 %2564  ;;  %v6419_v1 = vpop.permute.xlu0 %1271  ;;  %v441_v54 = vrot.slane %v439_v24, 5 }
  0x85   :  { %v2795_v51 = vsel %vm1500_vm7, %v2700_v48, %v2565_v0  ;;  %v53_v0 = vld [vmem:[%s9250_s0 + $0xa4] sm:$0x1]  ;;  %v1504_v35 = vsel %vm1500_vm7, %v1409_v49, %v6419_v1  ;;  %v469_v48 = vshll.u32 %v6508_v44, 16 }
  0x86   :  { %1289 = vrot.lane.b32.xlu1 %v6412_v58, %s5894_s19  ;;  %v455_v24 = vshll.u32 %v53_v0, 16  ;;  %v442_v16 = vor.u32 %v441_v54, %v438_v50  ;;  %v4556_v54 = vrot.slane %v6426_v13, 9 }
  0x88   :  { %1217 = vrot.lane.b32.xlu0 %v6421_v3, %s5895_s26  ;;  %v1340_v26 = vpop.permute.xlu1 %1339  ;;  %v443_v42 = vrot.slane %v442_v16, 4 }
  0x8a   :  { %v1196_v41 = vpop.permute.xlu0 %1195  ;;  %2584 = vrot.lane.b32.xlu1 %v6421_v3, %s5894_s19  ;;  %v448_v61 = vsel %vm5954_vm5, %v443_v42, %v447_v62 }
  0x8b   :  { %v1406_v52 = vsel %vm1403_vm6, %v4441_v17, %v1196_v41  ;;  %v460_v41 = vshrl.u32 %v6498_v32, 16 }
  0x8c   :  { %2522 = vrot.lane.b32.xlu0 %v4588_v29, %s5895_s26  ;;  %v2635_v56 = vpop.permute.xlu1 %2634  ;;  %v1502_v22 = vsel %vm1500_vm7, %v1406_v52, %v6381_v23  ;;  %v473_v52 = vshrl.u32 %v6508_v44, 16 }
  0x8d   :  { %v1567_v10 = vsel %vm1565_vm8, %v1502_v22, %v1340_v26  ;;  %v2859_v31 = vsel %vm1565_vm8, %v2795_v51, %v2635_v56  ;;  %v452_v26 = vor.u32 %v451_v25, %v447_v62  ;;  %v2259_v56 = vrot.slane %v2257_v38, 4 }
  0x8e   :  { %5065 = vmatprep.mubr.msk.bf16.mxu0 %vm1646_vm9, %v1567_v10  ;;  %v2567_v23 = vpop.permute.xlu0 %2566  ;;  %1359 = vrot.lane.b32.xlu1 %v6421_v3, %s5896_s11  ;;  %v2260_v22 = vrot.slane %v53_v0, 5  ;;  %v462_v21 = vrot.slane %v460_v41, 4  ;;  %v465_v10 = vrot.slane %v463_v7, 5  ;;  %v6536_v0 = vcombine.low %v6426_v13, %v6436_v63  ;;  %v6549_v13 = vld [vmem:[%s9250_s0 + $0xb4] sm:$0xf] }
  0x8f   :  { %5133 = vmatprep.mubr.msk.bf16.mxu1 %vm1646_vm9, %v2859_v31  ;;  %v2797_v60 = vsel %vm1500_vm7, %v2703_v53, %v2567_v23  ;;  %v453_v47 = vrot.slane %v452_v26, 4  ;;  %v56_v31 = vld [vmem:[%s9250_s0 + $0xb0] sm:$0x1]  ;;  %v471_v23 = vrot.slane %v469_v48, 5  ;;  %v475_v53 = vrot.slane %v473_v52, 4 }
  0x90   :  { %1291 = vrot.lane.b32.xlu0 %v6453_v2, %s5894_s19  ;;  %v2637_v17 = vpop.permute.xlu1 %2636  ;;  %v479_v14 = vshll.u32 %v56_v31, 16  ;;  %v2258_v62 = vsel %vm5930_vm3, %v4556_v54, %v2257_v38  ;;  %v466_v49 = vor.u32 %v465_v10, %v462_v21  ;;  %v6556_v26 = vld [vmem:[%s9250_s0 + $0xb8] sm:$0xf]  ;;  %v484_v42 = vshrl.u32 %v6549_v13, 16 }
  0x91   :  { %v6493_v46 = vsel %vm1565_vm8, %v2797_v60, %v2637_v17  ;;  %v476_v16 = vor.u32 %v475_v53, %v471_v23  ;;  %v2267_v10 = vrot.slane %v56_v31, 5 }
  0x92   :  { %v1342_v36 = vpop.permute.xlu0 %1341  ;;  %2654 = vrot.lane.b32.xlu1 %v4588_v29, %s5896_s11  ;;  %5134 = vmatmul.mubr.msk.bf16.vlgmr.msra.gmra.mrb[0].mxu1 %vm1646_vm9, %v6493_v46  ;;  %v457_v29 = vrot.slane %v455_v24, 5  ;;  %v2261_v24 = vsel %vm5930_vm3, %v2259_v56, %v2260_v22  ;;  %v467_v7 = vrot.slane %v466_v49, 4  ;;  %v4557_v22 = vrot.slane %v6498_v32, 9 }
  0x93   :  { %v6511_v37 = vsel %vm1565_vm8, %v1504_v35, %v1342_v36  ;;  %v4590_v36 = vcombine.low %v2258_v62, %v2261_v24  ;;  %v477_v52 = vrot.slane %v476_v16, 4  ;;  %v6609_v16 = vld [vmem:[%s9250_s0 + $0xc0] sm:$0xf] }
  0x94   :  { %2586 = vrot.lane.b32.xlu0 %v6487_v20, %s5894_s19  ;;  %5066 = vmatmul.mubr.msk.bf16.vlgmr.msra.gmra.mrb[0].mxu0 %vm1646_vm9, %v6511_v37  ;;  %v2505_v1 = vpop.permute.xlu1 %2504  ;;  %v458_v25 = vsel %vm5954_vm5, %v453_v47, %v457_v29  ;;  %v2264_v29 = vrot.slane %v6508_v44, 5  ;;  %v487_v47 = vshll.u32 %v6549_v13, 16  ;;  %v472_v53 = vsel %vm5954_vm5, %v467_v7, %v471_v23  ;;  %v59_v23 = vld [vmem:[%s9250_s0 + $0xbc] sm:$0x1] }
  0x95   :  { %v6540_v17 = vcombine.low %v448_v61, %v458_v25  ;;  %v2706_v56 = vsel %vm1403_vm6, %v6053_v40, %v2505_v1 }
  0x96   :  { %v1200_v50 = vpop.permute.xlu0 %1199  ;;  %2656 = vrot.lane.b32.xlu1 %v4589_v5, %s5896_s11  ;;  %v2266_v21 = vrot.slane %v2264_v29, 4  ;;  %v489_v62 = vrot.slane %v487_v47, 5  ;;  %v2265_v24 = vsel %vm5930_vm3, %v4557_v22, %v2264_v29 }
  0x97   :  { %v1412_v35 = vsel %vm1403_vm6, %v5993_v57, %v1200_v50  ;;  %v493_v57 = vshll.u32 %v6556_v26, 16  ;;  %v497_v50 = vshrl.u32 %v6556_v26, 16 }
  0x98   :  { %1361 = vrot.lane.b32.xlu0 %v6487_v20, %s5896_s11  ;;  %v1274_v51 = vpop.permute.xlu1 %1273  ;;  %v2268_v49 = vsel %vm5930_vm3, %v2266_v21, %v2267_v10 }
  0x99   :  { %v1506_v38 = vsel %vm1500_vm7, %v1412_v35, %v1274_v51  ;;  %v6577_v51 = vcombine.low %v6498_v32, %v6508_v44  ;;  %v6591_v1 = vrot.slane %v493_v57, 5  ;;  %v499_v32 = vrot.slane %v497_v50, 4 }
  0x9a   :  { %v1202_v15 = vpop.permute.xlu0 %1201  ;;  %2524 = vrot.lane.b32.xlu1 %v4589_v5, %s5895_s26  ;;  %v481_v5 = vrot.slane %v479_v14, 5  ;;  %v486_v14 = vrot.slane %v484_v42, 4  ;;  %v503_v42 = vshll.u32 %v59_v23, 16  ;;  %v4591_v57 = vcombine.low %v2265_v24, %v2268_v49  ;;  %v6652_v24 = vld [vmem:[%s9250_s0 + $0xc8] sm:$0x1] }
  0x9b   :  { %v1415_v29 = vsel %vm1403_vm6, %v6083_v4, %v1202_v15  ;;  %v500_v7 = vor.u32 %v499_v32, %v6591_v1  ;;  %v892_v50 = vshrl.u32 %v6609_v16, 16  ;;  %v2271_v15 = vrot.slane %v6556_v26, 5 }
  0x9c   :  { %1219 = vrot.lane.b32.xlu0 %v6487_v20, %s5895_s26  ;;  %v2569_v60 = vpop.permute.xlu1 %2568  ;;  %v482_v40 = vsel %vm5954_vm5, %v477_v52, %v481_v5  ;;  %v2274_v32 = vrot.slane %v59_v23, 5 }
  0x9d   :  { %v2799_v61 = vsel %vm1500_vm7, %v2706_v56, %v2569_v60  ;;  %v895_v56 = vshll.u32 %v6609_v16, 16  ;;  %v501_v10 = vrot.slane %v500_v7, 4  ;;  %v6676_v7 = vcombine.low %v6549_v13, %v6556_v26 }
  0x9e   :  { %v2507_v63 = vpop.permute.xlu0 %2506  ;;  %1293 = vrot.lane.b32.xlu1 %v6536_v0, %s5894_s19 }
  0x9f   :  { %v2709_v60 = vsel %vm1403_vm6, %v6087_v9, %v2507_v63  ;;  %v490_v9 = vor.u32 %v489_v62, %v486_v14  ;;  %v6619_v63 = vld [vmem:[%s9250_s0 + $0xc4] sm:$0xf]  ;;  %v894_v14 = vrot.slane %v892_v50, 4  ;;  %v897_v62 = vrot.slane %v895_v56, 5 }
  0xa0   :  { %1221 = vrot.lane.b32.xlu0 %v6540_v17, %s5895_s26  ;;  %v1344_v41 = vpop.permute.xlu1 %1343  ;;  %v901_v22 = vshll.u32 %v6619_v63, 16 }
  0xa1   :  { %v6567_v48 = vsel %vm1565_vm8, %v1506_v38, %v1344_v41  ;;  %v6614_v38 = vcombine.low %v472_v53, %v482_v40  ;;  %v491_v21 = vrot.slane %v490_v9, 4  ;;  %v4558_v53 = vrot.slane %v6549_v13, 9  ;;  %v6669_v9 = vld [vmem:[%s9250_s0 + $0xdc] sm:$0xf] }
  0xa2   :  { %9290 = vst [vmem:[#allocation2_spill] sm:$0xff] %v6567_v48  ;;  %v1276_v54 = vpop.permute.xlu0 %1275  ;;  %2588 = vrot.lane.b32.xlu1 %v6540_v17, %s5894_s19  ;;  %5069 = vmatprep.mubr.msk.bf16.mxu0 %vm1646_vm9, %v6567_v48  ;;  %v2273_v40 = vrot.slane %v2271_v15, 4 }
  0xa3   :  { %v1508_v47 = vsel %vm1500_vm7, %v1415_v29, %v1276_v54  ;;  %v905_v54 = vshrl.u32 %v6619_v63, 16  ;;  %v496_v23 = vsel %vm5954_vm5, %v491_v21, %v6591_v1  ;;  %v898_v1 = vor.u32 %v897_v62, %v894_v14  ;;  %v6699_v21 = vld [vmem:[%s9250_s0 + $0xe4] sm:$0xf] }
  0xa4   :  { %2526 = vrot.lane.b32.xlu0 %v4590_v36, %s5895_s26  ;;  %v2639_v25 = vpop.permute.xlu1 %2638  ;;  %v2392_v62 = vrot.slane %v6619_v63, 5 }
  0xa5   :  { %v6587_v44 = vsel %vm1565_vm8, %v2799_v61, %v2639_v25  ;;  %v505_v61 = vrot.slane %v503_v42, 5  ;;  %v2272_v42 = vsel %vm5930_vm3, %v4558_v53, %v2271_v15  ;;  %v521_v15 = vshrl.u32 %v6669_v9, 16 }
  0xa6   :  { %9291 = vst [vmem:[#allocation3_spill] sm:$0xff] %v6587_v44  ;;  %v2571_v31 = vpop.permute.xlu0 %2570  ;;  %1363 = vrot.lane.b32.xlu1 %v6540_v17, %s5896_s11  ;;  %5137 = vmatprep.mubr.msk.bf16.mxu1 %vm1646_vm9, %v6587_v44  ;;  %v899_v53 = vrot.slane %v898_v1, 4 }
  0xa7   :  { %v2801_v35 = vsel %vm1500_vm7, %v2709_v60, %v2571_v31  ;;  %v6647_v31 = vrot.slane %v901_v22, 5  ;;  %v907_v60 = vrot.slane %v905_v54, 4  ;;  %v6694_v54 = vcombine.low %v6609_v16, %v6619_v63 }
  0xa8   :  { %1295 = vrot.lane.b32.xlu0 %v6577_v51, %s5894_s19  ;;  %v2641_v5 = vpop.permute.xlu1 %2640  ;;  %v523_v63 = vrot.slane %v521_v15, 4  ;;  %v2278_v15 = vrot.slane %v6669_v9, 5 }
  0xa9   :  { %v6624_v41 = vsel %vm1565_vm8, %v2801_v35, %v2641_v5  ;;  %v6659_v35 = vld [vmem:[%s9250_s0 + $0xd8] sm:$0xf]  ;;  %v506_v5 = vsel %vm5954_vm5, %v501_v10, %v505_v61  ;;  %v908_v50 = vor.u32 %v907_v60, %v6647_v31  ;;  %9294 = vst [vmem:[#allocation6_spill] sm:$0xff] %v6694_v54 }
  0xaa   :  { %9292 = vst [vmem:[#allocation4_spill] sm:$0xff] %v6624_v41  ;;  %v1346_v52 = vpop.permute.xlu0 %1345  ;;  %2658 = vrot.lane.b32.xlu1 %v4590_v36, %s5896_s11  ;;  %5138 = vmatmul.mubr.msk.bf16.gmra.mrb[4].mxu1 %vm1646_vm9, %v6624_v41  ;;  %v508_v56 = vshrl.u32 %v6659_v35, 16  ;;  %v511_v22 = vshll.u32 %v6659_v35, 16  ;;  %v6688_v26 = vcombine.low %v496_v23, %v506_v5 }
  0xab   :  { %v6634_v4 = vsel %vm1565_vm8, %v1508_v47, %v1346_v52  ;;  %v911_v47 = vshll.u32 %v6652_v24, 16  ;;  %v2275_v52 = vsel %vm5930_vm3, %v2273_v40, %v2274_v32  ;;  %v6709_v40 = vld [vmem:[%s9250_s0 + $0xe8] sm:$0xf]  ;;  %v909_v60 = vrot.slane %v908_v50, 4 }
  0xac   :  { %9293 = vst [vmem:[#allocation5_spill] sm:$0xff] %v6634_v4  ;;  %2590 = vrot.lane.b32.xlu0 %v6614_v38, %s5894_s19  ;;  %5070 = vmatmul.mubr.msk.bf16.gmra.mrb[4].mxu0 %vm1646_vm9, %v6634_v4  ;;  %v6643_v36 = vpop.permute.xlu1 %2508  ;;  %v6703_v61 = vcombine.low %v2272_v42, %v2275_v52  ;;  %v510_v23 = vrot.slane %v508_v56, 4  ;;  %v513_v5 = vrot.slane %v511_v22, 5  ;;  %v541_v50 = vshll.u32 %v6709_v40, 16 }
  0xad   :  { %v913_v14 = vrot.slane %v911_v47, 5  ;;  %v532_v47 = vshrl.u32 %v6699_v21, 16  ;;  %v2394_v22 = vrot.slane %v2392_v62, 4 }
  0xae   :  { %v1204_v25 = vpop.permute.xlu0 %1203  ;;  %2660 = vrot.lane.b32.xlu1 %v4591_v57, %s5896_s11  ;;  %v514_v41 = vor.u32 %v513_v5, %v510_v23  ;;  %v4559_v23 = vrot.slane %v6659_v35, 9  ;;  %v2280_v5 = vrot.slane %v2278_v15, 4 }
  0xaf   :  { %v1418_v32 = vsel %vm1403_vm6, %v6116_v27, %v1204_v25  ;;  %v68_v27 = vld [vmem:[%s9250_s0 + $0xe0] sm:$0x1]  ;;  %v535_v25 = vshll.u32 %v6699_v21, 16  ;;  %v914_v48 = vsel %vm5954_vm5, %v909_v60, %v913_v14  ;;  %v534_v44 = vrot.slane %v532_v47, 4 }
  0xb0   :  { %1365 = vrot.lane.b32.xlu0 %v6614_v38, %s5896_s11  ;;  %v1278_v49 = vpop.permute.xlu1 %1277 }
  0xb1   :  { %v1510_v4 = vsel %vm1500_vm7, %v1418_v32, %v1278_v49  ;;  %v545_v49 = vshrl.u32 %v6709_v40, 16  ;;  %v2712_v32 = vsel %vm1403_vm6, %v6133_v39, %v6643_v36  ;;  %v6753_v36 = vld [vmem:[%s9250_s0 + $0xec] sm:$0x1] }
  0xb2   :  { %v6671_v29 = vpop.permute.xlu0 %1205  ;;  %2528 = vrot.lane.b32.xlu1 %v4591_v57, %s5895_s26  ;;  %v517_v57 = vshll.u32 %v6669_v9, 16  ;;  %v527_v9 = vshll.u32 %v68_v27, 16  ;;  %v551_v35 = vshll.u32 %v6753_v36, 16 }
  0xb4   :  { %1223 = vrot.lane.b32.xlu0 %v6614_v38, %s5895_s26  ;;  %v2573_v13 = vpop.permute.xlu1 %2572  ;;  %v6716_v1 = vrot.slane %v517_v57, 5  ;;  %v2395_v57 = vrot.slane %v6652_v24, 5 }
  0xb6   :  { %v2511_v10 = vpop.permute.xlu0 %2510  ;;  %1297 = vrot.lane.b32.xlu1 %v6676_v7, %s5894_s19  ;;  %v524_v24 = vor.u32 %v523_v63, %v6716_v1  ;;  %v2281_v63 = vrot.slane %v68_v27, 5  ;;  %v6784_v27 = vld [vmem:[%s9250_s0 + $0xf0] sm:$0xf] }
  0xb7   :  { %v2715_v47 = vsel %vm1403_vm6, %v6167_v11, %v2511_v10  ;;  %v1421_v11 = vsel %vm1403_vm6, %v6160_v6, %v6671_v29  ;;  %v6798_v29 = vld [vmem:[%s9250_s0 + $0xf4] sm:$0xf] }
  0xb8   :  { %1225 = vrot.lane.b32.xlu0 %v6688_v26, %s5895_s26  ;;  %v1348_v42 = vpop.permute.xlu1 %1347 }
  0xb9   :  { %v6720_v52 = vsel %vm1565_vm8, %v1510_v4, %v1348_v42  ;;  %v4575_v4 = vrot.slane %v6609_v16, 9  ;;  %v904_v42 = vsel %vm5954_vm5, %v899_v53, %v6647_v31  ;;  %v537_v31 = vrot.slane %v535_v25, 5 }
  0xba   :  { %9295 = vst [vmem:[#allocation7_spill] sm:$0xff] %v6720_v52  ;;  %v1280_v56 = vpop.permute.xlu0 %1279  ;;  %2592 = vrot.lane.b32.xlu1 %v6688_v26, %s5894_s19  ;;  %5073 = vmatprep.mubr.msk.bf16.mxu0 %vm1646_vm9, %v6720_v52  ;;  %v2803_v52 = vsel %vm1500_vm7, %v2712_v32, %v2573_v13  ;;  %v6755_v53 = vrot.slane %v541_v50, 5  ;;  %v547_v13 = vrot.slane %v545_v49, 4  ;;  %v2396_v25 = vsel %vm5930_vm3, %v2394_v22, %v2395_v57 }
  0xbb   :  { %v2393_v60 = vsel %vm5930_vm3, %v4575_v4, %v2392_v62  ;;  %v515_v49 = vrot.slane %v514_v41, 4  ;;  %v525_v62 = vrot.slane %v524_v24, 4  ;;  %v529_v4 = vrot.slane %v527_v9, 5 }
  0xbc   :  { %2530 = vrot.lane.b32.xlu0 %v6703_v61, %s5895_s26  ;;  %v2643_v16 = vpop.permute.xlu1 %2642  ;;  %v538_v10 = vor.u32 %v537_v31, %v534_v44  ;;  %v548_v41 = vor.u32 %v547_v13, %v6755_v53  ;;  %v1512_v22 = vsel %vm1500_vm7, %v1421_v11, %v1280_v56  ;;  %v6791_v6 = vcombine.low %v2393_v60, %v2396_v25 }
  0xbd   :  { %v6748_v39 = vsel %vm1565_vm8, %v2803_v52, %v2643_v16  ;;  %v6766_v52 = vcombine.low %v904_v42, %v914_v48  ;;  %v2279_v44 = vsel %vm5930_vm3, %v4559_v23, %v2278_v15  ;;  %v2282_v56 = vsel %vm5930_vm3, %v2280_v5, %v2281_v63 }
  0xbe   :  { %v2575_v14 = vpop.permute.xlu0 %2574  ;;  %1367 = vrot.lane.b32.xlu1 %v6688_v26, %s5896_s11  ;;  %5141 = vmatprep.mubr.msk.bf16.mxu1 %vm1646_vm9, %v6748_v39  ;;  %v2285_v16 = vrot.slane %v6709_v40, 5  ;;  %v530_v24 = vsel %vm5954_vm5, %v525_v62, %v529_v4  ;;  %v553_v9 = vrot.slane %v551_v35, 5  ;;  %v556_v31 = vshrl.u32 %v6784_v27, 16  ;;  %v74_v62 = vld [vmem:[%s9250_s0 + $0xf8] sm:$0x1] }
  0xbf   :  { %v2805_v50 = vsel %vm1500_vm7, %v2715_v47, %v2575_v14  ;;  %v559_v13 = vshll.u32 %v6784_v27, 16  ;;  %v539_v14 = vrot.slane %v538_v10, 4  ;;  %v549_v60 = vrot.slane %v548_v41, 4 }
  0xc0   :  { %1299 = vrot.lane.b32.xlu0 %v6694_v54, %s5894_s19  ;;  %v2645_v32 = vpop.permute.xlu1 %2644  ;;  %v565_v23 = vshll.u32 %v6798_v29, 16  ;;  %v4593_v63 = vcombine.low %v2279_v44, %v2282_v56  ;;  %v4560_v47 = vrot.slane %v6699_v21, 9  ;;  %v2288_v25 = vrot.slane %v6753_v36, 5 }
  0xc1   :  { %v6778_v48 = vsel %vm1565_vm8, %v2805_v50, %v2645_v32  ;;  %v2287_v32 = vrot.slane %v2285_v16, 4  ;;  %v558_v4 = vrot.slane %v556_v31, 4  ;;  %v561_v35 = vrot.slane %v559_v13, 5  ;;  %v6858_v13 = vld [vmem:[%s9250_s0 + $0x100] sm:$0xf] }
  0xc2   :  { %v1350_v57 = vpop.permute.xlu0 %1349  ;;  %2662 = vrot.lane.b32.xlu1 %v6703_v61, %s5896_s11  ;;  %5142 = vmatmul.mubr.msk.bf16.gmra.mrb[8].mxu1 %vm1646_vm9, %v6778_v48  ;;  %v520_v61 = vsel %vm5954_vm5, %v515_v49, %v6716_v1  ;;  %v569_v1 = vshrl.u32 %v6798_v29, 16  ;;  %v544_v11 = vsel %vm5954_vm5, %v539_v14, %v6755_v53  ;;  %v554_v36 = vsel %vm5954_vm5, %v549_v60, %v553_v9 }
  0xc3   :  { %v6801_v42 = vsel %vm1565_vm8, %v1512_v22, %v1350_v57  ;;  %v6825_v50 = vcombine.low %v520_v61, %v530_v24  ;;  %v567_v10 = vrot.slane %v565_v23, 5  ;;  %v6838_v57 = vcombine.low %v6699_v21, %v6709_v40  ;;  %v6851_v21 = vld [vmem:[%s9250_s0 + $0xfc] sm:$0xf] }
  0xc4   :  { %9296 = vst [vmem:[#allocation8_spill] sm:$0xff] %v6801_v42  ;;  %2594 = vrot.lane.b32.xlu0 %v6766_v52, %s5894_s19  ;;  %5074 = vmatmul.mubr.msk.bf16.gmra.mrb[8].mxu0 %vm1646_vm9, %v6801_v42  ;;  %v2513_v15 = vpop.permute.xlu1 %2512  ;;  %v571_v41 = vrot.slane %v569_v1, 4  ;;  %v575_v44 = vshll.u32 %v74_v62, 16  ;;  %v6842_v61 = vcombine.low %v544_v11, %v554_v36  ;;  %v2286_v53 = vsel %vm5930_vm3, %v4560_v47, %v2285_v16 }
  0xc5   :  { %v2289_v24 = vsel %vm5930_vm3, %v2287_v32, %v2288_v25  ;;  %v562_v9 = vor.u32 %v561_v35, %v558_v4  ;;  %v2292_v1 = vrot.slane %v6798_v29, 5  ;;  %v580_v25 = vshrl.u32 %v6851_v21, 16 }
  0xc6   :  { %v1208_v5 = vpop.permute.xlu0 %1207  ;;  %2664 = vrot.lane.b32.xlu1 %v6791_v6, %s5896_s11  ;;  %v572_v31 = vor.u32 %v571_v41, %v567_v10  ;;  %v4594_v14 = vcombine.low %v2286_v53, %v2289_v24  ;;  %v577_v60 = vrot.slane %v575_v44, 5  ;;  %v583_v32 = vshll.u32 %v6851_v21, 16 }
  0xc7   :  { %v1424_v16 = vsel %vm1403_vm6, %v6196_v33, %v1208_v5  ;;  %v563_v47 = vrot.slane %v562_v9, 4  ;;  %v593_v33 = vshrl.u32 %v6858_v13, 16  ;;  %v589_v5 = vshll.u32 %v6858_v13, 16 }
  0xc8   :  { %1369 = vrot.lane.b32.xlu0 %v6766_v52, %s5896_s11  ;;  %v1282_v49 = vpop.permute.xlu1 %1281  ;;  %v573_v35 = vrot.slane %v572_v31, 4  ;;  %v2718_v36 = vsel %vm1403_vm6, %v6213_v45, %v2513_v15  ;;  %v4561_v41 = vrot.slane %v6784_v27, 9  ;;  %v2294_v44 = vrot.slane %v2292_v1, 4 }
  0xc9   :  { %v1514_v23 = vsel %vm1500_vm7, %v1424_v16, %v1282_v49  ;;  %v6879_v49 = vcombine.low %v6784_v27, %v6798_v29  ;;  %v2295_v53 = vrot.slane %v74_v62, 5  ;;  %v568_v31 = vsel %vm5954_vm5, %v563_v47, %v567_v10  ;;  %v77_v62 = vld [vmem:[%s9250_s0 + $0x104] sm:$0x1] }
  0xca   :  { %v1210_v22 = vpop.permute.xlu0 %1209  ;;  %2532 = vrot.lane.b32.xlu1 %v4593_v63, %s5895_s26  ;;  %v582_v16 = vrot.slane %v580_v25, 4  ;;  %v578_v45 = vsel %vm5954_vm5, %v573_v35, %v577_v60  ;;  %v591_v15 = vrot.slane %v589_v5, 5  ;;  %v595_v27 = vrot.slane %v593_v33, 4  ;;  %v6919_v5 = vld [vmem:[%s9250_s0 + $0x108] sm:$0xf] }
  0xcb   :  { %v2296_v60 = vsel %vm5930_vm3, %v2294_v44, %v2295_v53  ;;  %v1427_v33 = vsel %vm1403_vm6, %v6243_v18, %v1210_v22  ;;  %v2299_v53 = vrot.slane %v6858_v13, 5 }
  0xcc   :  { %1227 = vrot.lane.b32.xlu0 %v6825_v50, %s5895_s26  ;;  %v2577_v56 = vpop.permute.xlu1 %2576 }
  0xcd   :  { %v2807_v24 = vsel %vm1500_vm7, %v2718_v36, %v2577_v56  ;;  %v2293_v56 = vsel %vm5930_vm3, %v4561_v41, %v2292_v1  ;;  %v599_v1 = vshll.u32 %v77_v62, 16  ;;  %v6924_v36 = vld [vmem:[%s9250_s0 + $0x10c] sm:$0xf] }
  0xce   :  { %v2515_v40 = vpop.permute.xlu0 %2514  ;;  %1301 = vrot.lane.b32.xlu1 %v6838_v57, %s5894_s19  ;;  %v4595_v18 = vcombine.low %v2293_v56, %v2296_v60  ;;  %v2302_v56 = vrot.slane %v77_v62, 5  ;;  %v6956_v62 = vcombine.low %v6851_v21, %v6858_v13 }
  0xcf   :  { %v2721_v10 = vsel %vm1403_vm6, %v6247_v19, %v2515_v40  ;;  %v596_v40 = vor.u32 %v595_v27, %v591_v15 }
  0xd0   :  { %1229 = vrot.lane.b32.xlu0 %v6842_v61, %s5895_s26  ;;  %v1352_v63 = vpop.permute.xlu1 %1351 }
  0xd1   :  { %v6869_v4 = vsel %vm1565_vm8, %v1514_v23, %v1352_v63  ;;  %v585_v23 = vrot.slane %v583_v32, 5  ;;  %v6909_v32 = vcombine.low %v568_v31, %v578_v45  ;;  %v613_v31 = vshll.u32 %v6924_v36, 16 }
  0xd2   :  { %9297 = vst [vmem:[#allocation9_spill] sm:$0xff] %v6869_v4  ;;  %v1284_v11 = vpop.permute.xlu0 %1283  ;;  %2596 = vrot.lane.b32.xlu1 %v6842_v61, %s5894_s19  ;;  %5077 = vmatprep.mubr.msk.bf16.mxu0 %vm1646_vm9, %v6869_v4  ;;  %v601_v45 = vrot.slane %v599_v1, 5 }
  0xd3   :  { %v586_v35 = vor.u32 %v585_v23, %v582_v16  ;;  %v1516_v41 = vsel %vm1500_vm7, %v1427_v33, %v1284_v11  ;;  %v604_v11 = vshrl.u32 %v6919_v5, 16  ;;  %v597_v23 = vrot.slane %v596_v40, 4 }
  0xd4   :  { %2534 = vrot.lane.b32.xlu0 %v4594_v14, %s5895_s26  ;;  %v2647_v9 = vpop.permute.xlu1 %2646 }
  0xd5   :  { %v6889_v29 = vsel %vm1565_vm8, %v2807_v24, %v2647_v9  ;;  %v617_v9 = vshrl.u32 %v6924_v36, 16  ;;  %v587_v16 = vrot.slane %v586_v35, 4  ;;  %v615_v35 = vrot.slane %v613_v31, 5 }
  0xd6   :  { %9298 = vst [vmem:[#allocation10_spill] sm:$0xff] %v6889_v29  ;;  %v2579_v63 = vpop.permute.xlu0 %2578  ;;  %1371 = vrot.lane.b32.xlu1 %v6842_v61, %s5896_s11  ;;  %5145 = vmatprep.mubr.msk.bf16.mxu1 %vm1646_vm9, %v6889_v29 }
  0xd7   :  { %v2809_v47 = vsel %vm1500_vm7, %v2721_v10, %v2579_v63  ;;  %v4562_v63 = vrot.slane %v6851_v21, 9  ;;  %v2301_v10 = vrot.slane %v2299_v53, 4  ;;  %v619_v40 = vrot.slane %v617_v9, 4  ;;  %v6969_v21 = vld [vmem:[%s9250_s0 + $0x114] sm:$0xf] }
  0xd8   :  { %1303 = vrot.lane.b32.xlu0 %v6879_v49, %s5894_s19  ;;  %v2649_v25 = vpop.permute.xlu1 %2648  ;;  %v592_v1 = vsel %vm5954_vm5, %v587_v16, %v591_v15 }
  0xd9   :  { %v6914_v19 = vsel %vm1565_vm8, %v2809_v47, %v2649_v25  ;;  %v80_v47 = vld [vmem:[%s9250_s0 + $0x110] sm:$0x1]  ;;  %v606_v25 = vrot.slane %v604_v11, 4  ;;  %v2300_v54 = vsel %vm5930_vm3, %v4562_v63, %v2299_v53  ;;  %v2303_v15 = vsel %vm5930_vm3, %v2301_v10, %v2302_v56 }
  0xda   :  { %9299 = vst [vmem:[#allocation11_spill] sm:$0xff] %v6914_v19  ;;  %v1354_v44 = vpop.permute.xlu0 %1353  ;;  %2666 = vrot.lane.b32.xlu1 %v4594_v14, %s5896_s11  ;;  %5146 = vmatmul.mubr.msk.bf16.gmra.mrb[12].mxu1 %vm1646_vm9, %v6914_v19  ;;  %v607_v14 = vshll.u32 %v6919_v5, 16  ;;  %v623_v11 = vshll.u32 %v80_v47, 16  ;;  %v620_v16 = vor.u32 %v619_v40, %v615_v35  ;;  %v2306_v63 = vrot.slane %v6924_v36, 5 }
  0xdb   :  { %v6931_v22 = vsel %vm1565_vm8, %v1516_v41, %v1354_v44  ;;  %v602_v41 = vsel %vm5954_vm5, %v597_v23, %v601_v45  ;;  %v4596_v23 = vcombine.low %v2300_v54, %v2303_v15  ;;  %v628_v40 = vshrl.u32 %v6969_v21, 16 }
  0xdc   :  { %9300 = vst [vmem:[#allocation12_spill] sm:$0xff] %v6931_v22  ;;  %2598 = vrot.lane.b32.xlu0 %v6909_v32, %s5894_s19  ;;  %5078 = vmatmul.mubr.msk.bf16.gmra.mrb[12].mxu0 %vm1646_vm9, %v6931_v22  ;;  %v2517_v24 = vpop.permute.xlu1 %2516  ;;  %v609_v33 = vrot.slane %v607_v14, 5  ;;  %v6962_v9 = vcombine.low %v592_v1, %v602_v41  ;;  %v625_v45 = vrot.slane %v623_v11, 5  ;;  %v631_v41 = vshll.u32 %v6969_v21, 16 }
  0xdd   :  { %v2724_v11 = vsel %vm1403_vm6, %v6293_v55, %v2517_v24  ;;  %v4563_v15 = vrot.slane %v6919_v5, 9  ;;  %v83_v55 = vld [vmem:[%s9250_s0 + $0x11c] sm:$0x1] }
  0xde   :  { %v1212_v27 = vpop.permute.xlu0 %1211  ;;  %2668 = vrot.lane.b32.xlu1 %v4595_v18, %s5896_s11  ;;  %v610_v31 = vor.u32 %v609_v33, %v606_v25  ;;  %v621_v33 = vrot.slane %v620_v16, 4  ;;  %v2309_v16 = vrot.slane %v80_v47, 5 }
  0xdf   :  { %v1430_v53 = vsel %vm1403_vm6, %v6276_v43, %v1212_v27 }
  0xe0   :  { %1373 = vrot.lane.b32.xlu0 %v6909_v32, %s5896_s11  ;;  %v1286_v60 = vpop.permute.xlu1 %1285  ;;  %v611_v25 = vrot.slane %v610_v31, 4  ;;  %v2308_v31 = vrot.slane %v2306_v63, 4 }
  0xe1   :  { %v1518_v10 = vsel %vm1500_vm7, %v1430_v53, %v1286_v60  ;;  %v6997_v60 = vcombine.low %v6919_v5, %v6924_v36  ;;  %v630_v36 = vrot.slane %v628_v40, 4  ;;  %v633_v5 = vrot.slane %v631_v41, 5 }
  0xe2   :  { %v1214_v44 = vpop.permute.xlu0 %1213  ;;  %2536 = vrot.lane.b32.xlu1 %v4595_v18, %s5895_s26  ;;  %v6976_v18 = vld [vmem:[%s9250_s0 + $0x118] sm:$0xf] }
  0xe3   :  { %v641_v43 = vshrl.u32 %v6976_v18, 16  ;;  %v637_v54 = vshll.u32 %v6976_v18, 16 }
  0xe4   :  { %1231 = vrot.lane.b32.xlu0 %v6909_v32, %s5895_s26  ;;  %v2581_v14 = vpop.permute.xlu1 %2580 }
  0xe5   :  { %v2811_v53 = vsel %vm1500_vm7, %v2724_v11, %v2581_v14  ;;  %v639_v24 = vrot.slane %v637_v54, 5  ;;  %v643_v47 = vrot.slane %v641_v43, 4  ;;  %v647_v43 = vshll.u32 %v83_v55, 16  ;;  %v7037_v11 = vld [vmem:[%s9250_s0 + $0x120] sm:$0xf] }
  0xe6   :  { %v2519_v13 = vpop.permute.xlu0 %2518  ;;  %1305 = vrot.lane.b32.xlu1 %v6956_v62, %s5894_s19  ;;  %v1433_v54 = vsel %vm1403_vm6, %v6320_v30, %v1214_v44  ;;  %v7046_v30 = vld [vmem:[%s9250_s0 + $0x124] sm:$0xf] }
  0xe8   :  { %1233 = vrot.lane.b32.xlu0 %v6962_v9, %s5895_s26  ;;  %v1356_v56 = vpop.permute.xlu1 %1355 }
  0xe9   :  { %v6986_v1 = vsel %vm1565_vm8, %v1518_v10, %v1356_v56  ;;  %v616_v56 = vsel %vm5954_vm5, %v611_v25, %v615_v35  ;;  %v2727_v35 = vsel %vm1403_vm6, %v6327_v34, %v2519_v13  ;;  %v2310_v25 = vsel %vm5930_vm3, %v2308_v31, %v2309_v16 }
  0xea   :  { %9301 = vst [vmem:[#allocation13_spill] sm:$0xff] %v6986_v1  ;;  %v1288_v27 = vpop.permute.xlu0 %1287  ;;  %2600 = vrot.lane.b32.xlu1 %v6962_v9, %s5894_s19  ;;  %5081 = vmatprep.mubr.msk.bf16.mxu0 %vm1646_vm9, %v6986_v1  ;;  %v626_v1 = vsel %vm5954_vm5, %v621_v33, %v625_v45  ;;  %v2307_v45 = vsel %vm5930_vm3, %v4563_v15, %v2306_v63  ;;  %v2313_v16 = vrot.slane %v6976_v18, 5 }
  0xeb   :  { %v7027_v41 = vcombine.low %v616_v56, %v626_v1  ;;  %v634_v13 = vor.u32 %v633_v5, %v630_v36  ;;  %v644_v63 = vor.u32 %v643_v47, %v639_v24  ;;  %v1520_v15 = vsel %vm1500_vm7, %v1433_v54, %v1288_v27 }
  0xec   :  { %2538 = vrot.lane.b32.xlu0 %v4596_v23, %s5895_s26  ;;  %v2651_v10 = vpop.permute.xlu1 %2650  ;;  %v4597_v1 = vcombine.low %v2307_v45, %v2310_v25  ;;  %v665_v5 = vshrl.u32 %v7046_v30, 16  ;;  %v661_v47 = vshll.u32 %v7046_v30, 16  ;;  %v2315_v25 = vrot.slane %v2313_v16, 4 }
  0xed   :  { %v7009_v22 = vsel %vm1565_vm8, %v2811_v53, %v2651_v10  ;;  %v652_v53 = vshrl.u32 %v7037_v11, 16  ;;  %v655_v10 = vshll.u32 %v7037_v11, 16  ;;  %v635_v56 = vrot.slane %v634_v13, 4 }
  0xee   :  { %9302 = vst [vmem:[#allocation14_spill] sm:$0xff] %v7009_v22  ;;  %v2583_v14 = vpop.permute.xlu0 %2582  ;;  %1375 = vrot.lane.b32.xlu1 %v6962_v9, %s5896_s11  ;;  %5149 = vmatprep.mubr.msk.bf16.mxu1 %vm1646_vm9, %v7009_v22  ;;  %v645_v36 = vrot.slane %v644_v63, 4 }
  0xef   :  { %v2813_v33 = vsel %vm1500_vm7, %v2727_v35, %v2583_v14  ;;  %v4564_v35 = vrot.slane %v6969_v21, 9  ;;  %v657_v54 = vrot.slane %v655_v10, 5  ;;  %v640_v13 = vsel %vm5954_vm5, %v635_v56, %v639_v24 }
  0xf0   :  { %1307 = vrot.lane.b32.xlu0 %v6997_v60, %s5894_s19  ;;  %v2653_v40 = vpop.permute.xlu1 %2652 }
  0xf1   :  { %v7032_v34 = vsel %vm1565_vm8, %v2813_v33, %v2653_v40  ;;  %v2316_v33 = vrot.slane %v83_v55, 5  ;;  %v86_v40 = vld [vmem:[%s9250_s0 + $0x128] sm:$0x1]  ;;  %v7074_v55 = vcombine.low %v6969_v21, %v6976_v18  ;;  %v2314_v24 = vsel %vm5930_vm3, %v4564_v35, %v2313_v16  ;;  %v7087_v21 = vld [vmem:[%s9250_s0 + $0x12c] sm:$0xf] }
  0xf2   :  { %9303 = vst [vmem:[#allocation15_spill] sm:$0xff] %v7032_v34  ;;  %v1358_v31 = vpop.permute.xlu0 %1357  ;;  %2670 = vrot.lane.b32.xlu1 %v4596_v23, %s5896_s11  ;;  %5150 = vmatmul.mubr.msk.bf16.gmra.mrb[16].mxu1 %vm1646_vm9, %v7032_v34  ;;  %v649_v23 = vrot.slane %v647_v43, 5  ;;  %v654_v43 = vrot.slane %v652_v53, 4  ;;  %v671_v34 = vshll.u32 %v86_v40, 16  ;;  %v2320_v35 = vrot.slane %v7046_v30, 5 }
  0xf3   :  { %v7049_v44 = vsel %vm1565_vm8, %v1520_v15, %v1358_v31  ;;  %v663_v15 = vrot.slane %v661_v47, 5  ;;  %v667_v31 = vrot.slane %v665_v5, 4 }
  0xf4   :  { %9304 = vst [vmem:[#allocation16_spill] sm:$0xff] %v7049_v44  ;;  %2602 = vrot.lane.b32.xlu0 %v7027_v41, %s5894_s19  ;;  %5082 = vmatmul.mubr.msk.bf16.gmra.mrb[16].mxu0 %vm1646_vm9, %v7049_v44  ;;  %v2521_v27 = vpop.permute.xlu1 %2520  ;;  %v650_v63 = vsel %vm5954_vm5, %v645_v36, %v649_v23  ;;  %v2317_v23 = vsel %vm5930_vm3, %v2315_v25, %v2316_v33  ;;  %v673_v47 = vrot.slane %v671_v34, 5 }
  0xf5   :  { %v7078_v10 = vcombine.low %v640_v13, %v650_v63  ;;  %v658_v56 = vor.u32 %v657_v54, %v654_v43  ;;  %v668_v36 = vor.u32 %v667_v31, %v663_v15  ;;  %v4598_v5 = vcombine.low %v2314_v24, %v2317_v23 }
  0xf6   :  { %v1216_v14 = vpop.permute.xlu0 %1215  ;;  %2672 = vrot.lane.b32.xlu1 %v4597_v1, %s5896_s11  ;;  %v676_v54 = vshrl.u32 %v7087_v21, 16  ;;  %v679_v13 = vshll.u32 %v7087_v21, 16  ;;  %v2730_v24 = vsel %vm1403_vm6, %v6373_v12, %v2521_v27  ;;  %v4565_v23 = vrot.slane %v7037_v11, 9 }
  0xf7   :  { %v1436_v16 = vsel %vm1403_vm6, %v6356_v59, %v1216_v14  ;;  %v659_v43 = vrot.slane %v658_v56, 4  ;;  %v669_v31 = vrot.slane %v668_v36, 4  ;;  %v2322_v56 = vrot.slane %v2320_v35, 4 }
  0xf8   :  { %1377 = vrot.lane.b32.xlu0 %v7027_v41, %s5896_s11  ;;  %v1290_v45 = vpop.permute.xlu1 %1289  ;;  %v2323_v36 = vrot.slane %v86_v40, 5  ;;  %v681_v22 = vrot.slane %v679_v13, 5 }
  0xf9   :  { %v1522_v25 = vsel %vm1500_vm7, %v1436_v16, %v1290_v45  ;;  %v7115_v45 = vcombine.low %v7037_v11, %v7046_v30  ;;  %v674_v12 = vsel %vm5954_vm5, %v669_v31, %v673_v47  ;;  %v7132_v11 = vld [vmem:[%s9250_s0 + $0x134] sm:$0x1]  ;;  %v2321_v47 = vsel %vm5930_vm3, %v4565_v23, %v2320_v35 }
  0xfa   :  { %v1218_v44 = vpop.permute.xlu0 %1217  ;;  %2540 = vrot.lane.b32.xlu1 %v4597_v1, %s5895_s26  ;;  %v7094_v1 = vld [vmem:[%s9250_s0 + $0x130] sm:$0xf] }
  0xfb   :  { %v689_v59 = vshrl.u32 %v7094_v1, 16  ;;  %v685_v34 = vshll.u32 %v7094_v1, 16 }
  0xfc   :  { %1235 = vrot.lane.b32.xlu0 %v7027_v41, %s5895_s26  ;;  %v2585_v53 = vpop.permute.xlu1 %2584 }
  0xfd   :  { %v2815_v16 = vsel %vm1500_vm7, %v2730_v24, %v2585_v53  ;;  %v7134_v27 = vrot.slane %v685_v34, 5  ;;  %v691_v40 = vrot.slane %v689_v59, 4  ;;  %v695_v59 = vshll.u32 %v7132_v11, 16  ;;  %v7161_v24 = vld [vmem:[%s9250_s0 + $0x138] sm:$0xf] }
  0xfe   :  { %v2523_v18 = vpop.permute.xlu0 %2522  ;;  %1309 = vrot.lane.b32.xlu1 %v7074_v55, %s5894_s19  ;;  %v1439_v34 = vsel %vm1403_vm6, %v6412_v58, %v1218_v44 }
  0xff   :  { %v692_v35 = vor.u32 %v691_v40, %v7134_v27 }
 0x100   :  { %1237 = vrot.lane.b32.xlu0 %v7078_v10, %s5895_s26  ;;  %v1360_v33 = vpop.permute.xlu1 %1359 }
 0x101   :  { %v7105_v63 = vsel %vm1565_vm8, %v1522_v25, %v1360_v33  ;;  %v664_v33 = vsel %vm5954_vm5, %v659_v43, %v663_v15  ;;  %v2733_v15 = vsel %vm1403_vm6, %v6421_v3, %v2523_v18  ;;  %v2324_v43 = vsel %vm5930_vm3, %v2322_v56, %v2323_v36 }
 0x102   :  { %9305 = vst [vmem:[#allocation17_spill] sm:$0xff] %v7105_v63  ;;  %v1292_v14 = vpop.permute.xlu0 %1291  ;;  %2604 = vrot.lane.b32.xlu1 %v7078_v10, %s5894_s19  ;;  %5085 = vmatprep.mubr.msk.bf16.mxu0 %vm1646_vm9, %v7105_v63  ;;  %v678_v63 = vrot.slane %v676_v54, 4  ;;  %v7149_v31 = vcombine.low %v664_v33, %v674_v12  ;;  %v4599_v58 = vcombine.low %v2321_v47, %v2324_v43  ;;  %v700_v36 = vshrl.u32 %v7161_v24, 16  ;;  %v7191_v47 = vld [vmem:[%s9250_s0 + $0x140] sm:$0x1] }
 0x103   :  { %v1524_v23 = vsel %vm1500_vm7, %v1439_v34, %v1292_v14  ;;  %v2327_v14 = vrot.slane %v7094_v1, 5  ;;  %v693_v33 = vrot.slane %v692_v35, 4  ;;  %v5375_v35 = vld [vmem:[%s9251_s1 + $0x30] sm:$0xff]  }
 0x104   :  { %2542 = vrot.lane.b32.xlu0 %v4598_v5, %s5895_s26  ;;  %v2655_v25 = vpop.permute.xlu1 %2654  ;;  %v682_v18 = vor.u32 %v681_v22, %v678_v63  ;;  %v7170_v22 = vld [vmem:[%s9250_s0 + $0x13c] sm:$0xf]  ;;  %5265 = vmatprep.subr.bf16.mxu1 %v5375_v35 }
 0x105   :  { %v7125_v30 = vsel %vm1565_vm8, %v2815_v16, %v2655_v25  ;;  %v703_v16 = vshll.u32 %v7161_v24, 16  ;;  %v713_v12 = vshrl.u32 %v7170_v22, 16  ;;  %v709_v40 = vshll.u32 %v7170_v22, 16  ;;  %5266 = vmatpush3.bf16.msra.mxu1 %v5375_v35 }
 0x106   :  { %9306 = vst [vmem:[#allocation18_spill] sm:$0xff] %v7125_v30  ;;  %v2587_v53 = vpop.permute.xlu0 %2586  ;;  %1379 = vrot.lane.b32.xlu1 %v7078_v10, %s5896_s11  ;;  %5153 = vmatprep.mubr.msk.bf16.mxu1 %vm1646_vm9, %v7125_v30  ;;  %v683_v25 = vrot.slane %v682_v18, 4  ;;  %v5374_v18 = vld [vmem:[%s9251_s1 + $0x20] sm:$0xff]  }
 0x107   :  { %v2817_v54 = vsel %vm1500_vm7, %v2733_v15, %v2587_v53  ;;  %v4566_v15 = vrot.slane %v7087_v21, 9  ;;  %v705_v34 = vrot.slane %v703_v16, 5  ;;  %v7214_v16 = vcombine.low %v7087_v21, %v7094_v1  ;;  %5197 = vmatprep.subr.bf16.mxu0 %v5374_v18  ;;  %v7229_v1 = vld [vmem:[%s9250_s0 + $0x144] sm:$0xf] }
 0x108   :  { %1311 = vrot.lane.b32.xlu0 %v7115_v45, %s5894_s19  ;;  %v2657_v13 = vpop.permute.xlu1 %2656  ;;  %5198 = vmatpush3.bf16.msra.mxu0 %v5374_v18  ;;  %v724_v35 = vshrl.u32 %v7229_v1, 16 }
 0x109   :  { %v7155_v3 = vsel %vm1565_vm8, %v2817_v54, %v2657_v13  ;;  %v2329_v54 = vrot.slane %v2327_v14, 4  ;;  %v2330_v13 = vrot.slane %v7132_v11, 5  ;;  %v715_v11 = vrot.slane %v713_v12, 4  ;;  %v7236_v12 = vld [vmem:[%s9250_s0 + $0x148] sm:$0xf] }
 0x10a   :  { %9307 = vst [vmem:[#allocation19_spill] sm:$0xff] %v7155_v3  ;;  %v1362_v56 = vpop.permute.xlu0 %1361  ;;  %2674 = vrot.lane.b32.xlu1 %v4598_v5, %s5896_s11  ;;  %5154 = vmatmul.mubr.msk.bf16.gmra.mrb[20].mxu1 %vm1646_vm9, %v7155_v3  ;;  %v697_v5 = vrot.slane %v695_v59, 5  ;;  %v702_v59 = vrot.slane %v700_v36, 4  ;;  %v2328_v3 = vsel %vm5930_vm3, %v4566_v15, %v2327_v14 }
 0x10b   :  { %v7173_v44 = vsel %vm1565_vm8, %v1524_v23, %v1362_v56  ;;  %v688_v23 = vsel %vm5954_vm5, %v683_v25, %v7134_v27  ;;  %v719_v27 = vshll.u32 %v7191_v47, 16 }
 0x10c   :  { %9308 = vst [vmem:[#allocation20_spill] sm:$0xff] %v7173_v44  ;;  %2606 = vrot.lane.b32.xlu0 %v7149_v31, %s5894_s19  ;;  %5086 = vmatmul.mubr.msk.bf16.gmra.mrb[20].mxu0 %vm1646_vm9, %v7173_v44  ;;  %v7179_v63 = vpop.permute.xlu1 %2524  ;;  %v698_v56 = vsel %vm5954_vm5, %v693_v33, %v697_v5  ;;  %v7207_v44 = vrot.slane %v709_v40, 5  ;;  %v706_v33 = vor.u32 %v705_v34, %v702_v59 }
 0x10d   :  { %v7221_v25 = vcombine.low %v688_v23, %v698_v56  ;;  %v727_v23 = vshll.u32 %v7229_v1, 16 }
 0x10e   :  { %v1220_v53 = vpop.permute.xlu0 %1219  ;;  %2676 = vrot.lane.b32.xlu1 %v4599_v58, %s5896_s11  ;;  %v716_v21 = vor.u32 %v715_v11, %v7207_v44  ;;  %v707_v18 = vrot.slane %v706_v33, 4 }
 0x10f   :  { %v1442_v40 = vsel %vm1403_vm6, %v6453_v2, %v1220_v53  ;;  %v737_v2 = vshrl.u32 %v7236_v12, 16 }
 0x110   :  { %1381 = vrot.lane.b32.xlu0 %v7149_v31, %s5896_s11  ;;  %v1294_v43 = vpop.permute.xlu1 %1293  ;;  %v717_v11 = vrot.slane %v716_v21, 4  ;;  %v2337_v21 = vrot.slane %v7191_v47, 5 }
 0x111   :  { %v1526_v59 = vsel %vm1500_vm7, %v1442_v40, %v1294_v43  ;;  %v7257_v43 = vcombine.low %v7161_v24, %v7170_v22  ;;  %v739_v47 = vrot.slane %v737_v2, 4 }
 0x112   :  { %v7209_v36 = vpop.permute.xlu0 %1221  ;;  %2544 = vrot.lane.b32.xlu1 %v4599_v58, %s5895_s26  ;;  %v2331_v58 = vsel %vm5930_vm3, %v2329_v54, %v2330_v13  ;;  %v721_v54 = vrot.slane %v719_v27, 5  ;;  %v2334_v13 = vrot.slane %v7170_v22, 5  ;;  %v2736_v27 = vsel %vm1403_vm6, %v6487_v20, %v7179_v63 }
 0x113   :  { %v4600_v15 = vcombine.low %v2328_v3, %v2331_v58  ;;  %v733_v3 = vshll.u32 %v7236_v12, 16  ;;  %v4567_v58 = vrot.slane %v7161_v24, 9  ;;  %v726_v22 = vrot.slane %v724_v35, 4  ;;  %v95_v24 = vld [vmem:[%s9250_s0 + $0x14c] sm:$0x1] }
 0x114   :  { %1239 = vrot.lane.b32.xlu0 %v7149_v31, %s5895_s26  ;;  %v2589_v5 = vpop.permute.xlu1 %2588  ;;  %v2336_v33 = vrot.slane %v2334_v13, 4  ;;  %v722_v20 = vsel %vm5954_vm5, %v717_v11, %v721_v54  ;;  %v7290_v35 = vld [vmem:[%s9250_s0 + $0x150] sm:$0xf] }
 0x115   :  { %v2819_v40 = vsel %vm1500_vm7, %v2736_v27, %v2589_v5  ;;  %v735_v63 = vrot.slane %v733_v3, 5 }
 0x116   :  { %v2527_v14 = vpop.permute.xlu0 %2526  ;;  %1313 = vrot.lane.b32.xlu1 %v7214_v16, %s5894_s19  ;;  %v2338_v54 = vsel %vm5930_vm3, %v2336_v33, %v2337_v21 }
 0x118   :  { %1241 = vrot.lane.b32.xlu0 %v7221_v25, %s5895_s26  ;;  %v1364_v34 = vpop.permute.xlu1 %1363 }
 0x119   :  { %v7247_v56 = vsel %vm1565_vm8, %v1526_v59, %v1364_v34  ;;  %v712_v34 = vsel %vm5954_vm5, %v707_v18, %v7207_v44  ;;  %v2739_v44 = vsel %vm1403_vm6, %v6540_v17, %v2527_v14  ;;  %v2335_v18 = vsel %vm5930_vm3, %v4567_v58, %v2334_v13  ;;  %v7300_v14 = vld [vmem:[%s9250_s0 + $0x154] sm:$0xf] }
 0x11a   :  { %9309 = vst [vmem:[#allocation21_spill] sm:$0xff] %v7247_v56  ;;  %v1296_v53 = vpop.permute.xlu0 %1295  ;;  %2608 = vrot.lane.b32.xlu1 %v7221_v25, %s5894_s19  ;;  %5089 = vmatprep.mubr.msk.bf16.mxu0 %vm1646_vm9, %v7247_v56  ;;  %v729_v56 = vrot.slane %v727_v23, 5  ;;  %v7295_v2 = vcombine.low %v712_v34, %v722_v20  ;;  %v743_v17 = vshll.u32 %v95_v24, 16  ;;  %v1445_v13 = vsel %vm1403_vm6, %v6536_v0, %v7209_v36 }
 0x11b   :  { %v740_v58 = vor.u32 %v739_v47, %v735_v63  ;;  %v1528_v33 = vsel %vm1500_vm7, %v1445_v13, %v1296_v53  ;;  %v748_v34 = vshrl.u32 %v7290_v35, 16  ;;  %v751_v36 = vshll.u32 %v7290_v35, 16 }
 0x11c   :  { %2546 = vrot.lane.b32.xlu0 %v4600_v15, %s5895_s26  ;;  %v2659_v59 = vpop.permute.xlu1 %2658  ;;  %v730_v27 = vor.u32 %v729_v56, %v726_v22  ;;  %v761_v56 = vshrl.u32 %v7300_v14, 16  ;;  %v757_v53 = vshll.u32 %v7300_v14, 16  ;;  %v745_v47 = vrot.slane %v743_v17, 5 }
 0x11d   :  { %v7270_v30 = vsel %vm1565_vm8, %v2819_v40, %v2659_v59  ;;  %v4601_v40 = vcombine.low %v2335_v18, %v2338_v54  ;;  %v2341_v59 = vrot.slane %v7236_v12, 5  ;;  %v741_v20 = vrot.slane %v740_v58, 4 }
 0x11e   :  { %9310 = vst [vmem:[#allocation22_spill] sm:$0xff] %v7270_v30  ;;  %v2591_v5 = vpop.permute.xlu0 %2590  ;;  %1383 = vrot.lane.b32.xlu1 %v7221_v25, %s5896_s11  ;;  %5157 = vmatprep.mubr.msk.bf16.mxu1 %vm1646_vm9, %v7270_v30  ;;  %v731_v22 = vrot.slane %v730_v27, 4  ;;  %v2344_v54 = vrot.slane %v95_v24, 5  ;;  %v753_v13 = vrot.slane %v751_v36, 5  ;;  %v7340_v24 = vcombine.low %v7229_v1, %v7236_v12 }
 0x11f   :  { %v2821_v23 = vsel %vm1500_vm7, %v2739_v44, %v2591_v5  ;;  %v4568_v44 = vrot.slane %v7229_v1, 9  ;;  %v2343_v18 = vrot.slane %v2341_v59, 4  ;;  %v746_v58 = vsel %vm5954_vm5, %v741_v20, %v745_v47  ;;  %v7354_v1 = vld [vmem:[%s9250_s0 + $0x15c] sm:$0xf] }
 0x120   :  { %1315 = vrot.lane.b32.xlu0 %v7257_v43, %s5894_s19  ;;  %v2661_v11 = vpop.permute.xlu1 %2660  ;;  %v736_v17 = vsel %vm5954_vm5, %v731_v22, %v735_v63 }
 0x121   :  { %v7306_v3 = vsel %vm1565_vm8, %v2821_v23, %v2661_v11  ;;  %v98_v23 = vld [vmem:[%s9250_s0 + $0x158] sm:$0x1]  ;;  %v750_v11 = vrot.slane %v748_v34, 4  ;;  %v2342_v36 = vsel %vm5930_vm3, %v4568_v44, %v2341_v59  ;;  %v7348_v20 = vcombine.low %v736_v17, %v746_v58  ;;  %v7361_v44 = vld [vmem:[%s9250_s0 + $0x160] sm:$0xf] }
 0x122   :  { %9311 = vst [vmem:[#allocation23_spill] sm:$0xff] %v7306_v3  ;;  %v1366_v21 = vpop.permute.xlu0 %1365  ;;  %2678 = vrot.lane.b32.xlu1 %v4600_v15, %s5896_s11  ;;  %5158 = vmatmul.mubr.msk.bf16.gmra.mrb[24].mxu1 %vm1646_vm9, %v7306_v3  ;;  %v767_v34 = vshll.u32 %v98_v23, 16  ;;  %v2351_v3 = vrot.slane %v98_v23, 5 }
 0x123   :  { %v7315_v0 = vsel %vm1565_vm8, %v1528_v33, %v1366_v21  ;;  %v759_v33 = vrot.slane %v757_v53, 5  ;;  %v763_v21 = vrot.slane %v761_v56, 4  ;;  %v2345_v56 = vsel %vm5930_vm3, %v2343_v18, %v2344_v54 }
 0x124   :  { %9312 = vst [vmem:[#allocation24_spill] sm:$0xff] %v7315_v0  ;;  %2610 = vrot.lane.b32.xlu0 %v7295_v2, %s5894_s19  ;;  %5090 = vmatmul.mubr.msk.bf16.gmra.mrb[24].mxu0 %vm1646_vm9, %v7315_v0  ;;  %v2529_v15 = vpop.permute.xlu1 %2528  ;;  %v754_v53 = vor.u32 %v753_v13, %v750_v11  ;;  %v4602_v59 = vcombine.low %v2342_v36, %v2345_v56  ;;  %v769_v47 = vrot.slane %v767_v34, 5  ;;  %v4569_v13 = vrot.slane %v7290_v35, 9 }
 0x125   :  { %v764_v63 = vor.u32 %v763_v21, %v759_v33  ;;  %v772_v34 = vshrl.u32 %v7354_v1, 16  ;;  %v775_v36 = vshll.u32 %v7354_v1, 16 }
 0x126   :  { %v1224_v5 = vpop.permute.xlu0 %1223  ;;  %2680 = vrot.lane.b32.xlu1 %v4601_v40, %s5896_s11  ;;  %v755_v54 = vrot.slane %v754_v53, 4 }
 0x127   :  { %v1448_v18 = vsel %vm1403_vm6, %v6577_v51, %v1224_v5  ;;  %v765_v11 = vrot.slane %v764_v63, 4  ;;  %v785_v51 = vshrl.u32 %v7361_v44, 16  ;;  %v781_v5 = vshll.u32 %v7361_v44, 16 }
 0x128   :  { %1385 = vrot.lane.b32.xlu0 %v7295_v2, %s5896_s11  ;;  %v1298_v27 = vpop.permute.xlu1 %1297  ;;  %v7384_v63 = vcombine.low %v7290_v35, %v7300_v14  ;;  %v760_v23 = vsel %vm5954_vm5, %v755_v54, %v759_v33  ;;  %v774_v30 = vrot.slane %v772_v34, 4 }
 0x129   :  { %v1530_v21 = vsel %vm1500_vm7, %v1448_v18, %v1298_v27  ;;  %v2742_v27 = vsel %vm1403_vm6, %v6614_v38, %v2529_v15  ;;  %v770_v18 = vsel %vm5954_vm5, %v765_v11, %v769_v47  ;;  %v777_v38 = vrot.slane %v775_v36, 5  ;;  %v7420_v11 = vld [vmem:[%s9250_s0 + $0x16c] sm:$0xf] }
 0x12a   :  { %v7335_v0 = vpop.permute.xlu0 %1225  ;;  %2548 = vrot.lane.b32.xlu1 %v4601_v40, %s5895_s26  ;;  %v2348_v40 = vrot.slane %v7300_v14, 5  ;;  %v7402_v14 = vld [vmem:[%s9250_s0 + $0x164] sm:$0x1]  ;;  %v783_v33 = vrot.slane %v781_v5, 5  ;;  %v7415_v54 = vcombine.low %v760_v23, %v770_v18 }
 0x12b   :  { %v778_v36 = vor.u32 %v777_v38, %v774_v30  ;;  %v2355_v38 = vrot.slane %v7361_v44, 5 }
 0x12c   :  { %1243 = vrot.lane.b32.xlu0 %v7295_v2, %s5895_s26  ;;  %v2593_v22 = vpop.permute.xlu1 %2592  ;;  %v2350_v58 = vrot.slane %v2348_v40, 4 }
 0x12e   :  { %v2531_v12 = vpop.permute.xlu0 %2530  ;;  %1317 = vrot.lane.b32.xlu1 %v7340_v24, %s5894_s19  ;;  %v2352_v35 = vsel %vm5930_vm3, %v2350_v58, %v2351_v3 }
 0x12f   :  { %v2745_v3 = vsel %vm1403_vm6, %v6688_v26, %v2531_v12  ;;  %v1451_v26 = vsel %vm1403_vm6, %v6676_v7, %v7335_v0  ;;  %v805_v7 = vshll.u32 %v7420_v11, 16 }
 0x130   :  { %1245 = vrot.lane.b32.xlu0 %v7348_v20, %s5895_s26  ;;  %v1368_v17 = vpop.permute.xlu1 %1367 }
 0x131   :  { %v7372_v56 = vsel %vm1565_vm8, %v1530_v21, %v1368_v17  ;;  %v2823_v21 = vsel %vm1500_vm7, %v2742_v27, %v2593_v22  ;;  %v787_v22 = vrot.slane %v785_v51, 4  ;;  %v791_v51 = vshll.u32 %v7402_v14, 16 }
 0x132   :  { %9313 = vst [vmem:[#allocation25_spill] sm:$0xff] %v7372_v56  ;;  %v1300_v53 = vpop.permute.xlu0 %1299  ;;  %2612 = vrot.lane.b32.xlu1 %v7348_v20, %s5894_s19  ;;  %5093 = vmatprep.mubr.msk.bf16.mxu0 %vm1646_vm9, %v7372_v56  ;;  %v2349_v56 = vsel %vm5930_vm3, %v4569_v13, %v2348_v40  ;;  %v7411_v40 = vld [vmem:[%s9250_s0 + $0x168] sm:$0xf] }
 0x133   :  { %v4603_v34 = vcombine.low %v2349_v56, %v2352_v35  ;;  %v788_v5 = vor.u32 %v787_v22, %v783_v33  ;;  %v796_v27 = vshrl.u32 %v7411_v40, 16  ;;  %v1532_v23 = vsel %vm1500_vm7, %v1451_v26, %v1300_v53 }
 0x134   :  { %2550 = vrot.lane.b32.xlu0 %v4602_v59, %s5895_s26  ;;  %v2663_v17 = vpop.permute.xlu1 %2662  ;;  %v799_v30 = vshll.u32 %v7411_v40, 16  ;;  %v809_v56 = vshrl.u32 %v7420_v11, 16 }
 0x135   :  { %v7395_v15 = vsel %vm1565_vm8, %v2823_v21, %v2663_v17  ;;  %v789_v21 = vrot.slane %v788_v5, 4  ;;  %v793_v17 = vrot.slane %v791_v51, 5  ;;  %v798_v22 = vrot.slane %v796_v27, 4 }
 0x136   :  { %9314 = vst [vmem:[#allocation26_spill] sm:$0xff] %v7395_v15  ;;  %v2595_v47 = vpop.permute.xlu0 %2594  ;;  %1387 = vrot.lane.b32.xlu1 %v7348_v20, %s5896_s11  ;;  %5161 = vmatprep.mubr.msk.bf16.mxu1 %vm1646_vm9, %v7395_v15  ;;  %v4570_v5 = vrot.slane %v7354_v1, 9  ;;  %v2357_v27 = vrot.slane %v2355_v38, 4 }
 0x137   :  { %v2825_v13 = vsel %vm1500_vm7, %v2745_v3, %v2595_v47  ;;  %v801_v47 = vrot.slane %v799_v30, 5  ;;  %v7451_v3 = vrot.slane %v805_v7, 5  ;;  %v794_v26 = vsel %vm5954_vm5, %v789_v21, %v793_v17 }
 0x138   :  { %1319 = vrot.lane.b32.xlu0 %v7384_v63, %s5894_s19  ;;  %v2665_v58 = vpop.permute.xlu1 %2664  ;;  %v7471_v30 = vcombine.low %v7354_v1, %v7361_v44  ;;  %v5378_v1 = vld [vmem:[%s9251_s1 + $0x38] sm:$0xff]  }
 0x139   :  { %v7430_v12 = vsel %vm1565_vm8, %v2825_v13, %v2665_v58  ;;  %v811_v13 = vrot.slane %v809_v56, 4  ;;  %v7456_v58 = vld [vmem:[%s9250_s0 + $0x170] sm:$0x1]  ;;  %v802_v56 = vor.u32 %v801_v47, %v798_v22  ;;  %v7494_v22 = vld [vmem:[%s9250_s0 + $0x174] sm:$0xf]  ;;  %v2356_v47 = vsel %vm5930_vm3, %v4570_v5, %v2355_v38  ;;  %5267 = vmatprep.subr.bf16.mxu1 %v5378_v1 }
 0x13a   :  { %9315 = vst [vmem:[#allocation27_spill] sm:$0xff] %v7430_v12  ;;  %v1370_v18 = vpop.permute.xlu0 %1369  ;;  %2682 = vrot.lane.b32.xlu1 %v4602_v59, %s5896_s11  ;;  %5162 = vmatmul.mubr.msk.bf16.gmra.mrb[28].mxu1 %vm1646_vm9, %v7430_v12  ;;  %v779_v59 = vrot.slane %v778_v36, 4  ;;  %v2362_v12 = vrot.slane %v7420_v11, 5  ;;  %v820_v5 = vshrl.u32 %v7494_v22, 16 }
 0x13b   :  { %v7441_v0 = vsel %vm1565_vm8, %v1532_v23, %v1370_v18  ;;  %v2358_v23 = vrot.slane %v7402_v14, 5  ;;  %v812_v7 = vor.u32 %v811_v13, %v7451_v3  ;;  %v5893_v14 = vld [vmem:[%s9250_s0 + $0xdc] sm:$0xf]  ;;  %5268 = vmatpush3.bf16.msra.mxu1 %v5378_v1 }
 0x13c   :  { %9316 = vst [vmem:[#allocation28_spill] sm:$0xff] %v7441_v0  ;;  %2614 = vrot.lane.b32.xlu0 %v7415_v54, %s5894_s19  ;;  %5094 = vmatmul.mubr.msk.bf16.gmra.mrb[28].mxu0 %vm1646_vm9, %v7441_v0  ;;  %v7447_v53 = vpop.permute.xlu1 %2532  ;;  %v784_v51 = vsel %vm5954_vm5, %v779_v59, %v783_v33  ;;  %v815_v33 = vshll.u32 %v7456_v58, 16  ;;  %v5892_v59 = vld [vmem:[%s9250_s0 + $0xd8] sm:$0xf]  ;;  %v2364_v1 = vrot.slane %v2362_v12, 4 }
 0x13d   :  { %v4457_v21 = vcombine.low %v5892_v59, %v5893_v14  ;;  %v7489_v17 = vcombine.low %v784_v51, %v794_v26  ;;  %v2359_v13 = vsel %vm5930_vm3, %v2357_v27, %v2358_v23  ;;  %v7503_v59 = vld [vmem:[%s9250_s0 + $0x178] sm:$0xf]  ;;  %v803_v26 = vrot.slane %v802_v56, 4 }
 0x13e   :  { %v1228_v35 = vpop.permute.xlu0 %1227  ;;  %2684 = vrot.lane.b32.xlu1 %v4603_v34, %s5896_s11  ;;  %v813_v14 = vrot.slane %v812_v7, 4  ;;  %v817_v0 = vrot.slane %v815_v33, 5  ;;  %v823_v27 = vshll.u32 %v7494_v22, 16  ;;  %v4604_v4 = vcombine.low %v2356_v47, %v2359_v13 }
 0x13f   :  { %v1454_v38 = vsel %vm1403_vm6, %v4457_v21, %v1228_v35  ;;  %v833_v56 = vshrl.u32 %v7503_v59, 16  ;;  %v829_v7 = vshll.u32 %v7503_v59, 16  ;;  %v808_v35 = vsel %vm5954_vm5, %v803_v26, %v7451_v3 }
 0x140   :  { %1389 = vrot.lane.b32.xlu0 %v7415_v54, %s5896_s11  ;;  %v1302_v36 = vpop.permute.xlu1 %1301  ;;  %v4571_v21 = vrot.slane %v7411_v40, 9  ;;  %v2365_v47 = vrot.slane %v7456_v58, 5  ;;  %v822_v13 = vrot.slane %v820_v5, 4  ;;  %v7534_v3 = vcombine.low %v7411_v40, %v7420_v11  ;;  %v7545_v58 = vld [vmem:[%s9250_s0 + $0x180] sm:$0xf] }
 0x141   :  { %v1534_v23 = vsel %vm1500_vm7, %v1454_v38, %v1302_v36  ;;  %v818_v36 = vsel %vm5954_vm5, %v813_v14, %v817_v0  ;;  %v825_v38 = vrot.slane %v823_v27, 5  ;;  %v7539_v0 = vld [vmem:[%s9250_s0 + $0x17c] sm:$0x1]  ;;  %v831_v26 = vrot.slane %v829_v7, 5  ;;  %v7557_v14 = vld [vmem:[%s9250_s0 + $0x184] sm:$0xf] }
 0x142   :  { %v7466_v18 = vpop.permute.xlu0 %1229  ;;  %2552 = vrot.lane.b32.xlu1 %v4603_v34, %s5895_s26  ;;  %v5377_v34 = vld [vmem:[%s9251_s1 + $0x28] sm:$0xff]   ;;  %v7550_v40 = vcombine.low %v808_v35, %v818_v36  ;;  %v2363_v11 = vsel %vm5930_vm3, %v4571_v21, %v2362_v12  ;;  %v2366_v27 = vsel %vm5930_vm3, %v2364_v1, %v2365_v47  ;;  %v839_v7 = vshll.u32 %v7539_v0, 16 }
 0x143   :  { %5199 = vmatprep.subr.bf16.mxu0 %v5377_v34  ;;  %v844_v21 = vshrl.u32 %v7545_v58, 16  ;;  %v857_v1 = vshrl.u32 %v7557_v14, 16  ;;  %v853_v47 = vshll.u32 %v7557_v14, 16 }
 0x144   :  { %1247 = vrot.lane.b32.xlu0 %v7415_v54, %s5895_s26  ;;  %v2597_v44 = vpop.permute.xlu1 %2596  ;;  %5200 = vmatpush3.bf16.msra.mxu0 %v5377_v34 }
 0x146   :  { %v2535_v51 = vpop.permute.xlu0 %2534  ;;  %1321 = vrot.lane.b32.xlu1 %v7471_v30, %s5894_s19 }
 0x147   :  { %v2751_v5 = vsel %vm1403_vm6, %v6842_v61, %v2535_v51  ;;  %v1457_v61 = vsel %vm1403_vm6, %v6838_v57, %v7466_v18 }
 0x148   :  { %1249 = vrot.lane.b32.xlu0 %v7489_v17, %s5895_s26  ;;  %v1372_v15 = vpop.permute.xlu1 %1371 }
 0x149   :  { %v1599_v33 = vsel %vm1565_vm8, %v1534_v23, %v1372_v15  ;;  %v2748_v15 = vsel %vm1403_vm6, %v6825_v50, %v7447_v53  ;;  %v835_v50 = vrot.slane %v833_v56, 4  ;;  %v826_v56 = vor.u32 %v825_v38, %v822_v13 }
 0x14a   :  { %v1304_v34 = vpop.permute.xlu0 %1303  ;;  %2616 = vrot.lane.b32.xlu1 %v7489_v17, %s5894_s19  ;;  %5097 = vmatprep.mubr.msk.bf16.mxu0 %vm1646_vm9, %v1599_v33  ;;  %v2827_v23 = vsel %vm1500_vm7, %v2748_v15, %v2597_v44  ;;  %v847_v15 = vshll.u32 %v7545_v58, 16 }
 0x14b   :  { %v836_v36 = vor.u32 %v835_v50, %v831_v26  ;;  %v1536_v13 = vsel %vm1500_vm7, %v1457_v61, %v1304_v34  ;;  %v827_v18 = vrot.slane %v826_v56, 4  ;;  %v841_v34 = vrot.slane %v839_v7, 5 }
 0x14c   :  { %2554 = vrot.lane.b32.xlu0 %v4604_v4, %s5895_s26  ;;  %v2667_v33 = vpop.permute.xlu1 %2666 }
 0x14d   :  { %v2891_v53 = vsel %vm1565_vm8, %v2827_v23, %v2667_v33  ;;  %v4605_v23 = vcombine.low %v2363_v11, %v2366_v27  ;;  %v837_v50 = vrot.slane %v836_v36, 4  ;;  %v859_v11 = vrot.slane %v857_v1, 4 }
 0x14e   :  { %v2599_v44 = vpop.permute.xlu0 %2598  ;;  %1391 = vrot.lane.b32.xlu1 %v7489_v17, %s5896_s11  ;;  %5165 = vmatprep.mubr.msk.bf16.mxu1 %vm1646_vm9, %v2891_v53  ;;  %v2369_v53 = vrot.slane %v7503_v59, 5  ;;  %v832_v7 = vsel %vm5954_vm5, %v827_v18, %v831_v26  ;;  %v4572_v36 = vrot.slane %v7494_v22, 9  ;;  %v7612_v26 = vcombine.low %v7494_v22, %v7503_v59 }
 0x14f   :  { %v2829_v35 = vsel %vm1500_vm7, %v2751_v5, %v2599_v44  ;;  %v849_v44 = vrot.slane %v847_v15, 5  ;;  %v7589_v5 = vrot.slane %v853_v47, 5  ;;  %v2372_v15 = vrot.slane %v7539_v0, 5 }
 0x150   :  { %1323 = vrot.lane.b32.xlu0 %v7534_v3, %s5894_s19  ;;  %v2669_v12 = vpop.permute.xlu1 %2668 }
 0x151   :  { %v7573_v51 = vsel %vm1565_vm8, %v2829_v35, %v2669_v12  ;;  %v7595_v35 = vld [vmem:[%s9250_s0 + $0x188] sm:$0x1]  ;;  %v842_v12 = vsel %vm5954_vm5, %v837_v50, %v841_v34  ;;  %v860_v1 = vor.u32 %v859_v11, %v7589_v5  ;;  %v2370_v50 = vsel %vm5930_vm3, %v4572_v36, %v2369_v53 }
 0x152   :  { %9317 = vst [vmem:[#allocation29_spill] sm:$0xff] %v7573_v51  ;;  %v1374_v38 = vpop.permute.xlu0 %1373  ;;  %2686 = vrot.lane.b32.xlu1 %v4604_v4, %s5896_s11  ;;  %5166 = vmatmul.mubr.msk.bf16.gmra.mrb[32].mxu1 %vm1646_vm9, %v7573_v51  ;;  %v846_v4 = vrot.slane %v844_v21, 4  ;;  %v2371_v21 = vrot.slane %v2369_v53, 4  ;;  %v863_v47 = vshll.u32 %v7595_v35, 16  ;;  %v7621_v18 = vcombine.low %v832_v7, %v842_v12 }
 0x153   :  { %v7582_v33 = vsel %vm1565_vm8, %v1536_v13, %v1374_v38  ;;  %v7617_v38 = vld [vmem:[%s9250_s0 + $0x18c] sm:$0xf]  ;;  %v861_v34 = vrot.slane %v860_v1, 4  ;;  %v2376_v11 = vrot.slane %v7557_v14, 5 }
 0x154   :  { %9318 = vst [vmem:[#allocation30_spill] sm:$0xff] %v7582_v33  ;;  %2618 = vrot.lane.b32.xlu0 %v7550_v40, %s5894_s19  ;;  %5098 = vmatmul.mubr.msk.bf16.gmra.mrb[32].mxu0 %vm1646_vm9, %v7582_v33  ;;  %v2537_v57 = vpop.permute.xlu1 %2536  ;;  %v850_v61 = vor.u32 %v849_v44, %v846_v4  ;;  %v2373_v22 = vsel %vm5930_vm3, %v2371_v21, %v2372_v15  ;;  %v865_v4 = vrot.slane %v863_v47, 5  ;;  %v868_v7 = vshrl.u32 %v7617_v38, 16 }
 0x155   :  { %v871_v53 = vshll.u32 %v7617_v38, 16  ;;  %v4606_v1 = vcombine.low %v2370_v50, %v2373_v22  ;;  %v2379_v50 = vrot.slane %v7595_v35, 5  ;;  %v7671_v35 = vcombine.low %v7545_v58, %v7557_v14 }
 0x156   :  { %v1232_v27 = vpop.permute.xlu0 %1231  ;;  %2688 = vrot.lane.b32.xlu1 %v4605_v23, %s5896_s11  ;;  %v851_v59 = vrot.slane %v850_v61, 4  ;;  %v870_v22 = vrot.slane %v868_v7, 4 }
 0x157   :  { %v1460_v12 = vsel %vm1403_vm6, %v6879_v49, %v1232_v27  ;;  %v866_v49 = vsel %vm5954_vm5, %v861_v34, %v865_v4  ;;  %v4573_v27 = vrot.slane %v7545_v58, 9 }
 0x158   :  { %1393 = vrot.lane.b32.xlu0 %v7550_v40, %s5896_s11  ;;  %v1306_v56 = vpop.permute.xlu1 %1305  ;;  %v856_v33 = vsel %vm5954_vm5, %v851_v59, %v7589_v5  ;;  %v2754_v5 = vsel %vm1403_vm6, %v6909_v32, %v2537_v57  ;;  %v7663_v59 = vld [vmem:[%s9250_s0 + $0x194] sm:$0x1]  ;;  %v7676_v32 = vld [vmem:[%s9250_s0 + $0x198] sm:$0xf] }
 0x159   :  { %v1538_v15 = vsel %vm1500_vm7, %v1460_v12, %v1306_v56  ;;  %v2378_v56 = vrot.slane %v2376_v11, 4  ;;  %v873_v12 = vrot.slane %v871_v53, 5  ;;  %v7681_v53 = vcombine.low %v856_v33, %v866_v49 }
 0x15a   :  { %v7607_v13 = vpop.permute.xlu0 %1233  ;;  %2556 = vrot.lane.b32.xlu1 %v4605_v23, %s5895_s26  ;;  %v7628_v23 = vld [vmem:[%s9250_s0 + $0x190] sm:$0xf] }
 0x15b   :  { %v881_v36 = vshrl.u32 %v7628_v23, 16  ;;  %v877_v21 = vshll.u32 %v7628_v23, 16  ;;  %v2380_v33 = vsel %vm5930_vm3, %v2378_v56, %v2379_v50  ;;  %v919_v50 = vshll.u32 %v7676_v32, 16 }
 0x15c   :  { %1251 = vrot.lane.b32.xlu0 %v7550_v40, %s5895_s26  ;;  %v2601_v0 = vpop.permute.xlu1 %2600 }
 0x15d   :  { %v7665_v34 = vrot.slane %v877_v21, 5  ;;  %v883_v4 = vrot.slane %v881_v36, 4  ;;  %v7688_v36 = vld [vmem:[%s9250_s0 + $0x19c] sm:$0xf]  ;;  %v874_v21 = vor.u32 %v873_v12, %v870_v22 }
 0x15e   :  { %v2539_v44 = vpop.permute.xlu0 %2538  ;;  %1325 = vrot.lane.b32.xlu1 %v7612_v26, %s5894_s19  ;;  %v929_v22 = vshrl.u32 %v7688_v36, 16 }
 0x15f   :  { %v2757_v49 = vsel %vm1403_vm6, %v6962_v9, %v2539_v44  ;;  %v1463_v9 = vsel %vm1403_vm6, %v6956_v62, %v7607_v13  ;;  %v875_v13 = vrot.slane %v874_v21, 4 }
 0x160   :  { %1253 = vrot.lane.b32.xlu0 %v7621_v18, %s5895_s26  ;;  %v1376_v61 = vpop.permute.xlu1 %1375 }
 0x161   :  { %v7645_v47 = vsel %vm1565_vm8, %v1538_v15, %v1376_v61  ;;  %v2831_v15 = vsel %vm1500_vm7, %v2754_v5, %v2601_v0  ;;  %v2377_v0 = vsel %vm5930_vm3, %v4573_v27, %v2376_v11  ;;  %v887_v11 = vshll.u32 %v7663_v59, 16 }
 0x162   :  { %9319 = vst [vmem:[#allocation31_spill] sm:$0xff] %v7645_v47  ;;  %v1308_v51 = vpop.permute.xlu0 %1307  ;;  %2620 = vrot.lane.b32.xlu1 %v7621_v18, %s5894_s19  ;;  %5101 = vmatprep.mubr.msk.bf16.mxu0 %vm1646_vm9, %v7645_v47 }
 0x164   :  { %2558 = vrot.lane.b32.xlu0 %v4606_v1, %s5895_s26  ;;  %v2671_v61 = vpop.permute.xlu1 %2670 }
 0x165   :  { %v7679_v57 = vsel %vm1565_vm8, %v2831_v15, %v2671_v61  ;;  %v5135_v7 = vpop.f32.mrb[0].mxu1  ;;  %v884_v15 = vor.u32 %v883_v4, %v7665_v34  ;;  %v916_v61 = vshrl.u32 %v7676_v32, 16 }
 0x166   :  { %9320 = vst [vmem:[#allocation32_spill] sm:$0xff] %v7679_v57  ;;  %v2603_v58 = vpop.permute.xlu0 %2602  ;;  %5380 = vtanh.f32 %v5135_v7  ;;  %1395 = vrot.lane.b32.xlu1 %v7621_v18, %s5896_s11  ;;  %v3037_v14 = vpop.f32.mrb[1].mxu1  ;;  %5169 = vmatprep.mubr.msk.bf16.mxu1 %vm1646_vm9, %v7679_v57  ;;  %v4607_v57 = vcombine.low %v2377_v0, %v2380_v33  ;;  %v921_v0 = vrot.slane %v919_v50, 5 }
 0x167   :  { %v5067_v27 = vpop.f32.mrb[0].mxu0  ;;  %5382 = vtanh.f32 %v3037_v14  ;;  %v5136_v5 = vpop.f32.mrb[2].mxu1  ;;  %v2833_v7 = vsel %vm1500_vm7, %v2757_v49, %v2603_v58  ;;  %v925_v58 = vshll.u32 %v7688_v36, 16  ;;  %v1540_v14 = vsel %vm1500_vm7, %v1463_v9, %v1308_v51 }
 0x168   :  { %5384 = vtanh.f32 %v5067_v27  ;;  %v1745_v47 = vpop.f32.mrb[1].mxu0  ;;  %1327 = vrot.lane.b32.xlu0 %v7671_v35, %s5894_s19  ;;  %v2673_v56 = vpop.permute.xlu1 %2672 }
 0x169   :  { %5386 = vtanh.f32 %v1745_v47  ;;  %v5068_v44 = vpop.f32.mrb[2].mxu0  ;;  %v7710_v12 = vsel %vm1565_vm8, %v2833_v7, %v2673_v56  ;;  %v3040_v4 = vpop.f32.mrb[3].mxu1  ;;  %v889_v47 = vrot.slane %v887_v11, 5  ;;  %v2383_v7 = vrot.slane %v7628_v23, 5  ;;  %v7733_v11 = vld [vmem:[%s9250_s0 + $0x1a0] sm:$0x1] }
 0x16a   :  { %9321 = vst [vmem:[#allocation33_spill] sm:$0xff] %v7710_v12  ;;  %5388 = vtanh.f32 %v5068_v44  ;;  %v1748_v49 = vpop.f32.mrb[3].mxu0  ;;  %v1378_v27 = vpop.permute.xlu0 %1377  ;;  %2690 = vrot.lane.b32.xlu1 %v4606_v1, %s5896_s11  ;;  %5170 = vmatmul.mubr.msk.bf16.gmra.mrb[36].mxu1 %vm1646_vm9, %v7710_v12  ;;  %v885_v1 = vrot.slane %v884_v15, 4  ;;  %v918_v56 = vrot.slane %v916_v61, 4  ;;  %v7727_v33 = vrot.slane %v925_v58, 5 }
 0x16b   :  { %5390 = vtanh.f32 %v5136_v5  ;;  %v7718_v62 = vsel %vm1565_vm8, %v1540_v14, %v1378_v27  ;;  %v931_v5 = vrot.slane %v929_v22, 4  ;;  %v880_v61 = vsel %vm5954_vm5, %v875_v13, %v7665_v34 }
 0x16c   :  { %9322 = vst [vmem:[#allocation34_spill] sm:$0xff] %v7718_v62  ;;  %5392 = vtanh.f32 %v1748_v49  ;;  %2622 = vrot.lane.b32.xlu0 %v7681_v53, %s5894_s19  ;;  %5102 = vmatmul.mubr.msk.bf16.gmra.mrb[36].mxu0 %vm1646_vm9, %v7718_v62  ;;  %v7724_v51 = vpop.permute.xlu1 %2540  ;;  %v890_v50 = vsel %vm5954_vm5, %v885_v1, %v889_v47  ;;  %v4574_v22 = vrot.slane %v7617_v38, 9  ;;  %v2385_v44 = vrot.slane %v2383_v7, 4 }
 0x16d   :  { %5394 = vtanh.f32 %v3040_v4  ;;  %v7746_v4 = vld [vmem:[%s9250_s0 + $0xcc] sm:$0xf]  ;;  %v2386_v14 = vrot.slane %v7663_v59, 5  ;;  %v922_v34 = vor.u32 %v921_v0, %v918_v56  ;;  %v932_v49 = vor.u32 %v931_v5, %v7727_v33  ;;  %v7774_v0 = vld [vmem:[%s9250_s0 + $0xd0] sm:$0xf] }
 0x16e   :  { %v1236_v21 = vpop.permute.xlu0 %1235  ;;  %2692 = vrot.lane.b32.xlu1 %v4607_v57, %s5896_s11  ;;  %v935_v27 = vshll.u32 %v7733_v11, 16  ;;  %v7764_v1 = vcombine.low %v7617_v38, %v7628_v23  ;;  %v2399_v59 = vrot.slane %v7688_v36, 5  ;;  %v3422_v5 = vshrl.u32 %v7746_v4, 16 }
 0x16f   :  { %v7784_v23 = vcombine.low %v880_v61, %v890_v50  ;;  %v2387_v62 = vsel %vm5930_vm3, %v2385_v44, %v2386_v14  ;;  %v923_v12 = vrot.slane %v922_v34, 4  ;;  %v3431_v44 = vshll.u32 %v7774_v0, 16 }
 0x170   :  { %v5381_v9 = vpop.eup %5380  ;;  %1397 = vrot.lane.b32.xlu0 %v7681_v53, %s5896_s11  ;;  %v1310_v15 = vpop.permute.xlu1 %1309  ;;  %v937_v19 = vrot.slane %v935_v27, 5  ;;  %v2401_v50 = vrot.slane %v2399_v59, 4  ;;  %v1466_v34 = vsel %vm1403_vm6, %v6997_v60, %v1236_v21  ;;  %v7826_v21 = vld [vmem:[%s9250_s0 + $0xd4] sm:$0x1] }
 0x171   :  { %v5383_v58 = vpop.eup %5382  ;;  %4651 = vst.msk [vmem:[%s9252_s2 + $0x210] sm:$0xff] %vm2064_vm10, %v5381_v9  ;;  %v928_v60 = vsel %vm5954_vm5, %v923_v12, %v7727_v33  ;;  %v2760_v33 = vsel %vm1403_vm6, %v7027_v41, %v7724_v51 }
 0x172   :  { %v5385_v13 = vpop.eup %5384  ;;  %4649 = vst.msk [vmem:[%s9252_s2 + $0x200] sm:$0xff] %vm2064_vm10, %v5383_v58  ;;  %v7759_v47 = vpop.permute.xlu0 %1237  ;;  %2560 = vrot.lane.b32.xlu1 %v4607_v57, %s5895_s26  ;;  %v3425_v57 = vshll.u32 %v7746_v4, 16  ;;  %v2384_v58 = vsel %vm5930_vm3, %v4574_v22, %v2383_v7  ;;  %v4576_v7 = vrot.slane %v7676_v32, 9  ;;  %v2402_v22 = vrot.slane %v7733_v11, 5 }
 0x173   :  { %v5387_v56 = vpop.eup %5386  ;;  %2067 = vst.msk [vmem:[%s9252_s2 + $0x10] sm:$0xff] %vm2064_vm10, %v5385_v13  ;;  %v1542_v11 = vsel %vm1500_vm7, %v1466_v34, %v1310_v15  ;;  %v4608_v42 = vcombine.low %v2384_v58, %v2387_v62  ;;  %v7841_v58 = vrot.slane %v3431_v44, 5 }
 0x174   :  { %v5389_v9 = vpop.eup %5388  ;;  %2065 = vst.msk [vmem:[%s9252_s2] sm:$0xff] %vm2064_vm10, %v5387_v56  ;;  %1255 = vrot.lane.b32.xlu0 %v7681_v53, %s5895_s26  ;;  %v2605_v38 = vpop.permute.xlu1 %2604  ;;  %v933_v56 = vrot.slane %v932_v49, 4  ;;  %v3424_v49 = vrot.slane %v3422_v5, 4  ;;  %v3427_v27 = vrot.slane %v3425_v57, 5  ;;  %v2400_v15 = vsel %vm5930_vm3, %v4576_v7, %v2399_v59 }
 0x175   :  { %v5391_v13 = vpop.eup %5390  ;;  %2068 = vst.msk [vmem:[%s9252_s2 + $0x18] sm:$0xff] %vm2064_vm10, %v5389_v9  ;;  %v3435_v9 = vshrl.u32 %v7774_v0, 16  ;;  %v2403_v12 = vsel %vm5930_vm3, %v2401_v50, %v2402_v22  ;;  %v2835_v34 = vsel %vm1500_vm7, %v2760_v33, %v2605_v38  ;;  %v3441_v59 = vshll.u32 %v7826_v21, 16 }
 0x176   :  { %v5393_v29 = vpop.eup %5392  ;;  %4652 = vst.msk [vmem:[%s9252_s2 + $0x218] sm:$0xff] %vm2064_vm10, %v5391_v13  ;;  %v2543_v61 = vpop.permute.xlu0 %2542  ;;  %1329 = vrot.lane.b32.xlu1 %v7764_v1, %s5894_s19  ;;  %v938_v62 = vsel %vm5954_vm5, %v933_v56, %v937_v19  ;;  %v3428_v57 = vor.u32 %v3427_v27, %v3424_v49  ;;  %v7847_v19 = vcombine.low %v7676_v32, %v7688_v36  ;;  %v7864_v32 = vld [vmem:[%s9250_s0 + $0x1a4] sm:$0xf] }
 0x177   :  { %v5395_v14 = vpop.eup %5394  ;;  %2066 = vst.msk [vmem:[%s9252_s2 + $0x8] sm:$0xff] %vm2064_vm10, %v5393_v29  ;;  %v7857_v38 = vcombine.low %v928_v60, %v938_v62  ;;  %v7859_v50 = vcombine.low %v2400_v15, %v2403_v12  ;;  %v2763_v36 = vsel %vm1403_vm6, %v7078_v10, %v2543_v61  ;;  %v3443_v61 = vrot.slane %v3441_v59, 5 }
 0x178   :  { %4650 = vst.msk [vmem:[%s9252_s2 + $0x208] sm:$0xff] %vm2064_vm10, %v5395_v14  ;;  %1257 = vrot.lane.b32.xlu0 %v7784_v23, %s5895_s26  ;;  %v1380_v13 = vpop.permute.xlu1 %1379  ;;  %v3437_v14 = vrot.slane %v3435_v9, 4  ;;  %v3429_v49 = vrot.slane %v3428_v57, 4  ;;  %v7872_v9 = vld [vmem:[%s9250_s0 + $0x1a8] sm:$0xf]  ;;  %v3446_v57 = vshrl.u32 %v7864_v32, 16 }
 0x179   :  { %v7818_v29 = vsel %vm1565_vm8, %v1542_v11, %v1380_v13  ;;  %v1469_v13 = vsel %vm1403_vm6, %v7074_v55, %v7759_v47  ;;  %v3459_v59 = vshrl.u32 %v7872_v9, 16 }
 0x17a   :  { %v1312_v5 = vpop.permute.xlu0 %1311  ;;  %2624 = vrot.lane.b32.xlu1 %v7784_v23, %s5894_s19  ;;  %5105 = vmatprep.mubr.msk.bf16.mxu0 %vm1646_vm9, %v7818_v29  ;;  %v3438_v27 = vor.u32 %v3437_v14, %v7841_v58  ;;  %v3449_v14 = vshll.u32 %v7864_v32, 16 }
 0x17b   :  { %v1544_v55 = vsel %vm1500_vm7, %v1469_v13, %v1312_v5  ;;  %v3434_v5 = vsel %vm5954_vm5, %v3429_v49, %v7841_v58  ;;  %v3461_v13 = vrot.slane %v3459_v59, 4  ;;  %v7913_v58 = vld [vmem:[%s9250_s0 + $0x1ac] sm:$0x1] }
 0x17c   :  { %2562 = vrot.lane.b32.xlu0 %v4608_v42, %s5895_s26  ;;  %v2675_v11 = vpop.permute.xlu1 %2674 }
 0x17d   :  { %v7851_v56 = vsel %vm1565_vm8, %v2835_v34, %v2675_v11  ;;  %v5139_v7 = vpop.f32.mrb[4].mxu1  ;;  %v3455_v11 = vshll.u32 %v7872_v9, 16 }
 0x17e   :  { %v2607_v41 = vpop.permute.xlu0 %2606  ;;  %5396 = vtanh.f32 %v5139_v7  ;;  %1399 = vrot.lane.b32.xlu1 %v7784_v23, %s5896_s11  ;;  %v3053_v51 = vpop.f32.mrb[5].mxu1  ;;  %5173 = vmatprep.mubr.msk.bf16.mxu1 %vm1646_vm9, %v7851_v56 }
 0x17f   :  { %v5071_v22 = vpop.f32.mrb[4].mxu0  ;;  %5398 = vtanh.f32 %v3053_v51  ;;  %v5140_v44 = vpop.f32.mrb[6].mxu1  ;;  %v2837_v60 = vsel %vm1500_vm7, %v2763_v36, %v2607_v41  ;;  %v3439_v41 = vrot.slane %v3438_v27, 4  ;;  %v3954_v51 = vrot.slane %v7774_v0, 5 }
 0x180   :  { %5400 = vtanh.f32 %v5071_v22  ;;  %v1761_v62 = vpop.f32.mrb[5].mxu0  ;;  %1331 = vrot.lane.b32.xlu0 %v7847_v19, %s5894_s19  ;;  %v2677_v10 = vpop.permute.xlu1 %2676  ;;  %v3448_v22 = vrot.slane %v3446_v57, 4  ;;  %v7904_v27 = vrot.slane %v3455_v11, 5 }
 0x181   :  { %5402 = vtanh.f32 %v1761_v62  ;;  %v5072_v15 = vpop.f32.mrb[6].mxu0  ;;  %v7881_v12 = vsel %vm1565_vm8, %v2837_v60, %v2677_v10  ;;  %v3056_v33 = vpop.f32.mrb[7].mxu1  ;;  %v3444_v60 = vsel %vm5954_vm5, %v3439_v41, %v3443_v61  ;;  %v4819_v62 = vrot.slane %v7746_v4, 9 }
 0x182   :  { %5404 = vtanh.f32 %v5072_v15  ;;  %v1764_v47 = vpop.f32.mrb[7].mxu0  ;;  %v1382_v34 = vpop.permute.xlu0 %1381  ;;  %2694 = vrot.lane.b32.xlu1 %v4608_v42, %s5896_s11  ;;  %5174 = vmatmul.mubr.msk.bf16.gmra.mrb[40].mxu1 %vm1646_vm9, %v7881_v12  ;;  %v3956_v10 = vrot.slane %v3954_v51, 4  ;;  %v3957_v15 = vrot.slane %v7826_v21, 5 }
 0x183   :  { %5406 = vtanh.f32 %v5140_v44  ;;  %v7892_v7 = vsel %vm1565_vm8, %v1544_v55, %v1382_v34  ;;  %v3451_v44 = vrot.slane %v3449_v14, 5  ;;  %v4715_v14 = vcombine.low %v3434_v5, %v3444_v60 }
 0x184   :  { %5408 = vtanh.f32 %v1764_v47  ;;  %2626 = vrot.lane.b32.xlu0 %v7857_v38, %s5894_s19  ;;  %5106 = vmatmul.mubr.msk.bf16.gmra.mrb[40].mxu0 %vm1646_vm9, %v7892_v7  ;;  %v2545_v42 = vpop.permute.xlu1 %2544  ;;  %v3462_v47 = vor.u32 %v3461_v13, %v7904_v27  ;;  %v3465_v34 = vshll.u32 %v7913_v58, 16  ;;  %v3955_v59 = vsel %vm5930_vm3, %v4819_v62, %v3954_v51 }
 0x185   :  { %5410 = vtanh.f32 %v3056_v33  ;;  %v3452_v55 = vor.u32 %v3451_v44, %v3448_v22  ;;  %v3958_v41 = vsel %vm5930_vm3, %v3956_v10, %v3957_v15  ;;  %v4713_v5 = vcombine.low %v7746_v4, %v7774_v0 }
 0x186   :  { %v1240_v36 = vpop.permute.xlu0 %1239  ;;  %2696 = vrot.lane.b32.xlu1 %v7859_v50, %s5896_s11  ;;  %v4821_v13 = vcombine.low %v3955_v59, %v3958_v41  ;;  %v3463_v62 = vrot.slane %v3462_v47, 4  ;;  %v3467_v10 = vrot.slane %v3465_v34, 5  ;;  %v3961_v15 = vrot.slane %v7872_v9, 5 }
 0x187   :  { %v3453_v60 = vrot.slane %v3452_v55, 4  ;;  %v1472_v0 = vsel %vm1403_vm6, %v7115_v45, %v1240_v36  ;;  %v4820_v34 = vrot.slane %v7864_v32, 9  ;;  %v3964_v59 = vrot.slane %v7913_v58, 5 }
 0x188   :  { %v5397_v49 = vpop.eup %5396  ;;  %1401 = vrot.lane.b32.xlu0 %v7857_v38, %s5896_s11  ;;  %v1314_v33 = vpop.permute.xlu1 %1313  ;;  %v3468_v36 = vsel %vm5954_vm5, %v3463_v62, %v3467_v10 }
 0x189   :  { %v5399_v57 = vpop.eup %5398  ;;  %4655 = vst.msk [vmem:[%s9252_s2 + $0x230] sm:$0xff] %vm2064_vm10, %v5397_v49  ;;  %v3458_v45 = vsel %vm5954_vm5, %v3453_v60, %v7904_v27 }
 0x18a   :  { %v5401_v61 = vpop.eup %5400  ;;  %4653 = vst.msk [vmem:[%s9252_s2 + $0x220] sm:$0xff] %vm2064_vm10, %v5399_v57  ;;  %v7925_v21 = vpop.permute.xlu0 %1241  ;;  %3966 = vrot.lane.b32.xlu1 %v6791_v6, %s5895_s26  ;;  %v1546_v57 = vsel %vm1500_vm7, %v1472_v0, %v1314_v33  ;;  %v2766_v33 = vsel %vm1403_vm6, %v7149_v31, %v2545_v42  ;;  %v4716_v31 = vcombine.low %v3458_v45, %v3468_v36 }
 0x18b   :  { %v5403_v11 = vpop.eup %5402  ;;  %2071 = vst.msk [vmem:[%s9252_s2 + $0x30] sm:$0xff] %vm2064_vm10, %v5401_v61 }
 0x18c   :  { %v5405_v49 = vpop.eup %5404  ;;  %2069 = vst.msk [vmem:[%s9252_s2 + $0x20] sm:$0xff] %vm2064_vm10, %v5403_v11  ;;  %v2609_v6 = vpop.permute.xlu1 %2608  ;;  %3469 = vrot.lane.b32.xlu0 %v6766_v52, %s5895_s26  ;;  %v3963_v11 = vrot.slane %v3961_v15, 4 }
 0x18d   :  { %v5407_v22 = vpop.eup %5406  ;;  %2072 = vst.msk [vmem:[%s9252_s2 + $0x38] sm:$0xff] %vm2064_vm10, %v5405_v49  ;;  %v2839_v41 = vsel %vm1500_vm7, %v2766_v33, %v2609_v6  ;;  %v3962_v6 = vsel %vm5930_vm3, %v4820_v34, %v3961_v15 }
 0x18e   :  { %v5409_v51 = vpop.eup %5408  ;;  %4656 = vst.msk [vmem:[%s9252_s2 + $0x238] sm:$0xff] %vm2064_vm10, %v5407_v22  ;;  %v2547_v44 = vpop.permute.xlu0 %2546  ;;  %3970 = vrot.lane.b32.xlu1 %v4715_v14, %s5894_s19 }
 0x18f   :  { %v5411_v4 = vpop.eup %5410  ;;  %2070 = vst.msk [vmem:[%s9252_s2 + $0x28] sm:$0xff] %vm2064_vm10, %v5409_v51  ;;  %v2769_v42 = vsel %vm1403_vm6, %v7221_v25, %v2547_v44  ;;  %v3965_v51 = vsel %vm5930_vm3, %v3963_v11, %v3964_v59  ;;  %v4714_v25 = vcombine.low %v7864_v32, %v7872_v9 }
 0x190   :  { %4654 = vst.msk [vmem:[%s9252_s2 + $0x228] sm:$0xff] %vm2064_vm10, %v5411_v4  ;;  %v1384_v61 = vpop.permute.xlu1 %1383  ;;  %3483 = vrot.lane.b32.xlu0 %v4713_v5, %s5894_s19  ;;  %v4822_v32 = vcombine.low %v3962_v6, %v3965_v51 }
 0x191   :  { %v7970_v55 = vsel %vm1565_vm8, %v1546_v57, %v1384_v61 }
 0x192   :  { %v1316_v47 = vpop.permute.xlu0 %1315  ;;  %5109 = vmatprep.mubr.msk.bf16.mxu0 %vm1646_vm9, %v7970_v55  ;;  %3980 = vrot.lane.b32.xlu1 %v4821_v13, %s5896_s11 }
 0x194   :  { %v2679_v49 = vpop.permute.xlu1 %2678  ;;  %3493 = vrot.lane.b32.xlu0 %v4715_v14, %s5896_s11 }
 0x195   :  { %v7987_v5 = vsel %vm1565_vm8, %v2839_v41, %v2679_v49  ;;  %v5143_v27 = vpop.f32.mrb[8].mxu1 }
 0x196   :  { %v2611_v22 = vpop.permute.xlu0 %2610  ;;  %5412 = vtanh.f32 %v5143_v27  ;;  %v3069_v28 = vpop.f32.mrb[9].mxu1  ;;  %5177 = vmatprep.mubr.msk.bf16.mxu1 %vm1646_vm9, %v7987_v5  ;;  %3968 = vrot.lane.b32.xlu1 %v7859_v50, %s5895_s26  ;;  %v1475_v50 = vsel %vm1403_vm6, %v7214_v16, %v7925_v21 }
 0x197   :  { %v5075_v58 = vpop.f32.mrb[8].mxu0  ;;  %5414 = vtanh.f32 %v3069_v28  ;;  %v5144_v14 = vpop.f32.mrb[10].mxu1  ;;  %v2841_v13 = vsel %vm1500_vm7, %v2769_v42, %v2611_v22  ;;  %v1548_v4 = vsel %vm1500_vm7, %v1475_v50, %v1316_v47 }
 0x198   :  { %5416 = vtanh.f32 %v5075_v58  ;;  %v1777_v60 = vpop.f32.mrb[9].mxu0  ;;  %v2681_v62 = vpop.permute.xlu1 %2680  ;;  %3471 = vrot.lane.b32.xlu0 %v7857_v38, %s5895_s26 }
 0x199   :  { %5418 = vtanh.f32 %v1777_v60  ;;  %v5076_v44 = vpop.f32.mrb[10].mxu0  ;;  %v8008_v8 = vsel %vm1565_vm8, %v2841_v13, %v2681_v62  ;;  %v3072_v10 = vpop.f32.mrb[11].mxu1 }
 0x19a   :  { %5420 = vtanh.f32 %v5076_v44  ;;  %v1780_v0 = vpop.f32.mrb[11].mxu0  ;;  %v1386_v15 = vpop.permute.xlu0 %1385  ;;  %5178 = vmatmul.mubr.msk.bf16.gmra.mrb[44].mxu1 %vm1646_vm9, %v8008_v8  ;;  %3972 = vrot.lane.b32.xlu1 %v4716_v31, %s5894_s19 }
 0x19b   :  { %5422 = vtanh.f32 %v5144_v14  ;;  %v8015_v16 = vsel %vm1565_vm8, %v1548_v4, %v1386_v15 }
 0x19c   :  { %5424 = vtanh.f32 %v1780_v0  ;;  %5110 = vmatmul.mubr.msk.bf16.gmra.mrb[44].mxu0 %vm1646_vm9, %v8015_v16  ;;  %v2549_v9 = vpop.permute.xlu1 %2548  ;;  %3485 = vrot.lane.b32.xlu0 %v4714_v25, %s5894_s19 }
 0x19d   :  { %5426 = vtanh.f32 %v3072_v10  ;;  %v2772_v14 = vsel %vm1403_vm6, %v7295_v2, %v2549_v9 }
 0x19e   :  { %v1244_v21 = vpop.permute.xlu0 %1243  ;;  %3982 = vrot.lane.b32.xlu1 %v4822_v32, %s5896_s11 }
 0x19f   :  { %v1478_v22 = vsel %vm1403_vm6, %v7257_v43, %v1244_v21 }
 0x1a0   :  { %v5413_v57 = vpop.eup %5412  ;;  %v1318_v61 = vpop.permute.xlu1 %1317  ;;  %3495 = vrot.lane.b32.xlu0 %v4716_v31, %s5896_s11 }
 0x1a1   :  { %v5415_v47 = vpop.eup %5414  ;;  %4659 = vst.msk [vmem:[%s9252_s2 + $0x250] sm:$0xff] %vm2064_vm10, %v5413_v57  ;;  %v1550_v28 = vsel %vm1500_vm7, %v1478_v22, %v1318_v61 }
 0x1a2   :  { %v5417_v45 = vpop.eup %5416  ;;  %4657 = vst.msk [vmem:[%s9252_s2 + $0x240] sm:$0xff] %vm2064_vm10, %v5415_v47  ;;  %v1246_v36 = vpop.permute.xlu0 %1245 }
 0x1a3   :  { %v5419_v33 = vpop.eup %5418  ;;  %2075 = vst.msk [vmem:[%s9252_s2 + $0x50] sm:$0xff] %vm2064_vm10, %v5417_v45  ;;  %v1481_v0 = vsel %vm1403_vm6, %v7340_v24, %v1246_v36 }
 0x1a4   :  { %v5421_v34 = vpop.eup %5420  ;;  %2073 = vst.msk [vmem:[%s9252_s2 + $0x40] sm:$0xff] %vm2064_vm10, %v5419_v33  ;;  %v2613_v11 = vpop.permute.xlu1 %2612 }
 0x1a5   :  { %v5423_v59 = vpop.eup %5422  ;;  %2076 = vst.msk [vmem:[%s9252_s2 + $0x58] sm:$0xff] %vm2064_vm10, %v5421_v34  ;;  %v2843_v43 = vsel %vm1500_vm7, %v2772_v14, %v2613_v11 }
 0x1a6   :  { %v5425_v41 = vpop.eup %5424  ;;  %4660 = vst.msk [vmem:[%s9252_s2 + $0x258] sm:$0xff] %vm2064_vm10, %v5423_v59  ;;  %v2551_v49 = vpop.permute.xlu0 %2550 }
 0x1a7   :  { %v5427_v27 = vpop.eup %5426  ;;  %2074 = vst.msk [vmem:[%s9252_s2 + $0x48] sm:$0xff] %vm2064_vm10, %v5425_v41  ;;  %v2775_v25 = vsel %vm1403_vm6, %v7348_v20, %v2551_v49 }
 0x1a8   :  { %4658 = vst.msk [vmem:[%s9252_s2 + $0x248] sm:$0xff] %vm2064_vm10, %v5427_v27  ;;  %v1388_v31 = vpop.permute.xlu1 %1387 }
 0x1a9   :  { %v8058_v42 = vsel %vm1565_vm8, %v1550_v28, %v1388_v31 }
 0x1aa   :  { %v1320_v58 = vpop.permute.xlu0 %1319  ;;  %5113 = vmatprep.mubr.msk.bf16.mxu0 %vm1646_vm9, %v8058_v42 }
 0x1ab   :  { %v1552_v21 = vsel %vm1500_vm7, %v1481_v0, %v1320_v58 }
 0x1ac   :  { %v2683_v6 = vpop.permute.xlu1 %2682 }
 0x1ad   :  { %v8066_v51 = vsel %vm1565_vm8, %v2843_v43, %v2683_v6  ;;  %v5147_v13 = vpop.f32.mrb[12].mxu1 }
 0x1ae   :  { %v2615_v60 = vpop.permute.xlu0 %2614  ;;  %5428 = vtanh.f32 %v5147_v13  ;;  %v3085_v62 = vpop.f32.mrb[13].mxu1  ;;  %5181 = vmatprep.mubr.msk.bf16.mxu1 %vm1646_vm9, %v8066_v51 }
 0x1af   :  { %v5079_v50 = vpop.f32.mrb[12].mxu0  ;;  %5430 = vtanh.f32 %v3085_v62  ;;  %v5148_v44 = vpop.f32.mrb[14].mxu1  ;;  %v2845_v2 = vsel %vm1500_vm7, %v2775_v25, %v2615_v60 }
 0x1b0   :  { %5432 = vtanh.f32 %v5079_v50  ;;  %v1793_v10 = vpop.f32.mrb[13].mxu0  ;;  %v2685_v4 = vpop.permute.xlu1 %2684 }
 0x1b1   :  { %5434 = vtanh.f32 %v1793_v10  ;;  %v5080_v15 = vpop.f32.mrb[14].mxu0  ;;  %v8076_v32 = vsel %vm1565_vm8, %v2845_v2, %v2685_v4  ;;  %v3088_v9 = vpop.f32.mrb[15].mxu1 }
 0x1b2   :  { %5436 = vtanh.f32 %v5080_v15  ;;  %v1796_v20 = vpop.f32.mrb[15].mxu0  ;;  %v1390_v57 = vpop.permute.xlu0 %1389  ;;  %5182 = vmatmul.mubr.msk.bf16.gmra.mrb[48].mxu1 %vm1646_vm9, %v8076_v32 }
 0x1b3   :  { %5438 = vtanh.f32 %v5148_v44  ;;  %v8082_v61 = vsel %vm1565_vm8, %v1552_v21, %v1390_v57 }
 0x1b4   :  { %5440 = vtanh.f32 %v1796_v20  ;;  %5114 = vmatmul.mubr.msk.bf16.gmra.mrb[48].mxu0 %vm1646_vm9, %v8082_v61  ;;  %v2553_v24 = vpop.permute.xlu1 %2552 }
 0x1b5   :  { %5442 = vtanh.f32 %v3088_v9  ;;  %v2778_v60 = vsel %vm1403_vm6, %v7415_v54, %v2553_v24 }
 0x1b6   :  { %v1248_v47 = vpop.permute.xlu0 %1247 }
 0x1b7   :  { %v1484_v58 = vsel %vm1403_vm6, %v7384_v63, %v1248_v47 }
 0x1b8   :  { %v5429_v45 = vpop.eup %5428  ;;  %v1322_v36 = vpop.permute.xlu1 %1321 }
 0x1b9   :  { %v5431_v33 = vpop.eup %5430  ;;  %4663 = vst.msk [vmem:[%s9252_s2 + $0x270] sm:$0xff] %vm2064_vm10, %v5429_v45  ;;  %v1554_v14 = vsel %vm1500_vm7, %v1484_v58, %v1322_v36 }
 0x1ba   :  { %v5433_v34 = vpop.eup %5432  ;;  %4661 = vst.msk [vmem:[%s9252_s2 + $0x260] sm:$0xff] %vm2064_vm10, %v5431_v33  ;;  %v1250_v11 = vpop.permute.xlu0 %1249 }
 0x1bb   :  { %v5435_v59 = vpop.eup %5434  ;;  %2079 = vst.msk [vmem:[%s9252_s2 + $0x70] sm:$0xff] %vm2064_vm10, %v5433_v34  ;;  %v1487_v21 = vsel %vm1403_vm6, %v7471_v30, %v1250_v11 }
 0x1bc   :  { %v5437_v41 = vpop.eup %5436  ;;  %2077 = vst.msk [vmem:[%s9252_s2 + $0x60] sm:$0xff] %vm2064_vm10, %v5435_v59  ;;  %v2617_v49 = vpop.permute.xlu1 %2616 }
 0x1bd   :  { %v5439_v27 = vpop.eup %5438  ;;  %2080 = vst.msk [vmem:[%s9252_s2 + $0x78] sm:$0xff] %vm2064_vm10, %v5437_v41  ;;  %v2847_v63 = vsel %vm1500_vm7, %v2778_v60, %v2617_v49 }
 0x1be   :  { %v5441_v22 = vpop.eup %5440  ;;  %4664 = vst.msk [vmem:[%s9252_s2 + $0x278] sm:$0xff] %vm2064_vm10, %v5439_v27  ;;  %v2555_v28 = vpop.permute.xlu0 %2554 }
 0x1bf   :  { %v5443_v31 = vpop.eup %5442  ;;  %2078 = vst.msk [vmem:[%s9252_s2 + $0x68] sm:$0xff] %vm2064_vm10, %v5441_v22  ;;  %v2781_v10 = vsel %vm1403_vm6, %v7489_v17, %v2555_v28 }
 0x1c0   :  { %4662 = vst.msk [vmem:[%s9252_s2 + $0x268] sm:$0xff] %vm2064_vm10, %v5443_v31  ;;  %v1392_v43 = vpop.permute.xlu1 %1391 }
 0x1c1   :  { %v8122_v6 = vsel %vm1565_vm8, %v1554_v14, %v1392_v43 }
 0x1c2   :  { %v1324_v13 = vpop.permute.xlu0 %1323  ;;  %5117 = vmatprep.mubr.msk.bf16.mxu0 %vm1646_vm9, %v8122_v6 }
 0x1c3   :  { %v1556_v47 = vsel %vm1500_vm7, %v1487_v21, %v1324_v13 }
 0x1c4   :  { %v2687_v62 = vpop.permute.xlu1 %2686 }
 0x1c5   :  { %v8130_v25 = vsel %vm1565_vm8, %v2847_v63, %v2687_v62  ;;  %v5151_v50 = vpop.f32.mrb[16].mxu1 }
 0x1c6   :  { %v2619_v44 = vpop.permute.xlu0 %2618  ;;  %5444 = vtanh.f32 %v5151_v50  ;;  %v3101_v2 = vpop.f32.mrb[17].mxu1  ;;  %5185 = vmatprep.mubr.msk.bf16.mxu1 %vm1646_vm9, %v8130_v25 }
 0x1c7   :  { %v5083_v4 = vpop.f32.mrb[16].mxu0  ;;  %5446 = vtanh.f32 %v3101_v2  ;;  %v5152_v0 = vpop.f32.mrb[18].mxu1  ;;  %v2849_v54 = vsel %vm1500_vm7, %v2781_v10, %v2619_v44 }
 0x1c8   :  { %5448 = vtanh.f32 %v5083_v4  ;;  %v1809_v15 = vpop.f32.mrb[17].mxu0  ;;  %v2689_v9 = vpop.permute.xlu1 %2688 }
 0x1c9   :  { %5450 = vtanh.f32 %v1809_v15  ;;  %v5084_v20 = vpop.f32.mrb[18].mxu0  ;;  %v8140_v57 = vsel %vm1565_vm8, %v2849_v54, %v2689_v9  ;;  %v3104_v24 = vpop.f32.mrb[19].mxu1 }
 0x1ca   :  { %5452 = vtanh.f32 %v5084_v20  ;;  %v1812_v17 = vpop.f32.mrb[19].mxu0  ;;  %v1394_v45 = vpop.permute.xlu0 %1393  ;;  %5186 = vmatmul.mubr.msk.bf16.gmra.mrb[52].mxu1 %vm1646_vm9, %v8140_v57 }
 0x1cb   :  { %5454 = vtanh.f32 %v5152_v0  ;;  %v8146_v36 = vsel %vm1565_vm8, %v1556_v47, %v1394_v45 }
 0x1cc   :  { %5456 = vtanh.f32 %v1812_v17  ;;  %5118 = vmatmul.mubr.msk.bf16.gmra.mrb[52].mxu0 %vm1646_vm9, %v8146_v36  ;;  %v2557_v30 = vpop.permute.xlu1 %2556 }
 0x1cd   :  { %5458 = vtanh.f32 %v3104_v24  ;;  %v2784_v44 = vsel %vm1403_vm6, %v7550_v40, %v2557_v30 }
 0x1ce   :  { %v1252_v33 = vpop.permute.xlu0 %1251 }
 0x1cf   :  { %v1490_v13 = vsel %vm1403_vm6, %v7534_v3, %v1252_v33 }
 0x1d0   :  { %v5445_v34 = vpop.eup %5444  ;;  %v1326_v11 = vpop.permute.xlu1 %1325 }
 0x1d1   :  { %v5447_v59 = vpop.eup %5446  ;;  %4667 = vst.msk [vmem:[%s9252_s2 + $0x290] sm:$0xff] %vm2064_vm10, %v5445_v34  ;;  %v1558_v60 = vsel %vm1500_vm7, %v1490_v13, %v1326_v11 }
 0x1d2   :  { %v5449_v41 = vpop.eup %5448  ;;  %4665 = vst.msk [vmem:[%s9252_s2 + $0x280] sm:$0xff] %vm2064_vm10, %v5447_v59  ;;  %v1254_v49 = vpop.permute.xlu0 %1253 }
 0x1d3   :  { %v5451_v27 = vpop.eup %5450  ;;  %2083 = vst.msk [vmem:[%s9252_s2 + $0x90] sm:$0xff] %vm2064_vm10, %v5449_v41  ;;  %v1493_v47 = vsel %vm1403_vm6, %v7612_v26, %v1254_v49 }
 0x1d4   :  { %v5453_v22 = vpop.eup %5452  ;;  %2081 = vst.msk [vmem:[%s9252_s2 + $0x80] sm:$0xff] %vm2064_vm10, %v5451_v27  ;;  %v2621_v28 = vpop.permute.xlu1 %2620 }
 0x1d5   :  { %v5455_v31 = vpop.eup %5454  ;;  %2084 = vst.msk [vmem:[%s9252_s2 + $0x98] sm:$0xff] %vm2064_vm10, %v5453_v22  ;;  %v2851_v3 = vsel %vm1500_vm7, %v2784_v44, %v2621_v28 }
 0x1d6   :  { %v5457_v58 = vpop.eup %5456  ;;  %4668 = vst.msk [vmem:[%s9252_s2 + $0x298] sm:$0xff] %vm2064_vm10, %v5455_v31  ;;  %v2559_v14 = vpop.permute.xlu0 %2558 }
 0x1d7   :  { %v5459_v43 = vpop.eup %5458  ;;  %2082 = vst.msk [vmem:[%s9252_s2 + $0x88] sm:$0xff] %vm2064_vm10, %v5457_v58  ;;  %v2787_v15 = vsel %vm1403_vm6, %v7621_v18, %v2559_v14 }
 0x1d8   :  { %4666 = vst.msk [vmem:[%s9252_s2 + $0x288] sm:$0xff] %vm2064_vm10, %v5459_v43  ;;  %v1396_v63 = vpop.permute.xlu1 %1395 }
 0x1d9   :  { %v8186_v62 = vsel %vm1565_vm8, %v1558_v60, %v1396_v63 }
 0x1da   :  { %v1328_v50 = vpop.permute.xlu0 %1327  ;;  %5121 = vmatprep.mubr.msk.bf16.mxu0 %vm1646_vm9, %v8186_v62 }
 0x1db   :  { %v1560_v33 = vsel %vm1500_vm7, %v1493_v47, %v1328_v50 }
 0x1dc   :  { %v2691_v2 = vpop.permute.xlu1 %2690 }
 0x1dd   :  { %v8194_v10 = vsel %vm1565_vm8, %v2851_v3, %v2691_v2  ;;  %v5155_v4 = vpop.f32.mrb[20].mxu1 }
 0x1de   :  { %v2623_v0 = vpop.permute.xlu0 %2622  ;;  %5460 = vtanh.f32 %v5155_v4  ;;  %v3117_v54 = vpop.f32.mrb[21].mxu1  ;;  %5189 = vmatprep.mubr.msk.bf16.mxu1 %vm1646_vm9, %v8194_v10 }
 0x1df   :  { %v5087_v9 = vpop.f32.mrb[20].mxu0  ;;  %5462 = vtanh.f32 %v3117_v54  ;;  %v5156_v21 = vpop.f32.mrb[22].mxu1  ;;  %v2853_v40 = vsel %vm1500_vm7, %v2787_v15, %v2623_v0 }
 0x1e0   :  { %5464 = vtanh.f32 %v5087_v9  ;;  %v1825_v20 = vpop.f32.mrb[21].mxu0  ;;  %v2693_v24 = vpop.permute.xlu1 %2692 }
 0x1e1   :  { %5466 = vtanh.f32 %v1825_v20  ;;  %v5088_v17 = vpop.f32.mrb[22].mxu0  ;;  %v8204_v45 = vsel %vm1565_vm8, %v2853_v40, %v2693_v24  ;;  %v3120_v30 = vpop.f32.mrb[23].mxu1 }
 0x1e2   :  { %5468 = vtanh.f32 %v5088_v17  ;;  %v1828_v18 = vpop.f32.mrb[23].mxu0  ;;  %v1398_v34 = vpop.permute.xlu0 %1397  ;;  %5190 = vmatmul.mubr.msk.bf16.gmra.mrb[56].mxu1 %vm1646_vm9, %v8204_v45 }
 0x1e3   :  { %5470 = vtanh.f32 %v5156_v21  ;;  %v8210_v11 = vsel %vm1565_vm8, %v1560_v33, %v1398_v34 }
 0x1e4   :  { %5472 = vtanh.f32 %v1828_v18  ;;  %5122 = vmatmul.mubr.msk.bf16.gmra.mrb[56].mxu0 %vm1646_vm9, %v8210_v11  ;;  %v2561_v26 = vpop.permute.xlu1 %2560 }
 0x1e5   :  { %5474 = vtanh.f32 %v3120_v30  ;;  %v2790_v0 = vsel %vm1403_vm6, %v7681_v53, %v2561_v26 }
 0x1e6   :  { %v1256_v59 = vpop.permute.xlu0 %1255 }
 0x1e7   :  { %v1496_v50 = vsel %vm1403_vm6, %v7671_v35, %v1256_v59 }
 0x1e8   :  { %v5461_v41 = vpop.eup %5460  ;;  %v1330_v49 = vpop.permute.xlu1 %1329 }
 0x1e9   :  { %v5463_v27 = vpop.eup %5462  ;;  %4671 = vst.msk [vmem:[%s9252_s2 + $0x2b0] sm:$0xff] %vm2064_vm10, %v5461_v41  ;;  %v1562_v44 = vsel %vm1500_vm7, %v1496_v50, %v1330_v49  ;;  %v9328_v50 = vld [vmem:[#allocation8_spill] sm:$0xff] }
 0x1ea   :  { %v5465_v22 = vpop.eup %5464  ;;  %4669 = vst.msk [vmem:[%s9252_s2 + $0x2a0] sm:$0xff] %vm2064_vm10, %v5463_v27  ;;  %v1258_v28 = vpop.permute.xlu0 %1257 }
 0x1eb   :  { %v5467_v31 = vpop.eup %5466  ;;  %2087 = vst.msk [vmem:[%s9252_s2 + $0xb0] sm:$0xff] %vm2064_vm10, %v5465_v22  ;;  %v1499_v33 = vsel %vm1403_vm6, %v7764_v1, %v1258_v28 }
 0x1ec   :  { %v5469_v58 = vpop.eup %5468  ;;  %2085 = vst.msk [vmem:[%s9252_s2 + $0xa0] sm:$0xff] %vm2064_vm10, %v5467_v31  ;;  %v2625_v14 = vpop.permute.xlu1 %2624 }
 0x1ed   :  { %v5471_v43 = vpop.eup %5470  ;;  %2088 = vst.msk [vmem:[%s9252_s2 + $0xb8] sm:$0xff] %vm2064_vm10, %v5469_v58  ;;  %v2855_v35 = vsel %vm1500_vm7, %v2790_v0, %v2625_v14  ;;  %v9325_v58 = vld [vmem:[#allocation2_spill] sm:$0xff] }
 0x1ee   :  { %v5473_v13 = vpop.eup %5472  ;;  %4672 = vst.msk [vmem:[%s9252_s2 + $0x2b8] sm:$0xff] %vm2064_vm10, %v5471_v43  ;;  %v2563_v60 = vpop.permute.xlu0 %2562  ;;  %v9326_v43 = vld [vmem:[#allocation5_spill] sm:$0xff] }
 0x1ef   :  { %v5475_v63 = vpop.eup %5474  ;;  %2086 = vst.msk [vmem:[%s9252_s2 + $0xa8] sm:$0xff] %vm2064_vm10, %v5473_v13  ;;  %v2793_v20 = vsel %vm1403_vm6, %v7784_v23, %v2563_v60 }
 0x1f0   :  { %4670 = vst.msk [vmem:[%s9252_s2 + $0x2a8] sm:$0xff] %vm2064_vm10, %v5475_v63  ;;  %v1400_v3 = vpop.permute.xlu1 %1399  ;;  %v9327_v63 = vld [vmem:[#allocation7_spill] sm:$0xff] }
 0x1f1   :  { %v8250_v2 = vsel %vm1565_vm8, %v1562_v44, %v1400_v3 }
 0x1f2   :  { %v1332_v4 = vpop.permute.xlu0 %1331  ;;  %5125 = vmatprep.mubr.msk.bf16.mxu0 %vm1646_vm9, %v8250_v2 }
 0x1f3   :  { %v1564_v59 = vsel %vm1500_vm7, %v1499_v33, %v1332_v4  ;;  %v9334_v33 = vld [vmem:[#allocation15_spill] sm:$0xff] }
 0x1f4   :  { %v2695_v54 = vpop.permute.xlu1 %2694 }
 0x1f5   :  { %v8258_v15 = vsel %vm1565_vm8, %v2855_v35, %v2695_v54  ;;  %v5159_v9 = vpop.f32.mrb[24].mxu1 }
 0x1f6   :  { %v2627_v21 = vpop.permute.xlu0 %2626  ;;  %5476 = vtanh.f32 %v5159_v9  ;;  %v3133_v40 = vpop.f32.mrb[25].mxu1  ;;  %5193 = vmatprep.mubr.msk.bf16.mxu1 %vm1646_vm9, %v8258_v15 }
 0x1f7   :  { %v5091_v24 = vpop.f32.mrb[24].mxu0  ;;  %5478 = vtanh.f32 %v3133_v40  ;;  %v5160_v47 = vpop.f32.mrb[26].mxu1  ;;  %v2857_v53 = vsel %vm1500_vm7, %v2793_v20, %v2627_v21  ;;  %v9330_v21 = vld [vmem:[#allocation11_spill] sm:$0xff]  ;;  %v9331_v40 = vld [vmem:[#allocation9_spill] sm:$0xff]  ;;  %v9332_v20 = vld [vmem:[#allocation12_spill] sm:$0xff] }
 0x1f8   :  { %5480 = vtanh.f32 %v5091_v24  ;;  %v1841_v17 = vpop.f32.mrb[25].mxu0  ;;  %v2697_v30 = vpop.permute.xlu1 %2696 }
 0x1f9   :  { %5482 = vtanh.f32 %v1841_v17  ;;  %v5092_v18 = vpop.f32.mrb[26].mxu0  ;;  %v8268_v34 = vsel %vm1565_vm8, %v2857_v53, %v2697_v30  ;;  %v3136_v26 = vpop.f32.mrb[27].mxu1  ;;  %v9333_v17 = vld [vmem:[#allocation14_spill] sm:$0xff] }
 0x1fa   :  { %5484 = vtanh.f32 %v5092_v18  ;;  %v1844_v23 = vpop.f32.mrb[27].mxu0  ;;  %v1402_v41 = vpop.permute.xlu0 %1401  ;;  %5194 = vmatmul.mubr.msk.bf16.gmra.mrb[60].mxu1 %vm1646_vm9, %v8268_v34 }
 0x1fb   :  { %5486 = vtanh.f32 %v5160_v47  ;;  %v8274_v49 = vsel %vm1565_vm8, %v1564_v59, %v1402_v41  ;;  %5269 = vmatprep.mubr.msk.bf16.mxu1 %vm1646_vm9, %v6493_v46  ;;  %v9323_v46 = vld [vmem:[#allocation3_spill] sm:$0xff] }
 0x1fc   :  { %5488 = vtanh.f32 %v1844_v23  ;;  %5126 = vmatmul.mubr.msk.bf16.gmra.mrb[60].mxu0 %vm1646_vm9, %v8274_v49  ;;  %v9336_v23 = vld [vmem:[#allocation16_spill] sm:$0xff] }
 0x1fd   :  { %5490 = vtanh.f32 %v3136_v26  ;;  %5201 = vmatprep.mubr.msk.bf16.mxu0 %vm1646_vm9, %v6511_v37  ;;  %v9324_v37 = vld [vmem:[#allocation4_spill] sm:$0xff]  ;;  %v9335_v26 = vld [vmem:[#allocation13_spill] sm:$0xff] }
 0x200   :  { %v5477_v1 = vpop.eup %5476 }
 0x201   :  { %v5479_v27 = vpop.eup %5478  ;;  %4675 = vst.msk [vmem:[%s9252_s2 + $0x2d0] sm:$0xff] %vm2064_vm10, %v5477_v1 }
 0x202   :  { %v5481_v22 = vpop.eup %5480  ;;  %4673 = vst.msk [vmem:[%s9252_s2 + $0x2c0] sm:$0xff] %vm2064_vm10, %v5479_v27  ;;  %5270 = vmatmul.mubr.msk.bf16.vlgmr.msra.gmra.mrb[64].mxu1 %vm1646_vm9, %v9323_v46  ;;  %v9337_v27 = vld [vmem:[#allocation18_spill] sm:$0xff]  ;;  %v9339_v46 = vld [vmem:[#allocation17_spill] sm:$0xff] }
 0x203   :  { %v5483_v28 = vpop.eup %5482  ;;  %2091 = vst.msk [vmem:[%s9252_s2 + $0xd0] sm:$0xff] %vm2064_vm10, %v5481_v22  ;;  %5273 = vmatprep.mubr.msk.bf16.mxu1 %vm1646_vm9, %v9324_v37  ;;  %v9338_v22 = vld [vmem:[#allocation19_spill] sm:$0xff] }
 0x204   :  { %v5485_v31 = vpop.eup %5484  ;;  %2089 = vst.msk [vmem:[%s9252_s2 + $0xc0] sm:$0xff] %vm2064_vm10, %v5483_v28  ;;  %5202 = vmatmul.mubr.msk.bf16.vlgmr.msra.gmra.mrb[64].mxu0 %vm1646_vm9, %v9325_v58  ;;  %v9340_v28 = vld [vmem:[#allocation20_spill] sm:$0xff] }
 0x205   :  { %v5487_v14 = vpop.eup %5486  ;;  %2092 = vst.msk [vmem:[%s9252_s2 + $0xd8] sm:$0xff] %vm2064_vm10, %v5485_v31  ;;  %5205 = vmatprep.mubr.msk.bf16.mxu0 %vm1646_vm9, %v9326_v43 }
 0x206   :  { %v5489_v13 = vpop.eup %5488  ;;  %4676 = vst.msk [vmem:[%s9252_s2 + $0x2d8] sm:$0xff] %vm2064_vm10, %v5487_v14 }
 0x207   :  { %v5491_v60 = vpop.eup %5490  ;;  %2090 = vst.msk [vmem:[%s9252_s2 + $0xc8] sm:$0xff] %vm2064_vm10, %v5489_v13 }
 0x208   :  { %4674 = vst.msk [vmem:[%s9252_s2 + $0x2c8] sm:$0xff] %vm2064_vm10, %v5491_v60 }
 0x20a   :  { %5274 = vmatmul.mubr.msk.bf16.gmra.mrb[68].mxu1 %vm1646_vm9, %v6748_v39 }
 0x20b   :  { %5277 = vmatprep.mubr.msk.bf16.mxu1 %vm1646_vm9, %v6778_v48  ;;  %v9329_v48 = vld [vmem:[#allocation10_spill] sm:$0xff] }
 0x20c   :  { %5206 = vmatmul.mubr.msk.bf16.gmra.mrb[68].mxu0 %vm1646_vm9, %v9327_v63 }
 0x20d   :  { %5209 = vmatprep.mubr.msk.bf16.mxu0 %vm1646_vm9, %v9328_v50  ;;  %v5163_v44 = vpop.f32.mrb[28].mxu1  ;;  %v3967_v50 = vpop.permute.xlu1 %3966 }
 0x20e   :  { %5492 = vtanh.f32 %v5163_v44  ;;  %v3149_v3 = vpop.f32.mrb[29].mxu1  ;;  %v9341_v44 = vld [vmem:[#allocation22_spill] sm:$0xff] }
 0x20f   :  { %v5095_v4 = vpop.f32.mrb[28].mxu0  ;;  %5494 = vtanh.f32 %v3149_v3  ;;  %v5164_v0 = vpop.f32.mrb[30].mxu1  ;;  %v9342_v3 = vld [vmem:[#allocation23_spill] sm:$0xff] }
 0x210   :  { %5496 = vtanh.f32 %v5095_v4  ;;  %v1857_v35 = vpop.f32.mrb[29].mxu0  ;;  %v3152_v54 = vpop.f32.mrb[31].mxu1  ;;  %v9343_v4 = vld [vmem:[#allocation21_spill] sm:$0xff] }
 0x211   :  { %5498 = vtanh.f32 %v1857_v35  ;;  %v5096_v39 = vpop.f32.mrb[30].mxu0  ;;  %v9344_v35 = vld [vmem:[#allocation24_spill] sm:$0xff] }
 0x212   :  { %5500 = vtanh.f32 %v5096_v39  ;;  %v1860_v9 = vpop.f32.mrb[31].mxu0  ;;  %5278 = vmatmul.mubr.msk.bf16.gmra.mrb[72].mxu1 %vm1646_vm9, %v9329_v48  ;;  %v3971_v39 = vpop.permute.xlu1 %3970 }
 0x213   :  { %5502 = vtanh.f32 %v5164_v0  ;;  %5281 = vmatprep.mubr.msk.bf16.mxu1 %vm1646_vm9, %v9330_v21  ;;  %v3470_v0 = vpop.permute.xlu0 %3469 }
 0x214   :  { %5504 = vtanh.f32 %v1860_v9  ;;  %5210 = vmatmul.mubr.msk.bf16.gmra.mrb[72].mxu0 %vm1646_vm9, %v9331_v40  ;;  %v9345_v40 = vld [vmem:[#allocation26_spill] sm:$0xff] }
 0x215   :  { %5506 = vtanh.f32 %v3152_v54  ;;  %5213 = vmatprep.mubr.msk.bf16.mxu0 %vm1646_vm9, %v9332_v20 }
 0x217   :  { %v3484_v21 = vpop.permute.xlu0 %3483 }
 0x218   :  { %v5493_v24 = vpop.eup %5492 }
 0x219   :  { %v5495_v47 = vpop.eup %5494  ;;  %4679 = vst.msk [vmem:[%s9252_s2 + $0x2f0] sm:$0xff] %vm2064_vm10, %v5493_v24  ;;  %v3986_v24 = vsel %vm1403_vm6, %v6766_v52, %v3967_v50 }
 0x21a   :  { %v5497_v53 = vpop.eup %5496  ;;  %4677 = vst.msk [vmem:[%s9252_s2 + $0x2e0] sm:$0xff] %vm2064_vm10, %v5495_v47  ;;  %5282 = vmatmul.mubr.msk.bf16.gmra.mrb[76].mxu1 %vm1646_vm9, %v9333_v17  ;;  %v9346_v47 = vld [vmem:[#allocation27_spill] sm:$0xff]  ;;  %v9347_v17 = vld [vmem:[#allocation25_spill] sm:$0xff] }
 0x21b   :  { %v5499_v30 = vpop.eup %5498  ;;  %2095 = vst.msk [vmem:[%s9252_s2 + $0xf0] sm:$0xff] %vm2064_vm10, %v5497_v53  ;;  %5285 = vmatprep.mubr.msk.bf16.mxu1 %vm1646_vm9, %v9334_v33  ;;  %v9348_v33 = vld [vmem:[#allocation6_spill] sm:$0xff] }
 0x21c   :  { %v5501_v18 = vpop.eup %5500  ;;  %2093 = vst.msk [vmem:[%s9252_s2 + $0xe0] sm:$0xff] %vm2064_vm10, %v5499_v30  ;;  %5214 = vmatmul.mubr.msk.bf16.gmra.mrb[76].mxu0 %vm1646_vm9, %v9335_v26  ;;  %v3499_v52 = vsel %vm1403_vm6, %v9348_v33, %v3470_v0  ;;  %v9355_v0 = vld [vmem:[#allocation34_spill] sm:$0xff] }
 0x21d   :  { %v5503_v59 = vpop.eup %5502  ;;  %2096 = vst.msk [vmem:[%s9252_s2 + $0xf8] sm:$0xff] %vm2064_vm10, %v5501_v18  ;;  %5217 = vmatprep.mubr.msk.bf16.mxu0 %vm1646_vm9, %v9336_v23  ;;  %v9349_v18 = vld [vmem:[#allocation28_spill] sm:$0xff]  ;;  %v3981_v23 = vpop.permute.xlu1 %3980 }
 0x21e   :  { %v5505_v41 = vpop.eup %5504  ;;  %4680 = vst.msk [vmem:[%s9252_s2 + $0x2f8] sm:$0xff] %vm2064_vm10, %v5503_v59  ;;  %v3991_v59 = vsel %vm1500_vm7, %v3986_v24, %v3971_v39 }
 0x21f   :  { %v5507_v1 = vpop.eup %5506  ;;  %2094 = vst.msk [vmem:[%s9252_s2 + $0xe8] sm:$0xff] %vm2064_vm10, %v5505_v41 }
 0x220   :  { %4678 = vst.msk [vmem:[%s9252_s2 + $0x2e8] sm:$0xff] %vm2064_vm10, %v5507_v1  ;;  %v3504_v1 = vsel %vm1500_vm7, %v3499_v52, %v3484_v21 }
 0x222   :  { %5286 = vmatmul.mubr.msk.bf16.gmra.mrb[80].mxu1 %vm1646_vm9, %v9337_v27  ;;  %v3494_v27 = vpop.permute.xlu0 %3493 }
 0x223   :  { %5289 = vmatprep.mubr.msk.bf16.mxu1 %vm1646_vm9, %v9338_v22  ;;  %v3995_v22 = vsel %vm1565_vm8, %v3991_v59, %v3981_v23 }
 0x224   :  { %5218 = vmatmul.mubr.msk.bf16.gmra.mrb[80].mxu0 %vm1646_vm9, %v9339_v46  ;;  %v3508_v46 = vsel %vm1565_vm8, %v3504_v1, %v3494_v27 }
 0x225   :  { %5221 = vmatprep.mubr.msk.bf16.mxu0 %vm1646_vm9, %v9340_v28  ;;  %v5167_v37 = vpop.f32.mrb[32].mxu1  ;;  %v9350_v28 = vld [vmem:[#allocation29_spill] sm:$0xff] }
 0x226   :  { %5508 = vtanh.f32 %v5167_v37  ;;  %v3165_v31 = vpop.f32.mrb[33].mxu1  ;;  %v9351_v37 = vld [vmem:[#allocation30_spill] sm:$0xff] }
 0x227   :  { %v5099_v58 = vpop.f32.mrb[32].mxu0  ;;  %5510 = vtanh.f32 %v3165_v31  ;;  %v5168_v14 = vpop.f32.mrb[34].mxu1 }
 0x228   :  { %5512 = vtanh.f32 %v5099_v58  ;;  %v1873_v43 = vpop.f32.mrb[33].mxu0  ;;  %v3168_v13 = vpop.f32.mrb[35].mxu1 }
 0x229   :  { %5514 = vtanh.f32 %v1873_v43  ;;  %v5100_v60 = vpop.f32.mrb[34].mxu0 }
 0x22a   :  { %5516 = vtanh.f32 %v5100_v60  ;;  %v1876_v63 = vpop.f32.mrb[35].mxu0  ;;  %5290 = vmatmul.mubr.msk.bf16.gmra.mrb[84].mxu1 %vm1646_vm9, %v9341_v44  ;;  %v9352_v44 = vld [vmem:[#allocation32_spill] sm:$0xff] }
 0x22b   :  { %5518 = vtanh.f32 %v5168_v14  ;;  %5293 = vmatprep.mubr.msk.bf16.mxu1 %vm1646_vm9, %v9342_v3  ;;  %v9353_v3 = vld [vmem:[#allocation33_spill] sm:$0xff] }
 0x22c   :  { %5520 = vtanh.f32 %v1876_v63  ;;  %5222 = vmatmul.mubr.msk.bf16.gmra.mrb[84].mxu0 %vm1646_vm9, %v9343_v4  ;;  %v9354_v4 = vld [vmem:[#allocation31_spill] sm:$0xff] }
 0x22d   :  { %5522 = vtanh.f32 %v3168_v13  ;;  %5225 = vmatprep.mubr.msk.bf16.mxu0 %vm1646_vm9, %v9344_v35 }
 0x230   :  { %v5509_v54 = vpop.eup %5508 }
 0x231   :  { %v5511_v9 = vpop.eup %5510  ;;  %4683 = vst.msk [vmem:[%s9252_s2 + $0x310] sm:$0xff] %vm2064_vm10, %v5509_v54 }
 0x232   :  { %v5513_v48 = vpop.eup %5512  ;;  %4681 = vst.msk [vmem:[%s9252_s2 + $0x300] sm:$0xff] %vm2064_vm10, %v5511_v9  ;;  %5294 = vmatmul.mubr.msk.bf16.gmra.mrb[88].mxu1 %vm1646_vm9, %v9345_v40 }
 0x233   :  { %v5515_v20 = vpop.eup %5514  ;;  %2099 = vst.msk [vmem:[%s9252_s2 + $0x110] sm:$0xff] %vm2064_vm10, %v5513_v48  ;;  %5297 = vmatprep.mubr.msk.bf16.mxu1 %vm1646_vm9, %v9346_v47 }
 0x234   :  { %v5517_v53 = vpop.eup %5516  ;;  %2097 = vst.msk [vmem:[%s9252_s2 + $0x100] sm:$0xff] %vm2064_vm10, %v5515_v20  ;;  %5226 = vmatmul.mubr.msk.bf16.gmra.mrb[88].mxu0 %vm1646_vm9, %v9347_v17 }
 0x235   :  { %v5519_v30 = vpop.eup %5518  ;;  %2100 = vst.msk [vmem:[%s9252_s2 + $0x118] sm:$0xff] %vm2064_vm10, %v5517_v53  ;;  %5229 = vmatprep.mubr.msk.bf16.mxu0 %vm1646_vm9, %v9349_v18 }
 0x236   :  { %v5521_v26 = vpop.eup %5520  ;;  %4684 = vst.msk [vmem:[%s9252_s2 + $0x318] sm:$0xff] %vm2064_vm10, %v5519_v30 }
 0x237   :  { %v5523_v41 = vpop.eup %5522  ;;  %2098 = vst.msk [vmem:[%s9252_s2 + $0x108] sm:$0xff] %vm2064_vm10, %v5521_v26 }
 0x238   :  { %4682 = vst.msk [vmem:[%s9252_s2 + $0x308] sm:$0xff] %vm2064_vm10, %v5523_v41 }
 0x23a   :  { %5298 = vmatmul.mubr.msk.bf16.gmra.mrb[92].mxu1 %vm1646_vm9, %v3995_v22 }
 0x23b   :  { %5301 = vmatprep.mubr.msk.bf16.mxu1 %vm1646_vm9, %v9350_v28 }
 0x23c   :  { %5230 = vmatmul.mubr.msk.bf16.gmra.mrb[92].mxu0 %vm1646_vm9, %v3508_v46 }
 0x23d   :  { %5233 = vmatprep.mubr.msk.bf16.mxu0 %vm1646_vm9, %v9351_v37  ;;  %v5171_v31 = vpop.f32.mrb[36].mxu1 }
 0x23e   :  { %5524 = vtanh.f32 %v5171_v31  ;;  %v3181_v58 = vpop.f32.mrb[37].mxu1 }
 0x23f   :  { %v5103_v14 = vpop.f32.mrb[36].mxu0  ;;  %5526 = vtanh.f32 %v3181_v58  ;;  %v5172_v43 = vpop.f32.mrb[38].mxu1 }
 0x240   :  { %5528 = vtanh.f32 %v5103_v14  ;;  %v1889_v13 = vpop.f32.mrb[37].mxu0  ;;  %v3184_v60 = vpop.f32.mrb[39].mxu1 }
 0x241   :  { %5530 = vtanh.f32 %v1889_v13  ;;  %v5104_v63 = vpop.f32.mrb[38].mxu0 }
 0x242   :  { %5532 = vtanh.f32 %v5104_v63  ;;  %v1892_v50 = vpop.f32.mrb[39].mxu0  ;;  %5302 = vmatmul.mubr.msk.bf16.gmra.mrb[96].mxu1 %vm1646_vm9, %v9352_v44 }
 0x243   :  { %5534 = vtanh.f32 %v5172_v43  ;;  %5305 = vmatprep.mubr.msk.bf16.mxu1 %vm1646_vm9, %v9353_v3 }
 0x244   :  { %5536 = vtanh.f32 %v1892_v50  ;;  %5234 = vmatmul.mubr.msk.bf16.gmra.mrb[96].mxu0 %vm1646_vm9, %v9354_v4 }
 0x245   :  { %5538 = vtanh.f32 %v3184_v60  ;;  %5237 = vmatprep.mubr.msk.bf16.mxu0 %vm1646_vm9, %v9355_v0 }
 0x248   :  { %v5525_v35 = vpop.eup %5524 }
 0x249   :  { %v5527_v54 = vpop.eup %5526  ;;  %4687 = vst.msk [vmem:[%s9252_s2 + $0x330] sm:$0xff] %vm2064_vm10, %v5525_v35 }
 0x24a   :  { %v5529_v39 = vpop.eup %5528  ;;  %4685 = vst.msk [vmem:[%s9252_s2 + $0x320] sm:$0xff] %vm2064_vm10, %v5527_v54  ;;  %5306 = vmatmul.mubr.msk.bf16.gmra.mrb[100].mxu1 %vm1646_vm9, %v7851_v56 }
 0x24b   :  { %v5531_v9 = vpop.eup %5530  ;;  %2103 = vst.msk [vmem:[%s9252_s2 + $0x130] sm:$0xff] %vm2064_vm10, %v5529_v39  ;;  %5309 = vmatprep.mubr.msk.bf16.mxu1 %vm1646_vm9, %v7881_v12 }
 0x24c   :  { %v5533_v48 = vpop.eup %5532  ;;  %2101 = vst.msk [vmem:[%s9252_s2 + $0x120] sm:$0xff] %vm2064_vm10, %v5531_v9  ;;  %5238 = vmatmul.mubr.msk.bf16.gmra.mrb[100].mxu0 %vm1646_vm9, %v7818_v29 }
 0x24d   :  { %v5535_v21 = vpop.eup %5534  ;;  %2104 = vst.msk [vmem:[%s9252_s2 + $0x138] sm:$0xff] %vm2064_vm10, %v5533_v48  ;;  %5241 = vmatprep.mubr.msk.bf16.mxu0 %vm1646_vm9, %v7892_v7 }
 0x24e   :  { %v5537_v56 = vpop.eup %5536  ;;  %4688 = vst.msk [vmem:[%s9252_s2 + $0x338] sm:$0xff] %vm2064_vm10, %v5535_v21 }
 0x24f   :  { %v5539_v12 = vpop.eup %5538  ;;  %2102 = vst.msk [vmem:[%s9252_s2 + $0x128] sm:$0xff] %vm2064_vm10, %v5537_v56 }
 0x250   :  { %4686 = vst.msk [vmem:[%s9252_s2 + $0x328] sm:$0xff] %vm2064_vm10, %v5539_v12 }
 0x252   :  { %5310 = vmatmul.mubr.msk.bf16.gmra.mrb[104].mxu1 %vm1646_vm9, %v7987_v5 }
 0x253   :  { %5313 = vmatprep.mubr.msk.bf16.mxu1 %vm1646_vm9, %v8008_v8 }
 0x254   :  { %5242 = vmatmul.mubr.msk.bf16.gmra.mrb[104].mxu0 %vm1646_vm9, %v7970_v55 }
 0x255   :  { %5245 = vmatprep.mubr.msk.bf16.mxu0 %vm1646_vm9, %v8015_v16  ;;  %v5175_v29 = vpop.f32.mrb[40].mxu1 }
 0x256   :  { %5540 = vtanh.f32 %v5175_v29  ;;  %v3197_v7 = vpop.f32.mrb[41].mxu1 }
 0x257   :  { %v5107_v40 = vpop.f32.mrb[40].mxu0  ;;  %5542 = vtanh.f32 %v3197_v7  ;;  %v5176_v20 = vpop.f32.mrb[42].mxu1 }
 0x258   :  { %5544 = vtanh.f32 %v5107_v40  ;;  %v1905_v24 = vpop.f32.mrb[41].mxu0  ;;  %v3200_v47 = vpop.f32.mrb[43].mxu1 }
 0x259   :  { %5546 = vtanh.f32 %v1905_v24  ;;  %v5108_v5 = vpop.f32.mrb[42].mxu0 }
 0x25a   :  { %5548 = vtanh.f32 %v5108_v5  ;;  %v1908_v53 = vpop.f32.mrb[43].mxu0  ;;  %5314 = vmatmul.mubr.msk.bf16.gmra.mrb[108].mxu1 %vm1646_vm9, %v8066_v51 }
 0x25b   :  { %5550 = vtanh.f32 %v5176_v20  ;;  %5317 = vmatprep.mubr.msk.bf16.mxu1 %vm1646_vm9, %v8076_v32 }
 0x25c   :  { %5552 = vtanh.f32 %v1908_v53  ;;  %5246 = vmatmul.mubr.msk.bf16.gmra.mrb[108].mxu0 %vm1646_vm9, %v8058_v42 }
 0x25d   :  { %5554 = vtanh.f32 %v3200_v47  ;;  %5249 = vmatprep.mubr.msk.bf16.mxu0 %vm1646_vm9, %v8082_v61 }
 0x260   :  { %v5541_v55 = vpop.eup %5540 }
 0x261   :  { %v5543_v8 = vpop.eup %5542  ;;  %4691 = vst.msk [vmem:[%s9252_s2 + $0x350] sm:$0xff] %vm2064_vm10, %v5541_v55 }
 0x262   :  { %v5545_v16 = vpop.eup %5544  ;;  %4689 = vst.msk [vmem:[%s9252_s2 + $0x340] sm:$0xff] %vm2064_vm10, %v5543_v8  ;;  %5318 = vmatmul.mubr.msk.bf16.gmra.mrb[112].mxu1 %vm1646_vm9, %v8130_v25 }
 0x263   :  { %v5547_v42 = vpop.eup %5546  ;;  %2107 = vst.msk [vmem:[%s9252_s2 + $0x150] sm:$0xff] %vm2064_vm10, %v5545_v16  ;;  %5321 = vmatprep.mubr.msk.bf16.mxu1 %vm1646_vm9, %v8140_v57  ;;  %v3472_v57 = vpop.permute.xlu0 %3471 }
 0x264   :  { %v5549_v51 = vpop.eup %5548  ;;  %2105 = vst.msk [vmem:[%s9252_s2 + $0x140] sm:$0xff] %vm2064_vm10, %v5547_v42  ;;  %5250 = vmatmul.mubr.msk.bf16.gmra.mrb[112].mxu0 %vm1646_vm9, %v8122_v6  ;;  %v3969_v6 = vpop.permute.xlu1 %3968 }
 0x265   :  { %v5551_v32 = vpop.eup %5550  ;;  %2108 = vst.msk [vmem:[%s9252_s2 + $0x158] sm:$0xff] %vm2064_vm10, %v5549_v51  ;;  %5253 = vmatprep.mubr.msk.bf16.mxu0 %vm1646_vm9, %v8146_v36 }
 0x266   :  { %v5553_v61 = vpop.eup %5552  ;;  %4692 = vst.msk [vmem:[%s9252_s2 + $0x358] sm:$0xff] %vm2064_vm10, %v5551_v32 }
 0x267   :  { %v5555_v25 = vpop.eup %5554  ;;  %2106 = vst.msk [vmem:[%s9252_s2 + $0x148] sm:$0xff] %vm2064_vm10, %v5553_v61 }
 0x268   :  { %4690 = vst.msk [vmem:[%s9252_s2 + $0x348] sm:$0xff] %vm2064_vm10, %v5555_v25  ;;  %v3973_v17 = vpop.permute.xlu1 %3972 }
 0x26a   :  { %5322 = vmatmul.mubr.msk.bf16.gmra.mrb[116].mxu1 %vm1646_vm9, %v8194_v10 }
 0x26b   :  { %5325 = vmatprep.mubr.msk.bf16.mxu1 %vm1646_vm9, %v8204_v45  ;;  %v3486_v45 = vpop.permute.xlu0 %3485 }
 0x26c   :  { %5254 = vmatmul.mubr.msk.bf16.gmra.mrb[116].mxu0 %vm1646_vm9, %v8186_v62  ;;  %v3989_v62 = vsel %vm1403_vm6, %v7857_v38, %v3969_v6  ;;  %v3983_v23 = vpop.permute.xlu1 %3982 }
 0x26d   :  { %5257 = vmatprep.mubr.msk.bf16.mxu0 %vm1646_vm9, %v8210_v11  ;;  %v5179_v36 = vpop.f32.mrb[44].mxu1  ;;  %v3502_v11 = vsel %vm1403_vm6, %v7847_v19, %v3472_v57 }
 0x26e   :  { %5556 = vtanh.f32 %v5179_v36  ;;  %v3213_v30 = vpop.f32.mrb[45].mxu1  ;;  %v3506_v38 = vsel %vm1500_vm7, %v3502_v11, %v3486_v45 }
 0x26f   :  { %v5111_v33 = vpop.f32.mrb[44].mxu0  ;;  %5558 = vtanh.f32 %v3213_v30  ;;  %v5180_v52 = vpop.f32.mrb[46].mxu1 }
 0x270   :  { %5560 = vtanh.f32 %v5111_v33  ;;  %v1921_v18 = vpop.f32.mrb[45].mxu0  ;;  %v3216_v10 = vpop.f32.mrb[47].mxu1 }
 0x271   :  { %5562 = vtanh.f32 %v1921_v18  ;;  %v5112_v26 = vpop.f32.mrb[46].mxu0  ;;  %v3496_v1 = vpop.permute.xlu0 %3495 }
 0x272   :  { %5564 = vtanh.f32 %v5112_v26  ;;  %v1924_v59 = vpop.f32.mrb[47].mxu0  ;;  %5326 = vmatmul.mubr.msk.bf16.gmra.mrb[120].mxu1 %vm1646_vm9, %v8258_v15  ;;  %v3993_v15 = vsel %vm1500_vm7, %v3989_v62, %v3973_v17 }
 0x273   :  { %5566 = vtanh.f32 %v5180_v52  ;;  %5329 = vmatprep.mubr.msk.bf16.mxu1 %vm1646_vm9, %v8268_v34 }
 0x274   :  { %5568 = vtanh.f32 %v1924_v59  ;;  %5258 = vmatmul.mubr.msk.bf16.gmra.mrb[120].mxu0 %vm1646_vm9, %v8250_v2  ;;  %v3997_v2 = vsel %vm1565_vm8, %v3993_v15, %v3983_v23 }
 0x275   :  { %5570 = vtanh.f32 %v3216_v10  ;;  %5261 = vmatprep.mubr.msk.bf16.mxu0 %vm1646_vm9, %v8274_v49  ;;  %v3510_v49 = vsel %vm1565_vm8, %v3506_v38, %v3496_v1 }
 0x278   :  { %v5557_v41 = vpop.eup %5556 }
 0x279   :  { %v5559_v27 = vpop.eup %5558  ;;  %4695 = vst.msk [vmem:[%s9252_s2 + $0x370] sm:$0xff] %vm2064_vm10, %v5557_v41 }
 0x27a   :  { %v5561_v19 = vpop.eup %5560  ;;  %4693 = vst.msk [vmem:[%s9252_s2 + $0x360] sm:$0xff] %vm2064_vm10, %v5559_v27  ;;  %5330 = vmatmul.mubr.msk.bf16.gmra.mrb[124].mxu1 %vm1646_vm9, %v3997_v2 }
 0x27b   :  { %v5563_v34 = vpop.eup %5562  ;;  %2111 = vst.msk [vmem:[%s9252_s2 + $0x170] sm:$0xff] %vm2064_vm10, %v5561_v19 }
 0x27c   :  { %v5565_v22 = vpop.eup %5564  ;;  %2109 = vst.msk [vmem:[%s9252_s2 + $0x160] sm:$0xff] %vm2064_vm10, %v5563_v34  ;;  %5262 = vmatmul.mubr.msk.bf16.gmra.mrb[124].mxu0 %vm1646_vm9, %v3510_v49 }
 0x27d   :  { %v5567_v46 = vpop.eup %5566  ;;  %2112 = vst.msk [vmem:[%s9252_s2 + $0x178] sm:$0xff] %vm2064_vm10, %v5565_v22 }
 0x27e   :  { %v5569_v28 = vpop.eup %5568  ;;  %4696 = vst.msk [vmem:[%s9252_s2 + $0x378] sm:$0xff] %vm2064_vm10, %v5567_v46 }
 0x27f   :  { %v5571_v37 = vpop.eup %5570  ;;  %2110 = vst.msk [vmem:[%s9252_s2 + $0x168] sm:$0xff] %vm2064_vm10, %v5569_v28 }
 0x280   :  { %4694 = vst.msk [vmem:[%s9252_s2 + $0x368] sm:$0xff] %vm2064_vm10, %v5571_v37 }
 0x285   :  { %v5183_v31 = vpop.f32.mrb[48].mxu1 }
 0x286   :  { %5572 = vtanh.f32 %v5183_v31  ;;  %v3229_v58 = vpop.f32.mrb[49].mxu1 }
 0x287   :  { %v5115_v14 = vpop.f32.mrb[48].mxu0  ;;  %5574 = vtanh.f32 %v3229_v58  ;;  %v5184_v43 = vpop.f32.mrb[50].mxu1 }
 0x288   :  { %5576 = vtanh.f32 %v5115_v14  ;;  %v1937_v13 = vpop.f32.mrb[49].mxu0  ;;  %v3232_v60 = vpop.f32.mrb[51].mxu1 }
 0x289   :  { %5578 = vtanh.f32 %v1937_v13  ;;  %v5116_v63 = vpop.f32.mrb[50].mxu0 }
 0x28a   :  { %5580 = vtanh.f32 %v5116_v63  ;;  %v1940_v50 = vpop.f32.mrb[51].mxu0 }
 0x28b   :  { %5582 = vtanh.f32 %v5184_v43 }
 0x28c   :  { %5584 = vtanh.f32 %v1940_v50 }
 0x28d   :  { %5586 = vtanh.f32 %v3232_v60 }
 0x290   :  { %v5573_v44 = vpop.eup %5572 }
 0x291   :  { %v5575_v3 = vpop.eup %5574  ;;  %4699 = vst.msk [vmem:[%s9252_s2 + $0x390] sm:$0xff] %vm2064_vm10, %v5573_v44 }
 0x292   :  { %v5577_v4 = vpop.eup %5576  ;;  %4697 = vst.msk [vmem:[%s9252_s2 + $0x380] sm:$0xff] %vm2064_vm10, %v5575_v3 }
 0x293   :  { %v5579_v0 = vpop.eup %5578  ;;  %2115 = vst.msk [vmem:[%s9252_s2 + $0x190] sm:$0xff] %vm2064_vm10, %v5577_v4 }
 0x294   :  { %v5581_v35 = vpop.eup %5580  ;;  %2113 = vst.msk [vmem:[%s9252_s2 + $0x180] sm:$0xff] %vm2064_vm10, %v5579_v0 }
 0x295   :  { %v5583_v54 = vpop.eup %5582  ;;  %2116 = vst.msk [vmem:[%s9252_s2 + $0x198] sm:$0xff] %vm2064_vm10, %v5581_v35 }
 0x296   :  { %v5585_v39 = vpop.eup %5584  ;;  %4700 = vst.msk [vmem:[%s9252_s2 + $0x398] sm:$0xff] %vm2064_vm10, %v5583_v54 }
 0x297   :  { %v5587_v9 = vpop.eup %5586  ;;  %2114 = vst.msk [vmem:[%s9252_s2 + $0x188] sm:$0xff] %vm2064_vm10, %v5585_v39 }
 0x298   :  { %4698 = vst.msk [vmem:[%s9252_s2 + $0x388] sm:$0xff] %vm2064_vm10, %v5587_v9 }
 0x29d   :  { %v5187_v48 = vpop.f32.mrb[52].mxu1 }
 0x29e   :  { %5588 = vtanh.f32 %v5187_v48  ;;  %v3245_v21 = vpop.f32.mrb[53].mxu1 }
 0x29f   :  { %v5119_v56 = vpop.f32.mrb[52].mxu0  ;;  %5590 = vtanh.f32 %v3245_v21  ;;  %v5188_v12 = vpop.f32.mrb[54].mxu1 }
 0x2a0   :  { %5592 = vtanh.f32 %v5119_v56  ;;  %v1953_v29 = vpop.f32.mrb[53].mxu0  ;;  %v3248_v7 = vpop.f32.mrb[55].mxu1 }
 0x2a1   :  { %5594 = vtanh.f32 %v1953_v29  ;;  %v5120_v40 = vpop.f32.mrb[54].mxu0 }
 0x2a2   :  { %5596 = vtanh.f32 %v5120_v40  ;;  %v1956_v20 = vpop.f32.mrb[55].mxu0 }
 0x2a3   :  { %5598 = vtanh.f32 %v5188_v12 }
 0x2a4   :  { %5600 = vtanh.f32 %v1956_v20 }
 0x2a5   :  { %5602 = vtanh.f32 %v3248_v7 }
 0x2a8   :  { %v5589_v24 = vpop.eup %5588 }
 0x2a9   :  { %v5591_v47 = vpop.eup %5590  ;;  %4703 = vst.msk [vmem:[%s9252_s2 + $0x3b0] sm:$0xff] %vm2064_vm10, %v5589_v24 }
 0x2aa   :  { %v5593_v5 = vpop.eup %5592  ;;  %4701 = vst.msk [vmem:[%s9252_s2 + $0x3a0] sm:$0xff] %vm2064_vm10, %v5591_v47 }
 0x2ab   :  { %v5595_v53 = vpop.eup %5594  ;;  %2119 = vst.msk [vmem:[%s9252_s2 + $0x1b0] sm:$0xff] %vm2064_vm10, %v5593_v5 }
 0x2ac   :  { %v5597_v55 = vpop.eup %5596  ;;  %2117 = vst.msk [vmem:[%s9252_s2 + $0x1a0] sm:$0xff] %vm2064_vm10, %v5595_v53 }
 0x2ad   :  { %v5599_v8 = vpop.eup %5598  ;;  %2120 = vst.msk [vmem:[%s9252_s2 + $0x1b8] sm:$0xff] %vm2064_vm10, %v5597_v55 }
 0x2ae   :  { %v5601_v16 = vpop.eup %5600  ;;  %4704 = vst.msk [vmem:[%s9252_s2 + $0x3b8] sm:$0xff] %vm2064_vm10, %v5599_v8 }
 0x2af   :  { %v5603_v42 = vpop.eup %5602  ;;  %2118 = vst.msk [vmem:[%s9252_s2 + $0x1a8] sm:$0xff] %vm2064_vm10, %v5601_v16 }
 0x2b0   :  { %4702 = vst.msk [vmem:[%s9252_s2 + $0x3a8] sm:$0xff] %vm2064_vm10, %v5603_v42 }
 0x2b5   :  { %v5191_v51 = vpop.f32.mrb[56].mxu1 }
 0x2b6   :  { %5604 = vtanh.f32 %v5191_v51  ;;  %v3261_v32 = vpop.f32.mrb[57].mxu1 }
 0x2b7   :  { %v5123_v61 = vpop.f32.mrb[56].mxu0  ;;  %5606 = vtanh.f32 %v3261_v32  ;;  %v5192_v25 = vpop.f32.mrb[58].mxu1 }
 0x2b8   :  { %5608 = vtanh.f32 %v5123_v61  ;;  %v1969_v6 = vpop.f32.mrb[57].mxu0  ;;  %v3264_v57 = vpop.f32.mrb[59].mxu1 }
 0x2b9   :  { %5610 = vtanh.f32 %v1969_v6  ;;  %v5124_v36 = vpop.f32.mrb[58].mxu0 }
 0x2ba   :  { %5612 = vtanh.f32 %v5124_v36  ;;  %v1972_v17 = vpop.f32.mrb[59].mxu0 }
 0x2bb   :  { %5614 = vtanh.f32 %v5192_v25 }
 0x2bc   :  { %5616 = vtanh.f32 %v1972_v17 }
 0x2bd   :  { %5618 = vtanh.f32 %v3264_v57 }
 0x2c0   :  { %v5605_v30 = vpop.eup %5604 }
 0x2c1   :  { %v5607_v33 = vpop.eup %5606  ;;  %4707 = vst.msk [vmem:[%s9252_s2 + $0x3d0] sm:$0xff] %vm2064_vm10, %v5605_v30 }
 0x2c2   :  { %v5609_v52 = vpop.eup %5608  ;;  %4705 = vst.msk [vmem:[%s9252_s2 + $0x3c0] sm:$0xff] %vm2064_vm10, %v5607_v33 }
 0x2c3   :  { %v5611_v18 = vpop.eup %5610  ;;  %2123 = vst.msk [vmem:[%s9252_s2 + $0x1d0] sm:$0xff] %vm2064_vm10, %v5609_v52 }
 0x2c4   :  { %v5613_v10 = vpop.eup %5612  ;;  %2121 = vst.msk [vmem:[%s9252_s2 + $0x1c0] sm:$0xff] %vm2064_vm10, %v5611_v18 }
 0x2c5   :  { %v5615_v26 = vpop.eup %5614  ;;  %2124 = vst.msk [vmem:[%s9252_s2 + $0x1d8] sm:$0xff] %vm2064_vm10, %v5613_v10 }
 0x2c6   :  { %v5617_v45 = vpop.eup %5616  ;;  %4708 = vst.msk [vmem:[%s9252_s2 + $0x3d8] sm:$0xff] %vm2064_vm10, %v5615_v26 }
 0x2c7   :  { %v5619_v59 = vpop.eup %5618  ;;  %2122 = vst.msk [vmem:[%s9252_s2 + $0x1c8] sm:$0xff] %vm2064_vm10, %v5617_v45 }
 0x2c8   :  { %4706 = vst.msk [vmem:[%s9252_s2 + $0x3c8] sm:$0xff] %vm2064_vm10, %v5619_v59 }
 0x2cd   :  { %v5195_v62 = vpop.f32.mrb[60].mxu1 }
 0x2ce   :  { %5620 = vtanh.f32 %v5195_v62  ;;  %v3277_v11 = vpop.f32.mrb[61].mxu1 }
 0x2cf   :  { %v5127_v15 = vpop.f32.mrb[60].mxu0  ;;  %5622 = vtanh.f32 %v3277_v11  ;;  %v5196_v23 = vpop.f32.mrb[62].mxu1 }
 0x2d0   :  { %5624 = vtanh.f32 %v5127_v15  ;;  %v1985_v41 = vpop.f32.mrb[61].mxu0  ;;  %v3280_v38 = vpop.f32.mrb[63].mxu1 }
 0x2d1   :  { %5626 = vtanh.f32 %v1985_v41  ;;  %v5128_v1 = vpop.f32.mrb[62].mxu0 }
 0x2d2   :  { %5628 = vtanh.f32 %v5128_v1  ;;  %v1988_v27 = vpop.f32.mrb[63].mxu0 }
 0x2d3   :  { %5630 = vtanh.f32 %v5196_v23 }
 0x2d4   :  { %5632 = vtanh.f32 %v1988_v27 }
 0x2d5   :  { %5634 = vtanh.f32 %v3280_v38  ;;  %v5271_v2 = vpop.f32.mrb[64].mxu1 }
 0x2d6   :  { %5636 = vtanh.f32 %v5271_v2  ;;  %v4053_v19 = vpop.f32.mrb[65].mxu1 }
 0x2d7   :  { %v5203_v34 = vpop.f32.mrb[64].mxu0  ;;  %5638 = vtanh.f32 %v4053_v19  ;;  %v5272_v49 = vpop.f32.mrb[66].mxu1 }
 0x2d8   :  { %v5621_v22 = vpop.eup %5620  ;;  %5640 = vtanh.f32 %v5203_v34  ;;  %v3566_v46 = vpop.f32.mrb[65].mxu0 }
 0x2d9   :  { %v4056_v28 = vpop.f32.mrb[67].mxu1  ;;  %v5623_v37 = vpop.eup %5622  ;;  %4711 = vst.msk [vmem:[%s9252_s2 + $0x3f0] sm:$0xff] %vm2064_vm10, %v5621_v22  ;;  %5642 = vtanh.f32 %v3566_v46 }
 0x2da   :  { %v5204_v31 = vpop.f32.mrb[66].mxu0  ;;  %v5625_v58 = vpop.eup %5624  ;;  %4709 = vst.msk [vmem:[%s9252_s2 + $0x3e0] sm:$0xff] %vm2064_vm10, %v5623_v37 }
 0x2db   :  { %5644 = vtanh.f32 %v5204_v31  ;;  %v3569_v14 = vpop.f32.mrb[67].mxu0  ;;  %v5627_v43 = vpop.eup %5626  ;;  %2127 = vst.msk [vmem:[%s9252_s2 + $0x1f0] sm:$0xff] %vm2064_vm10, %v5625_v58 }
 0x2dc   :  { %5646 = vtanh.f32 %v5272_v49  ;;  %v5629_v13 = vpop.eup %5628  ;;  %2125 = vst.msk [vmem:[%s9252_s2 + $0x1e0] sm:$0xff] %vm2064_vm10, %v5627_v43 }
 0x2dd   :  { %5648 = vtanh.f32 %v3569_v14  ;;  %v5631_v60 = vpop.eup %5630  ;;  %2128 = vst.msk [vmem:[%s9252_s2 + $0x1f8] sm:$0xff] %vm2064_vm10, %v5629_v13  ;;  %v5275_v63 = vpop.f32.mrb[68].mxu1 }
 0x2de   :  { %5650 = vtanh.f32 %v4056_v28  ;;  %v5633_v50 = vpop.eup %5632  ;;  %4712 = vst.msk [vmem:[%s9252_s2 + $0x3f8] sm:$0xff] %vm2064_vm10, %v5631_v60  ;;  %v4069_v44 = vpop.f32.mrb[69].mxu1 }
 0x2df   :  { %5652 = vtanh.f32 %v5275_v63  ;;  %v5635_v3 = vpop.eup %5634  ;;  %2126 = vst.msk [vmem:[%s9252_s2 + $0x1e8] sm:$0xff] %vm2064_vm10, %v5633_v50  ;;  %v5207_v4 = vpop.f32.mrb[68].mxu0 }
 0x2e0   :  { %5654 = vtanh.f32 %v4069_v44  ;;  %v5276_v0 = vpop.f32.mrb[70].mxu1  ;;  %v5637_v35 = vpop.eup %5636  ;;  %4710 = vst.msk [vmem:[%s9252_s2 + $0x3e8] sm:$0xff] %vm2064_vm10, %v5635_v3 }
 0x2e1   :  { %5656 = vtanh.f32 %v5207_v4  ;;  %v3582_v54 = vpop.f32.mrb[69].mxu0  ;;  %v4072_v39 = vpop.f32.mrb[71].mxu1  ;;  %4863 = vst.msk [vmem:[%s9252_s2 + $0x610] sm:$0xff] %vm2064_vm10, %v5637_v35 }
 0x2e2   :  { %v5639_v9 = vpop.eup %5638  ;;  %5658 = vtanh.f32 %v3582_v54  ;;  %v5208_v48 = vpop.f32.mrb[70].mxu0 }
 0x2e3   :  { %v5641_v21 = vpop.eup %5640  ;;  %4861 = vst.msk [vmem:[%s9252_s2 + $0x600] sm:$0xff] %vm2064_vm10, %v5639_v9  ;;  %5660 = vtanh.f32 %v5208_v48  ;;  %v3585_v56 = vpop.f32.mrb[71].mxu0 }
 0x2e4   :  { %v5643_v12 = vpop.eup %5642  ;;  %4757 = vst.msk [vmem:[%s9252_s2 + $0x410] sm:$0xff] %vm2064_vm10, %v5641_v21  ;;  %5662 = vtanh.f32 %v5276_v0 }
 0x2e5   :  { %v5645_v29 = vpop.eup %5644  ;;  %4755 = vst.msk [vmem:[%s9252_s2 + $0x400] sm:$0xff] %vm2064_vm10, %v5643_v12  ;;  %5664 = vtanh.f32 %v3585_v56  ;;  %v5279_v40 = vpop.f32.mrb[72].mxu1 }
 0x2e6   :  { %v5647_v7 = vpop.eup %5646  ;;  %4758 = vst.msk [vmem:[%s9252_s2 + $0x418] sm:$0xff] %vm2064_vm10, %v5645_v29  ;;  %5666 = vtanh.f32 %v4072_v39  ;;  %v4085_v24 = vpop.f32.mrb[73].mxu1 }
 0x2e7   :  { %v5649_v20 = vpop.eup %5648  ;;  %4864 = vst.msk [vmem:[%s9252_s2 + $0x618] sm:$0xff] %vm2064_vm10, %v5647_v7  ;;  %5668 = vtanh.f32 %v5279_v40  ;;  %v5211_v5 = vpop.f32.mrb[72].mxu0 }
 0x2e8   :  { %v5651_v47 = vpop.eup %5650  ;;  %4756 = vst.msk [vmem:[%s9252_s2 + $0x408] sm:$0xff] %vm2064_vm10, %v5649_v20  ;;  %5670 = vtanh.f32 %v4085_v24  ;;  %v5280_v53 = vpop.f32.mrb[74].mxu1 }
 0x2e9   :  { %v5653_v55 = vpop.eup %5652  ;;  %4862 = vst.msk [vmem:[%s9252_s2 + $0x608] sm:$0xff] %vm2064_vm10, %v5651_v47  ;;  %5672 = vtanh.f32 %v5211_v5  ;;  %v3598_v8 = vpop.f32.mrb[73].mxu0 }
 0x2ea   :  { %v4088_v16 = vpop.f32.mrb[75].mxu1  ;;  %v5655_v42 = vpop.eup %5654  ;;  %4867 = vst.msk [vmem:[%s9252_s2 + $0x630] sm:$0xff] %vm2064_vm10, %v5653_v55  ;;  %5674 = vtanh.f32 %v3598_v8 }
 0x2eb   :  { %v5212_v51 = vpop.f32.mrb[74].mxu0  ;;  %v5657_v32 = vpop.eup %5656  ;;  %4865 = vst.msk [vmem:[%s9252_s2 + $0x620] sm:$0xff] %vm2064_vm10, %v5655_v42 }
 0x2ec   :  { %5676 = vtanh.f32 %v5212_v51  ;;  %v3601_v61 = vpop.f32.mrb[75].mxu0  ;;  %v5659_v25 = vpop.eup %5658  ;;  %4761 = vst.msk [vmem:[%s9252_s2 + $0x430] sm:$0xff] %vm2064_vm10, %v5657_v32 }
 0x2ed   :  { %5678 = vtanh.f32 %v5280_v53  ;;  %v5661_v6 = vpop.eup %5660  ;;  %4759 = vst.msk [vmem:[%s9252_s2 + $0x420] sm:$0xff] %vm2064_vm10, %v5659_v25  ;;  %v5283_v36 = vpop.f32.mrb[76].mxu1 }
 0x2ee   :  { %5680 = vtanh.f32 %v3601_v61  ;;  %v5663_v57 = vpop.eup %5662  ;;  %4762 = vst.msk [vmem:[%s9252_s2 + $0x438] sm:$0xff] %vm2064_vm10, %v5661_v6  ;;  %v4101_v30 = vpop.f32.mrb[77].mxu1 }
 0x2ef   :  { %5682 = vtanh.f32 %v4088_v16  ;;  %v5665_v17 = vpop.eup %5664  ;;  %4868 = vst.msk [vmem:[%s9252_s2 + $0x638] sm:$0xff] %vm2064_vm10, %v5663_v57  ;;  %v5215_v52 = vpop.f32.mrb[76].mxu0 }
 0x2f0   :  { %5684 = vtanh.f32 %v5283_v36  ;;  %v5667_v33 = vpop.eup %5666  ;;  %4760 = vst.msk [vmem:[%s9252_s2 + $0x428] sm:$0xff] %vm2064_vm10, %v5665_v17  ;;  %v5284_v18 = vpop.f32.mrb[78].mxu1 }
 0x2f1   :  { %5686 = vtanh.f32 %v4101_v30  ;;  %v5669_v10 = vpop.eup %5668  ;;  %4866 = vst.msk [vmem:[%s9252_s2 + $0x628] sm:$0xff] %vm2064_vm10, %v5667_v33  ;;  %v3614_v26 = vpop.f32.mrb[77].mxu0 }
 0x2f2   :  { %5688 = vtanh.f32 %v5215_v52  ;;  %v4104_v45 = vpop.f32.mrb[79].mxu1  ;;  %v5671_v59 = vpop.eup %5670  ;;  %4871 = vst.msk [vmem:[%s9252_s2 + $0x650] sm:$0xff] %vm2064_vm10, %v5669_v10 }
 0x2f3   :  { %5690 = vtanh.f32 %v3614_v26  ;;  %v5216_v62 = vpop.f32.mrb[78].mxu0  ;;  %v5673_v11 = vpop.eup %5672  ;;  %4869 = vst.msk [vmem:[%s9252_s2 + $0x640] sm:$0xff] %vm2064_vm10, %v5671_v59 }
 0x2f4   :  { %5692 = vtanh.f32 %v5216_v62  ;;  %v3617_v15 = vpop.f32.mrb[79].mxu0  ;;  %v5675_v23 = vpop.eup %5674  ;;  %4765 = vst.msk [vmem:[%s9252_s2 + $0x450] sm:$0xff] %vm2064_vm10, %v5673_v11 }
 0x2f5   :  { %5694 = vtanh.f32 %v5284_v18  ;;  %4763 = vst.msk [vmem:[%s9252_s2 + $0x440] sm:$0xff] %vm2064_vm10, %v5675_v23  ;;  %v5287_v1 = vpop.f32.mrb[80].mxu1 }
 0x2f6   :  { %v5677_v41 = vpop.eup %5676  ;;  %5696 = vtanh.f32 %v3617_v15  ;;  %v4117_v2 = vpop.f32.mrb[81].mxu1 }
 0x2f7   :  { %v5679_v38 = vpop.eup %5678  ;;  %4766 = vst.msk [vmem:[%s9252_s2 + $0x458] sm:$0xff] %vm2064_vm10, %v5677_v41  ;;  %5698 = vtanh.f32 %v4104_v45  ;;  %v5219_v34 = vpop.f32.mrb[80].mxu0 }
 0x2f8   :  { %v5681_v27 = vpop.eup %5680  ;;  %4872 = vst.msk [vmem:[%s9252_s2 + $0x658] sm:$0xff] %vm2064_vm10, %v5679_v38  ;;  %5700 = vtanh.f32 %v5287_v1  ;;  %v5288_v49 = vpop.f32.mrb[82].mxu1 }
 0x2f9   :  { %v5683_v19 = vpop.eup %5682  ;;  %4764 = vst.msk [vmem:[%s9252_s2 + $0x448] sm:$0xff] %vm2064_vm10, %v5681_v27  ;;  %5702 = vtanh.f32 %v4117_v2  ;;  %v3630_v46 = vpop.f32.mrb[81].mxu0 }
 0x2fa   :  { %v5685_v22 = vpop.eup %5684  ;;  %4870 = vst.msk [vmem:[%s9252_s2 + $0x648] sm:$0xff] %vm2064_vm10, %v5683_v19  ;;  %5704 = vtanh.f32 %v5219_v34  ;;  %v4120_v28 = vpop.f32.mrb[83].mxu1 }
 0x2fb   :  { %v5687_v37 = vpop.eup %5686  ;;  %4875 = vst.msk [vmem:[%s9252_s2 + $0x670] sm:$0xff] %vm2064_vm10, %v5685_v22  ;;  %5706 = vtanh.f32 %v3630_v46  ;;  %v5220_v31 = vpop.f32.mrb[82].mxu0 }
 0x2fc   :  { %v5689_v58 = vpop.eup %5688  ;;  %4873 = vst.msk [vmem:[%s9252_s2 + $0x660] sm:$0xff] %vm2064_vm10, %v5687_v37  ;;  %5708 = vtanh.f32 %v5220_v31  ;;  %v3633_v14 = vpop.f32.mrb[83].mxu0 }
 0x2fd   :  { %v5691_v43 = vpop.eup %5690  ;;  %4769 = vst.msk [vmem:[%s9252_s2 + $0x470] sm:$0xff] %vm2064_vm10, %v5689_v58  ;;  %5710 = vtanh.f32 %v5288_v49  ;;  %v5291_v63 = vpop.f32.mrb[84].mxu1 }
 0x2fe   :  { %v5693_v13 = vpop.eup %5692  ;;  %4767 = vst.msk [vmem:[%s9252_s2 + $0x460] sm:$0xff] %vm2064_vm10, %v5691_v43  ;;  %5712 = vtanh.f32 %v3633_v14  ;;  %v4133_v44 = vpop.f32.mrb[85].mxu1 }
 0x2ff   :  { %v5695_v60 = vpop.eup %5694  ;;  %4770 = vst.msk [vmem:[%s9252_s2 + $0x478] sm:$0xff] %vm2064_vm10, %v5693_v13  ;;  %5714 = vtanh.f32 %v4120_v28  ;;  %v5223_v4 = vpop.f32.mrb[84].mxu0 }
 0x300   :  { %v5697_v50 = vpop.eup %5696  ;;  %4876 = vst.msk [vmem:[%s9252_s2 + $0x678] sm:$0xff] %vm2064_vm10, %v5695_v60  ;;  %5716 = vtanh.f32 %v5291_v63  ;;  %v5292_v0 = vpop.f32.mrb[86].mxu1 }
 0x301   :  { %v5699_v3 = vpop.eup %5698  ;;  %4768 = vst.msk [vmem:[%s9252_s2 + $0x468] sm:$0xff] %vm2064_vm10, %v5697_v50  ;;  %5718 = vtanh.f32 %v4133_v44  ;;  %v3646_v54 = vpop.f32.mrb[85].mxu0 }
 0x302   :  { %v5701_v35 = vpop.eup %5700  ;;  %4874 = vst.msk [vmem:[%s9252_s2 + $0x668] sm:$0xff] %vm2064_vm10, %v5699_v3  ;;  %5720 = vtanh.f32 %v5223_v4  ;;  %v4136_v39 = vpop.f32.mrb[87].mxu1 }
 0x303   :  { %v5703_v9 = vpop.eup %5702  ;;  %4879 = vst.msk [vmem:[%s9252_s2 + $0x690] sm:$0xff] %vm2064_vm10, %v5701_v35  ;;  %5722 = vtanh.f32 %v3646_v54  ;;  %v5224_v48 = vpop.f32.mrb[86].mxu0 }
 0x304   :  { %v5705_v21 = vpop.eup %5704  ;;  %4877 = vst.msk [vmem:[%s9252_s2 + $0x680] sm:$0xff] %vm2064_vm10, %v5703_v9  ;;  %5724 = vtanh.f32 %v5224_v48  ;;  %v3649_v56 = vpop.f32.mrb[87].mxu0 }
 0x305   :  { %v5707_v12 = vpop.eup %5706  ;;  %4773 = vst.msk [vmem:[%s9252_s2 + $0x490] sm:$0xff] %vm2064_vm10, %v5705_v21  ;;  %5726 = vtanh.f32 %v5292_v0  ;;  %v5295_v40 = vpop.f32.mrb[88].mxu1 }
 0x306   :  { %v5709_v29 = vpop.eup %5708  ;;  %4771 = vst.msk [vmem:[%s9252_s2 + $0x480] sm:$0xff] %vm2064_vm10, %v5707_v12  ;;  %5728 = vtanh.f32 %v3649_v56  ;;  %v4149_v24 = vpop.f32.mrb[89].mxu1 }
 0x307   :  { %v5711_v7 = vpop.eup %5710  ;;  %4774 = vst.msk [vmem:[%s9252_s2 + $0x498] sm:$0xff] %vm2064_vm10, %v5709_v29  ;;  %5730 = vtanh.f32 %v4136_v39  ;;  %v5227_v5 = vpop.f32.mrb[88].mxu0 }
 0x308   :  { %v5713_v20 = vpop.eup %5712  ;;  %4880 = vst.msk [vmem:[%s9252_s2 + $0x698] sm:$0xff] %vm2064_vm10, %v5711_v7  ;;  %5732 = vtanh.f32 %v5295_v40  ;;  %v5296_v53 = vpop.f32.mrb[90].mxu1 }
 0x309   :  { %v5715_v47 = vpop.eup %5714  ;;  %4772 = vst.msk [vmem:[%s9252_s2 + $0x488] sm:$0xff] %vm2064_vm10, %v5713_v20  ;;  %5734 = vtanh.f32 %v4149_v24  ;;  %v3662_v8 = vpop.f32.mrb[89].mxu0 }
 0x30a   :  { %v5717_v55 = vpop.eup %5716  ;;  %4878 = vst.msk [vmem:[%s9252_s2 + $0x688] sm:$0xff] %vm2064_vm10, %v5715_v47  ;;  %5736 = vtanh.f32 %v5227_v5  ;;  %v4152_v16 = vpop.f32.mrb[91].mxu1 }
 0x30b   :  { %v5719_v42 = vpop.eup %5718  ;;  %4883 = vst.msk [vmem:[%s9252_s2 + $0x6b0] sm:$0xff] %vm2064_vm10, %v5717_v55  ;;  %5738 = vtanh.f32 %v3662_v8  ;;  %v5228_v51 = vpop.f32.mrb[90].mxu0 }
 0x30c   :  { %v5721_v32 = vpop.eup %5720  ;;  %4881 = vst.msk [vmem:[%s9252_s2 + $0x6a0] sm:$0xff] %vm2064_vm10, %v5719_v42  ;;  %5740 = vtanh.f32 %v5228_v51  ;;  %v3665_v61 = vpop.f32.mrb[91].mxu0 }
 0x30d   :  { %v5723_v25 = vpop.eup %5722  ;;  %4777 = vst.msk [vmem:[%s9252_s2 + $0x4b0] sm:$0xff] %vm2064_vm10, %v5721_v32  ;;  %5742 = vtanh.f32 %v5296_v53  ;;  %v5299_v36 = vpop.f32.mrb[92].mxu1 }
 0x30e   :  { %v5725_v6 = vpop.eup %5724  ;;  %4775 = vst.msk [vmem:[%s9252_s2 + $0x4a0] sm:$0xff] %vm2064_vm10, %v5723_v25  ;;  %5744 = vtanh.f32 %v3665_v61  ;;  %v4165_v30 = vpop.f32.mrb[93].mxu1 }
 0x30f   :  { %v5727_v57 = vpop.eup %5726  ;;  %4778 = vst.msk [vmem:[%s9252_s2 + $0x4b8] sm:$0xff] %vm2064_vm10, %v5725_v6  ;;  %5746 = vtanh.f32 %v4152_v16  ;;  %v5231_v52 = vpop.f32.mrb[92].mxu0 }
 0x310   :  { %v5729_v17 = vpop.eup %5728  ;;  %4884 = vst.msk [vmem:[%s9252_s2 + $0x6b8] sm:$0xff] %vm2064_vm10, %v5727_v57  ;;  %5748 = vtanh.f32 %v5299_v36  ;;  %v5300_v18 = vpop.f32.mrb[94].mxu1 }
 0x311   :  { %v5731_v33 = vpop.eup %5730  ;;  %4776 = vst.msk [vmem:[%s9252_s2 + $0x4a8] sm:$0xff] %vm2064_vm10, %v5729_v17  ;;  %5750 = vtanh.f32 %v4165_v30  ;;  %v3678_v26 = vpop.f32.mrb[93].mxu0 }
 0x312   :  { %v5733_v10 = vpop.eup %5732  ;;  %4882 = vst.msk [vmem:[%s9252_s2 + $0x6a8] sm:$0xff] %vm2064_vm10, %v5731_v33  ;;  %5752 = vtanh.f32 %v5231_v52  ;;  %v4168_v45 = vpop.f32.mrb[95].mxu1 }
 0x313   :  { %v5735_v59 = vpop.eup %5734  ;;  %4887 = vst.msk [vmem:[%s9252_s2 + $0x6d0] sm:$0xff] %vm2064_vm10, %v5733_v10  ;;  %5754 = vtanh.f32 %v3678_v26  ;;  %v5232_v62 = vpop.f32.mrb[94].mxu0 }
 0x314   :  { %v5737_v11 = vpop.eup %5736  ;;  %4885 = vst.msk [vmem:[%s9252_s2 + $0x6c0] sm:$0xff] %vm2064_vm10, %v5735_v59  ;;  %5756 = vtanh.f32 %v5232_v62  ;;  %v3681_v15 = vpop.f32.mrb[95].mxu0 }
 0x315   :  { %v5739_v23 = vpop.eup %5738  ;;  %4781 = vst.msk [vmem:[%s9252_s2 + $0x4d0] sm:$0xff] %vm2064_vm10, %v5737_v11  ;;  %5758 = vtanh.f32 %v5300_v18  ;;  %v5303_v1 = vpop.f32.mrb[96].mxu1 }
 0x316   :  { %v5741_v41 = vpop.eup %5740  ;;  %4779 = vst.msk [vmem:[%s9252_s2 + $0x4c0] sm:$0xff] %vm2064_vm10, %v5739_v23  ;;  %5760 = vtanh.f32 %v3681_v15  ;;  %v4181_v2 = vpop.f32.mrb[97].mxu1 }
 0x317   :  { %v5743_v38 = vpop.eup %5742  ;;  %4782 = vst.msk [vmem:[%s9252_s2 + $0x4d8] sm:$0xff] %vm2064_vm10, %v5741_v41  ;;  %5762 = vtanh.f32 %v4168_v45  ;;  %v5235_v34 = vpop.f32.mrb[96].mxu0 }
 0x318   :  { %v5745_v27 = vpop.eup %5744  ;;  %4888 = vst.msk [vmem:[%s9252_s2 + $0x6d8] sm:$0xff] %vm2064_vm10, %v5743_v38  ;;  %5764 = vtanh.f32 %v5303_v1  ;;  %v5304_v49 = vpop.f32.mrb[98].mxu1 }
 0x319   :  { %v5747_v19 = vpop.eup %5746  ;;  %4780 = vst.msk [vmem:[%s9252_s2 + $0x4c8] sm:$0xff] %vm2064_vm10, %v5745_v27  ;;  %5766 = vtanh.f32 %v4181_v2  ;;  %v3694_v46 = vpop.f32.mrb[97].mxu0 }
 0x31a   :  { %v5749_v22 = vpop.eup %5748  ;;  %4886 = vst.msk [vmem:[%s9252_s2 + $0x6c8] sm:$0xff] %vm2064_vm10, %v5747_v19  ;;  %5768 = vtanh.f32 %v5235_v34  ;;  %v4184_v28 = vpop.f32.mrb[99].mxu1 }
 0x31b   :  { %v5751_v37 = vpop.eup %5750  ;;  %4891 = vst.msk [vmem:[%s9252_s2 + $0x6f0] sm:$0xff] %vm2064_vm10, %v5749_v22  ;;  %5770 = vtanh.f32 %v3694_v46  ;;  %v5236_v31 = vpop.f32.mrb[98].mxu0 }
 0x31c   :  { %v5753_v58 = vpop.eup %5752  ;;  %4889 = vst.msk [vmem:[%s9252_s2 + $0x6e0] sm:$0xff] %vm2064_vm10, %v5751_v37  ;;  %5772 = vtanh.f32 %v5236_v31  ;;  %v3697_v14 = vpop.f32.mrb[99].mxu0 }
 0x31d   :  { %v5755_v43 = vpop.eup %5754  ;;  %4785 = vst.msk [vmem:[%s9252_s2 + $0x4f0] sm:$0xff] %vm2064_vm10, %v5753_v58  ;;  %5774 = vtanh.f32 %v5304_v49  ;;  %v5307_v63 = vpop.f32.mrb[100].mxu1 }
 0x31e   :  { %v5757_v13 = vpop.eup %5756  ;;  %4783 = vst.msk [vmem:[%s9252_s2 + $0x4e0] sm:$0xff] %vm2064_vm10, %v5755_v43  ;;  %5776 = vtanh.f32 %v3697_v14  ;;  %v4197_v44 = vpop.f32.mrb[101].mxu1 }
 0x31f   :  { %v5759_v60 = vpop.eup %5758  ;;  %4786 = vst.msk [vmem:[%s9252_s2 + $0x4f8] sm:$0xff] %vm2064_vm10, %v5757_v13  ;;  %5778 = vtanh.f32 %v4184_v28  ;;  %v5239_v4 = vpop.f32.mrb[100].mxu0 }
 0x320   :  { %v5761_v50 = vpop.eup %5760  ;;  %4892 = vst.msk [vmem:[%s9252_s2 + $0x6f8] sm:$0xff] %vm2064_vm10, %v5759_v60  ;;  %5780 = vtanh.f32 %v5307_v63  ;;  %v5308_v0 = vpop.f32.mrb[102].mxu1 }
 0x321   :  { %v5763_v3 = vpop.eup %5762  ;;  %4784 = vst.msk [vmem:[%s9252_s2 + $0x4e8] sm:$0xff] %vm2064_vm10, %v5761_v50  ;;  %5782 = vtanh.f32 %v4197_v44  ;;  %v3710_v54 = vpop.f32.mrb[101].mxu0 }
 0x322   :  { %v5765_v35 = vpop.eup %5764  ;;  %4890 = vst.msk [vmem:[%s9252_s2 + $0x6e8] sm:$0xff] %vm2064_vm10, %v5763_v3  ;;  %5784 = vtanh.f32 %v5239_v4  ;;  %v4200_v39 = vpop.f32.mrb[103].mxu1 }
 0x323   :  { %v5767_v9 = vpop.eup %5766  ;;  %4895 = vst.msk [vmem:[%s9252_s2 + $0x710] sm:$0xff] %vm2064_vm10, %v5765_v35  ;;  %5786 = vtanh.f32 %v3710_v54  ;;  %v5240_v48 = vpop.f32.mrb[102].mxu0 }
 0x324   :  { %v5769_v21 = vpop.eup %5768  ;;  %4893 = vst.msk [vmem:[%s9252_s2 + $0x700] sm:$0xff] %vm2064_vm10, %v5767_v9  ;;  %5788 = vtanh.f32 %v5240_v48  ;;  %v3713_v56 = vpop.f32.mrb[103].mxu0 }
 0x325   :  { %v5771_v12 = vpop.eup %5770  ;;  %4789 = vst.msk [vmem:[%s9252_s2 + $0x510] sm:$0xff] %vm2064_vm10, %v5769_v21  ;;  %5790 = vtanh.f32 %v5308_v0  ;;  %v5311_v40 = vpop.f32.mrb[104].mxu1 }
 0x326   :  { %v5773_v29 = vpop.eup %5772  ;;  %4787 = vst.msk [vmem:[%s9252_s2 + $0x500] sm:$0xff] %vm2064_vm10, %v5771_v12  ;;  %5792 = vtanh.f32 %v3713_v56  ;;  %v4213_v24 = vpop.f32.mrb[105].mxu1 }
 0x327   :  { %v5775_v7 = vpop.eup %5774  ;;  %4790 = vst.msk [vmem:[%s9252_s2 + $0x518] sm:$0xff] %vm2064_vm10, %v5773_v29  ;;  %5794 = vtanh.f32 %v4200_v39  ;;  %v5243_v5 = vpop.f32.mrb[104].mxu0 }
 0x328   :  { %v5777_v20 = vpop.eup %5776  ;;  %4896 = vst.msk [vmem:[%s9252_s2 + $0x718] sm:$0xff] %vm2064_vm10, %v5775_v7  ;;  %5796 = vtanh.f32 %v5311_v40  ;;  %v5312_v53 = vpop.f32.mrb[106].mxu1 }
 0x329   :  { %v5779_v47 = vpop.eup %5778  ;;  %4788 = vst.msk [vmem:[%s9252_s2 + $0x508] sm:$0xff] %vm2064_vm10, %v5777_v20  ;;  %5798 = vtanh.f32 %v4213_v24  ;;  %v3726_v8 = vpop.f32.mrb[105].mxu0 }
 0x32a   :  { %v5781_v55 = vpop.eup %5780  ;;  %4894 = vst.msk [vmem:[%s9252_s2 + $0x708] sm:$0xff] %vm2064_vm10, %v5779_v47  ;;  %5800 = vtanh.f32 %v5243_v5  ;;  %v4216_v16 = vpop.f32.mrb[107].mxu1 }
 0x32b   :  { %v5783_v42 = vpop.eup %5782  ;;  %4899 = vst.msk [vmem:[%s9252_s2 + $0x730] sm:$0xff] %vm2064_vm10, %v5781_v55  ;;  %5802 = vtanh.f32 %v3726_v8  ;;  %v5244_v51 = vpop.f32.mrb[106].mxu0 }
 0x32c   :  { %v5785_v32 = vpop.eup %5784  ;;  %4897 = vst.msk [vmem:[%s9252_s2 + $0x720] sm:$0xff] %vm2064_vm10, %v5783_v42  ;;  %5804 = vtanh.f32 %v5244_v51  ;;  %v3729_v61 = vpop.f32.mrb[107].mxu0 }
 0x32d   :  { %v5787_v25 = vpop.eup %5786  ;;  %4793 = vst.msk [vmem:[%s9252_s2 + $0x530] sm:$0xff] %vm2064_vm10, %v5785_v32  ;;  %5806 = vtanh.f32 %v5312_v53  ;;  %v5315_v36 = vpop.f32.mrb[108].mxu1 }
 0x32e   :  { %v5789_v6 = vpop.eup %5788  ;;  %4791 = vst.msk [vmem:[%s9252_s2 + $0x520] sm:$0xff] %vm2064_vm10, %v5787_v25  ;;  %5808 = vtanh.f32 %v3729_v61  ;;  %v4229_v30 = vpop.f32.mrb[109].mxu1 }
 0x32f   :  { %v5791_v57 = vpop.eup %5790  ;;  %4794 = vst.msk [vmem:[%s9252_s2 + $0x538] sm:$0xff] %vm2064_vm10, %v5789_v6  ;;  %5810 = vtanh.f32 %v4216_v16  ;;  %v5247_v52 = vpop.f32.mrb[108].mxu0 }
 0x330   :  { %v5793_v17 = vpop.eup %5792  ;;  %4900 = vst.msk [vmem:[%s9252_s2 + $0x738] sm:$0xff] %vm2064_vm10, %v5791_v57  ;;  %5812 = vtanh.f32 %v5315_v36  ;;  %v5316_v18 = vpop.f32.mrb[110].mxu1 }
 0x331   :  { %v5795_v33 = vpop.eup %5794  ;;  %4792 = vst.msk [vmem:[%s9252_s2 + $0x528] sm:$0xff] %vm2064_vm10, %v5793_v17  ;;  %5814 = vtanh.f32 %v4229_v30  ;;  %v3742_v26 = vpop.f32.mrb[109].mxu0 }
 0x332   :  { %v5797_v10 = vpop.eup %5796  ;;  %4898 = vst.msk [vmem:[%s9252_s2 + $0x728] sm:$0xff] %vm2064_vm10, %v5795_v33  ;;  %5816 = vtanh.f32 %v5247_v52  ;;  %v4232_v45 = vpop.f32.mrb[111].mxu1 }
 0x333   :  { %v5799_v59 = vpop.eup %5798  ;;  %4903 = vst.msk [vmem:[%s9252_s2 + $0x750] sm:$0xff] %vm2064_vm10, %v5797_v10  ;;  %5818 = vtanh.f32 %v3742_v26  ;;  %v5248_v62 = vpop.f32.mrb[110].mxu0 }
 0x334   :  { %v5801_v11 = vpop.eup %5800  ;;  %4901 = vst.msk [vmem:[%s9252_s2 + $0x740] sm:$0xff] %vm2064_vm10, %v5799_v59  ;;  %5820 = vtanh.f32 %v5248_v62  ;;  %v3745_v15 = vpop.f32.mrb[111].mxu0 }
 0x335   :  { %v5803_v23 = vpop.eup %5802  ;;  %4797 = vst.msk [vmem:[%s9252_s2 + $0x550] sm:$0xff] %vm2064_vm10, %v5801_v11  ;;  %5822 = vtanh.f32 %v5316_v18  ;;  %v5319_v1 = vpop.f32.mrb[112].mxu1 }
 0x336   :  { %v5805_v41 = vpop.eup %5804  ;;  %4795 = vst.msk [vmem:[%s9252_s2 + $0x540] sm:$0xff] %vm2064_vm10, %v5803_v23  ;;  %5824 = vtanh.f32 %v3745_v15  ;;  %v4245_v2 = vpop.f32.mrb[113].mxu1 }
 0x337   :  { %v5807_v38 = vpop.eup %5806  ;;  %4798 = vst.msk [vmem:[%s9252_s2 + $0x558] sm:$0xff] %vm2064_vm10, %v5805_v41  ;;  %5826 = vtanh.f32 %v4232_v45  ;;  %v5251_v34 = vpop.f32.mrb[112].mxu0 }
 0x338   :  { %v5809_v27 = vpop.eup %5808  ;;  %4904 = vst.msk [vmem:[%s9252_s2 + $0x758] sm:$0xff] %vm2064_vm10, %v5807_v38  ;;  %5828 = vtanh.f32 %v5319_v1  ;;  %v5320_v49 = vpop.f32.mrb[114].mxu1 }
 0x339   :  { %v5811_v19 = vpop.eup %5810  ;;  %4796 = vst.msk [vmem:[%s9252_s2 + $0x548] sm:$0xff] %vm2064_vm10, %v5809_v27  ;;  %5830 = vtanh.f32 %v4245_v2  ;;  %v3758_v46 = vpop.f32.mrb[113].mxu0 }
 0x33a   :  { %v5813_v22 = vpop.eup %5812  ;;  %4902 = vst.msk [vmem:[%s9252_s2 + $0x748] sm:$0xff] %vm2064_vm10, %v5811_v19  ;;  %5832 = vtanh.f32 %v5251_v34  ;;  %v4248_v28 = vpop.f32.mrb[115].mxu1 }
 0x33b   :  { %v5815_v37 = vpop.eup %5814  ;;  %4907 = vst.msk [vmem:[%s9252_s2 + $0x770] sm:$0xff] %vm2064_vm10, %v5813_v22  ;;  %5834 = vtanh.f32 %v3758_v46  ;;  %v5252_v31 = vpop.f32.mrb[114].mxu0 }
 0x33c   :  { %v5817_v58 = vpop.eup %5816  ;;  %4905 = vst.msk [vmem:[%s9252_s2 + $0x760] sm:$0xff] %vm2064_vm10, %v5815_v37  ;;  %5836 = vtanh.f32 %v5252_v31  ;;  %v3761_v14 = vpop.f32.mrb[115].mxu0 }
 0x33d   :  { %v5819_v43 = vpop.eup %5818  ;;  %4801 = vst.msk [vmem:[%s9252_s2 + $0x570] sm:$0xff] %vm2064_vm10, %v5817_v58  ;;  %5838 = vtanh.f32 %v5320_v49  ;;  %v5323_v63 = vpop.f32.mrb[116].mxu1 }
 0x33e   :  { %v5821_v13 = vpop.eup %5820  ;;  %4799 = vst.msk [vmem:[%s9252_s2 + $0x560] sm:$0xff] %vm2064_vm10, %v5819_v43  ;;  %5840 = vtanh.f32 %v3761_v14  ;;  %v4261_v44 = vpop.f32.mrb[117].mxu1 }
 0x33f   :  { %v5823_v60 = vpop.eup %5822  ;;  %4802 = vst.msk [vmem:[%s9252_s2 + $0x578] sm:$0xff] %vm2064_vm10, %v5821_v13  ;;  %5842 = vtanh.f32 %v4248_v28  ;;  %v5255_v4 = vpop.f32.mrb[116].mxu0 }
 0x340   :  { %v5825_v50 = vpop.eup %5824  ;;  %4908 = vst.msk [vmem:[%s9252_s2 + $0x778] sm:$0xff] %vm2064_vm10, %v5823_v60  ;;  %5844 = vtanh.f32 %v5323_v63  ;;  %v5324_v0 = vpop.f32.mrb[118].mxu1 }
 0x341   :  { %v5827_v3 = vpop.eup %5826  ;;  %4800 = vst.msk [vmem:[%s9252_s2 + $0x568] sm:$0xff] %vm2064_vm10, %v5825_v50  ;;  %5846 = vtanh.f32 %v4261_v44  ;;  %v3774_v54 = vpop.f32.mrb[117].mxu0 }
 0x342   :  { %v5829_v35 = vpop.eup %5828  ;;  %4906 = vst.msk [vmem:[%s9252_s2 + $0x768] sm:$0xff] %vm2064_vm10, %v5827_v3  ;;  %5848 = vtanh.f32 %v5255_v4  ;;  %v4264_v39 = vpop.f32.mrb[119].mxu1 }
 0x343   :  { %v5831_v9 = vpop.eup %5830  ;;  %4911 = vst.msk [vmem:[%s9252_s2 + $0x790] sm:$0xff] %vm2064_vm10, %v5829_v35  ;;  %5850 = vtanh.f32 %v3774_v54  ;;  %v5256_v48 = vpop.f32.mrb[118].mxu0 }
 0x344   :  { %v5833_v21 = vpop.eup %5832  ;;  %4909 = vst.msk [vmem:[%s9252_s2 + $0x780] sm:$0xff] %vm2064_vm10, %v5831_v9  ;;  %5852 = vtanh.f32 %v5256_v48  ;;  %v3777_v56 = vpop.f32.mrb[119].mxu0 }
 0x345   :  { %v5835_v12 = vpop.eup %5834  ;;  %4805 = vst.msk [vmem:[%s9252_s2 + $0x590] sm:$0xff] %vm2064_vm10, %v5833_v21  ;;  %5854 = vtanh.f32 %v5324_v0  ;;  %v5327_v40 = vpop.f32.mrb[120].mxu1 }
 0x346   :  { %v5837_v29 = vpop.eup %5836  ;;  %4803 = vst.msk [vmem:[%s9252_s2 + $0x580] sm:$0xff] %vm2064_vm10, %v5835_v12  ;;  %5856 = vtanh.f32 %v3777_v56  ;;  %v4277_v24 = vpop.f32.mrb[121].mxu1 }
 0x347   :  { %v5839_v7 = vpop.eup %5838  ;;  %4806 = vst.msk [vmem:[%s9252_s2 + $0x598] sm:$0xff] %vm2064_vm10, %v5837_v29  ;;  %5858 = vtanh.f32 %v4264_v39  ;;  %v5259_v5 = vpop.f32.mrb[120].mxu0 }
 0x348   :  { %v5841_v20 = vpop.eup %5840  ;;  %4912 = vst.msk [vmem:[%s9252_s2 + $0x798] sm:$0xff] %vm2064_vm10, %v5839_v7  ;;  %5860 = vtanh.f32 %v5327_v40  ;;  %v5328_v53 = vpop.f32.mrb[122].mxu1 }
 0x349   :  { %v5843_v47 = vpop.eup %5842  ;;  %4804 = vst.msk [vmem:[%s9252_s2 + $0x588] sm:$0xff] %vm2064_vm10, %v5841_v20  ;;  %5862 = vtanh.f32 %v4277_v24  ;;  %v3790_v8 = vpop.f32.mrb[121].mxu0 }
 0x34a   :  { %v5845_v55 = vpop.eup %5844  ;;  %4910 = vst.msk [vmem:[%s9252_s2 + $0x788] sm:$0xff] %vm2064_vm10, %v5843_v47  ;;  %5864 = vtanh.f32 %v5259_v5  ;;  %v4280_v16 = vpop.f32.mrb[123].mxu1 }
 0x34b   :  { %v5847_v42 = vpop.eup %5846  ;;  %4915 = vst.msk [vmem:[%s9252_s2 + $0x7b0] sm:$0xff] %vm2064_vm10, %v5845_v55  ;;  %5866 = vtanh.f32 %v3790_v8  ;;  %v5260_v51 = vpop.f32.mrb[122].mxu0 }
 0x34c   :  { %v5849_v32 = vpop.eup %5848  ;;  %4913 = vst.msk [vmem:[%s9252_s2 + $0x7a0] sm:$0xff] %vm2064_vm10, %v5847_v42  ;;  %5868 = vtanh.f32 %v5260_v51  ;;  %v3793_v61 = vpop.f32.mrb[123].mxu0 }
 0x34d   :  { %v5851_v25 = vpop.eup %5850  ;;  %4809 = vst.msk [vmem:[%s9252_s2 + $0x5b0] sm:$0xff] %vm2064_vm10, %v5849_v32  ;;  %5870 = vtanh.f32 %v5328_v53  ;;  %v5331_v36 = vpop.f32.mrb[124].mxu1 }
 0x34e   :  { %v5853_v6 = vpop.eup %5852  ;;  %4807 = vst.msk [vmem:[%s9252_s2 + $0x5a0] sm:$0xff] %vm2064_vm10, %v5851_v25  ;;  %5872 = vtanh.f32 %v3793_v61  ;;  %v4293_v30 = vpop.f32.mrb[125].mxu1 }
 0x34f   :  { %v5855_v57 = vpop.eup %5854  ;;  %4810 = vst.msk [vmem:[%s9252_s2 + $0x5b8] sm:$0xff] %vm2064_vm10, %v5853_v6  ;;  %5874 = vtanh.f32 %v4280_v16  ;;  %v5263_v52 = vpop.f32.mrb[124].mxu0 }
 0x350   :  { %v5857_v17 = vpop.eup %5856  ;;  %4916 = vst.msk [vmem:[%s9252_s2 + $0x7b8] sm:$0xff] %vm2064_vm10, %v5855_v57  ;;  %5876 = vtanh.f32 %v5331_v36  ;;  %v5332_v18 = vpop.f32.mrb[126].mxu1 }
 0x351   :  { %v5859_v33 = vpop.eup %5858  ;;  %4808 = vst.msk [vmem:[%s9252_s2 + $0x5a8] sm:$0xff] %vm2064_vm10, %v5857_v17  ;;  %5878 = vtanh.f32 %v4293_v30  ;;  %v3806_v26 = vpop.f32.mrb[125].mxu0 }
 0x352   :  { %v5861_v10 = vpop.eup %5860  ;;  %4914 = vst.msk [vmem:[%s9252_s2 + $0x7a8] sm:$0xff] %vm2064_vm10, %v5859_v33  ;;  %5880 = vtanh.f32 %v5263_v52  ;;  %v4296_v45 = vpop.f32.mrb[127].mxu1 }
 0x353   :  { %v5863_v59 = vpop.eup %5862  ;;  %4919 = vst.msk [vmem:[%s9252_s2 + $0x7d0] sm:$0xff] %vm2064_vm10, %v5861_v10  ;;  %5882 = vtanh.f32 %v3806_v26  ;;  %v5264_v62 = vpop.f32.mrb[126].mxu0 }
 0x354   :  { %v5865_v11 = vpop.eup %5864  ;;  %4917 = vst.msk [vmem:[%s9252_s2 + $0x7c0] sm:$0xff] %vm2064_vm10, %v5863_v59  ;;  %5884 = vtanh.f32 %v5264_v62  ;;  %v3809_v15 = vpop.f32.mrb[127].mxu0 }
 0x355   :  { %v5867_v23 = vpop.eup %5866  ;;  %4813 = vst.msk [vmem:[%s9252_s2 + $0x5d0] sm:$0xff] %vm2064_vm10, %v5865_v11  ;;  %5886 = vtanh.f32 %v5332_v18 }
 0x356   :  { %v5869_v41 = vpop.eup %5868  ;;  %4811 = vst.msk [vmem:[%s9252_s2 + $0x5c0] sm:$0xff] %vm2064_vm10, %v5867_v23  ;;  %5888 = vtanh.f32 %v3809_v15 }
 0x357   :  { %v5871_v38 = vpop.eup %5870  ;;  %4814 = vst.msk [vmem:[%s9252_s2 + $0x5d8] sm:$0xff] %vm2064_vm10, %v5869_v41  ;;  %5890 = vtanh.f32 %v4296_v45 }
 0x358   :  { %v5873_v1 = vpop.eup %5872  ;;  %4920 = vst.msk [vmem:[%s9252_s2 + $0x7d8] sm:$0xff] %vm2064_vm10, %v5871_v38 }
 0x359   :  { %v5875_v27 = vpop.eup %5874  ;;  %4812 = vst.msk [vmem:[%s9252_s2 + $0x5c8] sm:$0xff] %vm2064_vm10, %v5873_v1 }
 0x35a   :  { %v5877_v2 = vpop.eup %5876  ;;  %4918 = vst.msk [vmem:[%s9252_s2 + $0x7c8] sm:$0xff] %vm2064_vm10, %v5875_v27 }
 0x35b   :  { %v5879_v19 = vpop.eup %5878  ;;  %4923 = vst.msk [vmem:[%s9252_s2 + $0x7f0] sm:$0xff] %vm2064_vm10, %v5877_v2 }
 0x35c   :  { %v5881_v34 = vpop.eup %5880  ;;  %4921 = vst.msk [vmem:[%s9252_s2 + $0x7e0] sm:$0xff] %vm2064_vm10, %v5879_v19 }
 0x35d   :  { %v5883_v49 = vpop.eup %5882  ;;  %4817 = vst.msk [vmem:[%s9252_s2 + $0x5f0] sm:$0xff] %vm2064_vm10, %v5881_v34 }
 0x35e   :  { %v5885_v22 = vpop.eup %5884  ;;  %4815 = vst.msk [vmem:[%s9252_s2 + $0x5e0] sm:$0xff] %vm2064_vm10, %v5883_v49 }
 0x35f   :  { %v5887_v46 = vpop.eup %5886  ;;  %4818 = vst.msk [vmem:[%s9252_s2 + $0x5f8] sm:$0xff] %vm2064_vm10, %v5885_v22 }
 0x360   :  { %v5889_v28 = vpop.eup %5888  ;;  %4924 = vst.msk [vmem:[%s9252_s2 + $0x7f8] sm:$0xff] %vm2064_vm10, %v5887_v46 }
 0x361   :  { %v5891_v37 = vpop.eup %5890  ;;  %4816 = vst.msk [vmem:[%s9252_s2 + $0x5e8] sm:$0xff] %vm2064_vm10, %v5889_v28 }
 0x362   :  { %4922 = vst.msk [vmem:[%s9252_s2 + $0x7e8] sm:$0xff] %vm2064_vm10, %v5891_v37 }

</bundles_post_ra>
